<compile_context>
chip_gen: v7x
topology: tpu7x:2x2x1
jax: 0.10.0
libtpu: 0.0.40
codegen_flags: <defaults>
</compile_context>

<pallas_src>
import functools

import jax
import jax.numpy as jnp
from jax.experimental import pallas as pl
from jax.experimental.pallas import tpu as pltpu


N_ENC_PARAMS = 16   # stacked parameter arrays per encoder stack
N_DEC_PARAMS = 26   # stacked parameter arrays per decoder stack


# --------------------------- in-kernel helpers ------------------------------ #

def _ln(x, g, b, eps=1e-5):
    # x: (S, D); g, b: (1, D).  Biased variance + eps=1e-5 matches nn.LayerNorm.
    mu = jnp.mean(x, axis=-1, keepdims=True)
    var = jnp.mean(jnp.square(x - mu), axis=-1, keepdims=True)
    return (x - mu) * jax.lax.rsqrt(var + eps) * g + b


def _attention(xq, xkv, wq, wk, wv, bq, bk, bv, wo, bo, *, causal):
    """Multi-head attention with heads batched along a leading dim.

    xq: (Sq, D), xkv: (Sk, D)
    wq/wk/wv: (H, D, Dh)   bq/bk/bv: (H, 1, Dh)   (scale folded into wq/bq)
    wo: (H, Dh, D)         bo: (1, D)
    """
    H = wq.shape[0]
    Sq, D = xq.shape
    Sk = xkv.shape[0]

    xqb = jnp.broadcast_to(xq[None], (H, Sq, D))
    xkb = jnp.broadcast_to(xkv[None], (H, Sk, D))

    q = jnp.einsum('hsd,hdf->hsf', xqb, wq, preferred_element_type=jnp.float32) + bq
    k = jnp.einsum('hsd,hdf->hsf', xkb, wk, preferred_element_type=jnp.float32) + bk
    v = jnp.einsum('hsd,hdf->hsf', xkb, wv, preferred_element_type=jnp.float32) + bv

    s = jnp.einsum('hqf,hkf->hqk', q, k, preferred_element_type=jnp.float32)
    if causal:
        row = jax.lax.broadcasted_iota(jnp.int32, (Sq, Sk), 0)
        col = jax.lax.broadcasted_iota(jnp.int32, (Sq, Sk), 1)
        s = jnp.where((col > row)[None], -jnp.inf, s)

    s = s - jnp.max(s, axis=-1, keepdims=True)
    p = jnp.exp(s)
    p = p / jnp.sum(p, axis=-1, keepdims=True)   # exact divide to hold 1e-4 tol

    ctx = jnp.einsum('hqk,hkf->hqf', p, v, preferred_element_type=jnp.float32)
    out = jnp.einsum('hsf,hfd->hsd', ctx, wo, preferred_element_type=jnp.float32)
    return jnp.sum(out, axis=0) + bo             # sum over heads == concat @ Wo


def _encoder_layer(x, w, l):
    (wq, wk, wv, bq, bk, bv, wo, bo,
     g1, be1, w1, bf1, w2, bf2, g2, be2) = w
    a = _attention(x, x, wq[l], wk[l], wv[l], bq[l], bk[l], bv[l], wo[l], bo[l],
                   causal=False)
    x = _ln(x + a, g1[l], be1[l])
    h = jnp.maximum(jnp.dot(x, w1[l], preferred_element_type=jnp.float32) + bf1[l], 0.0)
    y = jnp.dot(h, w2[l], preferred_element_type=jnp.float32) + bf2[l]
    return _ln(x + y, g2[l], be2[l])


def _decoder_layer(x, enc, w, l):
    (sa_wq, sa_wk, sa_wv, sa_bq, sa_bk, sa_bv, sa_wo, sa_bo, sa_g, sa_b,
     ca_wq, ca_wk, ca_wv, ca_bq, ca_bk, ca_bv, ca_wo, ca_bo, ca_g, ca_b,
     w1, bf1, w2, bf2, gf, bff) = w
    a = _attention(x, x, sa_wq[l], sa_wk[l], sa_wv[l], sa_bq[l], sa_bk[l], sa_bv[l],
                   sa_wo[l], sa_bo[l], causal=True)
    x = _ln(x + a, sa_g[l], sa_b[l])
    a = _attention(x, enc, ca_wq[l], ca_wk[l], ca_wv[l], ca_bq[l], ca_bk[l], ca_bv[l],
                   ca_wo[l], ca_bo[l], causal=False)
    x = _ln(x + a, ca_g[l], ca_b[l])
    h = jnp.maximum(jnp.dot(x, w1[l], preferred_element_type=jnp.float32) + bf1[l], 0.0)
    y = jnp.dot(h, w2[l], preferred_element_type=jnp.float32) + bf2[l]
    return _ln(x + y, gf[l], bff[l])


# ------------------------------ Pallas kernel ------------------------------- #

def transformer_kernel(*refs, num_enc_layers, num_dec_layers):
    src_ref = refs[0]                         # (S_src, D)  (batch squeezed)
    tgt_ref = refs[1]                         # (S_tgt, D)
    o_ref = refs[-1]                          # (S_tgt, D)
    enc_w = refs[2:2 + N_ENC_PARAMS]
    dec_w = refs[2 + N_ENC_PARAMS:2 + N_ENC_PARAMS + N_DEC_PARAMS]

    # encoder stack (enc_out stays resident in VMEM/registers)
    x = src_ref[...].astype(jnp.float32)
    for l in range(num_enc_layers):
        x = _encoder_layer(x, enc_w, l)
    enc_out = x

    # decoder stack (causal self-attn + cross-attn over enc_out)
    y = tgt_ref[...].astype(jnp.float32)
    for l in range(num_dec_layers):
        y = _decoder_layer(y, enc_out, dec_w, l)

    o_ref[...] = y.astype(o_ref.dtype)        # single full-slab store


# ------------------------------- Wrapper ------------------------------------ #

def transformer_forward(src, tgt, enc_params, dec_params):
    """Full Transformer.forward (masks None, dropout=0).  src/tgt: (B, S, D)."""
    B, S_src, D = src.shape
    _, S_tgt, _ = tgt.shape
    num_enc_layers = int(enc_params[0].shape[0])
    num_dec_layers = int(dec_params[0].shape[0])

    kern = functools.partial(transformer_kernel,
                             num_enc_layers=num_enc_layers,
                             num_dec_layers=num_dec_layers)

    def const_spec(a):
        return pl.BlockSpec(a.shape, lambda b, n=a.ndim: (0,) * n)

    in_specs = [pl.BlockSpec((None, S_src, D), lambda b: (b, 0, 0)),
                pl.BlockSpec((None, S_tgt, D), lambda b: (b, 0, 0))]
    in_specs += [const_spec(a) for a in tuple(enc_params) + tuple(dec_params)]

    return pl.pallas_call(
        kern,
        out_shape=jax.ShapeDtypeStruct((B, S_tgt, D), tgt.dtype),
        grid=(B,),
        in_specs=in_specs,
        out_specs=pl.BlockSpec((None, S_tgt, D), lambda b: (b, 0, 0)),
        compiler_params=pltpu.CompilerParams(dimension_semantics=("parallel",)),
    )(src, tgt, *enc_params, *dec_params)


# -------------------- host-side parameter preparation ----------------------- #
# One-time transform of "raw" (PyTorch-layout) parameters into the kernel's
# head-split, layer-stacked, scale-folded form.  Done once outside the kernel.

def _row(v):
    return v.reshape(1, -1)


def _prep_attention(wqkv, bqkv, wo, bo, num_heads):
    D = wqkv.shape[0]
    Dh = D // num_heads
    scale = 1.0 / float(Dh) ** 0.5

    def split_in(w, b, s):
        wh = (w.reshape(D, num_heads, Dh) * s).transpose(1, 0, 2)   # (H, D, Dh)
        bh = (b.reshape(num_heads, 1, Dh) * s)                      # (H, 1, Dh)
        return wh, bh

    wq, bq = split_in(wqkv[:, :D], bqkv[:D], scale)                 # scale folded
    wk, bk = split_in(wqkv[:, D:2 * D], bqkv[D:2 * D], 1.0)
    wv, bv = split_in(wqkv[:, 2 * D:], bqkv[2 * D:], 1.0)
    wo_h = wo.reshape(num_heads, Dh, D)                             # (H, Dh, D)
    return wq, wk, wv, bq, bk, bv, wo_h, _row(bo)


def prep_encoder_params(raw_layers, num_heads):
    per_layer = []
    for (wqkv, bqkv, wo, bo, g1, be1, w1, bf1, w2, bf2, g2, be2) in raw_layers:
        attn = _prep_attention(wqkv, bqkv, wo, bo, num_heads)
        per_layer.append(attn + (_row(g1), _row(be1), w1, _row(bf1),
                                 w2, _row(bf2), _row(g2), _row(be2)))
    return tuple(jnp.stack([layer[i] for layer in per_layer])
                 for i in range(len(per_layer[0])))


def prep_decoder_params(raw_layers, num_heads):
    per_layer = []
    for (sa_wqkv, sa_bqkv, sa_wo, sa_bo, sa_g, sa_b,
         ca_wqkv, ca_bqkv, ca_wo, ca_bo, ca_g, ca_b,
         w1, bf1, w2, bf2, gf, bff) in raw_layers:
        sa = _prep_attention(sa_wqkv, sa_bqkv, sa_wo, sa_bo, num_heads)
        ca = _prep_attention(ca_wqkv, ca_bqkv, ca_wo, ca_bo, num_heads)
        per_layer.append(sa + (_row(sa_g), _row(sa_b))
                         + ca + (_row(ca_g), _row(ca_b))
                         + (w1, _row(bf1), w2, _row(bf2), _row(gf), _row(bff)))
    return tuple(jnp.stack([layer[i] for layer in per_layer])
                 for i in range(len(per_layer[0])))


# --------------------------- pure-JAX reference ------------------------------ #

def _ref_ln(x, g, b, eps=1e-5):
    mu = jnp.mean(x, axis=-1, keepdims=True)
    var = jnp.mean((x - mu) ** 2, axis=-1, keepdims=True)
    return (x - mu) * jax.lax.rsqrt(var + eps) * g + b


def _ref_mha(xq, xkv, wqkv, bqkv, wo, bo, num_heads, causal):
    B, Sq, D = xq.shape
    Sk = xkv.shape[1]
    Dh = D // num_heads
    q = xq @ wqkv[:, :D] + bqkv[:D]
    k = xkv @ wqkv[:, D:2 * D] + bqkv[D:2 * D]
    v = xkv @ wqkv[:, 2 * D:] + bqkv[2 * D:]
    sp = lambda t, S: t.reshape(B, S, num_heads, Dh).transpose(0, 2, 1, 3)
    q = sp(q, Sq) * (Dh ** -0.5)
    k = sp(k, Sk)
    v = sp(v, Sk)
    s = jnp.einsum('bhqd,bhkd->bhqk', q, k)
    if causal:
        m = jnp.triu(jnp.ones((Sq, Sk), dtype=bool), k=1)
        s = jnp.where(m, -jnp.inf, s)
    p = jax.nn.softmax(s, axis=-1)
    o = jnp.einsum('bhqk,bhkd->bhqd', p, v).transpose(0, 2, 1, 3).reshape(B, Sq, D)
    return o @ wo + bo


def _ref_encoder_layer(x, p, num_heads):
    (wqkv, bqkv, wo, bo, g1, be1, w1, bf1, w2, bf2, g2, be2) = p
    a = _ref_mha(x, x, wqkv, bqkv, wo, bo, num_heads, causal=False)
    x = _ref_ln(x + a, g1, be1)
    h = jax.nn.relu(x @ w1 + bf1)
    y = h @ w2 + bf2
    return _ref_ln(x + y, g2, be2)


def _ref_decoder_layer(x, enc, p, num_heads):
    (sa_wqkv, sa_bqkv, sa_wo, sa_bo, sa_g, sa_b,
     ca_wqkv, ca_bqkv, ca_wo, ca_bo, ca_g, ca_b,
     w1, bf1, w2, bf2, gf, bff) = p
    a = _ref_mha(x, x, sa_wqkv, sa_bqkv, sa_wo, sa_bo, num_heads, causal=True)
    x = _ref_ln(x + a, sa_g, sa_b)
    a = _ref_mha(x, enc, ca_wqkv, ca_bqkv, ca_wo, ca_bo, num_heads, causal=False)
    x = _ref_ln(x + a, ca_g, ca_b)
    h = jax.nn.relu(x @ w1 + bf1)
    y = h @ w2 + bf2
    return _ref_ln(x + y, gf, bff)


def ref_transformer(src, tgt, enc_layers, dec_layers, num_heads):
    x = src
    for p in enc_layers:
        x = _ref_encoder_layer(x, p, num_heads)
    enc_out = x
    y = tgt
    for p in dec_layers:
        y = _ref_decoder_layer(y, enc_out, p, num_heads)
    return y


# --------------------------- parameter init --------------------------------- #

def init_encoder_layer(key, d_model):
    ks = jax.random.split(key, 6)
    s = 0.1
    wqkv = jax.random.normal(ks[0], (d_model, 3 * d_model), jnp.float32) * s
    bqkv = jax.random.normal(ks[1], (3 * d_model,), jnp.float32) * s
    wo = jax.random.normal(ks[2], (d_model, d_model), jnp.float32) * s
    bo = jnp.zeros((d_model,), jnp.float32)
    g1 = jnp.ones((d_model,), jnp.float32)
    be1 = jnp.zeros((d_model,), jnp.float32)
    w1 = jax.random.normal(ks[3], (d_model, 2 * d_model), jnp.float32) * s
    bf1 = jax.random.normal(ks[4], (2 * d_model,), jnp.float32) * s
    w2 = jax.random.normal(ks[5], (2 * d_model, d_model), jnp.float32) * s
    bf2 = jnp.zeros((d_model,), jnp.float32)
    g2 = jnp.ones((d_model,), jnp.float32)
    be2 = jnp.zeros((d_model,), jnp.float32)
    return (wqkv, bqkv, wo, bo, g1, be1, w1, bf1, w2, bf2, g2, be2)


def init_decoder_layer(key, d_model):
    ks = jax.random.split(key, 10)
    s = 0.1
    sa_wqkv = jax.random.normal(ks[0], (d_model, 3 * d_model), jnp.float32) * s
    sa_bqkv = jax.random.normal(ks[1], (3 * d_model,), jnp.float32) * s
    sa_wo = jax.random.normal(ks[2], (d_model, d_model), jnp.float32) * s
    sa_bo = jnp.zeros((d_model,), jnp.float32)
    sa_g = jnp.ones((d_model,), jnp.float32)
    sa_b = jnp.zeros((d_model,), jnp.float32)
    ca_wqkv = jax.random.normal(ks[3], (d_model, 3 * d_model), jnp.float32) * s
    ca_bqkv = jax.random.normal(ks[4], (3 * d_model,), jnp.float32) * s
    ca_wo = jax.random.normal(ks[5], (d_model, d_model), jnp.float32) * s
    ca_bo = jnp.zeros((d_model,), jnp.float32)
    ca_g = jnp.ones((d_model,), jnp.float32)
    ca_b = jnp.zeros((d_model,), jnp.float32)
    w1 = jax.random.normal(ks[6], (d_model, 2 * d_model), jnp.float32) * s
    bf1 = jax.random.normal(ks[7], (2 * d_model,), jnp.float32) * s
    w2 = jax.random.normal(ks[8], (2 * d_model, d_model), jnp.float32) * s
    bf2 = jax.random.normal(ks[9], (d_model,), jnp.float32) * s
    gf = jnp.ones((d_model,), jnp.float32)
    bff = jnp.zeros((d_model,), jnp.float32)
    return (sa_wqkv, sa_bqkv, sa_wo, sa_bo, sa_g, sa_b,
            ca_wqkv, ca_bqkv, ca_wo, ca_bo, ca_g, ca_b,
            w1, bf1, w2, bf2, gf, bff)


# ---------------------------------- main ------------------------------------ #

if __name__ == "__main__":
    d_model = 32
    num_heads = 4
    num_encoder_layers = 2
    num_decoder_layers = 2
    B, S_src, S_tgt = 2, 8, 8

    root = jax.random.PRNGKey(0)
    k_src, k_tgt, k_enc, k_dec = jax.random.split(root, 4)
    src = jax.random.normal(k_src, (B, S_src, d_model), jnp.float32)
    tgt = jax.random.normal(k_tgt, (B, S_tgt, d_model), jnp.float32)

    # TODO(synk): key-padding masks (src_mask/tgt_mask) and dropout>0 paths are
    # not implemented; this run uses mask=None, dropout=0 (eval) like the spec.
    enc_raw = [init_encoder_layer(k, d_model)
               for k in jax.random.split(k_enc, num_encoder_layers)]
    dec_raw = [init_decoder_layer(k, d_model)
               for k in jax.random.split(k_dec, num_decoder_layers)]

    enc_kp = prep_encoder_params(enc_raw, num_heads)
    dec_kp = prep_decoder_params(dec_raw, num_heads)

    out = transformer_forward(src, tgt, enc_kp, dec_kp)
    out = jax.block_until_ready(out)

    ref = ref_transformer(src, tgt, enc_raw, dec_raw, num_heads)
    assert out.shape == (B, S_tgt, d_model)
    err = jnp.max(jnp.abs(out - ref))
    assert jnp.allclose(out, ref, rtol=1e-4, atol=1e-4), f"mismatch, max abs err={err}"

    print("KERNEL_OK")
</pallas_src>

<mosaic_0001>
module attributes {stable_mosaic.version = 11 : i64} {
  func.func @transformer_kernel(%arg0: i32, %arg1: memref<1x8x32xf32, #tpu.memory_space<vmem>>, %arg2: memref<1x8x32xf32, #tpu.memory_space<vmem>>, %arg3: memref<2x4x32x8xf32, #tpu.memory_space<vmem>>, %arg4: memref<2x4x32x8xf32, #tpu.memory_space<vmem>>, %arg5: memref<2x4x32x8xf32, #tpu.memory_space<vmem>>, %arg6: memref<2x4x1x8xf32, #tpu.memory_space<vmem>>, %arg7: memref<2x4x1x8xf32, #tpu.memory_space<vmem>>, %arg8: memref<2x4x1x8xf32, #tpu.memory_space<vmem>>, %arg9: memref<2x4x8x32xf32, #tpu.memory_space<vmem>>, %arg10: memref<2x1x32xf32, #tpu.memory_space<vmem>>, %arg11: memref<2x1x32xf32, #tpu.memory_space<vmem>>, %arg12: memref<2x1x32xf32, #tpu.memory_space<vmem>>, %arg13: memref<2x32x64xf32, #tpu.memory_space<vmem>>, %arg14: memref<2x1x64xf32, #tpu.memory_space<vmem>>, %arg15: memref<2x64x32xf32, #tpu.memory_space<vmem>>, %arg16: memref<2x1x32xf32, #tpu.memory_space<vmem>>, %arg17: memref<2x1x32xf32, #tpu.memory_space<vmem>>, %arg18: memref<2x1x32xf32, #tpu.memory_space<vmem>>, %arg19: memref<2x4x32x8xf32, #tpu.memory_space<vmem>>, %arg20: memref<2x4x32x8xf32, #tpu.memory_space<vmem>>, %arg21: memref<2x4x32x8xf32, #tpu.memory_space<vmem>>, %arg22: memref<2x4x1x8xf32, #tpu.memory_space<vmem>>, %arg23: memref<2x4x1x8xf32, #tpu.memory_space<vmem>>, %arg24: memref<2x4x1x8xf32, #tpu.memory_space<vmem>>, %arg25: memref<2x4x8x32xf32, #tpu.memory_space<vmem>>, %arg26: memref<2x1x32xf32, #tpu.memory_space<vmem>>, %arg27: memref<2x1x32xf32, #tpu.memory_space<vmem>>, %arg28: memref<2x1x32xf32, #tpu.memory_space<vmem>>, %arg29: memref<2x4x32x8xf32, #tpu.memory_space<vmem>>, %arg30: memref<2x4x32x8xf32, #tpu.memory_space<vmem>>, %arg31: memref<2x4x32x8xf32, #tpu.memory_space<vmem>>, %arg32: memref<2x4x1x8xf32, #tpu.memory_space<vmem>>, %arg33: memref<2x4x1x8xf32, #tpu.memory_space<vmem>>, %arg34: memref<2x4x1x8xf32, #tpu.memory_space<vmem>>, %arg35: memref<2x4x8x32xf32, #tpu.memory_space<vmem>>, %arg36: memref<2x1x32xf32, #tpu.memory_space<vmem>>, %arg37: memref<2x1x32xf32, #tpu.memory_space<vmem>>, %arg38: memref<2x1x32xf32, #tpu.memory_space<vmem>>, %arg39: memref<2x32x64xf32, #tpu.memory_space<vmem>>, %arg40: memref<2x1x64xf32, #tpu.memory_space<vmem>>, %arg41: memref<2x64x32xf32, #tpu.memory_space<vmem>>, %arg42: memref<2x1x32xf32, #tpu.memory_space<vmem>>, %arg43: memref<2x1x32xf32, #tpu.memory_space<vmem>>, %arg44: memref<2x1x32xf32, #tpu.memory_space<vmem>>, %arg45: memref<1x8x32xf32, #tpu.memory_space<vmem>>) attributes {dimension_semantics = [#tpu.dimension_semantics<parallel>], iteration_bounds = array<i64: 2>, scalar_prefetch = 0 : i64, scratch_operands = 0 : i64, tpu.core_type = #tpu.core_type<tc>, window_params = [{transform_indices = @transform_0, window_bounds = array<i64: 1, 8, 32>}, {transform_indices = @transform_1, window_bounds = array<i64: 1, 8, 32>}, {pipeline_mode = #tpu.pipeline_mode<synchronous>, transform_indices = @transform_2, window_bounds = array<i64: 2, 4, 32, 8>}, {pipeline_mode = #tpu.pipeline_mode<synchronous>, transform_indices = @transform_3, window_bounds = array<i64: 2, 4, 32, 8>}, {pipeline_mode = #tpu.pipeline_mode<synchronous>, transform_indices = @transform_4, window_bounds = array<i64: 2, 4, 32, 8>}, {pipeline_mode = #tpu.pipeline_mode<synchronous>, transform_indices = @transform_5, window_bounds = array<i64: 2, 4, 1, 8>}, {pipeline_mode = #tpu.pipeline_mode<synchronous>, transform_indices = @transform_6, window_bounds = array<i64: 2, 4, 1, 8>}, {pipeline_mode = #tpu.pipeline_mode<synchronous>, transform_indices = @transform_7, window_bounds = array<i64: 2, 4, 1, 8>}, {pipeline_mode = #tpu.pipeline_mode<synchronous>, transform_indices = @transform_8, window_bounds = array<i64: 2, 4, 8, 32>}, {pipeline_mode = #tpu.pipeline_mode<synchronous>, transform_indices = @transform_9, window_bounds = array<i64: 2, 1, 32>}, {pipeline_mode = #tpu.pipeline_mode<synchronous>, transform_indices = @transform_10, window_bounds = array<i64: 2, 1, 32>}, {pipeline_mode = #tpu.pipeline_mode<synchronous>, transform_indices = @transform_11, window_bounds = array<i64: 2, 1, 32>}, {pipeline_mode = #tpu.pipeline_mode<synchronous>, transform_indices = @transform_12, window_bounds = array<i64: 2, 32, 64>}, {pipeline_mode = #tpu.pipeline_mode<synchronous>, transform_indices = @transform_13, window_bounds = array<i64: 2, 1, 64>}, {pipeline_mode = #tpu.pipeline_mode<synchronous>, transform_indices = @transform_14, window_bounds = array<i64: 2, 64, 32>}, {pipeline_mode = #tpu.pipeline_mode<synchronous>, transform_indices = @transform_15, window_bounds = array<i64: 2, 1, 32>}, {pipeline_mode = #tpu.pipeline_mode<synchronous>, transform_indices = @transform_16, window_bounds = array<i64: 2, 1, 32>}, {pipeline_mode = #tpu.pipeline_mode<synchronous>, transform_indices = @transform_17, window_bounds = array<i64: 2, 1, 32>}, {pipeline_mode = #tpu.pipeline_mode<synchronous>, transform_indices = @transform_18, window_bounds = array<i64: 2, 4, 32, 8>}, {pipeline_mode = #tpu.pipeline_mode<synchronous>, transform_indices = @transform_19, window_bounds = array<i64: 2, 4, 32, 8>}, {pipeline_mode = #tpu.pipeline_mode<synchronous>, transform_indices = @transform_20, window_bounds = array<i64: 2, 4, 32, 8>}, {pipeline_mode = #tpu.pipeline_mode<synchronous>, transform_indices = @transform_21, window_bounds = array<i64: 2, 4, 1, 8>}, {pipeline_mode = #tpu.pipeline_mode<synchronous>, transform_indices = @transform_22, window_bounds = array<i64: 2, 4, 1, 8>}, {pipeline_mode = #tpu.pipeline_mode<synchronous>, transform_indices = @transform_23, window_bounds = array<i64: 2, 4, 1, 8>}, {pipeline_mode = #tpu.pipeline_mode<synchronous>, transform_indices = @transform_24, window_bounds = array<i64: 2, 4, 8, 32>}, {pipeline_mode = #tpu.pipeline_mode<synchronous>, transform_indices = @transform_25, window_bounds = array<i64: 2, 1, 32>}, {pipeline_mode = #tpu.pipeline_mode<synchronous>, transform_indices = @transform_26, window_bounds = array<i64: 2, 1, 32>}, {pipeline_mode = #tpu.pipeline_mode<synchronous>, transform_indices = @transform_27, window_bounds = array<i64: 2, 1, 32>}, {pipeline_mode = #tpu.pipeline_mode<synchronous>, transform_indices = @transform_28, window_bounds = array<i64: 2, 4, 32, 8>}, {pipeline_mode = #tpu.pipeline_mode<synchronous>, transform_indices = @transform_29, window_bounds = array<i64: 2, 4, 32, 8>}, {pipeline_mode = #tpu.pipeline_mode<synchronous>, transform_indices = @transform_30, window_bounds = array<i64: 2, 4, 32, 8>}, {pipeline_mode = #tpu.pipeline_mode<synchronous>, transform_indices = @transform_31, window_bounds = array<i64: 2, 4, 1, 8>}, {pipeline_mode = #tpu.pipeline_mode<synchronous>, transform_indices = @transform_32, window_bounds = array<i64: 2, 4, 1, 8>}, {pipeline_mode = #tpu.pipeline_mode<synchronous>, transform_indices = @transform_33, window_bounds = array<i64: 2, 4, 1, 8>}, {pipeline_mode = #tpu.pipeline_mode<synchronous>, transform_indices = @transform_34, window_bounds = array<i64: 2, 4, 8, 32>}, {pipeline_mode = #tpu.pipeline_mode<synchronous>, transform_indices = @transform_35, window_bounds = array<i64: 2, 1, 32>}, {pipeline_mode = #tpu.pipeline_mode<synchronous>, transform_indices = @transform_36, window_bounds = array<i64: 2, 1, 32>}, {pipeline_mode = #tpu.pipeline_mode<synchronous>, transform_indices = @transform_37, window_bounds = array<i64: 2, 1, 32>}, {pipeline_mode = #tpu.pipeline_mode<synchronous>, transform_indices = @transform_38, window_bounds = array<i64: 2, 32, 64>}, {pipeline_mode = #tpu.pipeline_mode<synchronous>, transform_indices = @transform_39, window_bounds = array<i64: 2, 1, 64>}, {pipeline_mode = #tpu.pipeline_mode<synchronous>, transform_indices = @transform_40, window_bounds = array<i64: 2, 64, 32>}, {pipeline_mode = #tpu.pipeline_mode<synchronous>, transform_indices = @transform_41, window_bounds = array<i64: 2, 1, 32>}, {pipeline_mode = #tpu.pipeline_mode<synchronous>, transform_indices = @transform_42, window_bounds = array<i64: 2, 1, 32>}, {pipeline_mode = #tpu.pipeline_mode<synchronous>, transform_indices = @transform_43, window_bounds = array<i64: 2, 1, 32>}, {transform_indices = @transform_44, window_bounds = array<i64: 1, 8, 32>}]} {
    %c0 = arith.constant 0 : index
    %c0_0 = arith.constant 0 : index
    %c0_1 = arith.constant 0 : index
    %0 = vector.load %arg1[%c0, %c0_0, %c0_1] : memref<1x8x32xf32, #tpu.memory_space<vmem>>, vector<1x8x32xf32>
    %1 = vector.shape_cast %0 : vector<1x8x32xf32> to vector<8x32xf32>
    %c0_2 = arith.constant 0 : index
    %c0_3 = arith.constant 0 : index
    %c0_4 = arith.constant 0 : index
    %c0_5 = arith.constant 0 : index
    %2 = vector.load %arg3[%c0_2, %c0_3, %c0_4, %c0_5] : memref<2x4x32x8xf32, #tpu.memory_space<vmem>>, vector<1x4x32x8xf32>
    %3 = vector.shape_cast %2 : vector<1x4x32x8xf32> to vector<4x32x8xf32>
    %c0_6 = arith.constant 0 : index
    %c0_7 = arith.constant 0 : index
    %c0_8 = arith.constant 0 : index
    %c0_9 = arith.constant 0 : index
    %4 = vector.load %arg4[%c0_6, %c0_7, %c0_8, %c0_9] : memref<2x4x32x8xf32, #tpu.memory_space<vmem>>, vector<1x4x32x8xf32>
    %5 = vector.shape_cast %4 : vector<1x4x32x8xf32> to vector<4x32x8xf32>
    %c0_10 = arith.constant 0 : index
    %c0_11 = arith.constant 0 : index
    %c0_12 = arith.constant 0 : index
    %c0_13 = arith.constant 0 : index
    %6 = vector.load %arg5[%c0_10, %c0_11, %c0_12, %c0_13] : memref<2x4x32x8xf32, #tpu.memory_space<vmem>>, vector<1x4x32x8xf32>
    %7 = vector.shape_cast %6 : vector<1x4x32x8xf32> to vector<4x32x8xf32>
    %c0_14 = arith.constant 0 : index
    %c0_15 = arith.constant 0 : index
    %c0_16 = arith.constant 0 : index
    %c0_17 = arith.constant 0 : index
    %8 = vector.load %arg6[%c0_14, %c0_15, %c0_16, %c0_17] : memref<2x4x1x8xf32, #tpu.memory_space<vmem>>, vector<1x4x1x8xf32>
    %9 = vector.shape_cast %8 : vector<1x4x1x8xf32> to vector<4x1x8xf32>
    %c0_18 = arith.constant 0 : index
    %c0_19 = arith.constant 0 : index
    %c0_20 = arith.constant 0 : index
    %c0_21 = arith.constant 0 : index
    %10 = vector.load %arg7[%c0_18, %c0_19, %c0_20, %c0_21] : memref<2x4x1x8xf32, #tpu.memory_space<vmem>>, vector<1x4x1x8xf32>
    %11 = vector.shape_cast %10 : vector<1x4x1x8xf32> to vector<4x1x8xf32>
    %c0_22 = arith.constant 0 : index
    %c0_23 = arith.constant 0 : index
    %c0_24 = arith.constant 0 : index
    %c0_25 = arith.constant 0 : index
    %12 = vector.load %arg8[%c0_22, %c0_23, %c0_24, %c0_25] : memref<2x4x1x8xf32, #tpu.memory_space<vmem>>, vector<1x4x1x8xf32>
    %13 = vector.shape_cast %12 : vector<1x4x1x8xf32> to vector<4x1x8xf32>
    %c0_26 = arith.constant 0 : index
    %c0_27 = arith.constant 0 : index
    %c0_28 = arith.constant 0 : index
    %c0_29 = arith.constant 0 : index
    %14 = vector.load %arg9[%c0_26, %c0_27, %c0_28, %c0_29] : memref<2x4x8x32xf32, #tpu.memory_space<vmem>>, vector<1x4x8x32xf32>
    %15 = vector.shape_cast %14 : vector<1x4x8x32xf32> to vector<4x8x32xf32>
    %c0_30 = arith.constant 0 : index
    %c0_31 = arith.constant 0 : index
    %c0_32 = arith.constant 0 : index
    %16 = vector.load %arg10[%c0_30, %c0_31, %c0_32] : memref<2x1x32xf32, #tpu.memory_space<vmem>>, vector<1x1x32xf32>
    %17 = vector.shape_cast %16 : vector<1x1x32xf32> to vector<1x32xf32>
    %18 = vector.shape_cast %1 : vector<8x32xf32> to vector<1x8x32xf32>
    %19 = vector.shape_cast %18 : vector<1x8x32xf32> to vector<1x8x32xf32>
    %20 = vector.broadcast %19 : vector<1x8x32xf32> to vector<4x8x32xf32>
    %21 = vector.shape_cast %1 : vector<8x32xf32> to vector<1x8x32xf32>
    %22 = vector.shape_cast %21 : vector<1x8x32xf32> to vector<1x8x32xf32>
    %23 = vector.broadcast %22 : vector<1x8x32xf32> to vector<4x8x32xf32>
    "tpu.trace_start"() <{level = 10 : i32, message = "hsd,hdf->hsf"}> : () -> ()
    %cst = arith.constant dense<0.000000e+00> : vector<4x8x8xf32>
    %24 = tpu.matmul %20, %3, %cst {dimension_numbers = #tpu.dot_dimension_numbers<[2], [1], [1], [2], [0, 0, 0, 1, 1, 2], [0], [0]>} : vector<4x8x32xf32>, vector<4x32x8xf32>, vector<4x8x8xf32> -> vector<4x8x8xf32>
    "tpu.trace_stop"() : () -> ()
    %25 = vector.broadcast %9 : vector<4x1x8xf32> to vector<4x8x8xf32>
    %26 = arith.addf %24, %25 : vector<4x8x8xf32>
    "tpu.trace_start"() <{level = 10 : i32, message = "hsd,hdf->hsf"}> : () -> ()
    %cst_33 = arith.constant dense<0.000000e+00> : vector<4x8x8xf32>
    %27 = tpu.matmul %23, %5, %cst_33 {dimension_numbers = #tpu.dot_dimension_numbers<[2], [1], [1], [2], [0, 0, 0, 1, 1, 2], [0], [0]>} : vector<4x8x32xf32>, vector<4x32x8xf32>, vector<4x8x8xf32> -> vector<4x8x8xf32>
    "tpu.trace_stop"() : () -> ()
    %28 = vector.broadcast %11 : vector<4x1x8xf32> to vector<4x8x8xf32>
    %29 = arith.addf %27, %28 : vector<4x8x8xf32>
    "tpu.trace_start"() <{level = 10 : i32, message = "hsd,hdf->hsf"}> : () -> ()
    %cst_34 = arith.constant dense<0.000000e+00> : vector<4x8x8xf32>
    %30 = tpu.matmul %23, %7, %cst_34 {dimension_numbers = #tpu.dot_dimension_numbers<[2], [1], [1], [2], [0, 0, 0, 1, 1, 2], [0], [0]>} : vector<4x8x32xf32>, vector<4x32x8xf32>, vector<4x8x8xf32> -> vector<4x8x8xf32>
    "tpu.trace_stop"() : () -> ()
    %31 = vector.broadcast %13 : vector<4x1x8xf32> to vector<4x8x8xf32>
    %32 = arith.addf %30, %31 : vector<4x8x8xf32>
    "tpu.trace_start"() <{level = 10 : i32, message = "hqf,hkf->hqk"}> : () -> ()
    %cst_35 = arith.constant dense<0.000000e+00> : vector<4x8x8xf32>
    %33 = tpu.matmul %26, %29, %cst_35 {dimension_numbers = #tpu.dot_dimension_numbers<[2], [2], [1], [1], [0, 0, 0, 1, 1, 1], [0], [0]>} : vector<4x8x8xf32>, vector<4x8x8xf32>, vector<4x8x8xf32> -> vector<4x8x8xf32>
    "tpu.trace_stop"() : () -> ()
    %cst_36 = arith.constant dense<0xFF800000> : vector<4x8xf32>
    %34 = vector.multi_reduction <maximumf>, %33, %cst_36 [2] : vector<4x8x8xf32> to vector<4x8xf32>
    %35 = vector.shape_cast %34 : vector<4x8xf32> to vector<4x8x1xf32>
    %36 = vector.broadcast %35 : vector<4x8x1xf32> to vector<4x8x8xf32>
    %37 = arith.subf %33, %36 : vector<4x8x8xf32>
    %38 = math.exp %37 : vector<4x8x8xf32>
    %cst_37 = arith.constant dense<0.000000e+00> : vector<4x8xf32>
    %39 = vector.multi_reduction <add>, %38, %cst_37 [2] : vector<4x8x8xf32> to vector<4x8xf32>
    %40 = vector.shape_cast %39 : vector<4x8xf32> to vector<4x8x1xf32>
    %41 = vector.broadcast %40 : vector<4x8x1xf32> to vector<4x8x8xf32>
    %42 = arith.divf %38, %41 : vector<4x8x8xf32>
    "tpu.trace_start"() <{level = 10 : i32, message = "hqk,hkf->hqf"}> : () -> ()
    %cst_38 = arith.constant dense<0.000000e+00> : vector<4x8x8xf32>
    %43 = tpu.matmul %42, %32, %cst_38 {dimension_numbers = #tpu.dot_dimension_numbers<[2], [1], [1], [2], [0, 0, 0, 1, 1, 2], [0], [0]>} : vector<4x8x8xf32>, vector<4x8x8xf32>, vector<4x8x8xf32> -> vector<4x8x8xf32>
    "tpu.trace_stop"() : () -> ()
    "tpu.trace_start"() <{level = 10 : i32, message = "hsf,hfd->hsd"}> : () -> ()
    %cst_39 = arith.constant dense<0.000000e+00> : vector<4x8x32xf32>
    %44 = tpu.matmul %43, %15, %cst_39 {dimension_numbers = #tpu.dot_dimension_numbers<[2], [1], [1], [2], [0, 0, 0, 1, 1, 2], [0], [0]>} : vector<4x8x8xf32>, vector<4x8x32xf32>, vector<4x8x32xf32> -> vector<4x8x32xf32>
    "tpu.trace_stop"() : () -> ()
    %cst_40 = arith.constant dense<0.000000e+00> : vector<8x32xf32>
    %45 = vector.multi_reduction <add>, %44, %cst_40 [0] : vector<4x8x32xf32> to vector<8x32xf32>
    %46 = vector.broadcast %17 : vector<1x32xf32> to vector<8x32xf32>
    %47 = arith.addf %45, %46 : vector<8x32xf32>
    %48 = arith.addf %1, %47 : vector<8x32xf32>
    %c0_41 = arith.constant 0 : index
    %c0_42 = arith.constant 0 : index
    %c0_43 = arith.constant 0 : index
    %49 = vector.load %arg11[%c0_41, %c0_42, %c0_43] : memref<2x1x32xf32, #tpu.memory_space<vmem>>, vector<1x1x32xf32>
    %50 = vector.shape_cast %49 : vector<1x1x32xf32> to vector<1x32xf32>
    %c0_44 = arith.constant 0 : index
    %c0_45 = arith.constant 0 : index
    %c0_46 = arith.constant 0 : index
    %51 = vector.load %arg12[%c0_44, %c0_45, %c0_46] : memref<2x1x32xf32, #tpu.memory_space<vmem>>, vector<1x1x32xf32>
    %52 = vector.shape_cast %51 : vector<1x1x32xf32> to vector<1x32xf32>
    %cst_47 = arith.constant dense<0.000000e+00> : vector<8xf32>
    %53 = vector.multi_reduction <add>, %48, %cst_47 [1] : vector<8x32xf32> to vector<8xf32>
    %54 = vector.shape_cast %53 : vector<8xf32> to vector<8x1xf32>
    %cst_48 = arith.constant 3.200000e+01 : f32
    %55 = vector.broadcast %cst_48 : f32 to vector<8x1xf32>
    %56 = arith.divf %54, %55 : vector<8x1xf32>
    %57 = vector.broadcast %56 : vector<8x1xf32> to vector<8x32xf32>
    %58 = arith.subf %48, %57 : vector<8x32xf32>
    %59 = arith.mulf %58, %58 : vector<8x32xf32>
    %cst_49 = arith.constant dense<0.000000e+00> : vector<8xf32>
    %60 = vector.multi_reduction <add>, %59, %cst_49 [1] : vector<8x32xf32> to vector<8xf32>
    %61 = vector.shape_cast %60 : vector<8xf32> to vector<8x1xf32>
    %cst_50 = arith.constant 3.200000e+01 : f32
    %62 = vector.broadcast %cst_50 : f32 to vector<8x1xf32>
    %63 = arith.divf %61, %62 : vector<8x1xf32>
    %64 = vector.broadcast %56 : vector<8x1xf32> to vector<8x32xf32>
    %65 = arith.subf %48, %64 : vector<8x32xf32>
    %cst_51 = arith.constant 9.99999974E-6 : f32
    %66 = vector.broadcast %cst_51 : f32 to vector<8x1xf32>
    %67 = arith.addf %63, %66 : vector<8x1xf32>
    %68 = math.rsqrt %67 : vector<8x1xf32>
    %69 = vector.broadcast %68 : vector<8x1xf32> to vector<8x32xf32>
    %70 = arith.mulf %65, %69 : vector<8x32xf32>
    %71 = vector.broadcast %50 : vector<1x32xf32> to vector<8x32xf32>
    %72 = arith.mulf %70, %71 : vector<8x32xf32>
    %73 = vector.broadcast %52 : vector<1x32xf32> to vector<8x32xf32>
    %74 = arith.addf %72, %73 : vector<8x32xf32>
    %c0_52 = arith.constant 0 : index
    %c0_53 = arith.constant 0 : index
    %c0_54 = arith.constant 0 : index
    %75 = vector.load %arg13[%c0_52, %c0_53, %c0_54] : memref<2x32x64xf32, #tpu.memory_space<vmem>>, vector<1x32x64xf32>
    %76 = vector.shape_cast %75 : vector<1x32x64xf32> to vector<32x64xf32>
    %cst_55 = arith.constant dense<0.000000e+00> : vector<8x64xf32>
    %77 = tpu.matmul %74, %76, %cst_55 {dimension_numbers = #tpu.dot_dimension_numbers<[1], [0], [0], [1], [0, 0, 1, 1], [], []>} : vector<8x32xf32>, vector<32x64xf32>, vector<8x64xf32> -> vector<8x64xf32>
    %c0_56 = arith.constant 0 : index
    %c0_57 = arith.constant 0 : index
    %c0_58 = arith.constant 0 : index
    %78 = vector.load %arg14[%c0_56, %c0_57, %c0_58] : memref<2x1x64xf32, #tpu.memory_space<vmem>>, vector<1x1x64xf32>
    %79 = vector.shape_cast %78 : vector<1x1x64xf32> to vector<1x64xf32>
    %80 = vector.broadcast %79 : vector<1x64xf32> to vector<8x64xf32>
    %81 = arith.addf %77, %80 : vector<8x64xf32>
    %cst_59 = arith.constant 0.000000e+00 : f32
    %82 = vector.broadcast %cst_59 : f32 to vector<8x64xf32>
    %83 = arith.maximumf %81, %82 : vector<8x64xf32>
    %c0_60 = arith.constant 0 : index
    %c0_61 = arith.constant 0 : index
    %c0_62 = arith.constant 0 : index
    %84 = vector.load %arg15[%c0_60, %c0_61, %c0_62] : memref<2x64x32xf32, #tpu.memory_space<vmem>>, vector<1x64x32xf32>
    %85 = vector.shape_cast %84 : vector<1x64x32xf32> to vector<64x32xf32>
    %cst_63 = arith.constant dense<0.000000e+00> : vector<8x32xf32>
    %86 = tpu.matmul %83, %85, %cst_63 {dimension_numbers = #tpu.dot_dimension_numbers<[1], [0], [0], [1], [0, 0, 1, 1], [], []>} : vector<8x64xf32>, vector<64x32xf32>, vector<8x32xf32> -> vector<8x32xf32>
    %c0_64 = arith.constant 0 : index
    %c0_65 = arith.constant 0 : index
    %c0_66 = arith.constant 0 : index
    %87 = vector.load %arg16[%c0_64, %c0_65, %c0_66] : memref<2x1x32xf32, #tpu.memory_space<vmem>>, vector<1x1x32xf32>
    %88 = vector.shape_cast %87 : vector<1x1x32xf32> to vector<1x32xf32>
    %89 = vector.broadcast %88 : vector<1x32xf32> to vector<8x32xf32>
    %90 = arith.addf %86, %89 : vector<8x32xf32>
    %91 = arith.addf %74, %90 : vector<8x32xf32>
    %c0_67 = arith.constant 0 : index
    %c0_68 = arith.constant 0 : index
    %c0_69 = arith.constant 0 : index
    %92 = vector.load %arg17[%c0_67, %c0_68, %c0_69] : memref<2x1x32xf32, #tpu.memory_space<vmem>>, vector<1x1x32xf32>
    %93 = vector.shape_cast %92 : vector<1x1x32xf32> to vector<1x32xf32>
    %c0_70 = arith.constant 0 : index
    %c0_71 = arith.constant 0 : index
    %c0_72 = arith.constant 0 : index
    %94 = vector.load %arg18[%c0_70, %c0_71, %c0_72] : memref<2x1x32xf32, #tpu.memory_space<vmem>>, vector<1x1x32xf32>
    %95 = vector.shape_cast %94 : vector<1x1x32xf32> to vector<1x32xf32>
    %cst_73 = arith.constant dense<0.000000e+00> : vector<8xf32>
    %96 = vector.multi_reduction <add>, %91, %cst_73 [1] : vector<8x32xf32> to vector<8xf32>
    %97 = vector.shape_cast %96 : vector<8xf32> to vector<8x1xf32>
    %cst_74 = arith.constant 3.200000e+01 : f32
    %98 = vector.broadcast %cst_74 : f32 to vector<8x1xf32>
    %99 = arith.divf %97, %98 : vector<8x1xf32>
    %100 = vector.broadcast %99 : vector<8x1xf32> to vector<8x32xf32>
    %101 = arith.subf %91, %100 : vector<8x32xf32>
    %102 = arith.mulf %101, %101 : vector<8x32xf32>
    %cst_75 = arith.constant dense<0.000000e+00> : vector<8xf32>
    %103 = vector.multi_reduction <add>, %102, %cst_75 [1] : vector<8x32xf32> to vector<8xf32>
    %104 = vector.shape_cast %103 : vector<8xf32> to vector<8x1xf32>
    %cst_76 = arith.constant 3.200000e+01 : f32
    %105 = vector.broadcast %cst_76 : f32 to vector<8x1xf32>
    %106 = arith.divf %104, %105 : vector<8x1xf32>
    %107 = vector.broadcast %99 : vector<8x1xf32> to vector<8x32xf32>
    %108 = arith.subf %91, %107 : vector<8x32xf32>
    %cst_77 = arith.constant 9.99999974E-6 : f32
    %109 = vector.broadcast %cst_77 : f32 to vector<8x1xf32>
    %110 = arith.addf %106, %109 : vector<8x1xf32>
    %111 = math.rsqrt %110 : vector<8x1xf32>
    %112 = vector.broadcast %111 : vector<8x1xf32> to vector<8x32xf32>
    %113 = arith.mulf %108, %112 : vector<8x32xf32>
    %114 = vector.broadcast %93 : vector<1x32xf32> to vector<8x32xf32>
    %115 = arith.mulf %113, %114 : vector<8x32xf32>
    %116 = vector.broadcast %95 : vector<1x32xf32> to vector<8x32xf32>
    %117 = arith.addf %115, %116 : vector<8x32xf32>
    %c1 = arith.constant 1 : index
    %c0_78 = arith.constant 0 : index
    %c0_79 = arith.constant 0 : index
    %c0_80 = arith.constant 0 : index
    %118 = vector.load %arg3[%c1, %c0_78, %c0_79, %c0_80] : memref<2x4x32x8xf32, #tpu.memory_space<vmem>>, vector<1x4x32x8xf32>
    %119 = vector.shape_cast %118 : vector<1x4x32x8xf32> to vector<4x32x8xf32>
    %c1_81 = arith.constant 1 : index
    %c0_82 = arith.constant 0 : index
    %c0_83 = arith.constant 0 : index
    %c0_84 = arith.constant 0 : index
    %120 = vector.load %arg4[%c1_81, %c0_82, %c0_83, %c0_84] : memref<2x4x32x8xf32, #tpu.memory_space<vmem>>, vector<1x4x32x8xf32>
    %121 = vector.shape_cast %120 : vector<1x4x32x8xf32> to vector<4x32x8xf32>
    %c1_85 = arith.constant 1 : index
    %c0_86 = arith.constant 0 : index
    %c0_87 = arith.constant 0 : index
    %c0_88 = arith.constant 0 : index
    %122 = vector.load %arg5[%c1_85, %c0_86, %c0_87, %c0_88] : memref<2x4x32x8xf32, #tpu.memory_space<vmem>>, vector<1x4x32x8xf32>
    %123 = vector.shape_cast %122 : vector<1x4x32x8xf32> to vector<4x32x8xf32>
    %c1_89 = arith.constant 1 : index
    %c0_90 = arith.constant 0 : index
    %c0_91 = arith.constant 0 : index
    %c0_92 = arith.constant 0 : index
    %124 = vector.load %arg6[%c1_89, %c0_90, %c0_91, %c0_92] : memref<2x4x1x8xf32, #tpu.memory_space<vmem>>, vector<1x4x1x8xf32>
    %125 = vector.shape_cast %124 : vector<1x4x1x8xf32> to vector<4x1x8xf32>
    %c1_93 = arith.constant 1 : index
    %c0_94 = arith.constant 0 : index
    %c0_95 = arith.constant 0 : index
    %c0_96 = arith.constant 0 : index
    %126 = vector.load %arg7[%c1_93, %c0_94, %c0_95, %c0_96] : memref<2x4x1x8xf32, #tpu.memory_space<vmem>>, vector<1x4x1x8xf32>
    %127 = vector.shape_cast %126 : vector<1x4x1x8xf32> to vector<4x1x8xf32>
    %c1_97 = arith.constant 1 : index
    %c0_98 = arith.constant 0 : index
    %c0_99 = arith.constant 0 : index
    %c0_100 = arith.constant 0 : index
    %128 = vector.load %arg8[%c1_97, %c0_98, %c0_99, %c0_100] : memref<2x4x1x8xf32, #tpu.memory_space<vmem>>, vector<1x4x1x8xf32>
    %129 = vector.shape_cast %128 : vector<1x4x1x8xf32> to vector<4x1x8xf32>
    %c1_101 = arith.constant 1 : index
    %c0_102 = arith.constant 0 : index
    %c0_103 = arith.constant 0 : index
    %c0_104 = arith.constant 0 : index
    %130 = vector.load %arg9[%c1_101, %c0_102, %c0_103, %c0_104] : memref<2x4x8x32xf32, #tpu.memory_space<vmem>>, vector<1x4x8x32xf32>
    %131 = vector.shape_cast %130 : vector<1x4x8x32xf32> to vector<4x8x32xf32>
    %c1_105 = arith.constant 1 : index
    %c0_106 = arith.constant 0 : index
    %c0_107 = arith.constant 0 : index
    %132 = vector.load %arg10[%c1_105, %c0_106, %c0_107] : memref<2x1x32xf32, #tpu.memory_space<vmem>>, vector<1x1x32xf32>
    %133 = vector.shape_cast %132 : vector<1x1x32xf32> to vector<1x32xf32>
    %134 = vector.shape_cast %117 : vector<8x32xf32> to vector<1x8x32xf32>
    %135 = vector.shape_cast %134 : vector<1x8x32xf32> to vector<1x8x32xf32>
    %136 = vector.broadcast %135 : vector<1x8x32xf32> to vector<4x8x32xf32>
    %137 = vector.shape_cast %117 : vector<8x32xf32> to vector<1x8x32xf32>
    %138 = vector.shape_cast %137 : vector<1x8x32xf32> to vector<1x8x32xf32>
    %139 = vector.broadcast %138 : vector<1x8x32xf32> to vector<4x8x32xf32>
    "tpu.trace_start"() <{level = 10 : i32, message = "hsd,hdf->hsf"}> : () -> ()
    %cst_108 = arith.constant dense<0.000000e+00> : vector<4x8x8xf32>
    %140 = tpu.matmul %136, %119, %cst_108 {dimension_numbers = #tpu.dot_dimension_numbers<[2], [1], [1], [2], [0, 0, 0, 1, 1, 2], [0], [0]>} : vector<4x8x32xf32>, vector<4x32x8xf32>, vector<4x8x8xf32> -> vector<4x8x8xf32>
    "tpu.trace_stop"() : () -> ()
    %141 = vector.broadcast %125 : vector<4x1x8xf32> to vector<4x8x8xf32>
    %142 = arith.addf %140, %141 : vector<4x8x8xf32>
    "tpu.trace_start"() <{level = 10 : i32, message = "hsd,hdf->hsf"}> : () -> ()
    %cst_109 = arith.constant dense<0.000000e+00> : vector<4x8x8xf32>
    %143 = tpu.matmul %139, %121, %cst_109 {dimension_numbers = #tpu.dot_dimension_numbers<[2], [1], [1], [2], [0, 0, 0, 1, 1, 2], [0], [0]>} : vector<4x8x32xf32>, vector<4x32x8xf32>, vector<4x8x8xf32> -> vector<4x8x8xf32>
    "tpu.trace_stop"() : () -> ()
    %144 = vector.broadcast %127 : vector<4x1x8xf32> to vector<4x8x8xf32>
    %145 = arith.addf %143, %144 : vector<4x8x8xf32>
    "tpu.trace_start"() <{level = 10 : i32, message = "hsd,hdf->hsf"}> : () -> ()
    %cst_110 = arith.constant dense<0.000000e+00> : vector<4x8x8xf32>
    %146 = tpu.matmul %139, %123, %cst_110 {dimension_numbers = #tpu.dot_dimension_numbers<[2], [1], [1], [2], [0, 0, 0, 1, 1, 2], [0], [0]>} : vector<4x8x32xf32>, vector<4x32x8xf32>, vector<4x8x8xf32> -> vector<4x8x8xf32>
    "tpu.trace_stop"() : () -> ()
    %147 = vector.broadcast %129 : vector<4x1x8xf32> to vector<4x8x8xf32>
    %148 = arith.addf %146, %147 : vector<4x8x8xf32>
    "tpu.trace_start"() <{level = 10 : i32, message = "hqf,hkf->hqk"}> : () -> ()
    %cst_111 = arith.constant dense<0.000000e+00> : vector<4x8x8xf32>
    %149 = tpu.matmul %142, %145, %cst_111 {dimension_numbers = #tpu.dot_dimension_numbers<[2], [2], [1], [1], [0, 0, 0, 1, 1, 1], [0], [0]>} : vector<4x8x8xf32>, vector<4x8x8xf32>, vector<4x8x8xf32> -> vector<4x8x8xf32>
    "tpu.trace_stop"() : () -> ()
    %cst_112 = arith.constant dense<0xFF800000> : vector<4x8xf32>
    %150 = vector.multi_reduction <maximumf>, %149, %cst_112 [2] : vector<4x8x8xf32> to vector<4x8xf32>
    %151 = vector.shape_cast %150 : vector<4x8xf32> to vector<4x8x1xf32>
    %152 = vector.broadcast %151 : vector<4x8x1xf32> to vector<4x8x8xf32>
    %153 = arith.subf %149, %152 : vector<4x8x8xf32>
    %154 = math.exp %153 : vector<4x8x8xf32>
    %cst_113 = arith.constant dense<0.000000e+00> : vector<4x8xf32>
    %155 = vector.multi_reduction <add>, %154, %cst_113 [2] : vector<4x8x8xf32> to vector<4x8xf32>
    %156 = vector.shape_cast %155 : vector<4x8xf32> to vector<4x8x1xf32>
    %157 = vector.broadcast %156 : vector<4x8x1xf32> to vector<4x8x8xf32>
    %158 = arith.divf %154, %157 : vector<4x8x8xf32>
    "tpu.trace_start"() <{level = 10 : i32, message = "hqk,hkf->hqf"}> : () -> ()
    %cst_114 = arith.constant dense<0.000000e+00> : vector<4x8x8xf32>
    %159 = tpu.matmul %158, %148, %cst_114 {dimension_numbers = #tpu.dot_dimension_numbers<[2], [1], [1], [2], [0, 0, 0, 1, 1, 2], [0], [0]>} : vector<4x8x8xf32>, vector<4x8x8xf32>, vector<4x8x8xf32> -> vector<4x8x8xf32>
    "tpu.trace_stop"() : () -> ()
    "tpu.trace_start"() <{level = 10 : i32, message = "hsf,hfd->hsd"}> : () -> ()
    %cst_115 = arith.constant dense<0.000000e+00> : vector<4x8x32xf32>
    %160 = tpu.matmul %159, %131, %cst_115 {dimension_numbers = #tpu.dot_dimension_numbers<[2], [1], [1], [2], [0, 0, 0, 1, 1, 2], [0], [0]>} : vector<4x8x8xf32>, vector<4x8x32xf32>, vector<4x8x32xf32> -> vector<4x8x32xf32>
    "tpu.trace_stop"() : () -> ()
    %cst_116 = arith.constant dense<0.000000e+00> : vector<8x32xf32>
    %161 = vector.multi_reduction <add>, %160, %cst_116 [0] : vector<4x8x32xf32> to vector<8x32xf32>
    %162 = vector.broadcast %133 : vector<1x32xf32> to vector<8x32xf32>
    %163 = arith.addf %161, %162 : vector<8x32xf32>
    %164 = arith.addf %117, %163 : vector<8x32xf32>
    %c1_117 = arith.constant 1 : index
    %c0_118 = arith.constant 0 : index
    %c0_119 = arith.constant 0 : index
    %165 = vector.load %arg11[%c1_117, %c0_118, %c0_119] : memref<2x1x32xf32, #tpu.memory_space<vmem>>, vector<1x1x32xf32>
    %166 = vector.shape_cast %165 : vector<1x1x32xf32> to vector<1x32xf32>
    %c1_120 = arith.constant 1 : index
    %c0_121 = arith.constant 0 : index
    %c0_122 = arith.constant 0 : index
    %167 = vector.load %arg12[%c1_120, %c0_121, %c0_122] : memref<2x1x32xf32, #tpu.memory_space<vmem>>, vector<1x1x32xf32>
    %168 = vector.shape_cast %167 : vector<1x1x32xf32> to vector<1x32xf32>
    %cst_123 = arith.constant dense<0.000000e+00> : vector<8xf32>
    %169 = vector.multi_reduction <add>, %164, %cst_123 [1] : vector<8x32xf32> to vector<8xf32>
    %170 = vector.shape_cast %169 : vector<8xf32> to vector<8x1xf32>
    %cst_124 = arith.constant 3.200000e+01 : f32
    %171 = vector.broadcast %cst_124 : f32 to vector<8x1xf32>
    %172 = arith.divf %170, %171 : vector<8x1xf32>
    %173 = vector.broadcast %172 : vector<8x1xf32> to vector<8x32xf32>
    %174 = arith.subf %164, %173 : vector<8x32xf32>
    %175 = arith.mulf %174, %174 : vector<8x32xf32>
    %cst_125 = arith.constant dense<0.000000e+00> : vector<8xf32>
    %176 = vector.multi_reduction <add>, %175, %cst_125 [1] : vector<8x32xf32> to vector<8xf32>
    %177 = vector.shape_cast %176 : vector<8xf32> to vector<8x1xf32>
    %cst_126 = arith.constant 3.200000e+01 : f32
    %178 = vector.broadcast %cst_126 : f32 to vector<8x1xf32>
    %179 = arith.divf %177, %178 : vector<8x1xf32>
    %180 = vector.broadcast %172 : vector<8x1xf32> to vector<8x32xf32>
    %181 = arith.subf %164, %180 : vector<8x32xf32>
    %cst_127 = arith.constant 9.99999974E-6 : f32
    %182 = vector.broadcast %cst_127 : f32 to vector<8x1xf32>
    %183 = arith.addf %179, %182 : vector<8x1xf32>
    %184 = math.rsqrt %183 : vector<8x1xf32>
    %185 = vector.broadcast %184 : vector<8x1xf32> to vector<8x32xf32>
    %186 = arith.mulf %181, %185 : vector<8x32xf32>
    %187 = vector.broadcast %166 : vector<1x32xf32> to vector<8x32xf32>
    %188 = arith.mulf %186, %187 : vector<8x32xf32>
    %189 = vector.broadcast %168 : vector<1x32xf32> to vector<8x32xf32>
    %190 = arith.addf %188, %189 : vector<8x32xf32>
    %c1_128 = arith.constant 1 : index
    %c0_129 = arith.constant 0 : index
    %c0_130 = arith.constant 0 : index
    %191 = vector.load %arg13[%c1_128, %c0_129, %c0_130] : memref<2x32x64xf32, #tpu.memory_space<vmem>>, vector<1x32x64xf32>
    %192 = vector.shape_cast %191 : vector<1x32x64xf32> to vector<32x64xf32>
    %cst_131 = arith.constant dense<0.000000e+00> : vector<8x64xf32>
    %193 = tpu.matmul %190, %192, %cst_131 {dimension_numbers = #tpu.dot_dimension_numbers<[1], [0], [0], [1], [0, 0, 1, 1], [], []>} : vector<8x32xf32>, vector<32x64xf32>, vector<8x64xf32> -> vector<8x64xf32>
    %c1_132 = arith.constant 1 : index
    %c0_133 = arith.constant 0 : index
    %c0_134 = arith.constant 0 : index
    %194 = vector.load %arg14[%c1_132, %c0_133, %c0_134] : memref<2x1x64xf32, #tpu.memory_space<vmem>>, vector<1x1x64xf32>
    %195 = vector.shape_cast %194 : vector<1x1x64xf32> to vector<1x64xf32>
    %196 = vector.broadcast %195 : vector<1x64xf32> to vector<8x64xf32>
    %197 = arith.addf %193, %196 : vector<8x64xf32>
    %cst_135 = arith.constant 0.000000e+00 : f32
    %198 = vector.broadcast %cst_135 : f32 to vector<8x64xf32>
    %199 = arith.maximumf %197, %198 : vector<8x64xf32>
    %c1_136 = arith.constant 1 : index
    %c0_137 = arith.constant 0 : index
    %c0_138 = arith.constant 0 : index
    %200 = vector.load %arg15[%c1_136, %c0_137, %c0_138] : memref<2x64x32xf32, #tpu.memory_space<vmem>>, vector<1x64x32xf32>
    %201 = vector.shape_cast %200 : vector<1x64x32xf32> to vector<64x32xf32>
    %cst_139 = arith.constant dense<0.000000e+00> : vector<8x32xf32>
    %202 = tpu.matmul %199, %201, %cst_139 {dimension_numbers = #tpu.dot_dimension_numbers<[1], [0], [0], [1], [0, 0, 1, 1], [], []>} : vector<8x64xf32>, vector<64x32xf32>, vector<8x32xf32> -> vector<8x32xf32>
    %c1_140 = arith.constant 1 : index
    %c0_141 = arith.constant 0 : index
    %c0_142 = arith.constant 0 : index
    %203 = vector.load %arg16[%c1_140, %c0_141, %c0_142] : memref<2x1x32xf32, #tpu.memory_space<vmem>>, vector<1x1x32xf32>
    %204 = vector.shape_cast %203 : vector<1x1x32xf32> to vector<1x32xf32>
    %205 = vector.broadcast %204 : vector<1x32xf32> to vector<8x32xf32>
    %206 = arith.addf %202, %205 : vector<8x32xf32>
    %207 = arith.addf %190, %206 : vector<8x32xf32>
    %c1_143 = arith.constant 1 : index
    %c0_144 = arith.constant 0 : index
    %c0_145 = arith.constant 0 : index
    %208 = vector.load %arg17[%c1_143, %c0_144, %c0_145] : memref<2x1x32xf32, #tpu.memory_space<vmem>>, vector<1x1x32xf32>
    %209 = vector.shape_cast %208 : vector<1x1x32xf32> to vector<1x32xf32>
    %c1_146 = arith.constant 1 : index
    %c0_147 = arith.constant 0 : index
    %c0_148 = arith.constant 0 : index
    %210 = vector.load %arg18[%c1_146, %c0_147, %c0_148] : memref<2x1x32xf32, #tpu.memory_space<vmem>>, vector<1x1x32xf32>
    %211 = vector.shape_cast %210 : vector<1x1x32xf32> to vector<1x32xf32>
    %cst_149 = arith.constant dense<0.000000e+00> : vector<8xf32>
    %212 = vector.multi_reduction <add>, %207, %cst_149 [1] : vector<8x32xf32> to vector<8xf32>
    %213 = vector.shape_cast %212 : vector<8xf32> to vector<8x1xf32>
    %cst_150 = arith.constant 3.200000e+01 : f32
    %214 = vector.broadcast %cst_150 : f32 to vector<8x1xf32>
    %215 = arith.divf %213, %214 : vector<8x1xf32>
    %216 = vector.broadcast %215 : vector<8x1xf32> to vector<8x32xf32>
    %217 = arith.subf %207, %216 : vector<8x32xf32>
    %218 = arith.mulf %217, %217 : vector<8x32xf32>
    %cst_151 = arith.constant dense<0.000000e+00> : vector<8xf32>
    %219 = vector.multi_reduction <add>, %218, %cst_151 [1] : vector<8x32xf32> to vector<8xf32>
    %220 = vector.shape_cast %219 : vector<8xf32> to vector<8x1xf32>
    %cst_152 = arith.constant 3.200000e+01 : f32
    %221 = vector.broadcast %cst_152 : f32 to vector<8x1xf32>
    %222 = arith.divf %220, %221 : vector<8x1xf32>
    %223 = vector.broadcast %215 : vector<8x1xf32> to vector<8x32xf32>
    %224 = arith.subf %207, %223 : vector<8x32xf32>
    %cst_153 = arith.constant 9.99999974E-6 : f32
    %225 = vector.broadcast %cst_153 : f32 to vector<8x1xf32>
    %226 = arith.addf %222, %225 : vector<8x1xf32>
    %227 = math.rsqrt %226 : vector<8x1xf32>
    %228 = vector.broadcast %227 : vector<8x1xf32> to vector<8x32xf32>
    %229 = arith.mulf %224, %228 : vector<8x32xf32>
    %230 = vector.broadcast %209 : vector<1x32xf32> to vector<8x32xf32>
    %231 = arith.mulf %229, %230 : vector<8x32xf32>
    %232 = vector.broadcast %211 : vector<1x32xf32> to vector<8x32xf32>
    %233 = arith.addf %231, %232 : vector<8x32xf32>
    %c0_154 = arith.constant 0 : index
    %c0_155 = arith.constant 0 : index
    %c0_156 = arith.constant 0 : index
    %234 = vector.load %arg2[%c0_154, %c0_155, %c0_156] : memref<1x8x32xf32, #tpu.memory_space<vmem>>, vector<1x8x32xf32>
    %235 = vector.shape_cast %234 : vector<1x8x32xf32> to vector<8x32xf32>
    %c0_157 = arith.constant 0 : index
    %c0_158 = arith.constant 0 : index
    %c0_159 = arith.constant 0 : index
    %c0_160 = arith.constant 0 : index
    %236 = vector.load %arg19[%c0_157, %c0_158, %c0_159, %c0_160] : memref<2x4x32x8xf32, #tpu.memory_space<vmem>>, vector<1x4x32x8xf32>
    %237 = vector.shape_cast %236 : vector<1x4x32x8xf32> to vector<4x32x8xf32>
    %c0_161 = arith.constant 0 : index
    %c0_162 = arith.constant 0 : index
    %c0_163 = arith.constant 0 : index
    %c0_164 = arith.constant 0 : index
    %238 = vector.load %arg20[%c0_161, %c0_162, %c0_163, %c0_164] : memref<2x4x32x8xf32, #tpu.memory_space<vmem>>, vector<1x4x32x8xf32>
    %239 = vector.shape_cast %238 : vector<1x4x32x8xf32> to vector<4x32x8xf32>
    %c0_165 = arith.constant 0 : index
    %c0_166 = arith.constant 0 : index
    %c0_167 = arith.constant 0 : index
    %c0_168 = arith.constant 0 : index
    %240 = vector.load %arg21[%c0_165, %c0_166, %c0_167, %c0_168] : memref<2x4x32x8xf32, #tpu.memory_space<vmem>>, vector<1x4x32x8xf32>
    %241 = vector.shape_cast %240 : vector<1x4x32x8xf32> to vector<4x32x8xf32>
    %c0_169 = arith.constant 0 : index
    %c0_170 = arith.constant 0 : index
    %c0_171 = arith.constant 0 : index
    %c0_172 = arith.constant 0 : index
    %242 = vector.load %arg22[%c0_169, %c0_170, %c0_171, %c0_172] : memref<2x4x1x8xf32, #tpu.memory_space<vmem>>, vector<1x4x1x8xf32>
    %243 = vector.shape_cast %242 : vector<1x4x1x8xf32> to vector<4x1x8xf32>
    %c0_173 = arith.constant 0 : index
    %c0_174 = arith.constant 0 : index
    %c0_175 = arith.constant 0 : index
    %c0_176 = arith.constant 0 : index
    %244 = vector.load %arg23[%c0_173, %c0_174, %c0_175, %c0_176] : memref<2x4x1x8xf32, #tpu.memory_space<vmem>>, vector<1x4x1x8xf32>
    %245 = vector.shape_cast %244 : vector<1x4x1x8xf32> to vector<4x1x8xf32>
    %c0_177 = arith.constant 0 : index
    %c0_178 = arith.constant 0 : index
    %c0_179 = arith.constant 0 : index
    %c0_180 = arith.constant 0 : index
    %246 = vector.load %arg24[%c0_177, %c0_178, %c0_179, %c0_180] : memref<2x4x1x8xf32, #tpu.memory_space<vmem>>, vector<1x4x1x8xf32>
    %247 = vector.shape_cast %246 : vector<1x4x1x8xf32> to vector<4x1x8xf32>
    %c0_181 = arith.constant 0 : index
    %c0_182 = arith.constant 0 : index
    %c0_183 = arith.constant 0 : index
    %c0_184 = arith.constant 0 : index
    %248 = vector.load %arg25[%c0_181, %c0_182, %c0_183, %c0_184] : memref<2x4x8x32xf32, #tpu.memory_space<vmem>>, vector<1x4x8x32xf32>
    %249 = vector.shape_cast %248 : vector<1x4x8x32xf32> to vector<4x8x32xf32>
    %c0_185 = arith.constant 0 : index
    %c0_186 = arith.constant 0 : index
    %c0_187 = arith.constant 0 : index
    %250 = vector.load %arg26[%c0_185, %c0_186, %c0_187] : memref<2x1x32xf32, #tpu.memory_space<vmem>>, vector<1x1x32xf32>
    %251 = vector.shape_cast %250 : vector<1x1x32xf32> to vector<1x32xf32>
    %252 = vector.shape_cast %235 : vector<8x32xf32> to vector<1x8x32xf32>
    %253 = vector.shape_cast %252 : vector<1x8x32xf32> to vector<1x8x32xf32>
    %254 = vector.broadcast %253 : vector<1x8x32xf32> to vector<4x8x32xf32>
    %255 = vector.shape_cast %235 : vector<8x32xf32> to vector<1x8x32xf32>
    %256 = vector.shape_cast %255 : vector<1x8x32xf32> to vector<1x8x32xf32>
    %257 = vector.broadcast %256 : vector<1x8x32xf32> to vector<4x8x32xf32>
    "tpu.trace_start"() <{level = 10 : i32, message = "hsd,hdf->hsf"}> : () -> ()
    %cst_188 = arith.constant dense<0.000000e+00> : vector<4x8x8xf32>
    %258 = tpu.matmul %254, %237, %cst_188 {dimension_numbers = #tpu.dot_dimension_numbers<[2], [1], [1], [2], [0, 0, 0, 1, 1, 2], [0], [0]>} : vector<4x8x32xf32>, vector<4x32x8xf32>, vector<4x8x8xf32> -> vector<4x8x8xf32>
    "tpu.trace_stop"() : () -> ()
    %259 = vector.broadcast %243 : vector<4x1x8xf32> to vector<4x8x8xf32>
    %260 = arith.addf %258, %259 : vector<4x8x8xf32>
    "tpu.trace_start"() <{level = 10 : i32, message = "hsd,hdf->hsf"}> : () -> ()
    %cst_189 = arith.constant dense<0.000000e+00> : vector<4x8x8xf32>
    %261 = tpu.matmul %257, %239, %cst_189 {dimension_numbers = #tpu.dot_dimension_numbers<[2], [1], [1], [2], [0, 0, 0, 1, 1, 2], [0], [0]>} : vector<4x8x32xf32>, vector<4x32x8xf32>, vector<4x8x8xf32> -> vector<4x8x8xf32>
    "tpu.trace_stop"() : () -> ()
    %262 = vector.broadcast %245 : vector<4x1x8xf32> to vector<4x8x8xf32>
    %263 = arith.addf %261, %262 : vector<4x8x8xf32>
    "tpu.trace_start"() <{level = 10 : i32, message = "hsd,hdf->hsf"}> : () -> ()
    %cst_190 = arith.constant dense<0.000000e+00> : vector<4x8x8xf32>
    %264 = tpu.matmul %257, %241, %cst_190 {dimension_numbers = #tpu.dot_dimension_numbers<[2], [1], [1], [2], [0, 0, 0, 1, 1, 2], [0], [0]>} : vector<4x8x32xf32>, vector<4x32x8xf32>, vector<4x8x8xf32> -> vector<4x8x8xf32>
    "tpu.trace_stop"() : () -> ()
    %265 = vector.broadcast %247 : vector<4x1x8xf32> to vector<4x8x8xf32>
    %266 = arith.addf %264, %265 : vector<4x8x8xf32>
    "tpu.trace_start"() <{level = 10 : i32, message = "hqf,hkf->hqk"}> : () -> ()
    %cst_191 = arith.constant dense<0.000000e+00> : vector<4x8x8xf32>
    %267 = tpu.matmul %260, %263, %cst_191 {dimension_numbers = #tpu.dot_dimension_numbers<[2], [2], [1], [1], [0, 0, 0, 1, 1, 1], [0], [0]>} : vector<4x8x8xf32>, vector<4x8x8xf32>, vector<4x8x8xf32> -> vector<4x8x8xf32>
    "tpu.trace_stop"() : () -> ()
    %268 = tpu.iota {dimensions = array<i32: 0>} : vector<8x8xi32>
    %269 = tpu.iota {dimensions = array<i32: 1>} : vector<8x8xi32>
    %270 = arith.cmpi sgt, %269, %268 : vector<8x8xi32>
    %271 = vector.shape_cast %270 : vector<8x8xi1> to vector<1x8x8xi1>
    %cst_192 = arith.constant 0xFF800000 : f32
    %272 = vector.shape_cast %271 : vector<1x8x8xi1> to vector<1x8x8xi1>
    %273 = vector.broadcast %272 : vector<1x8x8xi1> to vector<4x8x8xi1>
    %274 = vector.broadcast %cst_192 : f32 to vector<4x8x8xf32>
    %275 = arith.select %273, %274, %267 : vector<4x8x8xi1>, vector<4x8x8xf32>
    %cst_193 = arith.constant dense<0xFF800000> : vector<4x8xf32>
    %276 = vector.multi_reduction <maximumf>, %275, %cst_193 [2] : vector<4x8x8xf32> to vector<4x8xf32>
    %277 = vector.shape_cast %276 : vector<4x8xf32> to vector<4x8x1xf32>
    %278 = vector.broadcast %277 : vector<4x8x1xf32> to vector<4x8x8xf32>
    %279 = arith.subf %275, %278 : vector<4x8x8xf32>
    %280 = math.exp %279 : vector<4x8x8xf32>
    %cst_194 = arith.constant dense<0.000000e+00> : vector<4x8xf32>
    %281 = vector.multi_reduction <add>, %280, %cst_194 [2] : vector<4x8x8xf32> to vector<4x8xf32>
    %282 = vector.shape_cast %281 : vector<4x8xf32> to vector<4x8x1xf32>
    %283 = vector.broadcast %282 : vector<4x8x1xf32> to vector<4x8x8xf32>
    %284 = arith.divf %280, %283 : vector<4x8x8xf32>
    "tpu.trace_start"() <{level = 10 : i32, message = "hqk,hkf->hqf"}> : () -> ()
    %cst_195 = arith.constant dense<0.000000e+00> : vector<4x8x8xf32>
    %285 = tpu.matmul %284, %266, %cst_195 {dimension_numbers = #tpu.dot_dimension_numbers<[2], [1], [1], [2], [0, 0, 0, 1, 1, 2], [0], [0]>} : vector<4x8x8xf32>, vector<4x8x8xf32>, vector<4x8x8xf32> -> vector<4x8x8xf32>
    "tpu.trace_stop"() : () -> ()
    "tpu.trace_start"() <{level = 10 : i32, message = "hsf,hfd->hsd"}> : () -> ()
    %cst_196 = arith.constant dense<0.000000e+00> : vector<4x8x32xf32>
    %286 = tpu.matmul %285, %249, %cst_196 {dimension_numbers = #tpu.dot_dimension_numbers<[2], [1], [1], [2], [0, 0, 0, 1, 1, 2], [0], [0]>} : vector<4x8x8xf32>, vector<4x8x32xf32>, vector<4x8x32xf32> -> vector<4x8x32xf32>
    "tpu.trace_stop"() : () -> ()
    %cst_197 = arith.constant dense<0.000000e+00> : vector<8x32xf32>
    %287 = vector.multi_reduction <add>, %286, %cst_197 [0] : vector<4x8x32xf32> to vector<8x32xf32>
    %288 = vector.broadcast %251 : vector<1x32xf32> to vector<8x32xf32>
    %289 = arith.addf %287, %288 : vector<8x32xf32>
    %290 = arith.addf %235, %289 : vector<8x32xf32>
    %c0_198 = arith.constant 0 : index
    %c0_199 = arith.constant 0 : index
    %c0_200 = arith.constant 0 : index
    %291 = vector.load %arg27[%c0_198, %c0_199, %c0_200] : memref<2x1x32xf32, #tpu.memory_space<vmem>>, vector<1x1x32xf32>
    %292 = vector.shape_cast %291 : vector<1x1x32xf32> to vector<1x32xf32>
    %c0_201 = arith.constant 0 : index
    %c0_202 = arith.constant 0 : index
    %c0_203 = arith.constant 0 : index
    %293 = vector.load %arg28[%c0_201, %c0_202, %c0_203] : memref<2x1x32xf32, #tpu.memory_space<vmem>>, vector<1x1x32xf32>
    %294 = vector.shape_cast %293 : vector<1x1x32xf32> to vector<1x32xf32>
    %cst_204 = arith.constant dense<0.000000e+00> : vector<8xf32>
    %295 = vector.multi_reduction <add>, %290, %cst_204 [1] : vector<8x32xf32> to vector<8xf32>
    %296 = vector.shape_cast %295 : vector<8xf32> to vector<8x1xf32>
    %cst_205 = arith.constant 3.200000e+01 : f32
    %297 = vector.broadcast %cst_205 : f32 to vector<8x1xf32>
    %298 = arith.divf %296, %297 : vector<8x1xf32>
    %299 = vector.broadcast %298 : vector<8x1xf32> to vector<8x32xf32>
    %300 = arith.subf %290, %299 : vector<8x32xf32>
    %301 = arith.mulf %300, %300 : vector<8x32xf32>
    %cst_206 = arith.constant dense<0.000000e+00> : vector<8xf32>
    %302 = vector.multi_reduction <add>, %301, %cst_206 [1] : vector<8x32xf32> to vector<8xf32>
    %303 = vector.shape_cast %302 : vector<8xf32> to vector<8x1xf32>
    %cst_207 = arith.constant 3.200000e+01 : f32
    %304 = vector.broadcast %cst_207 : f32 to vector<8x1xf32>
    %305 = arith.divf %303, %304 : vector<8x1xf32>
    %306 = vector.broadcast %298 : vector<8x1xf32> to vector<8x32xf32>
    %307 = arith.subf %290, %306 : vector<8x32xf32>
    %cst_208 = arith.constant 9.99999974E-6 : f32
    %308 = vector.broadcast %cst_208 : f32 to vector<8x1xf32>
    %309 = arith.addf %305, %308 : vector<8x1xf32>
    %310 = math.rsqrt %309 : vector<8x1xf32>
    %311 = vector.broadcast %310 : vector<8x1xf32> to vector<8x32xf32>
    %312 = arith.mulf %307, %311 : vector<8x32xf32>
    %313 = vector.broadcast %292 : vector<1x32xf32> to vector<8x32xf32>
    %314 = arith.mulf %312, %313 : vector<8x32xf32>
    %315 = vector.broadcast %294 : vector<1x32xf32> to vector<8x32xf32>
    %316 = arith.addf %314, %315 : vector<8x32xf32>
    %c0_209 = arith.constant 0 : index
    %c0_210 = arith.constant 0 : index
    %c0_211 = arith.constant 0 : index
    %c0_212 = arith.constant 0 : index
    %317 = vector.load %arg29[%c0_209, %c0_210, %c0_211, %c0_212] : memref<2x4x32x8xf32, #tpu.memory_space<vmem>>, vector<1x4x32x8xf32>
    %318 = vector.shape_cast %317 : vector<1x4x32x8xf32> to vector<4x32x8xf32>
    %c0_213 = arith.constant 0 : index
    %c0_214 = arith.constant 0 : index
    %c0_215 = arith.constant 0 : index
    %c0_216 = arith.constant 0 : index
    %319 = vector.load %arg30[%c0_213, %c0_214, %c0_215, %c0_216] : memref<2x4x32x8xf32, #tpu.memory_space<vmem>>, vector<1x4x32x8xf32>
    %320 = vector.shape_cast %319 : vector<1x4x32x8xf32> to vector<4x32x8xf32>
    %c0_217 = arith.constant 0 : index
    %c0_218 = arith.constant 0 : index
    %c0_219 = arith.constant 0 : index
    %c0_220 = arith.constant 0 : index
    %321 = vector.load %arg31[%c0_217, %c0_218, %c0_219, %c0_220] : memref<2x4x32x8xf32, #tpu.memory_space<vmem>>, vector<1x4x32x8xf32>
    %322 = vector.shape_cast %321 : vector<1x4x32x8xf32> to vector<4x32x8xf32>
    %c0_221 = arith.constant 0 : index
    %c0_222 = arith.constant 0 : index
    %c0_223 = arith.constant 0 : index
    %c0_224 = arith.constant 0 : index
    %323 = vector.load %arg32[%c0_221, %c0_222, %c0_223, %c0_224] : memref<2x4x1x8xf32, #tpu.memory_space<vmem>>, vector<1x4x1x8xf32>
    %324 = vector.shape_cast %323 : vector<1x4x1x8xf32> to vector<4x1x8xf32>
    %c0_225 = arith.constant 0 : index
    %c0_226 = arith.constant 0 : index
    %c0_227 = arith.constant 0 : index
    %c0_228 = arith.constant 0 : index
    %325 = vector.load %arg33[%c0_225, %c0_226, %c0_227, %c0_228] : memref<2x4x1x8xf32, #tpu.memory_space<vmem>>, vector<1x4x1x8xf32>
    %326 = vector.shape_cast %325 : vector<1x4x1x8xf32> to vector<4x1x8xf32>
    %c0_229 = arith.constant 0 : index
    %c0_230 = arith.constant 0 : index
    %c0_231 = arith.constant 0 : index
    %c0_232 = arith.constant 0 : index
    %327 = vector.load %arg34[%c0_229, %c0_230, %c0_231, %c0_232] : memref<2x4x1x8xf32, #tpu.memory_space<vmem>>, vector<1x4x1x8xf32>
    %328 = vector.shape_cast %327 : vector<1x4x1x8xf32> to vector<4x1x8xf32>
    %c0_233 = arith.constant 0 : index
    %c0_234 = arith.constant 0 : index
    %c0_235 = arith.constant 0 : index
    %c0_236 = arith.constant 0 : index
    %329 = vector.load %arg35[%c0_233, %c0_234, %c0_235, %c0_236] : memref<2x4x8x32xf32, #tpu.memory_space<vmem>>, vector<1x4x8x32xf32>
    %330 = vector.shape_cast %329 : vector<1x4x8x32xf32> to vector<4x8x32xf32>
    %c0_237 = arith.constant 0 : index
    %c0_238 = arith.constant 0 : index
    %c0_239 = arith.constant 0 : index
    %331 = vector.load %arg36[%c0_237, %c0_238, %c0_239] : memref<2x1x32xf32, #tpu.memory_space<vmem>>, vector<1x1x32xf32>
    %332 = vector.shape_cast %331 : vector<1x1x32xf32> to vector<1x32xf32>
    %333 = vector.shape_cast %316 : vector<8x32xf32> to vector<1x8x32xf32>
    %334 = vector.shape_cast %333 : vector<1x8x32xf32> to vector<1x8x32xf32>
    %335 = vector.broadcast %334 : vector<1x8x32xf32> to vector<4x8x32xf32>
    %336 = vector.shape_cast %233 : vector<8x32xf32> to vector<1x8x32xf32>
    %337 = vector.shape_cast %336 : vector<1x8x32xf32> to vector<1x8x32xf32>
    %338 = vector.broadcast %337 : vector<1x8x32xf32> to vector<4x8x32xf32>
    "tpu.trace_start"() <{level = 10 : i32, message = "hsd,hdf->hsf"}> : () -> ()
    %cst_240 = arith.constant dense<0.000000e+00> : vector<4x8x8xf32>
    %339 = tpu.matmul %335, %318, %cst_240 {dimension_numbers = #tpu.dot_dimension_numbers<[2], [1], [1], [2], [0, 0, 0, 1, 1, 2], [0], [0]>} : vector<4x8x32xf32>, vector<4x32x8xf32>, vector<4x8x8xf32> -> vector<4x8x8xf32>
    "tpu.trace_stop"() : () -> ()
    %340 = vector.broadcast %324 : vector<4x1x8xf32> to vector<4x8x8xf32>
    %341 = arith.addf %339, %340 : vector<4x8x8xf32>
    "tpu.trace_start"() <{level = 10 : i32, message = "hsd,hdf->hsf"}> : () -> ()
    %cst_241 = arith.constant dense<0.000000e+00> : vector<4x8x8xf32>
    %342 = tpu.matmul %338, %320, %cst_241 {dimension_numbers = #tpu.dot_dimension_numbers<[2], [1], [1], [2], [0, 0, 0, 1, 1, 2], [0], [0]>} : vector<4x8x32xf32>, vector<4x32x8xf32>, vector<4x8x8xf32> -> vector<4x8x8xf32>
    "tpu.trace_stop"() : () -> ()
    %343 = vector.broadcast %326 : vector<4x1x8xf32> to vector<4x8x8xf32>
    %344 = arith.addf %342, %343 : vector<4x8x8xf32>
    "tpu.trace_start"() <{level = 10 : i32, message = "hsd,hdf->hsf"}> : () -> ()
    %cst_242 = arith.constant dense<0.000000e+00> : vector<4x8x8xf32>
    %345 = tpu.matmul %338, %322, %cst_242 {dimension_numbers = #tpu.dot_dimension_numbers<[2], [1], [1], [2], [0, 0, 0, 1, 1, 2], [0], [0]>} : vector<4x8x32xf32>, vector<4x32x8xf32>, vector<4x8x8xf32> -> vector<4x8x8xf32>
    "tpu.trace_stop"() : () -> ()
    %346 = vector.broadcast %328 : vector<4x1x8xf32> to vector<4x8x8xf32>
    %347 = arith.addf %345, %346 : vector<4x8x8xf32>
    "tpu.trace_start"() <{level = 10 : i32, message = "hqf,hkf->hqk"}> : () -> ()
    %cst_243 = arith.constant dense<0.000000e+00> : vector<4x8x8xf32>
    %348 = tpu.matmul %341, %344, %cst_243 {dimension_numbers = #tpu.dot_dimension_numbers<[2], [2], [1], [1], [0, 0, 0, 1, 1, 1], [0], [0]>} : vector<4x8x8xf32>, vector<4x8x8xf32>, vector<4x8x8xf32> -> vector<4x8x8xf32>
    "tpu.trace_stop"() : () -> ()
    %cst_244 = arith.constant dense<0xFF800000> : vector<4x8xf32>
    %349 = vector.multi_reduction <maximumf>, %348, %cst_244 [2] : vector<4x8x8xf32> to vector<4x8xf32>
    %350 = vector.shape_cast %349 : vector<4x8xf32> to vector<4x8x1xf32>
    %351 = vector.broadcast %350 : vector<4x8x1xf32> to vector<4x8x8xf32>
    %352 = arith.subf %348, %351 : vector<4x8x8xf32>
    %353 = math.exp %352 : vector<4x8x8xf32>
    %cst_245 = arith.constant dense<0.000000e+00> : vector<4x8xf32>
    %354 = vector.multi_reduction <add>, %353, %cst_245 [2] : vector<4x8x8xf32> to vector<4x8xf32>
    %355 = vector.shape_cast %354 : vector<4x8xf32> to vector<4x8x1xf32>
    %356 = vector.broadcast %355 : vector<4x8x1xf32> to vector<4x8x8xf32>
    %357 = arith.divf %353, %356 : vector<4x8x8xf32>
    "tpu.trace_start"() <{level = 10 : i32, message = "hqk,hkf->hqf"}> : () -> ()
    %cst_246 = arith.constant dense<0.000000e+00> : vector<4x8x8xf32>
    %358 = tpu.matmul %357, %347, %cst_246 {dimension_numbers = #tpu.dot_dimension_numbers<[2], [1], [1], [2], [0, 0, 0, 1, 1, 2], [0], [0]>} : vector<4x8x8xf32>, vector<4x8x8xf32>, vector<4x8x8xf32> -> vector<4x8x8xf32>
    "tpu.trace_stop"() : () -> ()
    "tpu.trace_start"() <{level = 10 : i32, message = "hsf,hfd->hsd"}> : () -> ()
    %cst_247 = arith.constant dense<0.000000e+00> : vector<4x8x32xf32>
    %359 = tpu.matmul %358, %330, %cst_247 {dimension_numbers = #tpu.dot_dimension_numbers<[2], [1], [1], [2], [0, 0, 0, 1, 1, 2], [0], [0]>} : vector<4x8x8xf32>, vector<4x8x32xf32>, vector<4x8x32xf32> -> vector<4x8x32xf32>
    "tpu.trace_stop"() : () -> ()
    %cst_248 = arith.constant dense<0.000000e+00> : vector<8x32xf32>
    %360 = vector.multi_reduction <add>, %359, %cst_248 [0] : vector<4x8x32xf32> to vector<8x32xf32>
    %361 = vector.broadcast %332 : vector<1x32xf32> to vector<8x32xf32>
    %362 = arith.addf %360, %361 : vector<8x32xf32>
    %363 = arith.addf %316, %362 : vector<8x32xf32>
    %c0_249 = arith.constant 0 : index
    %c0_250 = arith.constant 0 : index
    %c0_251 = arith.constant 0 : index
    %364 = vector.load %arg37[%c0_249, %c0_250, %c0_251] : memref<2x1x32xf32, #tpu.memory_space<vmem>>, vector<1x1x32xf32>
    %365 = vector.shape_cast %364 : vector<1x1x32xf32> to vector<1x32xf32>
    %c0_252 = arith.constant 0 : index
    %c0_253 = arith.constant 0 : index
    %c0_254 = arith.constant 0 : index
    %366 = vector.load %arg38[%c0_252, %c0_253, %c0_254] : memref<2x1x32xf32, #tpu.memory_space<vmem>>, vector<1x1x32xf32>
    %367 = vector.shape_cast %366 : vector<1x1x32xf32> to vector<1x32xf32>
    %cst_255 = arith.constant dense<0.000000e+00> : vector<8xf32>
    %368 = vector.multi_reduction <add>, %363, %cst_255 [1] : vector<8x32xf32> to vector<8xf32>
    %369 = vector.shape_cast %368 : vector<8xf32> to vector<8x1xf32>
    %cst_256 = arith.constant 3.200000e+01 : f32
    %370 = vector.broadcast %cst_256 : f32 to vector<8x1xf32>
    %371 = arith.divf %369, %370 : vector<8x1xf32>
    %372 = vector.broadcast %371 : vector<8x1xf32> to vector<8x32xf32>
    %373 = arith.subf %363, %372 : vector<8x32xf32>
    %374 = arith.mulf %373, %373 : vector<8x32xf32>
    %cst_257 = arith.constant dense<0.000000e+00> : vector<8xf32>
    %375 = vector.multi_reduction <add>, %374, %cst_257 [1] : vector<8x32xf32> to vector<8xf32>
    %376 = vector.shape_cast %375 : vector<8xf32> to vector<8x1xf32>
    %cst_258 = arith.constant 3.200000e+01 : f32
    %377 = vector.broadcast %cst_258 : f32 to vector<8x1xf32>
    %378 = arith.divf %376, %377 : vector<8x1xf32>
    %379 = vector.broadcast %371 : vector<8x1xf32> to vector<8x32xf32>
    %380 = arith.subf %363, %379 : vector<8x32xf32>
    %cst_259 = arith.constant 9.99999974E-6 : f32
    %381 = vector.broadcast %cst_259 : f32 to vector<8x1xf32>
    %382 = arith.addf %378, %381 : vector<8x1xf32>
    %383 = math.rsqrt %382 : vector<8x1xf32>
    %384 = vector.broadcast %383 : vector<8x1xf32> to vector<8x32xf32>
    %385 = arith.mulf %380, %384 : vector<8x32xf32>
    %386 = vector.broadcast %365 : vector<1x32xf32> to vector<8x32xf32>
    %387 = arith.mulf %385, %386 : vector<8x32xf32>
    %388 = vector.broadcast %367 : vector<1x32xf32> to vector<8x32xf32>
    %389 = arith.addf %387, %388 : vector<8x32xf32>
    %c0_260 = arith.constant 0 : index
    %c0_261 = arith.constant 0 : index
    %c0_262 = arith.constant 0 : index
    %390 = vector.load %arg39[%c0_260, %c0_261, %c0_262] : memref<2x32x64xf32, #tpu.memory_space<vmem>>, vector<1x32x64xf32>
    %391 = vector.shape_cast %390 : vector<1x32x64xf32> to vector<32x64xf32>
    %cst_263 = arith.constant dense<0.000000e+00> : vector<8x64xf32>
    %392 = tpu.matmul %389, %391, %cst_263 {dimension_numbers = #tpu.dot_dimension_numbers<[1], [0], [0], [1], [0, 0, 1, 1], [], []>} : vector<8x32xf32>, vector<32x64xf32>, vector<8x64xf32> -> vector<8x64xf32>
    %c0_264 = arith.constant 0 : index
    %c0_265 = arith.constant 0 : index
    %c0_266 = arith.constant 0 : index
    %393 = vector.load %arg40[%c0_264, %c0_265, %c0_266] : memref<2x1x64xf32, #tpu.memory_space<vmem>>, vector<1x1x64xf32>
    %394 = vector.shape_cast %393 : vector<1x1x64xf32> to vector<1x64xf32>
    %395 = vector.broadcast %394 : vector<1x64xf32> to vector<8x64xf32>
    %396 = arith.addf %392, %395 : vector<8x64xf32>
    %cst_267 = arith.constant 0.000000e+00 : f32
    %397 = vector.broadcast %cst_267 : f32 to vector<8x64xf32>
    %398 = arith.maximumf %396, %397 : vector<8x64xf32>
    %c0_268 = arith.constant 0 : index
    %c0_269 = arith.constant 0 : index
    %c0_270 = arith.constant 0 : index
    %399 = vector.load %arg41[%c0_268, %c0_269, %c0_270] : memref<2x64x32xf32, #tpu.memory_space<vmem>>, vector<1x64x32xf32>
    %400 = vector.shape_cast %399 : vector<1x64x32xf32> to vector<64x32xf32>
    %cst_271 = arith.constant dense<0.000000e+00> : vector<8x32xf32>
    %401 = tpu.matmul %398, %400, %cst_271 {dimension_numbers = #tpu.dot_dimension_numbers<[1], [0], [0], [1], [0, 0, 1, 1], [], []>} : vector<8x64xf32>, vector<64x32xf32>, vector<8x32xf32> -> vector<8x32xf32>
    %c0_272 = arith.constant 0 : index
    %c0_273 = arith.constant 0 : index
    %c0_274 = arith.constant 0 : index
    %402 = vector.load %arg42[%c0_272, %c0_273, %c0_274] : memref<2x1x32xf32, #tpu.memory_space<vmem>>, vector<1x1x32xf32>
    %403 = vector.shape_cast %402 : vector<1x1x32xf32> to vector<1x32xf32>
    %404 = vector.broadcast %403 : vector<1x32xf32> to vector<8x32xf32>
    %405 = arith.addf %401, %404 : vector<8x32xf32>
    %406 = arith.addf %389, %405 : vector<8x32xf32>
    %c0_275 = arith.constant 0 : index
    %c0_276 = arith.constant 0 : index
    %c0_277 = arith.constant 0 : index
    %407 = vector.load %arg43[%c0_275, %c0_276, %c0_277] : memref<2x1x32xf32, #tpu.memory_space<vmem>>, vector<1x1x32xf32>
    %408 = vector.shape_cast %407 : vector<1x1x32xf32> to vector<1x32xf32>
    %c0_278 = arith.constant 0 : index
    %c0_279 = arith.constant 0 : index
    %c0_280 = arith.constant 0 : index
    %409 = vector.load %arg44[%c0_278, %c0_279, %c0_280] : memref<2x1x32xf32, #tpu.memory_space<vmem>>, vector<1x1x32xf32>
    %410 = vector.shape_cast %409 : vector<1x1x32xf32> to vector<1x32xf32>
    %cst_281 = arith.constant dense<0.000000e+00> : vector<8xf32>
    %411 = vector.multi_reduction <add>, %406, %cst_281 [1] : vector<8x32xf32> to vector<8xf32>
    %412 = vector.shape_cast %411 : vector<8xf32> to vector<8x1xf32>
    %cst_282 = arith.constant 3.200000e+01 : f32
    %413 = vector.broadcast %cst_282 : f32 to vector<8x1xf32>
    %414 = arith.divf %412, %413 : vector<8x1xf32>
    %415 = vector.broadcast %414 : vector<8x1xf32> to vector<8x32xf32>
    %416 = arith.subf %406, %415 : vector<8x32xf32>
    %417 = arith.mulf %416, %416 : vector<8x32xf32>
    %cst_283 = arith.constant dense<0.000000e+00> : vector<8xf32>
    %418 = vector.multi_reduction <add>, %417, %cst_283 [1] : vector<8x32xf32> to vector<8xf32>
    %419 = vector.shape_cast %418 : vector<8xf32> to vector<8x1xf32>
    %cst_284 = arith.constant 3.200000e+01 : f32
    %420 = vector.broadcast %cst_284 : f32 to vector<8x1xf32>
    %421 = arith.divf %419, %420 : vector<8x1xf32>
    %422 = vector.broadcast %414 : vector<8x1xf32> to vector<8x32xf32>
    %423 = arith.subf %406, %422 : vector<8x32xf32>
    %cst_285 = arith.constant 9.99999974E-6 : f32
    %424 = vector.broadcast %cst_285 : f32 to vector<8x1xf32>
    %425 = arith.addf %421, %424 : vector<8x1xf32>
    %426 = math.rsqrt %425 : vector<8x1xf32>
    %427 = vector.broadcast %426 : vector<8x1xf32> to vector<8x32xf32>
    %428 = arith.mulf %423, %427 : vector<8x32xf32>
    %429 = vector.broadcast %408 : vector<1x32xf32> to vector<8x32xf32>
    %430 = arith.mulf %428, %429 : vector<8x32xf32>
    %431 = vector.broadcast %410 : vector<1x32xf32> to vector<8x32xf32>
    %432 = arith.addf %430, %431 : vector<8x32xf32>
    %c1_286 = arith.constant 1 : index
    %c0_287 = arith.constant 0 : index
    %c0_288 = arith.constant 0 : index
    %c0_289 = arith.constant 0 : index
    %433 = vector.load %arg19[%c1_286, %c0_287, %c0_288, %c0_289] : memref<2x4x32x8xf32, #tpu.memory_space<vmem>>, vector<1x4x32x8xf32>
    %434 = vector.shape_cast %433 : vector<1x4x32x8xf32> to vector<4x32x8xf32>
    %c1_290 = arith.constant 1 : index
    %c0_291 = arith.constant 0 : index
    %c0_292 = arith.constant 0 : index
    %c0_293 = arith.constant 0 : index
    %435 = vector.load %arg20[%c1_290, %c0_291, %c0_292, %c0_293] : memref<2x4x32x8xf32, #tpu.memory_space<vmem>>, vector<1x4x32x8xf32>
    %436 = vector.shape_cast %435 : vector<1x4x32x8xf32> to vector<4x32x8xf32>
    %c1_294 = arith.constant 1 : index
    %c0_295 = arith.constant 0 : index
    %c0_296 = arith.constant 0 : index
    %c0_297 = arith.constant 0 : index
    %437 = vector.load %arg21[%c1_294, %c0_295, %c0_296, %c0_297] : memref<2x4x32x8xf32, #tpu.memory_space<vmem>>, vector<1x4x32x8xf32>
    %438 = vector.shape_cast %437 : vector<1x4x32x8xf32> to vector<4x32x8xf32>
    %c1_298 = arith.constant 1 : index
    %c0_299 = arith.constant 0 : index
    %c0_300 = arith.constant 0 : index
    %c0_301 = arith.constant 0 : index
    %439 = vector.load %arg22[%c1_298, %c0_299, %c0_300, %c0_301] : memref<2x4x1x8xf32, #tpu.memory_space<vmem>>, vector<1x4x1x8xf32>
    %440 = vector.shape_cast %439 : vector<1x4x1x8xf32> to vector<4x1x8xf32>
    %c1_302 = arith.constant 1 : index
    %c0_303 = arith.constant 0 : index
    %c0_304 = arith.constant 0 : index
    %c0_305 = arith.constant 0 : index
    %441 = vector.load %arg23[%c1_302, %c0_303, %c0_304, %c0_305] : memref<2x4x1x8xf32, #tpu.memory_space<vmem>>, vector<1x4x1x8xf32>
    %442 = vector.shape_cast %441 : vector<1x4x1x8xf32> to vector<4x1x8xf32>
    %c1_306 = arith.constant 1 : index
    %c0_307 = arith.constant 0 : index
    %c0_308 = arith.constant 0 : index
    %c0_309 = arith.constant 0 : index
    %443 = vector.load %arg24[%c1_306, %c0_307, %c0_308, %c0_309] : memref<2x4x1x8xf32, #tpu.memory_space<vmem>>, vector<1x4x1x8xf32>
    %444 = vector.shape_cast %443 : vector<1x4x1x8xf32> to vector<4x1x8xf32>
    %c1_310 = arith.constant 1 : index
    %c0_311 = arith.constant 0 : index
    %c0_312 = arith.constant 0 : index
    %c0_313 = arith.constant 0 : index
    %445 = vector.load %arg25[%c1_310, %c0_311, %c0_312, %c0_313] : memref<2x4x8x32xf32, #tpu.memory_space<vmem>>, vector<1x4x8x32xf32>
    %446 = vector.shape_cast %445 : vector<1x4x8x32xf32> to vector<4x8x32xf32>
    %c1_314 = arith.constant 1 : index
    %c0_315 = arith.constant 0 : index
    %c0_316 = arith.constant 0 : index
    %447 = vector.load %arg26[%c1_314, %c0_315, %c0_316] : memref<2x1x32xf32, #tpu.memory_space<vmem>>, vector<1x1x32xf32>
    %448 = vector.shape_cast %447 : vector<1x1x32xf32> to vector<1x32xf32>
    %449 = vector.shape_cast %432 : vector<8x32xf32> to vector<1x8x32xf32>
    %450 = vector.shape_cast %449 : vector<1x8x32xf32> to vector<1x8x32xf32>
    %451 = vector.broadcast %450 : vector<1x8x32xf32> to vector<4x8x32xf32>
    %452 = vector.shape_cast %432 : vector<8x32xf32> to vector<1x8x32xf32>
    %453 = vector.shape_cast %452 : vector<1x8x32xf32> to vector<1x8x32xf32>
    %454 = vector.broadcast %453 : vector<1x8x32xf32> to vector<4x8x32xf32>
    "tpu.trace_start"() <{level = 10 : i32, message = "hsd,hdf->hsf"}> : () -> ()
    %cst_317 = arith.constant dense<0.000000e+00> : vector<4x8x8xf32>
    %455 = tpu.matmul %451, %434, %cst_317 {dimension_numbers = #tpu.dot_dimension_numbers<[2], [1], [1], [2], [0, 0, 0, 1, 1, 2], [0], [0]>} : vector<4x8x32xf32>, vector<4x32x8xf32>, vector<4x8x8xf32> -> vector<4x8x8xf32>
    "tpu.trace_stop"() : () -> ()
    %456 = vector.broadcast %440 : vector<4x1x8xf32> to vector<4x8x8xf32>
    %457 = arith.addf %455, %456 : vector<4x8x8xf32>
    "tpu.trace_start"() <{level = 10 : i32, message = "hsd,hdf->hsf"}> : () -> ()
    %cst_318 = arith.constant dense<0.000000e+00> : vector<4x8x8xf32>
    %458 = tpu.matmul %454, %436, %cst_318 {dimension_numbers = #tpu.dot_dimension_numbers<[2], [1], [1], [2], [0, 0, 0, 1, 1, 2], [0], [0]>} : vector<4x8x32xf32>, vector<4x32x8xf32>, vector<4x8x8xf32> -> vector<4x8x8xf32>
    "tpu.trace_stop"() : () -> ()
    %459 = vector.broadcast %442 : vector<4x1x8xf32> to vector<4x8x8xf32>
    %460 = arith.addf %458, %459 : vector<4x8x8xf32>
    "tpu.trace_start"() <{level = 10 : i32, message = "hsd,hdf->hsf"}> : () -> ()
    %cst_319 = arith.constant dense<0.000000e+00> : vector<4x8x8xf32>
    %461 = tpu.matmul %454, %438, %cst_319 {dimension_numbers = #tpu.dot_dimension_numbers<[2], [1], [1], [2], [0, 0, 0, 1, 1, 2], [0], [0]>} : vector<4x8x32xf32>, vector<4x32x8xf32>, vector<4x8x8xf32> -> vector<4x8x8xf32>
    "tpu.trace_stop"() : () -> ()
    %462 = vector.broadcast %444 : vector<4x1x8xf32> to vector<4x8x8xf32>
    %463 = arith.addf %461, %462 : vector<4x8x8xf32>
    "tpu.trace_start"() <{level = 10 : i32, message = "hqf,hkf->hqk"}> : () -> ()
    %cst_320 = arith.constant dense<0.000000e+00> : vector<4x8x8xf32>
    %464 = tpu.matmul %457, %460, %cst_320 {dimension_numbers = #tpu.dot_dimension_numbers<[2], [2], [1], [1], [0, 0, 0, 1, 1, 1], [0], [0]>} : vector<4x8x8xf32>, vector<4x8x8xf32>, vector<4x8x8xf32> -> vector<4x8x8xf32>
    "tpu.trace_stop"() : () -> ()
    %465 = tpu.iota {dimensions = array<i32: 0>} : vector<8x8xi32>
    %466 = tpu.iota {dimensions = array<i32: 1>} : vector<8x8xi32>
    %467 = arith.cmpi sgt, %466, %465 : vector<8x8xi32>
    %468 = vector.shape_cast %467 : vector<8x8xi1> to vector<1x8x8xi1>
    %cst_321 = arith.constant 0xFF800000 : f32
    %469 = vector.shape_cast %468 : vector<1x8x8xi1> to vector<1x8x8xi1>
    %470 = vector.broadcast %469 : vector<1x8x8xi1> to vector<4x8x8xi1>
    %471 = vector.broadcast %cst_321 : f32 to vector<4x8x8xf32>
    %472 = arith.select %470, %471, %464 : vector<4x8x8xi1>, vector<4x8x8xf32>
    %cst_322 = arith.constant dense<0xFF800000> : vector<4x8xf32>
    %473 = vector.multi_reduction <maximumf>, %472, %cst_322 [2] : vector<4x8x8xf32> to vector<4x8xf32>
    %474 = vector.shape_cast %473 : vector<4x8xf32> to vector<4x8x1xf32>
    %475 = vector.broadcast %474 : vector<4x8x1xf32> to vector<4x8x8xf32>
    %476 = arith.subf %472, %475 : vector<4x8x8xf32>
    %477 = math.exp %476 : vector<4x8x8xf32>
    %cst_323 = arith.constant dense<0.000000e+00> : vector<4x8xf32>
    %478 = vector.multi_reduction <add>, %477, %cst_323 [2] : vector<4x8x8xf32> to vector<4x8xf32>
    %479 = vector.shape_cast %478 : vector<4x8xf32> to vector<4x8x1xf32>
    %480 = vector.broadcast %479 : vector<4x8x1xf32> to vector<4x8x8xf32>
    %481 = arith.divf %477, %480 : vector<4x8x8xf32>
    "tpu.trace_start"() <{level = 10 : i32, message = "hqk,hkf->hqf"}> : () -> ()
    %cst_324 = arith.constant dense<0.000000e+00> : vector<4x8x8xf32>
    %482 = tpu.matmul %481, %463, %cst_324 {dimension_numbers = #tpu.dot_dimension_numbers<[2], [1], [1], [2], [0, 0, 0, 1, 1, 2], [0], [0]>} : vector<4x8x8xf32>, vector<4x8x8xf32>, vector<4x8x8xf32> -> vector<4x8x8xf32>
    "tpu.trace_stop"() : () -> ()
    "tpu.trace_start"() <{level = 10 : i32, message = "hsf,hfd->hsd"}> : () -> ()
    %cst_325 = arith.constant dense<0.000000e+00> : vector<4x8x32xf32>
    %483 = tpu.matmul %482, %446, %cst_325 {dimension_numbers = #tpu.dot_dimension_numbers<[2], [1], [1], [2], [0, 0, 0, 1, 1, 2], [0], [0]>} : vector<4x8x8xf32>, vector<4x8x32xf32>, vector<4x8x32xf32> -> vector<4x8x32xf32>
    "tpu.trace_stop"() : () -> ()
    %cst_326 = arith.constant dense<0.000000e+00> : vector<8x32xf32>
    %484 = vector.multi_reduction <add>, %483, %cst_326 [0] : vector<4x8x32xf32> to vector<8x32xf32>
    %485 = vector.broadcast %448 : vector<1x32xf32> to vector<8x32xf32>
    %486 = arith.addf %484, %485 : vector<8x32xf32>
    %487 = arith.addf %432, %486 : vector<8x32xf32>
    %c1_327 = arith.constant 1 : index
    %c0_328 = arith.constant 0 : index
    %c0_329 = arith.constant 0 : index
    %488 = vector.load %arg27[%c1_327, %c0_328, %c0_329] : memref<2x1x32xf32, #tpu.memory_space<vmem>>, vector<1x1x32xf32>
    %489 = vector.shape_cast %488 : vector<1x1x32xf32> to vector<1x32xf32>
    %c1_330 = arith.constant 1 : index
    %c0_331 = arith.constant 0 : index
    %c0_332 = arith.constant 0 : index
    %490 = vector.load %arg28[%c1_330, %c0_331, %c0_332] : memref<2x1x32xf32, #tpu.memory_space<vmem>>, vector<1x1x32xf32>
    %491 = vector.shape_cast %490 : vector<1x1x32xf32> to vector<1x32xf32>
    %cst_333 = arith.constant dense<0.000000e+00> : vector<8xf32>
    %492 = vector.multi_reduction <add>, %487, %cst_333 [1] : vector<8x32xf32> to vector<8xf32>
    %493 = vector.shape_cast %492 : vector<8xf32> to vector<8x1xf32>
    %cst_334 = arith.constant 3.200000e+01 : f32
    %494 = vector.broadcast %cst_334 : f32 to vector<8x1xf32>
    %495 = arith.divf %493, %494 : vector<8x1xf32>
    %496 = vector.broadcast %495 : vector<8x1xf32> to vector<8x32xf32>
    %497 = arith.subf %487, %496 : vector<8x32xf32>
    %498 = arith.mulf %497, %497 : vector<8x32xf32>
    %cst_335 = arith.constant dense<0.000000e+00> : vector<8xf32>
    %499 = vector.multi_reduction <add>, %498, %cst_335 [1] : vector<8x32xf32> to vector<8xf32>
    %500 = vector.shape_cast %499 : vector<8xf32> to vector<8x1xf32>
    %cst_336 = arith.constant 3.200000e+01 : f32
    %501 = vector.broadcast %cst_336 : f32 to vector<8x1xf32>
    %502 = arith.divf %500, %501 : vector<8x1xf32>
    %503 = vector.broadcast %495 : vector<8x1xf32> to vector<8x32xf32>
    %504 = arith.subf %487, %503 : vector<8x32xf32>
    %cst_337 = arith.constant 9.99999974E-6 : f32
    %505 = vector.broadcast %cst_337 : f32 to vector<8x1xf32>
    %506 = arith.addf %502, %505 : vector<8x1xf32>
    %507 = math.rsqrt %506 : vector<8x1xf32>
    %508 = vector.broadcast %507 : vector<8x1xf32> to vector<8x32xf32>
    %509 = arith.mulf %504, %508 : vector<8x32xf32>
    %510 = vector.broadcast %489 : vector<1x32xf32> to vector<8x32xf32>
    %511 = arith.mulf %509, %510 : vector<8x32xf32>
    %512 = vector.broadcast %491 : vector<1x32xf32> to vector<8x32xf32>
    %513 = arith.addf %511, %512 : vector<8x32xf32>
    %c1_338 = arith.constant 1 : index
    %c0_339 = arith.constant 0 : index
    %c0_340 = arith.constant 0 : index
    %c0_341 = arith.constant 0 : index
    %514 = vector.load %arg29[%c1_338, %c0_339, %c0_340, %c0_341] : memref<2x4x32x8xf32, #tpu.memory_space<vmem>>, vector<1x4x32x8xf32>
    %515 = vector.shape_cast %514 : vector<1x4x32x8xf32> to vector<4x32x8xf32>
    %c1_342 = arith.constant 1 : index
    %c0_343 = arith.constant 0 : index
    %c0_344 = arith.constant 0 : index
    %c0_345 = arith.constant 0 : index
    %516 = vector.load %arg30[%c1_342, %c0_343, %c0_344, %c0_345] : memref<2x4x32x8xf32, #tpu.memory_space<vmem>>, vector<1x4x32x8xf32>
    %517 = vector.shape_cast %516 : vector<1x4x32x8xf32> to vector<4x32x8xf32>
    %c1_346 = arith.constant 1 : index
    %c0_347 = arith.constant 0 : index
    %c0_348 = arith.constant 0 : index
    %c0_349 = arith.constant 0 : index
    %518 = vector.load %arg31[%c1_346, %c0_347, %c0_348, %c0_349] : memref<2x4x32x8xf32, #tpu.memory_space<vmem>>, vector<1x4x32x8xf32>
    %519 = vector.shape_cast %518 : vector<1x4x32x8xf32> to vector<4x32x8xf32>
    %c1_350 = arith.constant 1 : index
    %c0_351 = arith.constant 0 : index
    %c0_352 = arith.constant 0 : index
    %c0_353 = arith.constant 0 : index
    %520 = vector.load %arg32[%c1_350, %c0_351, %c0_352, %c0_353] : memref<2x4x1x8xf32, #tpu.memory_space<vmem>>, vector<1x4x1x8xf32>
    %521 = vector.shape_cast %520 : vector<1x4x1x8xf32> to vector<4x1x8xf32>
    %c1_354 = arith.constant 1 : index
    %c0_355 = arith.constant 0 : index
    %c0_356 = arith.constant 0 : index
    %c0_357 = arith.constant 0 : index
    %522 = vector.load %arg33[%c1_354, %c0_355, %c0_356, %c0_357] : memref<2x4x1x8xf32, #tpu.memory_space<vmem>>, vector<1x4x1x8xf32>
    %523 = vector.shape_cast %522 : vector<1x4x1x8xf32> to vector<4x1x8xf32>
    %c1_358 = arith.constant 1 : index
    %c0_359 = arith.constant 0 : index
    %c0_360 = arith.constant 0 : index
    %c0_361 = arith.constant 0 : index
    %524 = vector.load %arg34[%c1_358, %c0_359, %c0_360, %c0_361] : memref<2x4x1x8xf32, #tpu.memory_space<vmem>>, vector<1x4x1x8xf32>
    %525 = vector.shape_cast %524 : vector<1x4x1x8xf32> to vector<4x1x8xf32>
    %c1_362 = arith.constant 1 : index
    %c0_363 = arith.constant 0 : index
    %c0_364 = arith.constant 0 : index
    %c0_365 = arith.constant 0 : index
    %526 = vector.load %arg35[%c1_362, %c0_363, %c0_364, %c0_365] : memref<2x4x8x32xf32, #tpu.memory_space<vmem>>, vector<1x4x8x32xf32>
    %527 = vector.shape_cast %526 : vector<1x4x8x32xf32> to vector<4x8x32xf32>
    %c1_366 = arith.constant 1 : index
    %c0_367 = arith.constant 0 : index
    %c0_368 = arith.constant 0 : index
    %528 = vector.load %arg36[%c1_366, %c0_367, %c0_368] : memref<2x1x32xf32, #tpu.memory_space<vmem>>, vector<1x1x32xf32>
    %529 = vector.shape_cast %528 : vector<1x1x32xf32> to vector<1x32xf32>
    %530 = vector.shape_cast %513 : vector<8x32xf32> to vector<1x8x32xf32>
    %531 = vector.shape_cast %530 : vector<1x8x32xf32> to vector<1x8x32xf32>
    %532 = vector.broadcast %531 : vector<1x8x32xf32> to vector<4x8x32xf32>
    %533 = vector.shape_cast %233 : vector<8x32xf32> to vector<1x8x32xf32>
    %534 = vector.shape_cast %533 : vector<1x8x32xf32> to vector<1x8x32xf32>
    %535 = vector.broadcast %534 : vector<1x8x32xf32> to vector<4x8x32xf32>
    "tpu.trace_start"() <{level = 10 : i32, message = "hsd,hdf->hsf"}> : () -> ()
    %cst_369 = arith.constant dense<0.000000e+00> : vector<4x8x8xf32>
    %536 = tpu.matmul %532, %515, %cst_369 {dimension_numbers = #tpu.dot_dimension_numbers<[2], [1], [1], [2], [0, 0, 0, 1, 1, 2], [0], [0]>} : vector<4x8x32xf32>, vector<4x32x8xf32>, vector<4x8x8xf32> -> vector<4x8x8xf32>
    "tpu.trace_stop"() : () -> ()
    %537 = vector.broadcast %521 : vector<4x1x8xf32> to vector<4x8x8xf32>
    %538 = arith.addf %536, %537 : vector<4x8x8xf32>
    "tpu.trace_start"() <{level = 10 : i32, message = "hsd,hdf->hsf"}> : () -> ()
    %cst_370 = arith.constant dense<0.000000e+00> : vector<4x8x8xf32>
    %539 = tpu.matmul %535, %517, %cst_370 {dimension_numbers = #tpu.dot_dimension_numbers<[2], [1], [1], [2], [0, 0, 0, 1, 1, 2], [0], [0]>} : vector<4x8x32xf32>, vector<4x32x8xf32>, vector<4x8x8xf32> -> vector<4x8x8xf32>
    "tpu.trace_stop"() : () -> ()
    %540 = vector.broadcast %523 : vector<4x1x8xf32> to vector<4x8x8xf32>
    %541 = arith.addf %539, %540 : vector<4x8x8xf32>
    "tpu.trace_start"() <{level = 10 : i32, message = "hsd,hdf->hsf"}> : () -> ()
    %cst_371 = arith.constant dense<0.000000e+00> : vector<4x8x8xf32>
    %542 = tpu.matmul %535, %519, %cst_371 {dimension_numbers = #tpu.dot_dimension_numbers<[2], [1], [1], [2], [0, 0, 0, 1, 1, 2], [0], [0]>} : vector<4x8x32xf32>, vector<4x32x8xf32>, vector<4x8x8xf32> -> vector<4x8x8xf32>
    "tpu.trace_stop"() : () -> ()
    %543 = vector.broadcast %525 : vector<4x1x8xf32> to vector<4x8x8xf32>
    %544 = arith.addf %542, %543 : vector<4x8x8xf32>
    "tpu.trace_start"() <{level = 10 : i32, message = "hqf,hkf->hqk"}> : () -> ()
    %cst_372 = arith.constant dense<0.000000e+00> : vector<4x8x8xf32>
    %545 = tpu.matmul %538, %541, %cst_372 {dimension_numbers = #tpu.dot_dimension_numbers<[2], [2], [1], [1], [0, 0, 0, 1, 1, 1], [0], [0]>} : vector<4x8x8xf32>, vector<4x8x8xf32>, vector<4x8x8xf32> -> vector<4x8x8xf32>
    "tpu.trace_stop"() : () -> ()
    %cst_373 = arith.constant dense<0xFF800000> : vector<4x8xf32>
    %546 = vector.multi_reduction <maximumf>, %545, %cst_373 [2] : vector<4x8x8xf32> to vector<4x8xf32>
    %547 = vector.shape_cast %546 : vector<4x8xf32> to vector<4x8x1xf32>
    %548 = vector.broadcast %547 : vector<4x8x1xf32> to vector<4x8x8xf32>
    %549 = arith.subf %545, %548 : vector<4x8x8xf32>
    %550 = math.exp %549 : vector<4x8x8xf32>
    %cst_374 = arith.constant dense<0.000000e+00> : vector<4x8xf32>
    %551 = vector.multi_reduction <add>, %550, %cst_374 [2] : vector<4x8x8xf32> to vector<4x8xf32>
    %552 = vector.shape_cast %551 : vector<4x8xf32> to vector<4x8x1xf32>
    %553 = vector.broadcast %552 : vector<4x8x1xf32> to vector<4x8x8xf32>
    %554 = arith.divf %550, %553 : vector<4x8x8xf32>
    "tpu.trace_start"() <{level = 10 : i32, message = "hqk,hkf->hqf"}> : () -> ()
    %cst_375 = arith.constant dense<0.000000e+00> : vector<4x8x8xf32>
    %555 = tpu.matmul %554, %544, %cst_375 {dimension_numbers = #tpu.dot_dimension_numbers<[2], [1], [1], [2], [0, 0, 0, 1, 1, 2], [0], [0]>} : vector<4x8x8xf32>, vector<4x8x8xf32>, vector<4x8x8xf32> -> vector<4x8x8xf32>
    "tpu.trace_stop"() : () -> ()
    "tpu.trace_start"() <{level = 10 : i32, message = "hsf,hfd->hsd"}> : () -> ()
    %cst_376 = arith.constant dense<0.000000e+00> : vector<4x8x32xf32>
    %556 = tpu.matmul %555, %527, %cst_376 {dimension_numbers = #tpu.dot_dimension_numbers<[2], [1], [1], [2], [0, 0, 0, 1, 1, 2], [0], [0]>} : vector<4x8x8xf32>, vector<4x8x32xf32>, vector<4x8x32xf32> -> vector<4x8x32xf32>
    "tpu.trace_stop"() : () -> ()
    %cst_377 = arith.constant dense<0.000000e+00> : vector<8x32xf32>
    %557 = vector.multi_reduction <add>, %556, %cst_377 [0] : vector<4x8x32xf32> to vector<8x32xf32>
    %558 = vector.broadcast %529 : vector<1x32xf32> to vector<8x32xf32>
    %559 = arith.addf %557, %558 : vector<8x32xf32>
    %560 = arith.addf %513, %559 : vector<8x32xf32>
    %c1_378 = arith.constant 1 : index
    %c0_379 = arith.constant 0 : index
    %c0_380 = arith.constant 0 : index
    %561 = vector.load %arg37[%c1_378, %c0_379, %c0_380] : memref<2x1x32xf32, #tpu.memory_space<vmem>>, vector<1x1x32xf32>
    %562 = vector.shape_cast %561 : vector<1x1x32xf32> to vector<1x32xf32>
    %c1_381 = arith.constant 1 : index
    %c0_382 = arith.constant 0 : index
    %c0_383 = arith.constant 0 : index
    %563 = vector.load %arg38[%c1_381, %c0_382, %c0_383] : memref<2x1x32xf32, #tpu.memory_space<vmem>>, vector<1x1x32xf32>
    %564 = vector.shape_cast %563 : vector<1x1x32xf32> to vector<1x32xf32>
    %cst_384 = arith.constant dense<0.000000e+00> : vector<8xf32>
    %565 = vector.multi_reduction <add>, %560, %cst_384 [1] : vector<8x32xf32> to vector<8xf32>
    %566 = vector.shape_cast %565 : vector<8xf32> to vector<8x1xf32>
    %cst_385 = arith.constant 3.200000e+01 : f32
    %567 = vector.broadcast %cst_385 : f32 to vector<8x1xf32>
    %568 = arith.divf %566, %567 : vector<8x1xf32>
    %569 = vector.broadcast %568 : vector<8x1xf32> to vector<8x32xf32>
    %570 = arith.subf %560, %569 : vector<8x32xf32>
    %571 = arith.mulf %570, %570 : vector<8x32xf32>
    %cst_386 = arith.constant dense<0.000000e+00> : vector<8xf32>
    %572 = vector.multi_reduction <add>, %571, %cst_386 [1] : vector<8x32xf32> to vector<8xf32>
    %573 = vector.shape_cast %572 : vector<8xf32> to vector<8x1xf32>
    %cst_387 = arith.constant 3.200000e+01 : f32
    %574 = vector.broadcast %cst_387 : f32 to vector<8x1xf32>
    %575 = arith.divf %573, %574 : vector<8x1xf32>
    %576 = vector.broadcast %568 : vector<8x1xf32> to vector<8x32xf32>
    %577 = arith.subf %560, %576 : vector<8x32xf32>
    %cst_388 = arith.constant 9.99999974E-6 : f32
    %578 = vector.broadcast %cst_388 : f32 to vector<8x1xf32>
    %579 = arith.addf %575, %578 : vector<8x1xf32>
    %580 = math.rsqrt %579 : vector<8x1xf32>
    %581 = vector.broadcast %580 : vector<8x1xf32> to vector<8x32xf32>
    %582 = arith.mulf %577, %581 : vector<8x32xf32>
    %583 = vector.broadcast %562 : vector<1x32xf32> to vector<8x32xf32>
    %584 = arith.mulf %582, %583 : vector<8x32xf32>
    %585 = vector.broadcast %564 : vector<1x32xf32> to vector<8x32xf32>
    %586 = arith.addf %584, %585 : vector<8x32xf32>
    %c1_389 = arith.constant 1 : index
    %c0_390 = arith.constant 0 : index
    %c0_391 = arith.constant 0 : index
    %587 = vector.load %arg39[%c1_389, %c0_390, %c0_391] : memref<2x32x64xf32, #tpu.memory_space<vmem>>, vector<1x32x64xf32>
    %588 = vector.shape_cast %587 : vector<1x32x64xf32> to vector<32x64xf32>
    %cst_392 = arith.constant dense<0.000000e+00> : vector<8x64xf32>
    %589 = tpu.matmul %586, %588, %cst_392 {dimension_numbers = #tpu.dot_dimension_numbers<[1], [0], [0], [1], [0, 0, 1, 1], [], []>} : vector<8x32xf32>, vector<32x64xf32>, vector<8x64xf32> -> vector<8x64xf32>
    %c1_393 = arith.constant 1 : index
    %c0_394 = arith.constant 0 : index
    %c0_395 = arith.constant 0 : index
    %590 = vector.load %arg40[%c1_393, %c0_394, %c0_395] : memref<2x1x64xf32, #tpu.memory_space<vmem>>, vector<1x1x64xf32>
    %591 = vector.shape_cast %590 : vector<1x1x64xf32> to vector<1x64xf32>
    %592 = vector.broadcast %591 : vector<1x64xf32> to vector<8x64xf32>
    %593 = arith.addf %589, %592 : vector<8x64xf32>
    %cst_396 = arith.constant 0.000000e+00 : f32
    %594 = vector.broadcast %cst_396 : f32 to vector<8x64xf32>
    %595 = arith.maximumf %593, %594 : vector<8x64xf32>
    %c1_397 = arith.constant 1 : index
    %c0_398 = arith.constant 0 : index
    %c0_399 = arith.constant 0 : index
    %596 = vector.load %arg41[%c1_397, %c0_398, %c0_399] : memref<2x64x32xf32, #tpu.memory_space<vmem>>, vector<1x64x32xf32>
    %597 = vector.shape_cast %596 : vector<1x64x32xf32> to vector<64x32xf32>
    %cst_400 = arith.constant dense<0.000000e+00> : vector<8x32xf32>
    %598 = tpu.matmul %595, %597, %cst_400 {dimension_numbers = #tpu.dot_dimension_numbers<[1], [0], [0], [1], [0, 0, 1, 1], [], []>} : vector<8x64xf32>, vector<64x32xf32>, vector<8x32xf32> -> vector<8x32xf32>
    %c1_401 = arith.constant 1 : index
    %c0_402 = arith.constant 0 : index
    %c0_403 = arith.constant 0 : index
    %599 = vector.load %arg42[%c1_401, %c0_402, %c0_403] : memref<2x1x32xf32, #tpu.memory_space<vmem>>, vector<1x1x32xf32>
    %600 = vector.shape_cast %599 : vector<1x1x32xf32> to vector<1x32xf32>
    %601 = vector.broadcast %600 : vector<1x32xf32> to vector<8x32xf32>
    %602 = arith.addf %598, %601 : vector<8x32xf32>
    %603 = arith.addf %586, %602 : vector<8x32xf32>
    %c1_404 = arith.constant 1 : index
    %c0_405 = arith.constant 0 : index
    %c0_406 = arith.constant 0 : index
    %604 = vector.load %arg43[%c1_404, %c0_405, %c0_406] : memref<2x1x32xf32, #tpu.memory_space<vmem>>, vector<1x1x32xf32>
    %605 = vector.shape_cast %604 : vector<1x1x32xf32> to vector<1x32xf32>
    %c1_407 = arith.constant 1 : index
    %c0_408 = arith.constant 0 : index
    %c0_409 = arith.constant 0 : index
    %606 = vector.load %arg44[%c1_407, %c0_408, %c0_409] : memref<2x1x32xf32, #tpu.memory_space<vmem>>, vector<1x1x32xf32>
    %607 = vector.shape_cast %606 : vector<1x1x32xf32> to vector<1x32xf32>
    %cst_410 = arith.constant dense<0.000000e+00> : vector<8xf32>
    %608 = vector.multi_reduction <add>, %603, %cst_410 [1] : vector<8x32xf32> to vector<8xf32>
    %609 = vector.shape_cast %608 : vector<8xf32> to vector<8x1xf32>
    %cst_411 = arith.constant 3.200000e+01 : f32
    %610 = vector.broadcast %cst_411 : f32 to vector<8x1xf32>
    %611 = arith.divf %609, %610 : vector<8x1xf32>
    %612 = vector.broadcast %611 : vector<8x1xf32> to vector<8x32xf32>
    %613 = arith.subf %603, %612 : vector<8x32xf32>
    %614 = arith.mulf %613, %613 : vector<8x32xf32>
    %cst_412 = arith.constant dense<0.000000e+00> : vector<8xf32>
    %615 = vector.multi_reduction <add>, %614, %cst_412 [1] : vector<8x32xf32> to vector<8xf32>
    %616 = vector.shape_cast %615 : vector<8xf32> to vector<8x1xf32>
    %cst_413 = arith.constant 3.200000e+01 : f32
    %617 = vector.broadcast %cst_413 : f32 to vector<8x1xf32>
    %618 = arith.divf %616, %617 : vector<8x1xf32>
    %619 = vector.broadcast %611 : vector<8x1xf32> to vector<8x32xf32>
    %620 = arith.subf %603, %619 : vector<8x32xf32>
    %cst_414 = arith.constant 9.99999974E-6 : f32
    %621 = vector.broadcast %cst_414 : f32 to vector<8x1xf32>
    %622 = arith.addf %618, %621 : vector<8x1xf32>
    %623 = math.rsqrt %622 : vector<8x1xf32>
    %624 = vector.broadcast %623 : vector<8x1xf32> to vector<8x32xf32>
    %625 = arith.mulf %620, %624 : vector<8x32xf32>
    %626 = vector.broadcast %605 : vector<1x32xf32> to vector<8x32xf32>
    %627 = arith.mulf %625, %626 : vector<8x32xf32>
    %628 = vector.broadcast %607 : vector<1x32xf32> to vector<8x32xf32>
    %629 = arith.addf %627, %628 : vector<8x32xf32>
    %c0_415 = arith.constant 0 : index
    %c0_416 = arith.constant 0 : index
    %c0_417 = arith.constant 0 : index
    %630 = vector.load %arg45[%c0_415, %c0_416, %c0_417] : memref<1x8x32xf32, #tpu.memory_space<vmem>>, vector<1x8x32xf32>
    %631 = vector.shape_cast %630 : vector<1x8x32xf32> to vector<8x32xf32>
    %632 = vector.shape_cast %629 : vector<8x32xf32> to vector<1x8x32xf32>
    tpu.vector_store %arg45[%c0_415, %c0_416, %c0_417], %632 {strides = array<i32>} : memref<1x8x32xf32, #tpu.memory_space<vmem>>, vector<1x8x32xf32>,
    return
  }
  func.func @transform_0(%arg0: i32) -> (i32, i32, i32) {
    %c0_i32 = arith.constant 0 : i32
    %c0_i32_0 = arith.constant 0 : i32
    %c0_i32_1 = arith.constant 0 : i32
    return %arg0, %c0_i32, %c0_i32_0 : i32, i32, i32
  }
  func.func @transform_1(%arg0: i32) -> (i32, i32, i32) {
    %c0_i32 = arith.constant 0 : i32
    %c0_i32_0 = arith.constant 0 : i32
    %c0_i32_1 = arith.constant 0 : i32
    return %arg0, %c0_i32, %c0_i32_0 : i32, i32, i32
  }
  func.func @transform_2(%arg0: i32) -> (i32, i32, i32, i32) {
    %c0_i32 = arith.constant 0 : i32
    %c0_i32_0 = arith.constant 0 : i32
    %c0_i32_1 = arith.constant 0 : i32
    %c0_i32_2 = arith.constant 0 : i32
    %c0_i32_3 = arith.constant 0 : i32
    return %c0_i32, %c0_i32_0, %c0_i32_1, %c0_i32_2 : i32, i32, i32, i32
  }
  func.func @transform_3(%arg0: i32) -> (i32, i32, i32, i32) {
    %c0_i32 = arith.constant 0 : i32
    %c0_i32_0 = arith.constant 0 : i32
    %c0_i32_1 = arith.constant 0 : i32
    %c0_i32_2 = arith.constant 0 : i32
    %c0_i32_3 = arith.constant 0 : i32
    return %c0_i32, %c0_i32_0, %c0_i32_1, %c0_i32_2 : i32, i32, i32, i32
  }
  func.func @transform_4(%arg0: i32) -> (i32, i32, i32, i32) {
    %c0_i32 = arith.constant 0 : i32
    %c0_i32_0 = arith.constant 0 : i32
    %c0_i32_1 = arith.constant 0 : i32
    %c0_i32_2 = arith.constant 0 : i32
    %c0_i32_3 = arith.constant 0 : i32
    return %c0_i32, %c0_i32_0, %c0_i32_1, %c0_i32_2 : i32, i32, i32, i32
  }
  func.func @transform_5(%arg0: i32) -> (i32, i32, i32, i32) {
    %c0_i32 = arith.constant 0 : i32
    %c0_i32_0 = arith.constant 0 : i32
    %c0_i32_1 = arith.constant 0 : i32
    %c0_i32_2 = arith.constant 0 : i32
    %c0_i32_3 = arith.constant 0 : i32
    return %c0_i32, %c0_i32_0, %c0_i32_1, %c0_i32_2 : i32, i32, i32, i32
  }
  func.func @transform_6(%arg0: i32) -> (i32, i32, i32, i32) {
    %c0_i32 = arith.constant 0 : i32
    %c0_i32_0 = arith.constant 0 : i32
    %c0_i32_1 = arith.constant 0 : i32
    %c0_i32_2 = arith.constant 0 : i32
    %c0_i32_3 = arith.constant 0 : i32
    return %c0_i32, %c0_i32_0, %c0_i32_1, %c0_i32_2 : i32, i32, i32, i32
  }
  func.func @transform_7(%arg0: i32) -> (i32, i32, i32, i32) {
    %c0_i32 = arith.constant 0 : i32
    %c0_i32_0 = arith.constant 0 : i32
    %c0_i32_1 = arith.constant 0 : i32
    %c0_i32_2 = arith.constant 0 : i32
    %c0_i32_3 = arith.constant 0 : i32
    return %c0_i32, %c0_i32_0, %c0_i32_1, %c0_i32_2 : i32, i32, i32, i32
  }
  func.func @transform_8(%arg0: i32) -> (i32, i32, i32, i32) {
    %c0_i32 = arith.constant 0 : i32
    %c0_i32_0 = arith.constant 0 : i32
    %c0_i32_1 = arith.constant 0 : i32
    %c0_i32_2 = arith.constant 0 : i32
    %c0_i32_3 = arith.constant 0 : i32
    return %c0_i32, %c0_i32_0, %c0_i32_1, %c0_i32_2 : i32, i32, i32, i32
  }
  func.func @transform_9(%arg0: i32) -> (i32, i32, i32) {
    %c0_i32 = arith.constant 0 : i32
    %c0_i32_0 = arith.constant 0 : i32
    %c0_i32_1 = arith.constant 0 : i32
    %c0_i32_2 = arith.constant 0 : i32
    return %c0_i32, %c0_i32_0, %c0_i32_1 : i32, i32, i32
  }
  func.func @transform_10(%arg0: i32) -> (i32, i32, i32) {
    %c0_i32 = arith.constant 0 : i32
    %c0_i32_0 = arith.constant 0 : i32
    %c0_i32_1 = arith.constant 0 : i32
    %c0_i32_2 = arith.constant 0 : i32
    return %c0_i32, %c0_i32_0, %c0_i32_1 : i32, i32, i32
  }
  func.func @transform_11(%arg0: i32) -> (i32, i32, i32) {
    %c0_i32 = arith.constant 0 : i32
    %c0_i32_0 = arith.constant 0 : i32
    %c0_i32_1 = arith.constant 0 : i32
    %c0_i32_2 = arith.constant 0 : i32
    return %c0_i32, %c0_i32_0, %c0_i32_1 : i32, i32, i32
  }
  func.func @transform_12(%arg0: i32) -> (i32, i32, i32) {
    %c0_i32 = arith.constant 0 : i32
    %c0_i32_0 = arith.constant 0 : i32
    %c0_i32_1 = arith.constant 0 : i32
    %c0_i32_2 = arith.constant 0 : i32
    return %c0_i32, %c0_i32_0, %c0_i32_1 : i32, i32, i32
  }
  func.func @transform_13(%arg0: i32) -> (i32, i32, i32) {
    %c0_i32 = arith.constant 0 : i32
    %c0_i32_0 = arith.constant 0 : i32
    %c0_i32_1 = arith.constant 0 : i32
    %c0_i32_2 = arith.constant 0 : i32
    return %c0_i32, %c0_i32_0, %c0_i32_1 : i32, i32, i32
  }
  func.func @transform_14(%arg0: i32) -> (i32, i32, i32) {
    %c0_i32 = arith.constant 0 : i32
    %c0_i32_0 = arith.constant 0 : i32
    %c0_i32_1 = arith.constant 0 : i32
    %c0_i32_2 = arith.constant 0 : i32
    return %c0_i32, %c0_i32_0, %c0_i32_1 : i32, i32, i32
  }
  func.func @transform_15(%arg0: i32) -> (i32, i32, i32) {
    %c0_i32 = arith.constant 0 : i32
    %c0_i32_0 = arith.constant 0 : i32
    %c0_i32_1 = arith.constant 0 : i32
    %c0_i32_2 = arith.constant 0 : i32
    return %c0_i32, %c0_i32_0, %c0_i32_1 : i32, i32, i32
  }
  func.func @transform_16(%arg0: i32) -> (i32, i32, i32) {
    %c0_i32 = arith.constant 0 : i32
    %c0_i32_0 = arith.constant 0 : i32
    %c0_i32_1 = arith.constant 0 : i32
    %c0_i32_2 = arith.constant 0 : i32
    return %c0_i32, %c0_i32_0, %c0_i32_1 : i32, i32, i32
  }
  func.func @transform_17(%arg0: i32) -> (i32, i32, i32) {
    %c0_i32 = arith.constant 0 : i32
    %c0_i32_0 = arith.constant 0 : i32
    %c0_i32_1 = arith.constant 0 : i32
    %c0_i32_2 = arith.constant 0 : i32
    return %c0_i32, %c0_i32_0, %c0_i32_1 : i32, i32, i32
  }
  func.func @transform_18(%arg0: i32) -> (i32, i32, i32, i32) {
    %c0_i32 = arith.constant 0 : i32
    %c0_i32_0 = arith.constant 0 : i32
    %c0_i32_1 = arith.constant 0 : i32
    %c0_i32_2 = arith.constant 0 : i32
    %c0_i32_3 = arith.constant 0 : i32
    return %c0_i32, %c0_i32_0, %c0_i32_1, %c0_i32_2 : i32, i32, i32, i32
  }
  func.func @transform_19(%arg0: i32) -> (i32, i32, i32, i32) {
    %c0_i32 = arith.constant 0 : i32
    %c0_i32_0 = arith.constant 0 : i32
    %c0_i32_1 = arith.constant 0 : i32
    %c0_i32_2 = arith.constant 0 : i32
    %c0_i32_3 = arith.constant 0 : i32
    return %c0_i32, %c0_i32_0, %c0_i32_1, %c0_i32_2 : i32, i32, i32, i32
  }
  func.func @transform_20(%arg0: i32) -> (i32, i32, i32, i32) {
    %c0_i32 = arith.constant 0 : i32
    %c0_i32_0 = arith.constant 0 : i32
    %c0_i32_1 = arith.constant 0 : i32
    %c0_i32_2 = arith.constant 0 : i32
    %c0_i32_3 = arith.constant 0 : i32
    return %c0_i32, %c0_i32_0, %c0_i32_1, %c0_i32_2 : i32, i32, i32, i32
  }
  func.func @transform_21(%arg0: i32) -> (i32, i32, i32, i32) {
    %c0_i32 = arith.constant 0 : i32
    %c0_i32_0 = arith.constant 0 : i32
    %c0_i32_1 = arith.constant 0 : i32
    %c0_i32_2 = arith.constant 0 : i32
    %c0_i32_3 = arith.constant 0 : i32
    return %c0_i32, %c0_i32_0, %c0_i32_1, %c0_i32_2 : i32, i32, i32, i32
  }
  func.func @transform_22(%arg0: i32) -> (i32, i32, i32, i32) {
    %c0_i32 = arith.constant 0 : i32
    %c0_i32_0 = arith.constant 0 : i32
    %c0_i32_1 = arith.constant 0 : i32
    %c0_i32_2 = arith.constant 0 : i32
    %c0_i32_3 = arith.constant 0 : i32
    return %c0_i32, %c0_i32_0, %c0_i32_1, %c0_i32_2 : i32, i32, i32, i32
  }
  func.func @transform_23(%arg0: i32) -> (i32, i32, i32, i32) {
    %c0_i32 = arith.constant 0 : i32
    %c0_i32_0 = arith.constant 0 : i32
    %c0_i32_1 = arith.constant 0 : i32
    %c0_i32_2 = arith.constant 0 : i32
    %c0_i32_3 = arith.constant 0 : i32
    return %c0_i32, %c0_i32_0, %c0_i32_1, %c0_i32_2 : i32, i32, i32, i32
  }
  func.func @transform_24(%arg0: i32) -> (i32, i32, i32, i32) {
    %c0_i32 = arith.constant 0 : i32
    %c0_i32_0 = arith.constant 0 : i32
    %c0_i32_1 = arith.constant 0 : i32
    %c0_i32_2 = arith.constant 0 : i32
    %c0_i32_3 = arith.constant 0 : i32
    return %c0_i32, %c0_i32_0, %c0_i32_1, %c0_i32_2 : i32, i32, i32, i32
  }
  func.func @transform_25(%arg0: i32) -> (i32, i32, i32) {
    %c0_i32 = arith.constant 0 : i32
    %c0_i32_0 = arith.constant 0 : i32
    %c0_i32_1 = arith.constant 0 : i32
    %c0_i32_2 = arith.constant 0 : i32
    return %c0_i32, %c0_i32_0, %c0_i32_1 : i32, i32, i32
  }
  func.func @transform_26(%arg0: i32) -> (i32, i32, i32) {
    %c0_i32 = arith.constant 0 : i32
    %c0_i32_0 = arith.constant 0 : i32
    %c0_i32_1 = arith.constant 0 : i32
    %c0_i32_2 = arith.constant 0 : i32
    return %c0_i32, %c0_i32_0, %c0_i32_1 : i32, i32, i32
  }
  func.func @transform_27(%arg0: i32) -> (i32, i32, i32) {
    %c0_i32 = arith.constant 0 : i32
    %c0_i32_0 = arith.constant 0 : i32
    %c0_i32_1 = arith.constant 0 : i32
    %c0_i32_2 = arith.constant 0 : i32
    return %c0_i32, %c0_i32_0, %c0_i32_1 : i32, i32, i32
  }
  func.func @transform_28(%arg0: i32) -> (i32, i32, i32, i32) {
    %c0_i32 = arith.constant 0 : i32
    %c0_i32_0 = arith.constant 0 : i32
    %c0_i32_1 = arith.constant 0 : i32
    %c0_i32_2 = arith.constant 0 : i32
    %c0_i32_3 = arith.constant 0 : i32
    return %c0_i32, %c0_i32_0, %c0_i32_1, %c0_i32_2 : i32, i32, i32, i32
  }
  func.func @transform_29(%arg0: i32) -> (i32, i32, i32, i32) {
    %c0_i32 = arith.constant 0 : i32
    %c0_i32_0 = arith.constant 0 : i32
    %c0_i32_1 = arith.constant 0 : i32
    %c0_i32_2 = arith.constant 0 : i32
    %c0_i32_3 = arith.constant 0 : i32
    return %c0_i32, %c0_i32_0, %c0_i32_1, %c0_i32_2 : i32, i32, i32, i32
  }
  func.func @transform_30(%arg0: i32) -> (i32, i32, i32, i32) {
    %c0_i32 = arith.constant 0 : i32
    %c0_i32_0 = arith.constant 0 : i32
    %c0_i32_1 = arith.constant 0 : i32
    %c0_i32_2 = arith.constant 0 : i32
    %c0_i32_3 = arith.constant 0 : i32
    return %c0_i32, %c0_i32_0, %c0_i32_1, %c0_i32_2 : i32, i32, i32, i32
  }
  func.func @transform_31(%arg0: i32) -> (i32, i32, i32, i32) {
    %c0_i32 = arith.constant 0 : i32
    %c0_i32_0 = arith.constant 0 : i32
    %c0_i32_1 = arith.constant 0 : i32
    %c0_i32_2 = arith.constant 0 : i32
    %c0_i32_3 = arith.constant 0 : i32
    return %c0_i32, %c0_i32_0, %c0_i32_1, %c0_i32_2 : i32, i32, i32, i32
  }
  func.func @transform_32(%arg0: i32) -> (i32, i32, i32, i32) {
    %c0_i32 = arith.constant 0 : i32
    %c0_i32_0 = arith.constant 0 : i32
    %c0_i32_1 = arith.constant 0 : i32
    %c0_i32_2 = arith.constant 0 : i32
    %c0_i32_3 = arith.constant 0 : i32
    return %c0_i32, %c0_i32_0, %c0_i32_1, %c0_i32_2 : i32, i32, i32, i32
  }
  func.func @transform_33(%arg0: i32) -> (i32, i32, i32, i32) {
    %c0_i32 = arith.constant 0 : i32
    %c0_i32_0 = arith.constant 0 : i32
    %c0_i32_1 = arith.constant 0 : i32
    %c0_i32_2 = arith.constant 0 : i32
    %c0_i32_3 = arith.constant 0 : i32
    return %c0_i32, %c0_i32_0, %c0_i32_1, %c0_i32_2 : i32, i32, i32, i32
  }
  func.func @transform_34(%arg0: i32) -> (i32, i32, i32, i32) {
    %c0_i32 = arith.constant 0 : i32
    %c0_i32_0 = arith.constant 0 : i32
    %c0_i32_1 = arith.constant 0 : i32
    %c0_i32_2 = arith.constant 0 : i32
    %c0_i32_3 = arith.constant 0 : i32
    return %c0_i32, %c0_i32_0, %c0_i32_1, %c0_i32_2 : i32, i32, i32, i32
  }
  func.func @transform_35(%arg0: i32) -> (i32, i32, i32) {
    %c0_i32 = arith.constant 0 : i32
    %c0_i32_0 = arith.constant 0 : i32
    %c0_i32_1 = arith.constant 0 : i32
    %c0_i32_2 = arith.constant 0 : i32
    return %c0_i32, %c0_i32_0, %c0_i32_1 : i32, i32, i32
  }
  func.func @transform_36(%arg0: i32) -> (i32, i32, i32) {
    %c0_i32 = arith.constant 0 : i32
    %c0_i32_0 = arith.constant 0 : i32
    %c0_i32_1 = arith.constant 0 : i32
    %c0_i32_2 = arith.constant 0 : i32
    return %c0_i32, %c0_i32_0, %c0_i32_1 : i32, i32, i32
  }
  func.func @transform_37(%arg0: i32) -> (i32, i32, i32) {
    %c0_i32 = arith.constant 0 : i32
    %c0_i32_0 = arith.constant 0 : i32
    %c0_i32_1 = arith.constant 0 : i32
    %c0_i32_2 = arith.constant 0 : i32
    return %c0_i32, %c0_i32_0, %c0_i32_1 : i32, i32, i32
  }
  func.func @transform_38(%arg0: i32) -> (i32, i32, i32) {
    %c0_i32 = arith.constant 0 : i32
    %c0_i32_0 = arith.constant 0 : i32
    %c0_i32_1 = arith.constant 0 : i32
    %c0_i32_2 = arith.constant 0 : i32
    return %c0_i32, %c0_i32_0, %c0_i32_1 : i32, i32, i32
  }
  func.func @transform_39(%arg0: i32) -> (i32, i32, i32) {
    %c0_i32 = arith.constant 0 : i32
    %c0_i32_0 = arith.constant 0 : i32
    %c0_i32_1 = arith.constant 0 : i32
    %c0_i32_2 = arith.constant 0 : i32
    return %c0_i32, %c0_i32_0, %c0_i32_1 : i32, i32, i32
  }
  func.func @transform_40(%arg0: i32) -> (i32, i32, i32) {
    %c0_i32 = arith.constant 0 : i32
    %c0_i32_0 = arith.constant 0 : i32
    %c0_i32_1 = arith.constant 0 : i32
    %c0_i32_2 = arith.constant 0 : i32
    return %c0_i32, %c0_i32_0, %c0_i32_1 : i32, i32, i32
  }
  func.func @transform_41(%arg0: i32) -> (i32, i32, i32) {
    %c0_i32 = arith.constant 0 : i32
    %c0_i32_0 = arith.constant 0 : i32
    %c0_i32_1 = arith.constant 0 : i32
    %c0_i32_2 = arith.constant 0 : i32
    return %c0_i32, %c0_i32_0, %c0_i32_1 : i32, i32, i32
  }
  func.func @transform_42(%arg0: i32) -> (i32, i32, i32) {
    %c0_i32 = arith.constant 0 : i32
    %c0_i32_0 = arith.constant 0 : i32
    %c0_i32_1 = arith.constant 0 : i32
    %c0_i32_2 = arith.constant 0 : i32
    return %c0_i32, %c0_i32_0, %c0_i32_1 : i32, i32, i32
  }
  func.func @transform_43(%arg0: i32) -> (i32, i32, i32) {
    %c0_i32 = arith.constant 0 : i32
    %c0_i32_0 = arith.constant 0 : i32
    %c0_i32_1 = arith.constant 0 : i32
    %c0_i32_2 = arith.constant 0 : i32
    return %c0_i32, %c0_i32_0, %c0_i32_1 : i32, i32, i32
  }
  func.func @transform_44(%arg0: i32) -> (i32, i32, i32) {
    %c0_i32 = arith.constant 0 : i32
    %c0_i32_0 = arith.constant 0 : i32
    %c0_i32_1 = arith.constant 0 : i32
    return %arg0, %c0_i32, %c0_i32_0 : i32, i32, i32
  }
}

</mosaic_0001>

<bundles_post_ra>
// kernel: tpu_custom_call.1
= control target key start
LH: loop header
LB: loop body
LE: loop exit
PB: predicated region body
PF: predicated region fallthrough
CT: control target
= control target key end

     0   :  { %s17207_s6 = smov 1   ;;  %s17208_s10 = smov 2   ;;  %s19021_s0 = inlined_call_operand.smem [shape: u32[45], index: -1, kind: input, shape index: {}] }
   0x1   :  { %s17263_s5 = sld [smem:[%s19021_s0]]   ;;  %s17209_s14 = smov 3  }
   0x2   :  { %s17268_s9 = sld [smem:[%s19021_s0 + %s17207_s6]]   ;;  %s17210_s18 = smov 4  }
   0x3   :  { %s17273_s13 = sld [smem:[%s19021_s0 + %s17208_s10]]   ;;  %s17211_s22 = smov 5  }
   0x4   :  { %s17278_s17 = sld [smem:[%s19021_s0 + %s17209_s14]]   ;;  %s17212_s26 = smov 6  }
   0x5   :  { %s17283_s21 = sld [smem:[%s19021_s0 + %s17210_s18]]   ;;  %s17213_s30 = smov 7  }
   0x6   :  { %s17288_s25 = sld [smem:[%s19021_s0 + %s17211_s22]]   ;;  %s17214_s4 = smov 8  }
   0x7   :  { %19083 = sst [smem:[#allocation5_spill]] %s17263_s5  ;;  %s17215_s10 = smov 9  }
   0x8   :  { %19084 = sst [smem:[#allocation6_spill]] %s17268_s9  ;;  %s17216_s15 = smov 10  }
   0x9   :  { %19085 = sst [smem:[#allocation7_spill]] %s17273_s13  ;;  %s17217_s20 = smov 11  }
   0xa   :  { %19086 = sst [smem:[#allocation8_spill]] %s17278_s17  ;;  %s17219_s1 = smov 13  }
   0xb   :  { %19087 = sst [smem:[#allocation9_spill]] %s17283_s21  ;;  %s17220_s7 = smov 14  }
   0xc   :  { %19088 = sst [smem:[#allocation10_spill]] %s17288_s25  ;;  %s17222_s22 = smov 16  }
   0xd   :  { %s17293_s29 = sld [smem:[%s19021_s0 + %s17212_s26]]   ;;  %s17218_s26 = smov 12  }
   0xe   :  { %s17298_s3 = sld [smem:[%s19021_s0 + %s17213_s30]]   ;;  %s17223_s28 = smov 17  }
   0xf   :  { %s17303_s8 = sld [smem:[%s19021_s0 + %s17214_s4]]  }
  0x10   :  { %s17308_s14 = sld [smem:[%s19021_s0 + %s17215_s10]]  }
  0x11   :  { %s17313_s19 = sld [smem:[%s19021_s0 + %s17216_s15]]   ;;  %s17221_s15 = smov 15  }
  0x12   :  { %s17318_s24 = sld [smem:[%s19021_s0 + %s17217_s20]]  }
  0x13   :  { %19089 = sst [smem:[#allocation11_spill]] %s17293_s29 }
  0x14   :  { %19090 = sst [smem:[#allocation12_spill]] %s17298_s3 }
  0x15   :  { %19091 = sst [smem:[#allocation13_spill]] %s17303_s8 }
  0x16   :  { %19092 = sst [smem:[#allocation14_spill]] %s17308_s14 }
  0x17   :  { %19093 = sst [smem:[#allocation15_spill]] %s17313_s19 }
  0x18   :  { %19094 = sst [smem:[#allocation16_spill]] %s17318_s24 }
  0x19   :  { %s17323_s30 = sld [smem:[%s19021_s0 + %s17218_s26]]  }
  0x1a   :  { %s17328_s6 = sld [smem:[%s19021_s0 + %s17219_s1]]  }
  0x1b   :  { %s17333_s12 = sld [smem:[%s19021_s0 + %s17220_s7]]   ;;  %s17224_s7 = smov 18  }
  0x1c   :  { %s17338_s20 = sld [smem:[%s19021_s0 + %s17221_s15]]   ;;  %s17225_s15 = smov 19  }
  0x1d   :  { %s17343_s27 = sld [smem:[%s19021_s0 + %s17222_s22]]   ;;  %s17226_s22 = smov 20  }
  0x1e   :  { %s17348_s4 = sld [smem:[%s19021_s0 + %s17223_s28]]   ;;  %s17227_s28 = smov 21  }
  0x1f   :  { %19095 = sst [smem:[#allocation17_spill]] %s17323_s30 }
  0x20   :  { %19096 = sst [smem:[#allocation18_spill]] %s17328_s6 }
  0x21   :  { %19097 = sst [smem:[#allocation19_spill]] %s17333_s12 }
  0x22   :  { %19098 = sst [smem:[#allocation20_spill]] %s17338_s20 }
  0x23   :  { %19099 = sst [smem:[#allocation21_spill]] %s17343_s27 }
  0x24   :  { %19100 = sst [smem:[#allocation22_spill]] %s17348_s4 }
  0x25   :  { %s17353_s9 = sld [smem:[%s19021_s0 + %s17224_s7]]   ;;  %s17228_s7 = smov 22  }
  0x26   :  { %s17358_s20 = sld [smem:[%s19021_s0 + %s17225_s15]]   ;;  %s17229_s15 = smov 23  }
  0x27   :  { %s17363_s27 = sld [smem:[%s19021_s0 + %s17226_s22]]   ;;  %s17230_s22 = smov 24  }
  0x28   :  { %s17368_s4 = sld [smem:[%s19021_s0 + %s17227_s28]]   ;;  %s17231_s28 = smov 25  }
  0x2b   :  { %19101 = sst [smem:[#allocation23_spill]] %s17353_s9 }
  0x2c   :  { %19102 = sst [smem:[#allocation24_spill]] %s17358_s20 }
  0x2d   :  { %19103 = sst [smem:[#allocation25_spill]] %s17363_s27 }
  0x2e   :  { %19104 = sst [smem:[#allocation26_spill]] %s17368_s4 }
  0x2f   :  { %s17373_s9 = sld [smem:[%s19021_s0 + %s17228_s7]]   ;;  %s17232_s7 = smov 26  }
  0x30   :  { %s17378_s20 = sld [smem:[%s19021_s0 + %s17229_s15]]   ;;  %s17233_s15 = smov 27  }
  0x31   :  { %s17383_s27 = sld [smem:[%s19021_s0 + %s17230_s22]]   ;;  %s17234_s22 = smov 28  }
  0x32   :  { %s17388_s4 = sld [smem:[%s19021_s0 + %s17231_s28]]   ;;  %s17235_s28 = smov 29  }
  0x35   :  { %19105 = sst [smem:[#allocation27_spill]] %s17373_s9 }
  0x36   :  { %19106 = sst [smem:[#allocation28_spill]] %s17378_s20 }
  0x37   :  { %19107 = sst [smem:[#allocation29_spill]] %s17383_s27 }
  0x38   :  { %19108 = sst [smem:[#allocation30_spill]] %s17388_s4 }
  0x39   :  { %s17393_s9 = sld [smem:[%s19021_s0 + %s17232_s7]]   ;;  %s17236_s7 = smov 30  }
  0x3a   :  { %s17398_s20 = sld [smem:[%s19021_s0 + %s17233_s15]]   ;;  %s17237_s15 = smov 31  }
  0x3b   :  { %s17403_s27 = sld [smem:[%s19021_s0 + %s17234_s22]]   ;;  %s17238_s22 = smov 32  }
  0x3c   :  { %s17408_s4 = sld [smem:[%s19021_s0 + %s17235_s28]]   ;;  %s17239_s28 = smov 33  }
  0x3f   :  { %19109 = sst [smem:[#allocation31_spill]] %s17393_s9 }
  0x40   :  { %19110 = sst [smem:[#allocation32_spill]] %s17398_s20 }
  0x41   :  { %19111 = sst [smem:[#allocation33_spill]] %s17403_s27 }
  0x42   :  { %19112 = sst [smem:[#allocation34_spill]] %s17408_s4 }
  0x43   :  { %s17413_s9 = sld [smem:[%s19021_s0 + %s17236_s7]]   ;;  %s17240_s7 = smov 34  }
  0x44   :  { %s17418_s20 = sld [smem:[%s19021_s0 + %s17237_s15]]   ;;  %s17241_s15 = smov 35  }
  0x45   :  { %s17423_s27 = sld [smem:[%s19021_s0 + %s17238_s22]]   ;;  %s17242_s22 = smov 36  }
  0x46   :  { %s17428_s4 = sld [smem:[%s19021_s0 + %s17239_s28]]   ;;  %s17243_s28 = smov 37  }
  0x49   :  { %19113 = sst [smem:[#allocation35_spill]] %s17413_s9 }
  0x4a   :  { %19114 = sst [smem:[#allocation36_spill]] %s17418_s20 }
  0x4b   :  { %19115 = sst [smem:[#allocation37_spill]] %s17423_s27 }
  0x4c   :  { %19116 = sst [smem:[#allocation38_spill]] %s17428_s4 }
  0x4d   :  { %s17433_s9 = sld [smem:[%s19021_s0 + %s17240_s7]]   ;;  %s17244_s7 = smov 38  }
  0x4e   :  { %s17438_s20 = sld [smem:[%s19021_s0 + %s17241_s15]]   ;;  %s17245_s15 = smov 39  }
  0x4f   :  { %s17443_s27 = sld [smem:[%s19021_s0 + %s17242_s22]]   ;;  %s17246_s22 = smov 40  }
  0x50   :  { %s17448_s4 = sld [smem:[%s19021_s0 + %s17243_s28]]   ;;  %s17247_s28 = smov 41  }
  0x53   :  { %19117 = sst [smem:[#allocation39_spill]] %s17433_s9 }
  0x54   :  { %19118 = sst [smem:[#allocation40_spill]] %s17438_s20 }
  0x55   :  { %19119 = sst [smem:[#allocation41_spill]] %s17443_s27 }
  0x56   :  { %19120 = sst [smem:[#allocation42_spill]] %s17448_s4 }
  0x57   :  { %s17453_s9 = sld [smem:[%s19021_s0 + %s17244_s7]]   ;;  %s17248_s7 = smov 42  }
  0x58   :  { %s17458_s20 = sld [smem:[%s19021_s0 + %s17245_s15]]   ;;  %s17249_s15 = smov 43  }
  0x59   :  { %s17463_s27 = sld [smem:[%s19021_s0 + %s17246_s22]]   ;;  %s17250_s22 = smov 44  }
  0x5a   :  { %s17468_s4 = sld [smem:[%s19021_s0 + %s17247_s28]]  }
  0x5d   :  { %19121 = sst [smem:[#allocation43_spill]] %s17453_s9 }
  0x5e   :  { %19122 = sst [smem:[#allocation44_spill]] %s17458_s20 }
  0x5f   :  { %19123 = sst [smem:[#allocation45_spill]] %s17463_s27 }
  0x60   :  { %19124 = sst [smem:[#allocation46_spill]] %s17468_s4 }
  0x61   :  { %s17473_s9 = sld [smem:[%s19021_s0 + %s17248_s7]]  }
  0x62   :  { %s17478_s20 = sld [smem:[%s19021_s0 + %s17249_s15]]  }
  0x63   :  { %s17483_s27 = sld [smem:[%s19021_s0 + %s17250_s22]]  }
  0x67   :  { %19125 = sst [smem:[#allocation47_spill]] %s17473_s9 }
  0x69   :  { %19126 = sst [smem:[#allocation48_spill]] %s17483_s27 }
  0x6a   :  { %94 = vsyncpa [#allocation3], 0 }
  0x6b   :  { %96 = vsyncpa [#allocation3 + $0x1], 0  ;;  %s17485_s28 = smov 0   ;;  %s17487_s1 = smov 0  }
  0x6c   :  { %s17489_s2 = smov 0   ;;  %s17491_s7 = smov 0  }
  0x6d LB: > { %s19127_s9 = sld [smem:[#allocation47_spill]]  ;;  %s19128_s4 = sld [smem:[#allocation46_spill]]  ;;  %s17201_s2 = sphi %s17489_s2, %s19191_s2   ;;  %s17197_s1 = sphi %s17487_s1, %s19193_s1   ;;  %s17193_s28 = sphi %s17485_s28, %s19192_s28   ;;  %s17205_s7 = sphi %s17491_s7, %s19189_s7  }
  0x6e   : > { %s19129_s30 = sld [smem:[#allocation17_spill]]  ;;  %s19130_s29 = sld [smem:[#allocation11_spill]] }
  0x6f   : > { %s19131_s25 = sld [smem:[#allocation10_spill]]  ;;  %s19132_s24 = sld [smem:[#allocation16_spill]] }
  0x70   : > { %s19133_s21 = sld [smem:[#allocation9_spill]]  ;;  %s19134_s19 = sld [smem:[#allocation15_spill]] }
  0x71   : > { %s19135_s17 = sld [smem:[#allocation8_spill]]  ;;  %s19136_s14 = sld [smem:[#allocation14_spill]] }
  0x72   : > { %s19137_s12 = sld [smem:[#allocation19_spill]]  ;;  %s19138_s6 = sld [smem:[#allocation18_spill]] }
  0x73   : > { %s19139_s13 = sld [smem:[#allocation7_spill]]  ;;  %s19140_s8 = sld [smem:[#allocation13_spill]] }
  0x74   : > { %s19141_s3 = sld [smem:[#allocation12_spill]]  ;;  %19143 = sst [smem:[#allocation50_spill]] %s17201_s2 }
  0x75   : > { %19142 = sst [smem:[#allocation49_spill]] %s17193_s28  ;;  %s17506_s0 = sadd.s32 4294967295, %s17205_s7  }
  0x76   : > { %s14079_s10 = sadd.s32 4294967294, %s17205_s7   ;;  %s17510_s11 = sadd.s32 1, %s17205_s7  }
  0x77   : > { %19144 = sst [smem:[#allocation51_spill]] %s17510_s11  ;;  %s1043_s15 = sadd.s32 1, %s17201_s2 }
  0x78   : > { %s1040_s16 = ssub.s32 %s17205_s7, %s17510_s11  ;;  %p1053_p0 = scmp.ne.s32.totalorder %s17201_s2, %s17197_s1 }
  0x79   : > { %p1041_p1 = scmp.eq.s32.totalorder %s1040_s16, 0  ;;  %p1054_p2 = scmp.eq.s32.totalorder %s17506_s0, 1 }
  0x7a   : > { %p1059_p3 = scmp.ne.s32.totalorder %s17197_s1, %s17193_s28  ;;  %p1060_p4 = scmp.eq.s32.totalorder %s14079_s10, 1 }
  0x7b   : > { %s17521_s18 = scalar_select %p1041_p1, %s17201_s2, %s1043_s15  }
  0x7c   : > { %p17523_p5 = por %p1054_p2, %p1053_p0  ;;  %p17527_p6 = por %p1060_p4, %p1059_p3 }
  0x7d   : > { %19145 = sst [smem:[#allocation52_spill]] %s17521_s18  ;;  %p14082_p7 = scmp.ge.s32.totalorder %s17205_s7, 1 }
  0x7e   : > { %s19146_s22 = scalar_select %p17523_p5, 1, 0 }
  0x7f   : > { %s19148_s23 = scalar_select %p17527_p6, 1, 0 }
  0x80   : > { %19147 = sst [smem:[#allocation53_spill]] %s19146_s22  ;;  %p1218_p8 = scmp.lt.s32.totalorder %s17205_s7, 3 }
  0x81   : > { %19149 = sst [smem:[#allocation54_spill]] %s19148_s23 }
  0x82   : > { %p1219_p9 = pnand %p14082_p7, %p1218_p8 }
  0x83   : > { %v1336_v0 = vld [vmem:[%s19139_s13] sm:$0xff] (!%p1219_p9)  ;;  %v1337_v1 = vld [vmem:[%s19139_s13 + $0x8] sm:$0xff] (!%p1219_p9)  ;;  %v17251_v3 = vmov (!%p1219_p9), 0.0|0.0   ;;  %v1338_v6 = vld [vmem:[%s19139_s13 + $0x10] sm:$0xff] (!%p1219_p9)  ;;  %p1327_p10 = scmp.lt.s32.totalorder (!%p1219_p9), %s17506_s0, 1  ;;  %vm17252_vm0 = vmmov (!%p1219_p9), 0  }
  0x84   : > { %1222 = sbr.rel (%p1219_p9) target bundleno = 11706 (0x2dba), region = 196  ;;  %v1340_v2 = vld [vmem:[%s19139_s13 + $0x20] sm:$0xff] (!%p1219_p9)  ;;  %16437 = vmatprep.subr.bf16.mxu0 (!%p1219_p9), %v17251_v3  ;;  %16443 = vmatprep.subr.bf16.mxu1 (!%p1219_p9), %v17251_v3  ;;  %v16438_v4 = vpack.c.bf16 (!%p1219_p9), %v1337_v1, %v1336_v0  ;;  %v1341_v5 = vld [vmem:[%s19139_s13 + $0x28] sm:$0xff] (!%p1219_p9)  ;;  %v1339_v7 = vld [vmem:[%s19139_s13 + $0x18] sm:$0xff] (!%p1219_p9)  ;;  %s19150_s5 = sld [smem:[#allocation5_spill]] (!%p1219_p9)  ;;  %v17253_v11 = vmov (!%p1219_p9), 0.0  }
  0x85   : > { %v16444_v8 = vpack.c.bf16 (!%p1219_p9), %v1341_v5, %v1340_v2  ;;  %v1342_v9 = vld [vmem:[%s19139_s13 + $0x30] sm:$0xff] (!%p1219_p9)  ;;  %v1343_v10 = vld [vmem:[%s19139_s13 + $0x38] sm:$0xff] (!%p1219_p9)  ;;  %15173 = vmatprep.mubr.msk.f32.mxu0 (!%p1219_p9), %vm17252_vm0, %v17253_v11  ;;  %15184 = vmatprep.mubr.msk.f32.mxu1 (!%p1219_p9), %vm17252_vm0, %v17253_v11  ;;  %v16441_v12 = vpack.c.bf16 (!%p1219_p9), %v1339_v7, %v1338_v6  ;;  %v1344_v14 = vld [vmem:[%s19139_s13 + $0x40] sm:$0xff] (!%p1219_p9)  ;;  %vm1425_vm1 = vcmask (!%p1219_p9), 261120   ;;  %vm2317_vm2 = vcmask (!%p1219_p9), 64512   ;;  %s19151_s16 = sld [smem:[#allocation20_spill]] (!%p1219_p9) }
  0x86   : > { %16439 = vmatpush3.bf16.msra.mxu0 (!%p1219_p9), %v16438_v4  ;;  %v16447_v13 = vpack.c.bf16 (!%p1219_p9), %v1343_v10, %v1342_v9  ;;  %v1345_v15 = vld [vmem:[%s19139_s13 + $0x48] sm:$0xff] (!%p1219_p9)  ;;  %v1348_v16 = vld [vmem:[%s19139_s13 + $0x60] sm:$0xff] (!%p1219_p9)  ;;  %v1346_v21 = vld [vmem:[%s19139_s13 + $0x50] sm:$0xff] (!%p1219_p9)  ;;  %vm3395_vm3 = vcmask (!%p1219_p9), 523264   ;;  %s19176_s18 = sld [smem:[#allocation43_spill]] (!%p1219_p9)  ;;  %s19177_s2 = sld [smem:[#allocation45_spill]] (!%p1219_p9) }
  0x87   : > { %16445 = vmatpush3.bf16.msra.mxu1 (!%p1219_p9), %v16444_v8  ;;  %16440 = vmatprep.subr.bf16.mxu0 (!%p1219_p9), %v17251_v3  ;;  %v1349_v17 = vld [vmem:[%s19139_s13 + $0x68] sm:$0xff] (!%p1219_p9)  ;;  %v16450_v19 = vpack.c.bf16 (!%p1219_p9), %v1345_v15, %v1344_v14  ;;  %v1347_v22 = vld [vmem:[%s19139_s13 + $0x58] sm:$0xff] (!%p1219_p9)  ;;  %v1350_v23 = vld [vmem:[%s19139_s13 + $0x70] sm:$0xff] (!%p1219_p9)  ;;  %s19179_s23 = sld [smem:[#allocation41_spill]] (!%p1219_p9)  ;;  %s19180_s28 = sld [smem:[#allocation42_spill]] (!%p1219_p9) }
  0x88   : > { %16446 = vmatprep.subr.bf16.mxu1 (!%p1219_p9), %v17251_v3  ;;  %v16456_v20 = vpack.c.bf16 (!%p1219_p9), %v1349_v17, %v1348_v16  ;;  %v1351_v24 = vld [vmem:[%s19139_s13 + $0x78] sm:$0xff] (!%p1219_p9)  ;;  %v16453_v25 = vpack.c.bf16 (!%p1219_p9), %v1347_v22, %v1346_v21  ;;  %v1352_v27 = vld [vmem:[%s19135_s17] sm:$0xff] (!%p1219_p9)  ;;  %v1353_v28 = vld [vmem:[%s19135_s17 + $0x8] sm:$0xff] (!%p1219_p9) }
  0x89   : > { %v16459_v26 = vpack.c.bf16 (!%p1219_p9), %v1351_v24, %v1350_v23  ;;  %v1356_v29 = vld [vmem:[%s19135_s17 + $0x20] sm:$0xff] (!%p1219_p9)  ;;  %v1357_v30 = vld [vmem:[%s19135_s17 + $0x28] sm:$0xff] (!%p1219_p9)  ;;  %v16462_v31 = vpack.c.bf16 (!%p1219_p9), %v1353_v28, %v1352_v27  ;;  %v1354_v33 = vld [vmem:[%s19135_s17 + $0x10] sm:$0xff] (!%p1219_p9) }
  0x8a   : > { %16442 = vmatpush3.bf16.msra.mxu0 (!%p1219_p9), %v16441_v12  ;;  %v16468_v32 = vpack.c.bf16 (!%p1219_p9), %v1357_v30, %v1356_v29  ;;  %v1355_v34 = vld [vmem:[%s19135_s17 + $0x18] sm:$0xff] (!%p1219_p9)  ;;  %v1358_v35 = vld [vmem:[%s19135_s17 + $0x30] sm:$0xff] (!%p1219_p9)  ;;  %v1360_v39 = vld [vmem:[%s19135_s17 + $0x40] sm:$0xff] (!%p1219_p9) }
  0x8b   : > { %s17549_s26 = scalar_select %p1327_p10, %s17506_s0, 1  ;;  %16448 = vmatpush3.bf16.msra.mxu1 %v16447_v13  ;;  %16449 = vmatprep.subr.bf16.mxu0 %v17251_v3  ;;  %v1359_v36 = vld [vmem:[%s19135_s17 + $0x38] sm:$0xff]  ;;  %v16465_v37 = vpack.c.bf16 %v1355_v34, %v1354_v33  ;;  %v1361_v40 = vld [vmem:[%s19135_s17 + $0x48] sm:$0xff]  ;;  %v1364_v41 = vld [vmem:[%s19135_s17 + $0x60] sm:$0xff] }
  0x8c   : > { %16455 = vmatprep.subr.bf16.mxu1 %v17251_v3  ;;  %v16471_v38 = vpack.c.bf16 %v1359_v36, %v1358_v35  ;;  %v1365_v42 = vld [vmem:[%s19135_s17 + $0x68] sm:$0xff]  ;;  %v16474_v43 = vpack.c.bf16 %v1361_v40, %v1360_v39  ;;  %v1362_v45 = vld [vmem:[%s19135_s17 + $0x50] sm:$0xff]  ;;  %v1363_v46 = vld [vmem:[%s19135_s17 + $0x58] sm:$0xff]  ;;  %s19178_s11 = smov %s19177_s2 }
  0x8d   : > { %s19048_s10 = sshll.u32 %s17549_s26, 3  ;;  %v16480_v44 = vpack.c.bf16 %v1365_v42, %v1364_v41  ;;  %v1366_v47 = vld [vmem:[%s19135_s17 + $0x70] sm:$0xff]  ;;  %v1367_v48 = vld [vmem:[%s19135_s17 + $0x78] sm:$0xff]  ;;  %v16477_v49 = vpack.c.bf16 %v1363_v46, %v1362_v45  ;;  %v1368_v51 = vld [vmem:[%s19133_s21] sm:$0xff]  ;;  %s19181_s22 = smov %s19180_s28 }
  0x8e   : > { %s1330_s15 = scalar_lea.vmem %s19150_s5, %s19048_s10  ;;  %v16483_v50 = vpack.c.bf16 %v1367_v48, %v1366_v47  ;;  %v1369_v52 = vld [vmem:[%s19133_s21 + $0x8] sm:$0xff]  ;;  %v1370_v54 = vld [vmem:[%s19133_s21 + $0x10] sm:$0xff]  ;;  %v1371_v55 = vld [vmem:[%s19133_s21 + $0x18] sm:$0xff]  ;;  %s19153_s10 = sld [smem:[#allocation22_spill]] }
  0x8f   : > { %v17561_v18 = vld [vmem:[%s1330_s15] sm:$0xff]  ;;  %v16486_v53 = vpack.c.bf16 %v1369_v52, %v1368_v51  ;;  %v16489_v56 = vpack.c.bf16 %v1371_v55, %v1370_v54  ;;  %v1373_v58 = vld [vmem:[%s19133_s21 + $0x28] sm:$0xff]  ;;  %v1374_v63 = vld [vmem:[%s19133_s21 + $0x30] sm:$0xff]  ;;  %s19152_s15 = sld [smem:[#allocation21_spill]]  ;;  %s19155_s5 = sld [smem:[#allocation6_spill]] }
  0x90   : > { %15174 = vmatmul.mubr.msk.f32.vlgmr.msra.gmra.mrb[0].mxu0 %vm1425_vm1, %v17561_v18  ;;  %15185 = vmatmul.mubr.msk.f32.vlgmr.msra.gmra.mrb[0].mxu1 %vm1425_vm1, %v17561_v18  ;;  %v1372_v57 = vld [vmem:[%s19133_s21 + $0x20] sm:$0xff]  ;;  %v1377_v61 = vld [vmem:[%s19133_s21 + $0x48] sm:$0xff]  ;;  %v1375_v0 = vld [vmem:[%s19133_s21 + $0x38] sm:$0xff] }
  0x91   : > { %16451 = vmatpush3.bf16.msra.mxu0 %v16450_v19  ;;  %16457 = vmatpush3.bf16.msra.mxu1 %v16456_v20  ;;  %v1376_v59 = vld [vmem:[%s19133_s21 + $0x40] sm:$0xff]  ;;  %v16492_v60 = vpack.c.bf16 %v1373_v58, %v1372_v57  ;;  %v1378_v1 = vld [vmem:[%s19133_s21 + $0x50] sm:$0xff]  ;;  %v16495_v2 = vpack.c.bf16 %v1375_v0, %v1374_v63  ;;  %v1379_v4 = vld [vmem:[%s19133_s21 + $0x58] sm:$0xff] }
  0x92   : > { %16452 = vmatprep.subr.bf16.mxu0 %v17251_v3  ;;  %16458 = vmatprep.subr.bf16.mxu1 %v17251_v3  ;;  %v16498_v62 = vpack.c.bf16 %v1377_v61, %v1376_v59  ;;  %v16501_v5 = vpack.c.bf16 %v1379_v4, %v1378_v1  ;;  %v1380_v6 = vld [vmem:[%s19133_s21 + $0x60] sm:$0xff]  ;;  %v1381_v7 = vld [vmem:[%s19133_s21 + $0x68] sm:$0xff]  ;;  %v1382_v9 = vld [vmem:[%s19133_s21 + $0x70] sm:$0xff] }
  0x93   : > { %15195 = vmatprep.mubr.msk.f32.mxu0 %vm17252_vm0, %v17253_v11  ;;  %15206 = vmatprep.mubr.msk.f32.mxu1 %vm17252_vm0, %v17253_v11  ;;  %v16504_v8 = vpack.c.bf16 %v1381_v7, %v1380_v6  ;;  %v1383_v10 = vld [vmem:[%s19133_s21 + $0x78] sm:$0xff]  ;;  %v14094_v22 = vld [vmem:[%s19130_s29] ss:$0 sm:$0xff]  ;;  %v14095_v24 = vld [vmem:[%s19130_s29 + $0x1] ss:$0 sm:$0xff] }
  0x94   : > { %v16507_v12 = vpack.c.bf16 %v1383_v10, %v1382_v9  ;;  %v14096_v33 = vld [vmem:[%s19130_s29 + $0x2] ss:$0 sm:$0xff]  ;;  %v14097_v34 = vld [vmem:[%s19130_s29 + $0x3] ss:$0 sm:$0xff]  ;;  %v14102_v46 = vld [vmem:[%s19141_s3] ss:$0 sm:$0xff] }
  0x95   : > { %16454 = vmatpush3.bf16.msra.mxu0 %v16453_v25  ;;  %16460 = vmatpush3.bf16.msra.mxu1 %v16459_v26  ;;  %v14086_v25 = vld [vmem:[%s19131_s25] ss:$0 sm:$0xff]  ;;  %v14089_v41 = vld [vmem:[%s19131_s25 + $0x3] ss:$0 sm:$0xff] }
  0x96   : > { %16461 = vmatprep.subr.bf16.mxu0 %v17251_v3  ;;  %16467 = vmatprep.subr.bf16.mxu1 %v17251_v3 }
  0x98   : > { %15196 = vmatmul.mubr.msk.f32.vlgmr.msra.gmra.mrb[2].mxu0 %vm1425_vm1, %v17561_v18  ;;  %15207 = vmatmul.mubr.msk.f32.vlgmr.msra.gmra.mrb[2].mxu1 %vm1425_vm1, %v17561_v18 }
  0x99   : > { %16463 = vmatpush3.bf16.msra.mxu0 %v16462_v31  ;;  %16469 = vmatpush3.bf16.msra.mxu1 %v16468_v32  ;;  %v14087_v32 = vld [vmem:[%s19131_s25 + $0x1] ss:$0 sm:$0xff] }
  0x9a   : > { %16464 = vmatprep.subr.bf16.mxu0 %v17251_v3  ;;  %16470 = vmatprep.subr.bf16.mxu1 %v17251_v3 }
  0x9b   : > { %15217 = vmatprep.mubr.msk.f32.mxu0 %vm17252_vm0, %v17253_v11  ;;  %15228 = vmatprep.mubr.msk.f32.mxu1 %vm17252_vm0, %v17253_v11 }
  0x9d   : > { %16466 = vmatpush3.bf16.msra.mxu0 %v16465_v37  ;;  %16472 = vmatpush3.bf16.msra.mxu1 %v16471_v38  ;;  %v14088_v37 = vld [vmem:[%s19131_s25 + $0x2] ss:$0 sm:$0xff] }
  0x9e   : > { %16473 = vmatprep.subr.bf16.mxu0 %v17251_v3  ;;  %16479 = vmatprep.subr.bf16.mxu1 %v17251_v3 }
  0xa0   : > { %15218 = vmatmul.mubr.msk.f32.vlgmr.msra.gmra.mrb[4].mxu0 %vm1425_vm1, %v17561_v18  ;;  %15229 = vmatmul.mubr.msk.f32.vlgmr.msra.gmra.mrb[4].mxu1 %vm1425_vm1, %v17561_v18 }
  0xa1   : > { %16475 = vmatpush3.bf16.msra.mxu0 %v16474_v43  ;;  %16481 = vmatpush3.bf16.msra.mxu1 %v16480_v44 }
  0xa2   : > { %16476 = vmatprep.subr.bf16.mxu0 %v17251_v3  ;;  %16482 = vmatprep.subr.bf16.mxu1 %v17251_v3 }
  0xa3   : > { %15239 = vmatprep.mubr.msk.f32.mxu0 %vm17252_vm0, %v17253_v11  ;;  %15250 = vmatprep.mubr.msk.f32.mxu1 %vm17252_vm0, %v17253_v11 }
  0xa5   : > { %16478 = vmatpush3.bf16.msra.mxu0 %v16477_v49  ;;  %16484 = vmatpush3.bf16.msra.mxu1 %v16483_v50  ;;  %v14103_v50 = vld [vmem:[%s19141_s3 + $0x1] ss:$0 sm:$0xff] }
  0xa6   : > { %16485 = vmatprep.subr.bf16.mxu0 %v17251_v3  ;;  %16491 = vmatprep.subr.bf16.mxu1 %v17251_v3 }
  0xa8   : > { %15240 = vmatmul.mubr.msk.f32.vlgmr.msra.gmra.mrb[6].mxu0 %vm1425_vm1, %v17561_v18  ;;  %15251 = vmatmul.mubr.msk.f32.vlgmr.msra.gmra.mrb[6].mxu1 %vm1425_vm1, %v17561_v18 }
  0xa9   : > { %16487 = vmatpush3.bf16.msra.mxu0 %v16486_v53  ;;  %15261 = vmatprep.mubr.msk.f32.mxu0 %vm17252_vm0, %v17253_v11 }
  0xaa   : > { %16488 = vmatprep.subr.bf16.mxu0 %v17251_v3  ;;  %15272 = vmatprep.mubr.msk.f32.mxu1 %vm17252_vm0, %v17253_v11 }
  0xab   : > { %16493 = vmatpush3.bf16.msra.mxu1 %v16492_v60 }
  0xac   : > { %16494 = vmatprep.subr.bf16.mxu1 %v17251_v3 }
  0xad   : > { %16490 = vmatpush3.bf16.msra.mxu0 %v16489_v56 }
  0xae   : > { %16497 = vmatprep.subr.bf16.mxu0 %v17251_v3 }
  0xaf   : > { %16496 = vmatpush3.bf16.msra.mxu1 %v16495_v2 }
  0xb0   : > { %15262 = vmatmul.mubr.msk.f32.vlgmr.msra.gmra.mrb[8].mxu0 %vm1425_vm1, %v17561_v18  ;;  %16503 = vmatprep.subr.bf16.mxu1 %v17251_v3 }
  0xb1   : > { %16499 = vmatpush3.bf16.msra.mxu0 %v16498_v62  ;;  %15283 = vmatprep.mubr.msk.f32.mxu0 %vm17252_vm0, %v17253_v11 }
  0xb2   : > { %16500 = vmatprep.subr.bf16.mxu0 %v17251_v3  ;;  %15273 = vmatmul.mubr.msk.f32.vlgmr.msra.gmra.mrb[8].mxu1 %vm1425_vm1, %v17561_v18 }
  0xb3   : > { %16505 = vmatpush3.bf16.msra.mxu1 %v16504_v8  ;;  %15294 = vmatprep.mubr.msk.f32.mxu1 %vm17252_vm0, %v17253_v11 }
  0xb4   : > { %16506 = vmatprep.subr.bf16.mxu1 %v17251_v3 }
  0xb5   : > { %16502 = vmatpush3.bf16.msra.mxu0 %v16501_v5 }
  0xb6   : > { %15297 = vmatprep.subr.mxu0 %v17253_v11 }
  0xb7   : > { %16508 = vmatpush3.bf16.msra.mxu1 %v16507_v12 }
  0xb8   : > { %15284 = vmatmul.mubr.msk.f32.vlgmr.msra.gmra.mrb[10].mxu0 %vm1425_vm1, %v17561_v18  ;;  %15312 = vmatprep.subr.mxu1 %v17253_v11 }
  0xb9   : > { %15299 = vmatprep.mubr.msk.f32.mxu0 %vm17252_vm0, %v17253_v11 }
  0xba   : > { %15295 = vmatmul.mubr.msk.f32.vlgmr.msra.gmra.mrb[10].mxu1 %vm1425_vm1, %v17561_v18 }
  0xbb   : > { %15314 = vmatprep.mubr.msk.f32.mxu1 %vm17252_vm0, %v17253_v11 }
 0x163   : > { %v1495_v13 = vpop.f32.mrb[0].mxu0  ;;  %v1565_v15 = vpop.f32.mrb[0].mxu1 }
 0x164   : > { %v15175_v14 = vpop.f32.mrb[1].mxu0  ;;  %v15186_v16 = vpop.f32.mrb[1].mxu1  ;;  %v1496_v31 = vadd.f32 %v14086_v25, %v1495_v13  ;;  %v1566_v35 = vadd.f32 %v14087_v32, %v1565_v15  ;;  %v14104_v32 = vld [vmem:[%s19141_s3 + $0x2] ss:$0 sm:$0xff] }
 0x16b   : > { %v1635_v17 = vpop.f32.mrb[2].mxu0  ;;  %v1705_v20 = vpop.f32.mrb[2].mxu1 }
 0x16c   : > { %v15197_v19 = vpop.f32.mrb[3].mxu0  ;;  %v15208_v21 = vpop.f32.mrb[3].mxu1  ;;  %v1636_v44 = vadd.f32 %v14088_v37, %v1635_v17  ;;  %v1706_v45 = vadd.f32 %v14089_v41, %v1705_v20  ;;  %v14105_v37 = vld [vmem:[%s19141_s3 + $0x3] ss:$0 sm:$0xff] }
 0x173   : > { %v1799_v23 = vpop.f32.mrb[4].mxu0  ;;  %v1869_v28 = vpop.f32.mrb[4].mxu1 }
 0x174   : > { %v1800_v26 = vadd.f32 %v14094_v22, %v1799_v23  ;;  %v15219_v27 = vpop.f32.mrb[5].mxu0  ;;  %v15230_v29 = vpop.f32.mrb[5].mxu1  ;;  %v1870_v30 = vadd.f32 %v14095_v24, %v1869_v28 }
 0x176   : > { %15298 = vmatpush3.xpose.msk.msra.mxu0 %vm2317_vm2, %v1800_v26 }
 0x177   : > { %15302 = vmatprep.subr.mxu0 %v17253_v11 }
 0x179   : > { %15300 = vmatmul.mubr.msk.f32.vlgmr.msra.gmra.mrb[12].mxu0 %vm2317_vm2, %v1496_v31 }
 0x17a   : > { %15303 = vmatpush3.xpose.msk.msra.mxu0 %vm2317_vm2, %v1870_v30  ;;  %15304 = vmatprep.mubr.msk.f32.mxu0 %vm17252_vm0, %v17253_v11 }
 0x17b   : > { %v1939_v36 = vpop.f32.mrb[6].mxu0  ;;  %15307 = vmatprep.subr.mxu0 %v17253_v11  ;;  %v2009_v39 = vpop.f32.mrb[6].mxu1 }
 0x17c   : > { %v1940_v38 = vadd.f32 %v14096_v33, %v1939_v36  ;;  %v15241_v40 = vpop.f32.mrb[7].mxu0  ;;  %v2010_v42 = vadd.f32 %v14097_v34, %v2009_v39  ;;  %v15252_v43 = vpop.f32.mrb[7].mxu1 }
 0x17d   : > { %15305 = vmatmul.mubr.msk.f32.vlgmr.msra.gmra.mrb[14].mxu0 %vm2317_vm2, %v1566_v35 }
 0x17e   : > { %15308 = vmatpush3.xpose.msk.msra.mxu0 %vm2317_vm2, %v1940_v38  ;;  %15309 = vmatprep.mubr.msk.f32.mxu0 %vm17252_vm0, %v17253_v11 }
 0x17f   : > { %15313 = vmatpush3.xpose.msk.msra.mxu1 %vm2317_vm2, %v2010_v42  ;;  %15317 = vmatprep.subr.mxu0 %v17253_v11 }
 0x180   : > { %15322 = vmatprep.subr.mxu1 %v17253_v11 }
 0x181   : > { %15310 = vmatmul.mubr.msk.f32.vlgmr.msra.gmra.mrb[16].mxu0 %vm2317_vm2, %v1636_v44 }
 0x182   : > { %15315 = vmatmul.mubr.msk.f32.vlgmr.msra.gmra.mrb[12].mxu1 %vm2317_vm2, %v1706_v45  ;;  %15319 = vmatprep.mubr.msk.f32.mxu0 %vm17252_vm0, %v17253_v11  ;;  %v1396_v45 = vld [vmem:[%s19140_s8] sm:$0xff] }
 0x183   : > { %15324 = vmatprep.mubr.msk.f32.mxu1 %vm17252_vm0, %v17253_v11  ;;  %v2103_v47 = vpop.f32.mrb[8].mxu0 }
 0x184   : > { %v2104_v48 = vadd.f32 %v14102_v46, %v2103_v47  ;;  %v15263_v49 = vpop.f32.mrb[9].mxu0  ;;  %v1397_v46 = vld [vmem:[%s19140_s8 + $0x8] sm:$0xff]  ;;  %v1398_v47 = vld [vmem:[%s19140_s8 + $0x10] sm:$0xff] }
 0x185   : > { %v2173_v51 = vpop.f32.mrb[8].mxu1 }
 0x186   : > { %15318 = vmatpush3.msra.mxu0 %v2104_v48  ;;  %v2174_v52 = vadd.f32 %v14103_v50, %v2173_v51  ;;  %v15274_v54 = vpop.f32.mrb[9].mxu1  ;;  %v1399_v50 = vld [vmem:[%s19140_s8 + $0x18] sm:$0xff] }
 0x187   : > { %15327 = vmatprep.subr.mxu0 %v17253_v11 }
 0x188   : > { %15323 = vmatpush3.msra.mxu1 %v2174_v52 }
 0x189   : > { %15332 = vmatprep.subr.mxu1 %v17253_v11 }
 0x18b   : > { %v2243_v53 = vpop.f32.mrb[10].mxu0 }
 0x18c   : > { %v15285_v55 = vpop.f32.mrb[11].mxu0  ;;  %v2244_v36 = vadd.f32 %v14104_v32, %v2243_v53  ;;  %v3385_v32 = vld [vmem:[%s19137_s12 + $0x28] sm:$0xff] }
 0x18d   : > { %v17701_v56 = vpop.f32.mrb[10].mxu1 }
 0x18e   : > { %v15296_v57 = vpop.f32.mrb[11].mxu1  ;;  %v2314_v40 = vadd.f32 %v14105_v37, %v17701_v56 }
 0x24c   : > { %v2390_v58 = vpop.f32.mrb[12].mxu0 }
 0x24d   : > { %v15301_v59 = vpop.f32.mrb[13].mxu0  ;;  %v2622_v60 = vsel %vm2317_vm2, %v2390_v58, -inf }
 0x24e   : > { %2623 = vmax.xlane.f32.xlu0 %v2622_v60 }
 0x250   : > { %v2466_v61 = vpop.f32.mrb[14].mxu0 }
 0x251   : > { %v15306_v62 = vpop.f32.mrb[15].mxu0  ;;  %v2625_v63 = vsel %vm2317_vm2, %v2466_v61, -inf }
 0x252   : > { %2626 = vmax.xlane.f32.xlu0 %v2625_v63 }
 0x254   : > { %v2542_v0 = vpop.f32.mrb[16].mxu0 }
 0x255   : > { %v2618_v1 = vpop.f32.mrb[12].mxu1  ;;  %v15311_v2 = vpop.f32.mrb[17].mxu0  ;;  %v2628_v4 = vsel %vm2317_vm2, %v2542_v0, -inf }
 0x256   : > { %v15316_v5 = vpop.f32.mrb[13].mxu1  ;;  %2629 = vmax.xlane.f32.xlu1 %v2628_v4  ;;  %v2631_v6 = vsel %vm2317_vm2, %v2618_v1, -inf }
 0x25a   : > { %2632 = vmax.xlane.f32.xlu1 %v2631_v6  ;;  %v14126_v6 = vld [vmem:[%s19136_s14] ss:$0 sm:$0xff] }
 0x2db   : > { %v2624_v7 = vpop.xlane.xlu0 %2623 }
 0x2dc   : > { %v2634_v8 = vsub.f32 %v2390_v58, %v2624_v7 }
 0x2de   : > { %v2638_v9 = vmul.f32 1.442695, %v2634_v8 }
 0x2df   : > { %v2627_v10 = vpop.xlane.xlu0 %2626 }
 0x2e0   : > { %17027 = vpow2.f32 %v2638_v9  ;;  %v2635_v12 = vsub.f32 %v2466_v61, %v2627_v10 }
 0x2e2   : > { %v2640_v13 = vmul.f32 1.442695, %v2635_v12 }
 0x2e3   : > { %v2630_v14 = vpop.xlane.xlu1 %2629 }
 0x2e4   : > { %17029 = vpow2.f32 %v2640_v13  ;;  %v2636_v15 = vsub.f32 %v2542_v0, %v2630_v14 }
 0x2e6   : > { %v2642_v16 = vmul.f32 1.442695, %v2636_v15 }
 0x2e7   : > { %v2633_v17 = vpop.xlane.xlu1 %2632 }
 0x2e8   : > { %17031 = vpow2.f32 %v2642_v16  ;;  %v2637_v19 = vsub.f32 %v2618_v1, %v2633_v17 }
 0x2ea   : > { %v17028_v20 = vpop.eup %17027  ;;  %v2644_v21 = vmul.f32 1.442695, %v2637_v19 }
 0x2eb   : > { %v2646_v22 = vsel %vm2317_vm2, %v17028_v20, 0.0 }
 0x2ec   : > { %17033 = vpow2.f32 %v2644_v21  ;;  %2647 = vadd.xlane.f32.xlu0 %v2646_v22  ;;  %v3296_v21 = vld [vmem:[%s19129_s30 + $0x8] sm:$0xff] }
 0x2ee   : > { %v17030_v23 = vpop.eup %17029 }
 0x2ef   : > { %v2649_v24 = vsel %vm2317_vm2, %v17030_v23, 0.0 }
 0x2f0   : > { %2650 = vadd.xlane.f32.xlu1 %v2649_v24 }
 0x2f2   : > { %v17032_v25 = vpop.eup %17031 }
 0x2f3   : > { %v2652_v26 = vsel %vm2317_vm2, %v17032_v25, 0.0 }
 0x2f4   : > { %2653 = vadd.xlane.f32.xlu0 %v2652_v26  ;;  %v3381_v26 = vld [vmem:[%s19137_s12 + $0x8] sm:$0xff] }
 0x2f6   : > { %v17034_v27 = vpop.eup %17033 }
 0x2f7   : > { %v2655_v28 = vsel %vm2317_vm2, %v17034_v27, 0.0 }
 0x2f8   : > { %2656 = vadd.xlane.f32.xlu1 %v2655_v28 }
 0x379   : > { %v2648_v29 = vpop.xlane.xlu0 %2647 }
 0x37a   : > { %17035 = vrcp.f32 %v2648_v29  ;;  %v3383_v29 = vld [vmem:[%s19137_s12 + $0x18] sm:$0xff] }
 0x37d   : > { %v2651_v30 = vpop.xlane.xlu1 %2650 }
 0x37e   : > { %17037 = vrcp.f32 %v2651_v30 }
 0x381   : > { %v2654_v31 = vpop.xlane.xlu0 %2653 }
 0x382   : > { %17039 = vrcp.f32 %v2654_v31  ;;  %v3384_v31 = vld [vmem:[%s19137_s12 + $0x20] sm:$0xff] }
 0x384   : > { %v17036_v33 = vpop.eup %17035 }
 0x385   : > { %v2659_v34 = vmul.f32 %v17036_v33, %v17028_v20  ;;  %v2657_v35 = vpop.xlane.xlu1 %2656  ;;  %v3295_v20 = vld [vmem:[%s19129_s30] sm:$0xff]  ;;  %v16522_v33 = vpack.c.bf16 %v3385_v32, %v3384_v31 }
 0x386   : > { %17041 = vrcp.f32 %v2657_v35  ;;  %v16510_v22 = vpack.c.bf16 %v3296_v21, %v3295_v20  ;;  %v14140_v20 = vld [vmem:[%s19139_s13 + $0xa8] sm:$0xff]  ;;  %v14151_v21 = vld [vmem:[%s19135_s17 + $0x80] sm:$0xff] }
 0x387   : > { %15320 = vmatmul.mubr.msk.f32.vlgmr.msra.gmra.mrb[18].mxu0 %vm2317_vm2, %v2659_v34 }
 0x388   : > { %v17038_v38 = vpop.eup %17037  ;;  %15328 = vmatpush3.msra.mxu0 %v2244_v36  ;;  %15329 = vmatprep.mubr.msk.f32.mxu0 %vm17252_vm0, %v17253_v11 }
 0x389   : > { %v2661_v39 = vmul.f32 %v17038_v38, %v17030_v23  ;;  %15337 = vmatprep.subr.mxu0 %v17253_v11  ;;  %v3298_v23 = vld [vmem:[%s19129_s30 + $0x18] sm:$0xff]  ;;  %v14127_v38 = vld [vmem:[%s19134_s19] ss:$0 sm:$0xff] }
 0x38b   : > { %15325 = vmatmul.mubr.msk.f32.vlgmr.msra.gmra.mrb[14].mxu1 %vm2317_vm2, %v2661_v39 }
 0x38c   : > { %v17040_v41 = vpop.eup %17039  ;;  %15333 = vmatpush3.msra.mxu1 %v2314_v40  ;;  %15334 = vmatprep.mubr.msk.f32.mxu1 %vm17252_vm0, %v17253_v11  ;;  %v14128_v40 = vld [vmem:[%s19132_s24] ss:$0 sm:$0xff] }
 0x38d   : > { %v2663_v42 = vmul.f32 %v17040_v41, %v17032_v25  ;;  %15342 = vmatprep.subr.mxu1 %v17253_v11  ;;  %v3380_v25 = vld [vmem:[%s19137_s12] sm:$0xff] }
 0x38e   : > { %v16516_v28 = vpack.c.bf16 %v3381_v26, %v3380_v25  ;;  %v14141_v26 = vld [vmem:[%s19139_s13 + $0xb0] sm:$0xff] }
 0x38f   : > { %15330 = vmatmul.mubr.msk.f32.vlgmr.msra.gmra.mrb[20].mxu0 %vm2317_vm2, %v2663_v42 }
 0x390   : > { %v17042_v43 = vpop.eup %17041  ;;  %15339 = vmatprep.mubr.msk.f32.mxu0 %vm17252_vm0, %v17253_v11  ;;  %15338 = vmatpush3.msra.mxu0 %v1396_v45 }
 0x391   : > { %v2665_v44 = vmul.f32 %v17042_v43, %v17034_v27  ;;  %15347 = vmatprep.subr.mxu0 %v17253_v11  ;;  %v3382_v27 = vld [vmem:[%s19137_s12 + $0x10] sm:$0xff] }
 0x392   : > { %v16519_v30 = vpack.c.bf16 %v3383_v29, %v3382_v27  ;;  %v3386_v43 = vld [vmem:[%s19137_s12 + $0x30] sm:$0xff] }
 0x393   : > { %15335 = vmatmul.mubr.msk.f32.vlgmr.msra.gmra.mrb[16].mxu1 %vm2317_vm2, %v2665_v44  ;;  %v3387_v44 = vld [vmem:[%s19137_s12 + $0x38] sm:$0xff]  ;;  %v14153_v29 = vld [vmem:[%s19135_s17 + $0x90] sm:$0xff] }
 0x394   : > { %15344 = vmatprep.mubr.msk.f32.mxu1 %vm17252_vm0, %v17253_v11  ;;  %15343 = vmatpush3.msra.mxu1 %v1397_v46  ;;  %v16525_v45 = vpack.c.bf16 %v3387_v44, %v3386_v43  ;;  %v14129_v46 = vld [vmem:[%s19138_s6] ss:$0 sm:$0xff] }
 0x395   : > { %15352 = vmatprep.subr.mxu1 %v17253_v11 }
 0x45a   : > { %v2735_v48 = vpop.f32.mrb[18].mxu0 }
 0x45b   : > { %v15321_v49 = vpop.f32.mrb[19].mxu0  ;;  %15340 = vmatmul.mubr.msk.f32.vlgmr.msra.gmra.mrb[22].mxu0 %vm2317_vm2, %v2735_v48 }
 0x45c   : > { %15348 = vmatpush3.msra.mxu0 %v1398_v47  ;;  %15349 = vmatprep.mubr.msk.f32.mxu0 %vm17252_vm0, %v17253_v11 }
 0x45d   : > { %16509 = vmatprep.subr.bf16.mxu0 %v17251_v3 }
 0x45e   : > { %v2808_v51 = vpop.f32.mrb[14].mxu1 }
 0x45f   : > { %v15326_v52 = vpop.f32.mrb[15].mxu1  ;;  %15345 = vmatmul.mubr.msk.f32.vlgmr.msra.gmra.mrb[18].mxu1 %vm2317_vm2, %v2808_v51  ;;  %v14131_v51 = vld [vmem:[%s19151_s16] ss:$0 sm:$0xff] }
 0x460   : > { %15353 = vmatpush3.msra.mxu1 %v1399_v50  ;;  %15354 = vmatprep.mubr.msk.f32.mxu1 %vm17252_vm0, %v17253_v11 }
 0x461   : > { %16515 = vmatprep.subr.bf16.mxu1 %v17251_v3 }
 0x462   : > { %v2881_v53 = vpop.f32.mrb[20].mxu0 }
 0x463   : > { %v15331_v54 = vpop.f32.mrb[21].mxu0  ;;  %15350 = vmatmul.mubr.msk.f32.vlgmr.msra.gmra.mrb[24].mxu0 %vm2317_vm2, %v2881_v53 }
 0x464   : > { %15365 = vmatprep.mubr.msk.f32.mxu0 %vm17252_vm0, %v17253_v11  ;;  %16511 = vmatpush3.bf16.msra.mxu0 %v16510_v22  ;;  %v14152_v22 = vld [vmem:[%s19135_s17 + $0x88] sm:$0xff] }
 0x465   : > { %16512 = vmatprep.subr.bf16.mxu0 %v17251_v3  ;;  %v16552_v25 = vpack.c.bf16 %v14152_v22, %v14151_v21 }
 0x466   : > { %v2954_v55 = vpop.f32.mrb[16].mxu1 }
 0x467   : > { %v15336_v56 = vpop.f32.mrb[17].mxu1  ;;  %15355 = vmatmul.mubr.msk.f32.vlgmr.msra.gmra.mrb[20].mxu1 %vm2317_vm2, %v2954_v55 }
 0x468   : > { %15384 = vmatprep.mubr.msk.f32.mxu1 %vm17252_vm0, %v17253_v11  ;;  %16517 = vmatpush3.bf16.msra.mxu1 %v16516_v28  ;;  %v14142_v28 = vld [vmem:[%s19139_s13 + $0xb8] sm:$0xff] }
 0x469   : > { %16518 = vmatprep.subr.bf16.mxu1 %v17251_v3  ;;  %v16537_v31 = vpack.c.bf16 %v14142_v28, %v14141_v26  ;;  %v14200_v26 = vld [vmem:[%s19131_s25 + $0x4] ss:$0 sm:$0xff] }
 0x46c   : > { %16520 = vmatpush3.bf16.msra.mxu1 %v16519_v30  ;;  %v14154_v30 = vld [vmem:[%s19135_s17 + $0x98] sm:$0xff] }
 0x46d   : > { %16521 = vmatprep.subr.bf16.mxu1 %v17251_v3  ;;  %v16555_v32 = vpack.c.bf16 %v14154_v30, %v14153_v29 }
 0x470   : > { %16523 = vmatpush3.bf16.msra.mxu1 %v16522_v33  ;;  %v14147_v33 = vld [vmem:[%s19139_s13 + $0xe0] sm:$0xff] }
 0x471   : > { %16524 = vmatprep.subr.bf16.mxu1 %v17251_v3 }
 0x474   : > { %16526 = vmatpush3.bf16.msra.mxu1 %v16525_v45  ;;  %v14155_v45 = vld [vmem:[%s19135_s17 + $0xa0] sm:$0xff] }
 0x475   : > { %16539 = vmatprep.subr.bf16.mxu1 %v17251_v3 }
 0x52e   : > { %v3027_v57 = vpop.f32.mrb[22].mxu0 }
 0x52f   : > { %v15341_v58 = vpop.f32.mrb[23].mxu0  ;;  %v3250_v60 = vsel %vm1425_vm1, %v3027_v57, 0.0 }
 0x532   : > { %v3100_v59 = vpop.f32.mrb[18].mxu1 }
 0x533   : > { %v3251_v61 = vsel %vm1425_vm1, %v3100_v59, 0.0  ;;  %v15346_v62 = vpop.f32.mrb[19].mxu1 }
 0x534   : > { %v3252_v63 = vadd.f32 %v3251_v61, %v3250_v60  ;;  %v14135_v62 = vld [vmem:[%s19139_s13 + $0x80] sm:$0xff] }
 0x536   : > { %v3173_v0 = vpop.f32.mrb[24].mxu0 }
 0x537   : > { %v3253_v1 = vsel %vm1425_vm1, %v3173_v0, 0.0  ;;  %v15351_v2 = vpop.f32.mrb[25].mxu0  ;;  %v14143_v0 = vld [vmem:[%s19139_s13 + $0xc0] sm:$0xff] }
 0x538   : > { %v3254_v4 = vadd.f32 %v3253_v1, %v3252_v63  ;;  %v14136_v63 = vld [vmem:[%s19139_s13 + $0x88] sm:$0xff] }
 0x539   : > { %v16528_v1 = vpack.c.bf16 %v14136_v63, %v14135_v62  ;;  %v14144_v2 = vld [vmem:[%s19139_s13 + $0xc8] sm:$0xff]  ;;  %v14165_v63 = vld [vmem:[%s19135_s17 + $0xf0] sm:$0xff] }
 0x53a   : > { %v3246_v5 = vpop.f32.mrb[20].mxu1 }
 0x53b   : > { %v3255_v7 = vsel %vm1425_vm1, %v3246_v5, 0.0  ;;  %v15356_v8 = vpop.f32.mrb[21].mxu1  ;;  %v14137_v5 = vld [vmem:[%s19139_s13 + $0x90] sm:$0xff] }
 0x53c   : > { %v3256_v9 = vadd.f32 %v3255_v7, %v3254_v4  ;;  %v16540_v4 = vpack.c.bf16 %v14144_v2, %v14143_v0  ;;  %v14145_v7 = vld [vmem:[%s19139_s13 + $0xd0] sm:$0xff]  ;;  %v14166_v0 = vld [vmem:[%s19135_s17 + $0xf8] sm:$0xff] }
 0x53d   : > { %v14178_v2 = vld [vmem:[%s19133_s21 + $0xd8] sm:$0xff] }
 0x53e   : > { %v3263_v10 = vadd.f32 %v14126_v6, %v3256_v9  ;;  %v14138_v6 = vld [vmem:[%s19139_s13 + $0x98] sm:$0xff] }
 0x53f   : > { %v16531_v8 = vpack.c.bf16 %v14138_v6, %v14137_v5  ;;  %v14146_v9 = vld [vmem:[%s19139_s13 + $0xd8] sm:$0xff]  ;;  %v14171_v6 = vld [vmem:[%s19133_s21 + $0xa0] sm:$0xff] }
 0x540   : > { %v3264_v12 = vadd.f32 %v3263_v10, %v17561_v18  ;;  %v3297_v18 = vld [vmem:[%s19129_s30 + $0x10] sm:$0xff]  ;;  %v16543_v10 = vpack.c.bf16 %v14146_v9, %v14145_v7  ;;  %v14172_v7 = vld [vmem:[%s19133_s21 + $0xa8] sm:$0xff] }
 0x541   : > { %v16513_v24 = vpack.c.bf16 %v3298_v23, %v3297_v18  ;;  %v14134_v18 = vld [vmem:[%s19153_s10] ss:$0 sm:$0xff]  ;;  %v14173_v9 = vld [vmem:[%s19133_s21 + $0xb0] sm:$0xff] }
 0x542   : > { %v3267_v13 = vsel %vm1425_vm1, %v3264_v12, 0.0 }
 0x543   : > { %3268 = vadd.xlane.f32.xlu0 %v3267_v13  ;;  %16514 = vmatpush3.bf16.msra.mxu0 %v16513_v24 }
 0x544   : > { %16527 = vmatprep.subr.bf16.mxu0 %v17251_v3 }
 0x5d0   : > { %v3269_v14 = vpop.xlane.xlu0 %3268 }
 0x5d1   : > { %v3271_v15 = vmul.f32 0.03125, %v3269_v14 }
 0x5d3   : > { %v3272_v16 = vsub.f32 %v3264_v12, %v3271_v15 }
 0x5d5   : > { %v3273_v17 = vmul.f32 %v3272_v16, %v3272_v16 }
 0x5d7   : > { %v3274_v19 = vsel %vm1425_vm1, %v3273_v17, 0.0  ;;  %v14139_v17 = vld [vmem:[%s19139_s13 + $0xa0] sm:$0xff] }
 0x5d8   : > { %3275 = vadd.xlane.f32.xlu1 %v3274_v19  ;;  %v16534_v24 = vpack.c.bf16 %v14140_v20, %v14139_v17  ;;  %v14182_v17 = vld [vmem:[%s19133_s21 + $0xf8] sm:$0xff] }
 0x665   : > { %v3276_v34 = vpop.xlane.xlu1 %3275 }
 0x666   : > { %v3277_v35 = vmul.f32 0.03125, %v3276_v34  ;;  %v14148_v34 = vld [vmem:[%s19139_s13 + $0xe8] sm:$0xff] }
 0x668   : > { %v3278_v36 = vadd.f32 1e-05, %v3277_v35  ;;  %v14159_v35 = vld [vmem:[%s19135_s17 + $0xc0] sm:$0xff] }
 0x66a   : > { %17043 = vrsqrt.f32 %v3278_v36  ;;  %v14160_v36 = vld [vmem:[%s19135_s17 + $0xc8] sm:$0xff] }
 0x674   : > { %v17044_v37 = vpop.eup %17043 }
 0x675   : > { %v3280_v39 = vmul.f32 %v17044_v37, %v3272_v16  ;;  %v14133_v16 = vld [vmem:[%s19152_s15] ss:$0 sm:$0xff]  ;;  %v16546_v37 = vpack.c.bf16 %v14148_v34, %v14147_v33 }
 0x677   : > { %v3287_v41 = vmul.f32 %v14127_v38, %v3280_v39  ;;  %v16564_v38 = vpack.c.bf16 %v14160_v36, %v14159_v35  ;;  %v14149_v39 = vld [vmem:[%s19139_s13 + $0xf0] sm:$0xff]  ;;  %v14202_v35 = vld [vmem:[%s19131_s25 + $0x6] ss:$0 sm:$0xff] }
 0x679   : > { %v3294_v42 = vadd.f32 %v14128_v40, %v3287_v41  ;;  %v14150_v40 = vld [vmem:[%s19139_s13 + $0xf8] sm:$0xff]  ;;  %v14161_v41 = vld [vmem:[%s19135_s17 + $0xd0] sm:$0xff] }
 0x67a   : > { %v16549_v43 = vpack.c.bf16 %v14150_v40, %v14149_v39  ;;  %v14209_v40 = vld [vmem:[%s19130_s29 + $0x5] ss:$0 sm:$0xff] }
 0x67b   : > { %15366 = vmatmul.mubr.msk.f32.vlgmr.msra.gmra.mrb[26].mxu0 %vm1425_vm1, %v3294_v42 }
 0x67c   : > { %15395 = vmatprep.mubr.msk.f32.mxu0 %vm17252_vm0, %v17253_v11  ;;  %16529 = vmatpush3.bf16.msra.mxu0 %v16528_v1  ;;  %v14177_v1 = vld [vmem:[%s19133_s21 + $0xd0] sm:$0xff] }
 0x67d   : > { %16530 = vmatprep.subr.bf16.mxu0 %v17251_v3  ;;  %v16591_v5 = vpack.c.bf16 %v14178_v2, %v14177_v1 }
 0x680   : > { %16532 = vmatpush3.bf16.msra.mxu0 %v16531_v8  ;;  %v16582_v8 = vpack.c.bf16 %v14172_v7, %v14171_v6 }
 0x681   : > { %16533 = vmatprep.subr.bf16.mxu0 %v17251_v3 }
 0x74e   : > { %v3375_v47 = vpop.f32.mrb[26].mxu0 }
 0x74f   : > { %v3376_v48 = vadd.f32 %v14129_v46, %v3375_v47  ;;  %v15367_v49 = vpop.f32.mrb[27].mxu0  ;;  %v14156_v46 = vld [vmem:[%s19135_s17 + $0xa8] sm:$0xff]  ;;  %v14167_v47 = vld [vmem:[%s19133_s21 + $0x80] sm:$0xff] }
 0x750   : > { %v16558_v49 = vpack.c.bf16 %v14156_v46, %v14155_v45 }
 0x751   : > { %v3379_v50 = vmax.f32 %v3376_v48, 0.0  ;;  %v14168_v48 = vld [vmem:[%s19133_s21 + $0x88] sm:$0xff] }
 0x753   : > { %15385 = vmatmul.mubr.msk.f32.vlgmr.msra.gmra.mrb[22].mxu1 %vm3395_vm3, %v3379_v50  ;;  %v16576_v50 = vpack.c.bf16 %v14168_v48, %v14167_v47 }
 0x754   : > { %15417 = vmatprep.mubr.msk.f32.mxu1 %vm17252_vm0, %v17253_v11  ;;  %16541 = vmatpush3.bf16.msra.mxu1 %v16540_v4  ;;  %v16573_v4 = vpack.c.bf16 %v14166_v0, %v14165_v63 }
 0x755   : > { %16542 = vmatprep.subr.bf16.mxu1 %v17251_v3 }
 0x758   : > { %16544 = vmatpush3.bf16.msra.mxu1 %v16543_v10  ;;  %v14174_v10 = vld [vmem:[%s19133_s21 + $0xb8] sm:$0xff] }
 0x759   : > { %16551 = vmatprep.subr.bf16.mxu1 %v17251_v3 }
 0x826   : > { %v3465_v52 = vpop.f32.mrb[22].mxu1 }
 0x827   : > { %v3466_v53 = vadd.f32 %v14131_v51, %v3465_v52  ;;  %v15386_v54 = vpop.f32.mrb[23].mxu1  ;;  %v14157_v51 = vld [vmem:[%s19135_s17 + $0xb0] sm:$0xff]  ;;  %v14158_v52 = vld [vmem:[%s19135_s17 + $0xb8] sm:$0xff] }
 0x828   : > { %v14170_v54 = vld [vmem:[%s19133_s21 + $0x98] sm:$0xff] }
 0x829   : > { %v3469_v55 = vadd.f32 %v3466_v53, %v3294_v42  ;;  %v14162_v42 = vld [vmem:[%s19135_s17 + $0xd8] sm:$0xff]  ;;  %v14169_v53 = vld [vmem:[%s19133_s21 + $0x90] sm:$0xff] }
 0x82a   : > { %v16567_v44 = vpack.c.bf16 %v14162_v42, %v14161_v41  ;;  %v14216_v41 = vld [vmem:[%s19141_s3 + $0x4] ss:$0 sm:$0xff] }
 0x82b   : > { %v3472_v56 = vsel %vm1425_vm1, %v3469_v55, 0.0 }
 0x82c   : > { %3473 = vadd.xlane.f32.xlu0 %v3472_v56  ;;  %v16579_v56 = vpack.c.bf16 %v14170_v54, %v14169_v53  ;;  %v14203_v53 = vld [vmem:[%s19131_s25 + $0x7] ss:$0 sm:$0xff] }
 0x8b9   : > { %v3474_v57 = vpop.xlane.xlu0 %3473 }
 0x8ba   : > { %v3475_v58 = vmul.f32 0.03125, %v3474_v57  ;;  %v14163_v57 = vld [vmem:[%s19135_s17 + $0xe0] sm:$0xff] }
 0x8bc   : > { %v3476_v59 = vsub.f32 %v3469_v55, %v3475_v58  ;;  %v16561_v55 = vpack.c.bf16 %v14158_v52, %v14157_v51  ;;  %v14164_v58 = vld [vmem:[%s19135_s17 + $0xe8] sm:$0xff]  ;;  %s19167_s17 = sld [smem:[#allocation31_spill]] }
 0x8be   : > { %v3477_v60 = vmul.f32 %v3476_v59, %v3476_v59 }
 0x8c0   : > { %v3478_v61 = vsel %vm1425_vm1, %v3477_v60, 0.0  ;;  %v14176_v60 = vld [vmem:[%s19133_s21 + $0xc8] sm:$0xff] }
 0x8c1   : > { %3479 = vadd.xlane.f32.xlu1 %v3478_v61  ;;  %v16570_v61 = vpack.c.bf16 %v14164_v58, %v14163_v57  ;;  %v14217_v58 = vld [vmem:[%s19141_s3 + $0x5] ss:$0 sm:$0xff] }
 0x94e   : > { %v3480_v12 = vpop.xlane.xlu1 %3479 }
 0x94f   : > { %v3481_v13 = vmul.f32 0.03125, %v3480_v12  ;;  %v16585_v12 = vpack.c.bf16 %v14174_v10, %v14173_v9 }
 0x951   : > { %v3482_v14 = vadd.f32 1e-05, %v3481_v13  ;;  %v14179_v13 = vld [vmem:[%s19133_s21 + $0xe0] sm:$0xff] }
 0x953   : > { %17045 = vrsqrt.f32 %v3482_v14  ;;  %v14180_v14 = vld [vmem:[%s19133_s21 + $0xe8] sm:$0xff] }
 0x95d   : > { %v17046_v15 = vpop.eup %17045 }
 0x95e   : > { %v3484_v19 = vmul.f32 %v17046_v15, %v3476_v59  ;;  %v14175_v59 = vld [vmem:[%s19133_s21 + $0xc0] sm:$0xff]  ;;  %v16594_v15 = vpack.c.bf16 %v14180_v14, %v14179_v13 }
 0x95f   : > { %v16588_v62 = vpack.c.bf16 %v14176_v60, %v14175_v59 }
 0x960   : > { %v3491_v23 = vmul.f32 %v14133_v16, %v3484_v19  ;;  %v14181_v16 = vld [vmem:[%s19133_s21 + $0xf0] sm:$0xff]  ;;  %s19169_s21 = sld [smem:[#allocation34_spill]] }
 0x961   : > { %v16597_v19 = vpack.c.bf16 %v14182_v17, %v14181_v16 }
 0x962   : > { %v17805_v27 = vadd.f32 %v14134_v18, %v3491_v23  ;;  %v14208_v23 = vld [vmem:[%s19130_s29 + $0x4] ss:$0 sm:$0xff] }
 0x964   : > { %15396 = vmatmul.mubr.msk.f32.vlgmr.msra.gmra.mrb[28].mxu0 %vm1425_vm1, %v17805_v27  ;;  %15418 = vmatmul.mubr.msk.f32.vlgmr.msra.gmra.mrb[24].mxu1 %vm1425_vm1, %v17805_v27 }
 0x965   : > { %16535 = vmatpush3.bf16.msra.mxu0 %v16534_v24  ;;  %16553 = vmatpush3.bf16.msra.mxu1 %v16552_v25 }
 0x966   : > { %16536 = vmatprep.subr.bf16.mxu0 %v17251_v3  ;;  %16554 = vmatprep.subr.bf16.mxu1 %v17251_v3 }
 0x967   : > { %15406 = vmatprep.mubr.msk.f32.mxu0 %vm17252_vm0, %v17253_v11  ;;  %15439 = vmatprep.mubr.msk.f32.mxu1 %vm17252_vm0, %v17253_v11 }
 0x969   : > { %16538 = vmatpush3.bf16.msra.mxu0 %v16537_v31  ;;  %16556 = vmatpush3.bf16.msra.mxu1 %v16555_v32  ;;  %v14210_v32 = vld [vmem:[%s19130_s29 + $0x6] ss:$0 sm:$0xff] }
 0x96a   : > { %16545 = vmatprep.subr.bf16.mxu0 %v17251_v3  ;;  %16563 = vmatprep.subr.bf16.mxu1 %v17251_v3 }
 0x96c   : > { %15407 = vmatmul.mubr.msk.f32.vlgmr.msra.gmra.mrb[30].mxu0 %vm1425_vm1, %v17805_v27  ;;  %15440 = vmatmul.mubr.msk.f32.vlgmr.msra.gmra.mrb[26].mxu1 %vm1425_vm1, %v17805_v27 }
 0x96d   : > { %16547 = vmatpush3.bf16.msra.mxu0 %v16546_v37  ;;  %16565 = vmatpush3.bf16.msra.mxu1 %v16564_v38 }
 0x96e   : > { %16548 = vmatprep.subr.bf16.mxu0 %v17251_v3  ;;  %16566 = vmatprep.subr.bf16.mxu1 %v17251_v3 }
 0x96f   : > { %15428 = vmatprep.mubr.msk.f32.mxu0 %vm17252_vm0, %v17253_v11  ;;  %15461 = vmatprep.mubr.msk.f32.mxu1 %vm17252_vm0, %v17253_v11 }
 0x971   : > { %16550 = vmatpush3.bf16.msra.mxu0 %v16549_v43  ;;  %16568 = vmatpush3.bf16.msra.mxu1 %v16567_v44  ;;  %v14201_v44 = vld [vmem:[%s19131_s25 + $0x5] ss:$0 sm:$0xff]  ;;  %s19173_s25 = sld [smem:[#allocation38_spill]] }
 0x972   : > { %16557 = vmatprep.subr.bf16.mxu0 %v17251_v3  ;;  %16575 = vmatprep.subr.bf16.mxu1 %v17251_v3 }
 0x974   : > { %15429 = vmatmul.mubr.msk.f32.vlgmr.msra.gmra.mrb[32].mxu0 %vm1425_vm1, %v17805_v27  ;;  %15462 = vmatmul.mubr.msk.f32.vlgmr.msra.gmra.mrb[28].mxu1 %vm1425_vm1, %v17805_v27 }
 0x975   : > { %16559 = vmatpush3.bf16.msra.mxu0 %v16558_v49  ;;  %16577 = vmatpush3.bf16.msra.mxu1 %v16576_v50  ;;  %v14211_v50 = vld [vmem:[%s19130_s29 + $0x7] ss:$0 sm:$0xff]  ;;  %s19174_s29 = sld [smem:[#allocation39_spill]] }
 0x976   : > { %16560 = vmatprep.subr.bf16.mxu0 %v17251_v3  ;;  %16578 = vmatprep.subr.bf16.mxu1 %v17251_v3 }
 0x977   : > { %15450 = vmatprep.mubr.msk.f32.mxu0 %vm17252_vm0, %v17253_v11  ;;  %15483 = vmatprep.mubr.msk.f32.mxu1 %vm17252_vm0, %v17253_v11 }
 0x979   : > { %16562 = vmatpush3.bf16.msra.mxu0 %v16561_v55  ;;  %16580 = vmatpush3.bf16.msra.mxu1 %v16579_v56 }
 0x97a   : > { %16569 = vmatprep.subr.bf16.mxu0 %v17251_v3  ;;  %16587 = vmatprep.subr.bf16.mxu1 %v17251_v3 }
 0x97c   : > { %15451 = vmatmul.mubr.msk.f32.vlgmr.msra.gmra.mrb[34].mxu0 %vm1425_vm1, %v17805_v27  ;;  %15484 = vmatmul.mubr.msk.f32.vlgmr.msra.gmra.mrb[30].mxu1 %vm1425_vm1, %v17805_v27 }
 0x97d   : > { %16571 = vmatpush3.bf16.msra.mxu0 %v16570_v61  ;;  %16589 = vmatpush3.bf16.msra.mxu1 %v16588_v62 }
 0x97e   : > { %16572 = vmatprep.subr.bf16.mxu0 %v17251_v3  ;;  %16590 = vmatprep.subr.bf16.mxu1 %v17251_v3 }
 0x97f   : > { %15472 = vmatprep.mubr.msk.f32.mxu0 %vm17252_vm0, %v17253_v11  ;;  %15505 = vmatprep.mubr.msk.f32.mxu1 %vm17252_vm0, %v17253_v11 }
 0x981   : > { %16574 = vmatpush3.bf16.msra.mxu0 %v16573_v4  ;;  %16592 = vmatpush3.bf16.msra.mxu1 %v16591_v5 }
 0x982   : > { %16581 = vmatprep.subr.bf16.mxu0 %v17251_v3  ;;  %15519 = vmatprep.subr.mxu1 %v17253_v11 }
 0x984   : > { %15473 = vmatmul.mubr.msk.f32.vlgmr.msra.gmra.mrb[36].mxu0 %vm1425_vm1, %v17805_v27  ;;  %15506 = vmatmul.mubr.msk.f32.vlgmr.msra.gmra.mrb[32].mxu1 %vm1425_vm1, %v17805_v27 }
 0x985   : > { %16583 = vmatpush3.bf16.msra.mxu0 %v16582_v8  ;;  %15494 = vmatprep.mubr.msk.f32.mxu0 %vm17252_vm0, %v17253_v11 }
 0x986   : > { %16584 = vmatprep.subr.bf16.mxu0 %v17251_v3  ;;  %15521 = vmatprep.mubr.msk.f32.mxu1 %vm17252_vm0, %v17253_v11 }
 0x989   : > { %16586 = vmatpush3.bf16.msra.mxu0 %v16585_v12 }
 0x98a   : > { %16593 = vmatprep.subr.bf16.mxu0 %v17251_v3 }
 0x98c   : > { %15495 = vmatmul.mubr.msk.f32.vlgmr.msra.gmra.mrb[38].mxu0 %vm1425_vm1, %v17805_v27 }
 0x98d   : > { %16595 = vmatpush3.bf16.msra.mxu0 %v16594_v15  ;;  %15516 = vmatprep.mubr.msk.f32.mxu0 %vm17252_vm0, %v17253_v11 }
 0x98e   : > { %16596 = vmatprep.subr.bf16.mxu0 %v17251_v3 }
 0x991   : > { %16598 = vmatpush3.bf16.msra.mxu0 %v16597_v19 }
 0x992   : > { %15529 = vmatprep.subr.mxu0 %v17253_v11 }
 0x994   : > { %15517 = vmatmul.mubr.msk.f32.vlgmr.msra.gmra.mrb[40].mxu0 %vm1425_vm1, %v17805_v27 }
 0x995   : > { %15531 = vmatprep.mubr.msk.f32.mxu0 %vm17252_vm0, %v17253_v11 }
 0xa37   : > { %v3665_v20 = vpop.f32.mrb[28].mxu0  ;;  %v3805_v21 = vpop.f32.mrb[24].mxu1 }
 0xa38   : > { %v15397_v22 = vpop.f32.mrb[29].mxu0  ;;  %v15419_v18 = vpop.f32.mrb[25].mxu1  ;;  %v3666_v31 = vadd.f32 %v14200_v26, %v3665_v20  ;;  %v3806_v39 = vadd.f32 %v14202_v35, %v3805_v21 }
 0xa3f   : > { %v3735_v24 = vpop.f32.mrb[30].mxu0  ;;  %v3969_v25 = vpop.f32.mrb[26].mxu1 }
 0xa40   : > { %v3970_v28 = vadd.f32 %v14208_v23, %v3969_v25  ;;  %v15408_v29 = vpop.f32.mrb[31].mxu0  ;;  %v15441_v30 = vpop.f32.mrb[27].mxu1  ;;  %v3736_v49 = vadd.f32 %v14201_v44, %v3735_v24 }
 0xa42   : > { %15520 = vmatpush3.xpose.msk.msra.mxu1 %vm2317_vm2, %v3970_v28 }
 0xa43   : > { %15524 = vmatprep.subr.mxu1 %v17253_v11 }
 0xa45   : > { %15522 = vmatmul.mubr.msk.f32.vlgmr.msra.gmra.mrb[34].mxu1 %vm2317_vm2, %v3666_v31 }
 0xa46   : > { %15526 = vmatprep.mubr.msk.f32.mxu1 %vm17252_vm0, %v17253_v11 }
 0xa47   : > { %v3875_v33 = vpop.f32.mrb[32].mxu0  ;;  %v4109_v34 = vpop.f32.mrb[28].mxu1 }
 0xa48   : > { %v4110_v36 = vadd.f32 %v14210_v32, %v4109_v34  ;;  %v15430_v37 = vpop.f32.mrb[33].mxu0  ;;  %v15463_v38 = vpop.f32.mrb[29].mxu1  ;;  %v3876_v57 = vadd.f32 %v14203_v53, %v3875_v33  ;;  %v14197_v53 = vld [vmem:[%s19140_s8 + $0x30] sm:$0xff] }
 0xa49   : > { %v14218_v37 = vld [vmem:[%s19141_s3 + $0x6] ss:$0 sm:$0xff] }
 0xa4a   : > { %15530 = vmatpush3.xpose.msk.msra.mxu0 %vm2317_vm2, %v4110_v36 }
 0xa4b   : > { %15539 = vmatprep.subr.mxu0 %v17253_v11 }
 0xa4d   : > { %15532 = vmatmul.mubr.msk.f32.vlgmr.msra.gmra.mrb[42].mxu0 %vm2317_vm2, %v3806_v39 }
 0xa4e   : > { %15541 = vmatprep.mubr.msk.f32.mxu0 %vm17252_vm0, %v17253_v11 }
 0xa4f   : > { %v4039_v42 = vpop.f32.mrb[34].mxu0  ;;  %v4273_v43 = vpop.f32.mrb[30].mxu1 }
 0xa50   : > { %v4040_v45 = vadd.f32 %v14209_v40, %v4039_v42  ;;  %v4274_v46 = vadd.f32 %v14216_v41, %v4273_v43  ;;  %v15452_v47 = vpop.f32.mrb[35].mxu0  ;;  %v15485_v48 = vpop.f32.mrb[31].mxu1 }
 0xa52   : > { %15525 = vmatpush3.xpose.msk.msra.mxu1 %vm2317_vm2, %v4040_v45  ;;  %15540 = vmatpush3.msra.mxu0 %v4274_v46  ;;  %v14219_v45 = vld [vmem:[%s19141_s3 + $0x7] ss:$0 sm:$0xff]  ;;  %s19154_s3 = sld [smem:[#allocation23_spill]] }
 0xa53   : > { %15534 = vmatprep.subr.mxu1 %v17253_v11  ;;  %15549 = vmatprep.subr.mxu0 %v17253_v11 }
 0xa55   : > { %15527 = vmatmul.mubr.msk.f32.vlgmr.msra.gmra.mrb[36].mxu1 %vm2317_vm2, %v3736_v49 }
 0xa56   : > { %15536 = vmatprep.mubr.msk.f32.mxu1 %vm17252_vm0, %v17253_v11 }
 0xa57   : > { %v4179_v51 = vpop.f32.mrb[36].mxu0  ;;  %v17934_v52 = vpop.f32.mrb[32].mxu1 }
 0xa58   : > { %v4180_v54 = vadd.f32 %v14211_v50, %v4179_v51  ;;  %v15474_v55 = vpop.f32.mrb[37].mxu0  ;;  %v15507_v56 = vpop.f32.mrb[33].mxu1  ;;  %v4414_v40 = vadd.f32 %v14218_v37, %v17934_v52  ;;  %v14195_v51 = vld [vmem:[%s19140_s8 + $0x20] sm:$0xff]  ;;  %v14196_v52 = vld [vmem:[%s19140_s8 + $0x28] sm:$0xff] }
 0xa59   : > { %v14256_v37 = vld [vmem:[%s19137_s12 + $0x60] sm:$0xff] }
 0xa5a   : > { %15535 = vmatpush3.xpose.msk.msra.mxu1 %vm2317_vm2, %v4180_v54 }
 0xa5b   : > { %15544 = vmatprep.subr.mxu1 %v17253_v11 }
 0xa5d   : > { %15537 = vmatmul.mubr.msk.f32.vlgmr.msra.gmra.mrb[38].mxu1 %vm2317_vm2, %v3876_v57 }
 0xa5e   : > { %15546 = vmatprep.mubr.msk.f32.mxu1 %vm17252_vm0, %v17253_v11 }
 0xa5f   : > { %v4343_v59 = vpop.f32.mrb[38].mxu0 }
 0xa60   : > { %v4344_v60 = vadd.f32 %v14217_v58, %v4343_v59  ;;  %v15496_v61 = vpop.f32.mrb[39].mxu0  ;;  %v14198_v58 = vld [vmem:[%s19140_s8 + $0x38] sm:$0xff]  ;;  %s19156_s8 = sshll.u32 %s17549_s26, 3  ;;  %s19160_s26 = sld [smem:[#allocation26_spill]] }
 0xa61   : > { %s1334_s13 = scalar_lea.vmem %s19155_s5, %s19156_s8  ;;  %s19157_s5 = sld [smem:[#allocation24_spill]] }
 0xa62   : > { %15545 = vmatpush3.msra.mxu1 %v4344_v60  ;;  %s19159_s8 = sld [smem:[#allocation27_spill]] }
 0xa63   : > { %15554 = vmatprep.subr.mxu1 %v17253_v11 }
 0xa67   : > { %v17944_v62 = vpop.f32.mrb[40].mxu0 }
 0xa68   : > { %v15518_v63 = vpop.f32.mrb[41].mxu0  ;;  %v4484_v48 = vadd.f32 %v14219_v45, %v17944_v62 }
 0xb18   : > { %v4559_v0 = vpop.f32.mrb[34].mxu1 }
 0xb19   : > { %v15523_v1 = vpop.f32.mrb[35].mxu1  ;;  %v4791_v2 = vsel %vm2317_vm2, %v4559_v0, -inf }
 0xb1a   : > { %4792 = vmax.xlane.f32.xlu0 %v4791_v2 }
 0xb20   : > { %v4711_v4 = vpop.f32.mrb[42].mxu0 }
 0xb21   : > { %v15533_v5 = vpop.f32.mrb[43].mxu0  ;;  %v4797_v6 = vsel %vm2317_vm2, %v4711_v4, -inf }
 0xb22   : > { %4798 = vmax.xlane.f32.xlu0 %v4797_v6 }
 0xb28   : > { %v4635_v7 = vpop.f32.mrb[36].mxu1 }
 0xb29   : > { %v15528_v8 = vpop.f32.mrb[37].mxu1  ;;  %v4794_v9 = vsel %vm2317_vm2, %v4635_v7, -inf }
 0xb2a   : > { %4795 = vmax.xlane.f32.xlu1 %v4794_v9 }
 0xb30   : > { %v4787_v10 = vpop.f32.mrb[38].mxu1 }
 0xb31   : > { %v15538_v12 = vpop.f32.mrb[39].mxu1  ;;  %v4800_v13 = vsel %vm2317_vm2, %v4787_v10, -inf }
 0xb32   : > { %4801 = vmax.xlane.f32.xlu1 %v4800_v13  ;;  %v14240_v13 = vld [vmem:[%s19136_s14 + $0x1] ss:$0 sm:$0xff]  ;;  %s19165_s14 = sld [smem:[#allocation30_spill]] }
 0xba7   : > { %v4793_v14 = vpop.xlane.xlu0 %4792 }
 0xba8   : > { %v4803_v15 = vsub.f32 %v4559_v0, %v4793_v14 }
 0xbaa   : > { %v4807_v16 = vmul.f32 1.442695, %v4803_v15 }
 0xbac   : > { %17047 = vpow2.f32 %v4807_v16 }
 0xbaf   : > { %v4799_v17 = vpop.xlane.xlu0 %4798 }
 0xbb0   : > { %v4805_v19 = vsub.f32 %v4711_v4, %v4799_v17 }
 0xbb2   : > { %v4811_v20 = vmul.f32 1.442695, %v4805_v19 }
 0xbb4   : > { %17049 = vpow2.f32 %v4811_v20 }
 0xbb6   : > { %v17048_v21 = vpop.eup %17047 }
 0xbb7   : > { %v4796_v22 = vpop.xlane.xlu1 %4795  ;;  %v4815_v18 = vsel %vm2317_vm2, %v17048_v21, 0.0 }
 0xbb8   : > { %v4804_v23 = vsub.f32 %v4635_v7, %v4796_v22  ;;  %4816 = vadd.xlane.f32.xlu0 %v4815_v18 }
 0xbba   : > { %v4809_v24 = vmul.f32 1.442695, %v4804_v23 }
 0xbbc   : > { %17051 = vpow2.f32 %v4809_v24 }
 0xbbe   : > { %v17050_v25 = vpop.eup %17049 }
 0xbbf   : > { %v4802_v26 = vpop.xlane.xlu1 %4801  ;;  %v4821_v28 = vsel %vm2317_vm2, %v17050_v25, 0.0 }
 0xbc0   : > { %v4806_v29 = vsub.f32 %v4787_v10, %v4802_v26  ;;  %4822 = vadd.xlane.f32.xlu0 %v4821_v28  ;;  %v14246_v26 = vld [vmem:[%s19129_s30 + $0x28] sm:$0xff] }
 0xbc2   : > { %v4813_v30 = vmul.f32 1.442695, %v4806_v29  ;;  %v14248_v29 = vld [vmem:[%s19129_s30 + $0x38] sm:$0xff] }
 0xbc4   : > { %17053 = vpow2.f32 %v4813_v30 }
 0xbc6   : > { %v17052_v31 = vpop.eup %17051 }
 0xbc7   : > { %v4818_v32 = vsel %vm2317_vm2, %v17052_v31, 0.0 }
 0xbc8   : > { %4819 = vadd.xlane.f32.xlu1 %v4818_v32  ;;  %v14253_v32 = vld [vmem:[%s19137_s12 + $0x48] sm:$0xff] }
 0xbce   : > { %v17054_v33 = vpop.eup %17053 }
 0xbcf   : > { %v4824_v34 = vsel %vm2317_vm2, %v17054_v33, 0.0 }
 0xbd0   : > { %4825 = vadd.xlane.f32.xlu1 %v4824_v34  ;;  %v14254_v34 = vld [vmem:[%s19137_s12 + $0x50] sm:$0xff] }
 0xc45   : > { %v4817_v35 = vpop.xlane.xlu0 %4816 }
 0xc46   : > { %17055 = vrcp.f32 %v4817_v35  ;;  %v14255_v35 = vld [vmem:[%s19137_s12 + $0x58] sm:$0xff] }
 0xc4d   : > { %v4823_v36 = vpop.xlane.xlu0 %4822 }
 0xc4e   : > { %17057 = vrcp.f32 %v4823_v36  ;;  %v16609_v36 = vpack.c.bf16 %v14255_v35, %v14254_v34 }
 0xc50   : > { %v17056_v38 = vpop.eup %17055 }
 0xc51   : > { %v4828_v39 = vmul.f32 %v17056_v38, %v17048_v21  ;;  %v14257_v38 = vld [vmem:[%s19137_s12 + $0x68] sm:$0xff] }
 0xc53   : > { %15542 = vmatmul.mubr.msk.f32.vlgmr.msra.gmra.mrb[44].mxu0 %vm2317_vm2, %v4828_v39  ;;  %v16612_v39 = vpack.c.bf16 %v14257_v38, %v14256_v37  ;;  %v5693_v37 = vld [vmem:[%s19157_s5 + $0x10] sm:$0xff]  ;;  %v5694_v38 = vld [vmem:[%s19157_s5 + $0x18] sm:$0xff] }
 0xc54   : > { %15550 = vmatpush3.msra.mxu0 %v4414_v40  ;;  %15551 = vmatprep.mubr.msk.f32.mxu0 %vm17252_vm0, %v17253_v11 }
 0xc55   : > { %v4820_v41 = vpop.xlane.xlu1 %4819  ;;  %15559 = vmatprep.subr.mxu0 %v17253_v11 }
 0xc56   : > { %17059 = vrcp.f32 %v4820_v41 }
 0xc58   : > { %v17058_v42 = vpop.eup %17057 }
 0xc59   : > { %v4832_v43 = vmul.f32 %v17058_v42, %v17050_v25  ;;  %v14245_v25 = vld [vmem:[%s19129_s30 + $0x20] sm:$0xff] }
 0xc5a   : > { %v16600_v28 = vpack.c.bf16 %v14246_v26, %v14245_v25 }
 0xc5b   : > { %15552 = vmatmul.mubr.msk.f32.vlgmr.msra.gmra.mrb[46].mxu0 %vm2317_vm2, %v4832_v43 }
 0xc5c   : > { %15561 = vmatprep.mubr.msk.f32.mxu0 %vm17252_vm0, %v17253_v11  ;;  %15560 = vmatpush3.msra.mxu0 %v14195_v51 }
 0xc5d   : > { %v4826_v44 = vpop.xlane.xlu1 %4825  ;;  %15569 = vmatprep.subr.mxu0 %v17253_v11 }
 0xc5e   : > { %17061 = vrcp.f32 %v4826_v44  ;;  %v14243_v44 = vld [vmem:[%s19134_s19 + $0x1] ss:$0 sm:$0xff]  ;;  %s19168_s19 = sld [smem:[#allocation32_spill]] }
 0xc60   : > { %v17060_v46 = vpop.eup %17059 }
 0xc61   : > { %v4830_v47 = vmul.f32 %v17060_v46, %v17052_v31  ;;  %v14252_v31 = vld [vmem:[%s19137_s12 + $0x40] sm:$0xff] }
 0xc62   : > { %v5675_v46 = vld [vmem:[%s19154_s3] sm:$0xff] }
 0xc63   : > { %15547 = vmatmul.mubr.msk.f32.vlgmr.msra.gmra.mrb[40].mxu1 %vm2317_vm2, %v4830_v47  ;;  %v5676_v47 = vld [vmem:[%s19154_s3 + $0x8] sm:$0xff] }
 0xc64   : > { %15555 = vmatpush3.msra.mxu1 %v4484_v48  ;;  %15556 = vmatprep.mubr.msk.f32.mxu1 %vm17252_vm0, %v17253_v11  ;;  %v14244_v48 = vld [vmem:[%s19132_s24 + $0x1] ss:$0 sm:$0xff]  ;;  %s19172_s24 = sld [smem:[#allocation36_spill]] }
 0xc65   : > { %15564 = vmatprep.subr.mxu1 %v17253_v11 }
 0xc68   : > { %v17062_v49 = vpop.eup %17061 }
 0xc69   : > { %v4834_v50 = vmul.f32 %v17062_v49, %v17054_v33  ;;  %v16606_v33 = vpack.c.bf16 %v14253_v32, %v14252_v31  ;;  %v5691_v32 = vld [vmem:[%s19157_s5] sm:$0xff] }
 0xc6b   : > { %15557 = vmatmul.mubr.msk.f32.vlgmr.msra.gmra.mrb[42].mxu1 %vm2317_vm2, %v4834_v50  ;;  %v16618_v50 = vpack.c.bf16 %v5676_v47, %v5675_v46 }
 0xc6c   : > { %15566 = vmatprep.mubr.msk.f32.mxu1 %vm17252_vm0, %v17253_v11  ;;  %15565 = vmatpush3.msra.mxu1 %v14196_v52  ;;  %v5677_v52 = vld [vmem:[%s19154_s3 + $0x10] sm:$0xff] }
 0xc6d   : > { %15574 = vmatprep.subr.mxu1 %v17253_v11 }
 0xd26   : > { %v4904_v54 = vpop.f32.mrb[44].mxu0 }
 0xd27   : > { %v15543_v55 = vpop.f32.mrb[45].mxu0  ;;  %15562 = vmatmul.mubr.msk.f32.vlgmr.msra.gmra.mrb[48].mxu0 %vm2317_vm2, %v4904_v54 }
 0xd28   : > { %15570 = vmatpush3.msra.mxu0 %v14197_v53  ;;  %15571 = vmatprep.mubr.msk.f32.mxu0 %vm17252_vm0, %v17253_v11  ;;  %v5678_v53 = vld [vmem:[%s19154_s3 + $0x18] sm:$0xff]  ;;  %v5679_v55 = vld [vmem:[%s19154_s3 + $0x20] sm:$0xff] }
 0xd29   : > { %16599 = vmatprep.subr.bf16.mxu0 %v17251_v3  ;;  %v16621_v54 = vpack.c.bf16 %v5678_v53, %v5677_v52 }
 0xd2e   : > { %v5050_v56 = vpop.f32.mrb[46].mxu0 }
 0xd2f   : > { %v15553_v57 = vpop.f32.mrb[47].mxu0  ;;  %15572 = vmatmul.mubr.msk.f32.vlgmr.msra.gmra.mrb[50].mxu0 %vm2317_vm2, %v5050_v56  ;;  %v5680_v56 = vld [vmem:[%s19154_s3 + $0x28] sm:$0xff] }
 0xd30   : > { %15587 = vmatprep.mubr.msk.f32.mxu0 %vm17252_vm0, %v17253_v11  ;;  %16601 = vmatpush3.bf16.msra.mxu0 %v16600_v28  ;;  %v18033_v57 = vld [vmem:[%s1334_s13] sm:$0xff]  ;;  %s19158_s13 = sld [smem:[#allocation25_spill]] }
 0xd31   : > { %16602 = vmatprep.subr.bf16.mxu0 %v17251_v3 }
 0xd36   : > { %v4977_v59 = vpop.f32.mrb[40].mxu1  ;;  %v5707_v46 = vld [vmem:[%s19158_s13] sm:$0xff]  ;;  %v5708_v47 = vld [vmem:[%s19158_s13 + $0x8] sm:$0xff] }
 0xd37   : > { %v15548_v60 = vpop.f32.mrb[41].mxu1  ;;  %15567 = vmatmul.mubr.msk.f32.vlgmr.msra.gmra.mrb[44].mxu1 %vm2317_vm2, %v4977_v59  ;;  %v14258_v59 = vld [vmem:[%s19137_s12 + $0x70] sm:$0xff] }
 0xd38   : > { %15575 = vmatpush3.msra.mxu1 %v14198_v58  ;;  %15576 = vmatprep.mubr.msk.f32.mxu1 %vm17252_vm0, %v17253_v11  ;;  %v16624_v58 = vpack.c.bf16 %v5680_v56, %v5679_v55  ;;  %v14259_v60 = vld [vmem:[%s19137_s12 + $0x78] sm:$0xff]  ;;  %v5712_v55 = vld [vmem:[%s19158_s13 + $0x28] sm:$0xff]  ;;  %s19164_s12 = sld [smem:[#allocation29_spill]] }
 0xd39   : > { %16605 = vmatprep.subr.bf16.mxu1 %v17251_v3 }
 0xd3e   : > { %v5123_v61 = vpop.f32.mrb[42].mxu1 }
 0xd3f   : > { %v15558_v62 = vpop.f32.mrb[43].mxu1  ;;  %15577 = vmatmul.mubr.msk.f32.vlgmr.msra.gmra.mrb[46].mxu1 %vm2317_vm2, %v5123_v61  ;;  %v5681_v61 = vld [vmem:[%s19154_s3 + $0x30] sm:$0xff] }
 0xd40   : > { %15606 = vmatprep.mubr.msk.f32.mxu1 %vm17252_vm0, %v17253_v11  ;;  %16607 = vmatpush3.bf16.msra.mxu1 %v16606_v33  ;;  %v16615_v62 = vpack.c.bf16 %v14259_v60, %v14258_v59  ;;  %v5692_v33 = vld [vmem:[%s19157_s5 + $0x8] sm:$0xff]  ;;  %v5715_v59 = vld [vmem:[%s19158_s13 + $0x40] sm:$0xff] }
 0xd41   : > { %16608 = vmatprep.subr.bf16.mxu1 %v17251_v3  ;;  %v5716_v60 = vld [vmem:[%s19158_s13 + $0x48] sm:$0xff] }
 0xd44   : > { %16610 = vmatpush3.bf16.msra.mxu1 %v16609_v36  ;;  %v16642_v36 = vpack.c.bf16 %v5692_v33, %v5691_v32  ;;  %v14277_v32 = vld [vmem:[%s19159_s8 + $0x2] ss:$0 sm:$0xff] }
 0xd45   : > { %16611 = vmatprep.subr.bf16.mxu1 %v17251_v3 }
 0xd48   : > { %16613 = vmatpush3.bf16.msra.mxu1 %v16612_v39  ;;  %v16645_v39 = vpack.c.bf16 %v5694_v38, %v5693_v37  ;;  %v14269_v37 = vld [vmem:[%s19160_s26 + $0x2] ss:$0 sm:$0xff] }
 0xd49   : > { %16614 = vmatprep.subr.bf16.mxu1 %v17251_v3 }
 0xd4c   : > { %16616 = vmatpush3.bf16.msra.mxu1 %v16615_v62  ;;  %v5713_v62 = vld [vmem:[%s19158_s13 + $0x30] sm:$0xff] }
 0xd4d   : > { %16629 = vmatprep.subr.bf16.mxu1 %v17251_v3 }
 0xdfa   : > { %v5196_v63 = vpop.f32.mrb[48].mxu0 }
 0xdfb   : > { %v15563_v0 = vpop.f32.mrb[49].mxu0  ;;  %v5419_v5 = vsel %vm1425_vm1, %v5196_v63, 0.0  ;;  %v5682_v63 = vld [vmem:[%s19154_s3 + $0x38] sm:$0xff] }
 0xdfc   : > { %v16627_v0 = vpack.c.bf16 %v5682_v63, %v5681_v61  ;;  %v16678_v61 = vpack.c.bf16 %v5716_v60, %v5715_v59  ;;  %v5714_v63 = vld [vmem:[%s19158_s13 + $0x38] sm:$0xff] }
 0xe02   : > { %v5342_v1 = vpop.f32.mrb[50].mxu0 }
 0xe03   : > { %v15573_v2 = vpop.f32.mrb[51].mxu0  ;;  %v5422_v9 = vsel %vm1425_vm1, %v5342_v1, 0.0  ;;  %v5687_v1 = vld [vmem:[%s19154_s3 + $0x60] sm:$0xff] }
 0xe04   : > { %v5688_v2 = vld [vmem:[%s19154_s3 + $0x68] sm:$0xff] }
 0xe0a   : > { %v5269_v4 = vpop.f32.mrb[44].mxu1 }
 0xe0b   : > { %v5420_v6 = vsel %vm1425_vm1, %v5269_v4, 0.0  ;;  %v15568_v7 = vpop.f32.mrb[45].mxu1  ;;  %v16636_v4 = vpack.c.bf16 %v5688_v2, %v5687_v1  ;;  %v16675_v1 = vpack.c.bf16 %v5714_v63, %v5713_v62  ;;  %v5718_v2 = vld [vmem:[%s19158_s13 + $0x58] sm:$0xff] }
 0xe0c   : > { %v5421_v8 = vadd.f32 %v5420_v6, %v5419_v5  ;;  %v5689_v5 = vld [vmem:[%s19154_s3 + $0x70] sm:$0xff]  ;;  %v5690_v6 = vld [vmem:[%s19154_s3 + $0x78] sm:$0xff] }
 0xe0d   : > { %v16639_v7 = vpack.c.bf16 %v5690_v6, %v5689_v5  ;;  %v5719_v6 = vld [vmem:[%s19158_s13 + $0x60] sm:$0xff] }
 0xe0e   : > { %v5423_v10 = vadd.f32 %v5422_v9, %v5421_v8  ;;  %v5695_v8 = vld [vmem:[%s19157_s5 + $0x20] sm:$0xff]  ;;  %v5696_v9 = vld [vmem:[%s19157_s5 + $0x28] sm:$0xff] }
 0xe12   : > { %v5415_v12 = vpop.f32.mrb[46].mxu1 }
 0xe13   : > { %v5424_v14 = vsel %vm1425_vm1, %v5415_v12, 0.0  ;;  %v15578_v15 = vpop.f32.mrb[47].mxu1  ;;  %v5697_v12 = vld [vmem:[%s19157_s5 + $0x30] sm:$0xff] }
 0xe14   : > { %v5425_v16 = vadd.f32 %v5424_v14, %v5423_v10  ;;  %v16648_v10 = vpack.c.bf16 %v5696_v9, %v5695_v8  ;;  %v5703_v15 = vld [vmem:[%s19157_s5 + $0x60] sm:$0xff] }
 0xe16   : > { %v5432_v17 = vadd.f32 %v14240_v13, %v5425_v16  ;;  %v5698_v13 = vld [vmem:[%s19157_s5 + $0x38] sm:$0xff]  ;;  %v5704_v16 = vld [vmem:[%s19157_s5 + $0x68] sm:$0xff] }
 0xe17   : > { %v16651_v14 = vpack.c.bf16 %v5698_v13, %v5697_v12  ;;  %v5722_v12 = vld [vmem:[%s19158_s13 + $0x78] sm:$0xff] }
 0xe18   : > { %v5433_v19 = vadd.f32 %v5432_v17, %v17805_v27  ;;  %v14247_v27 = vld [vmem:[%s19129_s30 + $0x30] sm:$0xff]  ;;  %v16660_v17 = vpack.c.bf16 %v5704_v16, %v5703_v15  ;;  %s19175_s30 = sld [smem:[#allocation40_spill]] }
 0xe19   : > { %v16603_v30 = vpack.c.bf16 %v14248_v29, %v14247_v27  ;;  %v5685_v29 = vld [vmem:[%s19154_s3 + $0x50] sm:$0xff] }
 0xe1a   : > { %v5438_v20 = vsel %vm1425_vm1, %v5433_v19, 0.0 }
 0xe1b   : > { %5439 = vadd.xlane.f32.xlu0 %v5438_v20  ;;  %16604 = vmatpush3.bf16.msra.mxu0 %v16603_v30  ;;  %v5706_v20 = vld [vmem:[%s19157_s5 + $0x78] sm:$0xff] }
 0xe1c   : > { %16617 = vmatprep.subr.bf16.mxu0 %v17251_v3  ;;  %v5686_v30 = vld [vmem:[%s19154_s3 + $0x58] sm:$0xff] }
 0xe1d   : > { %v16633_v31 = vpack.c.bf16 %v5686_v30, %v5685_v29  ;;  %v14278_v30 = vld [vmem:[%s19159_s8 + $0x3] ss:$0 sm:$0xff] }
 0xea8   : > { %v5440_v21 = vpop.xlane.xlu0 %5439 }
 0xea9   : > { %v5441_v22 = vmul.f32 0.03125, %v5440_v21 }
 0xeab   : > { %v5442_v18 = vsub.f32 %v5433_v19, %v5441_v22  ;;  %v5705_v19 = vld [vmem:[%s19157_s5 + $0x70] sm:$0xff]  ;;  %v14250_v22 = vld [vmem:[%s19138_s6 + $0x1] ss:$0 sm:$0xff]  ;;  %s19161_s6 = sld [smem:[#allocation28_spill]] }
 0xeac   : > { %v16663_v21 = vpack.c.bf16 %v5706_v20, %v5705_v19 }
 0xead   : > { %v5443_v23 = vmul.f32 %v5442_v18, %v5442_v18 }
 0xeaf   : > { %v5444_v24 = vsel %vm1425_vm1, %v5443_v23, 0.0  ;;  %v5684_v23 = vld [vmem:[%s19154_s3 + $0x48] sm:$0xff] }
 0xeb0   : > { %5445 = vadd.xlane.f32.xlu1 %v5444_v24 }
 0xf3d   : > { %v5446_v40 = vpop.xlane.xlu1 %5445 }
 0xf3e   : > { %v5447_v41 = vmul.f32 0.03125, %v5446_v40  ;;  %v5699_v40 = vld [vmem:[%s19157_s5 + $0x40] sm:$0xff] }
 0xf40   : > { %v5448_v42 = vadd.f32 1e-05, %v5447_v41  ;;  %v5700_v41 = vld [vmem:[%s19157_s5 + $0x48] sm:$0xff] }
 0xf42   : > { %17063 = vrsqrt.f32 %v5448_v42  ;;  %v16654_v42 = vpack.c.bf16 %v5700_v41, %v5699_v40 }
 0xf4c   : > { %v17064_v43 = vpop.eup %17063 }
 0xf4d   : > { %v5450_v45 = vmul.f32 %v17064_v43, %v5442_v18  ;;  %v5683_v18 = vld [vmem:[%s19154_s3 + $0x40] sm:$0xff]  ;;  %v5701_v43 = vld [vmem:[%s19157_s5 + $0x50] sm:$0xff] }
 0xf4e   : > { %v16630_v28 = vpack.c.bf16 %v5684_v23, %v5683_v18  ;;  %v14275_v18 = vld [vmem:[%s19159_s8] ss:$0 sm:$0xff] }
 0xf4f   : > { %v5457_v49 = vmul.f32 %v14243_v44, %v5450_v45  ;;  %v5702_v44 = vld [vmem:[%s19157_s5 + $0x58] sm:$0xff] }
 0xf50   : > { %v16657_v45 = vpack.c.bf16 %v5702_v44, %v5701_v43 }
 0xf51   : > { %v18019_v51 = vadd.f32 %v14244_v48, %v5457_v49  ;;  %v16666_v48 = vpack.c.bf16 %v5708_v47, %v5707_v46  ;;  %v5709_v49 = vld [vmem:[%s19158_s13 + $0x10] sm:$0xff]  ;;  %v14284_v46 = vld [vmem:[%s19161_s6 + $0x1] ss:$0 sm:$0xff] }
 0xf53   : > { %15588 = vmatmul.mubr.msk.f32.vlgmr.msra.gmra.mrb[52].mxu0 %vm1425_vm1, %v18019_v51 }
 0xf54   : > { %16619 = vmatpush3.bf16.msra.mxu0 %v16618_v50  ;;  %15617 = vmatprep.mubr.msk.f32.mxu0 %vm17252_vm0, %v17253_v11  ;;  %v5710_v50 = vld [vmem:[%s19158_s13 + $0x18] sm:$0xff] }
 0xf55   : > { %16620 = vmatprep.subr.bf16.mxu0 %v17251_v3  ;;  %v16669_v52 = vpack.c.bf16 %v5710_v50, %v5709_v49 }
 0xf58   : > { %16622 = vmatpush3.bf16.msra.mxu0 %v16621_v54  ;;  %v5711_v54 = vld [vmem:[%s19158_s13 + $0x20] sm:$0xff] }
 0xf59   : > { %16623 = vmatprep.subr.bf16.mxu0 %v17251_v3 }
 0xf5b   : > { %15618 = vmatmul.mubr.msk.f32.vlgmr.msra.gmra.mrb[54].mxu0 %vm1425_vm1, %v18033_v57 }
 0xf5c   : > { %16625 = vmatpush3.bf16.msra.mxu0 %v16624_v58  ;;  %15628 = vmatprep.mubr.msk.f32.mxu0 %vm17252_vm0, %v17253_v11  ;;  %v16672_v58 = vpack.c.bf16 %v5712_v55, %v5711_v54  ;;  %v6959_v55 = vlaneseq }
 0xf5d   : > { %16626 = vmatprep.subr.bf16.mxu0 %v17251_v3 }
 0xf60   : > { %16628 = vmatpush3.bf16.msra.mxu0 %v16627_v0  ;;  %v5717_v0 = vld [vmem:[%s19158_s13 + $0x50] sm:$0xff] }
 0xf61   : > { %16635 = vmatprep.subr.bf16.mxu0 %v17251_v3  ;;  %v16681_v5 = vpack.c.bf16 %v5718_v2, %v5717_v0 }
 0xf63   : > { %15629 = vmatmul.mubr.msk.f32.vlgmr.msra.gmra.mrb[56].mxu0 %vm1425_vm1, %v18033_v57 }
 0xf64   : > { %16637 = vmatpush3.bf16.msra.mxu0 %v16636_v4  ;;  %15650 = vmatprep.mubr.msk.f32.mxu0 %vm17252_vm0, %v17253_v11 }
 0xf65   : > { %16638 = vmatprep.subr.bf16.mxu0 %v17251_v3 }
 0xf68   : > { %16640 = vmatpush3.bf16.msra.mxu0 %v16639_v7  ;;  %v5720_v7 = vld [vmem:[%s19158_s13 + $0x68] sm:$0xff] }
 0xf69   : > { %16647 = vmatprep.subr.bf16.mxu0 %v17251_v3  ;;  %v16684_v9 = vpack.c.bf16 %v5720_v7, %v5719_v6 }
 0xf6b   : > { %15651 = vmatmul.mubr.msk.f32.vlgmr.msra.gmra.mrb[58].mxu0 %vm1425_vm1, %v18033_v57 }
 0xf6c   : > { %16649 = vmatpush3.bf16.msra.mxu0 %v16648_v10  ;;  %15672 = vmatprep.mubr.msk.f32.mxu0 %vm17252_vm0, %v17253_v11  ;;  %v5721_v10 = vld [vmem:[%s19158_s13 + $0x70] sm:$0xff] }
 0xf6d   : > { %16650 = vmatprep.subr.bf16.mxu0 %v17251_v3  ;;  %v16687_v13 = vpack.c.bf16 %v5722_v12, %v5721_v10 }
 0xf70   : > { %16652 = vmatpush3.bf16.msra.mxu0 %v16651_v14 }
 0xf71   : > { %16659 = vmatprep.subr.bf16.mxu0 %v17251_v3 }
 0xf73   : > { %15673 = vmatmul.mubr.msk.f32.vlgmr.msra.gmra.mrb[60].mxu0 %vm1425_vm1, %v18033_v57 }
 0xf74   : > { %16661 = vmatpush3.bf16.msra.mxu0 %v16660_v17  ;;  %15694 = vmatprep.mubr.msk.f32.mxu0 %vm17252_vm0, %v17253_v11 }
 0xf75   : > { %16662 = vmatprep.subr.bf16.mxu0 %v17251_v3 }
 0xf78   : > { %16664 = vmatpush3.bf16.msra.mxu0 %v16663_v21 }
 0xf79   : > { %16671 = vmatprep.subr.bf16.mxu0 %v17251_v3 }
 0xf7b   : > { %15695 = vmatmul.mubr.msk.f32.vlgmr.msra.gmra.mrb[62].mxu0 %vm1425_vm1, %v18033_v57 }
 0xf7c   : > { %15716 = vmatprep.mubr.msk.f32.mxu0 %vm17252_vm0, %v17253_v11  ;;  %16673 = vmatpush3.bf16.msra.mxu0 %v16672_v58  ;;  %v6962_v58 = vand.u32 127, %v6959_v55 }
 0xf7d   : > { %16674 = vmatprep.subr.bf16.mxu0 %v17251_v3 }
 0xf80   : > { %16676 = vmatpush3.bf16.msra.mxu0 %v16675_v1 }
 0xf81   : > { %16683 = vmatprep.subr.bf16.mxu0 %v17251_v3 }
 0xf83   : > { %15717 = vmatmul.mubr.msk.f32.vlgmr.msra.gmra.mrb[64].mxu0 %vm1425_vm1, %v18033_v57 }
 0xf84   : > { %16685 = vmatpush3.bf16.msra.mxu0 %v16684_v9  ;;  %15738 = vmatprep.mubr.msk.f32.mxu0 %vm17252_vm0, %v17253_v11 }
 0xf85   : > { %16686 = vmatprep.subr.bf16.mxu0 %v17251_v3 }
 0xf88   : > { %16688 = vmatpush3.bf16.msra.mxu0 %v16687_v13 }
 0xf89   : > { %15751 = vmatprep.subr.mxu0 %v17253_v11 }
 0xf8b   : > { %15739 = vmatmul.mubr.msk.f32.vlgmr.msra.gmra.mrb[66].mxu0 %vm1425_vm1, %v18033_v57 }
 0xf8c   : > { %15753 = vmatprep.mubr.msk.f32.mxu0 %vm17252_vm0, %v17253_v11 }
0x1026   : > { %v5547_v24 = vpop.f32.mrb[52].mxu0 }
0x1027   : > { %v5548_v25 = vadd.f32 %v14250_v22, %v5547_v24  ;;  %v15589_v26 = vpop.f32.mrb[53].mxu0  ;;  %v14276_v24 = vld [vmem:[%s19159_s8 + $0x1] ss:$0 sm:$0xff] }
0x1029   : > { %v5551_v27 = vmax.f32 %v5548_v25, 0.0  ;;  %v14267_v25 = vld [vmem:[%s19160_s26] ss:$0 sm:$0xff] }
0x102b   : > { %15607 = vmatmul.mubr.msk.f32.vlgmr.msra.gmra.mrb[48].mxu1 %vm3395_vm3, %v5551_v27 }
0x102c   : > { %16631 = vmatpush3.bf16.msra.mxu1 %v16630_v28  ;;  %15639 = vmatprep.mubr.msk.f32.mxu1 %vm17252_vm0, %v17253_v11 }
0x102d   : > { %16632 = vmatprep.subr.bf16.mxu1 %v17251_v3 }
0x102e   : > { %v18092_v34 = vpop.f32.mrb[54].mxu0 }
0x102f   : > { %v15619_v35 = vpop.f32.mrb[55].mxu0  ;;  %v5834_v29 = vadd.f32 %v14267_v25, %v18092_v34  ;;  %v14270_v34 = vld [vmem:[%s19160_s26 + $0x3] ss:$0 sm:$0xff] }
0x1030   : > { %16634 = vmatpush3.bf16.msra.mxu1 %v16633_v31  ;;  %v14268_v31 = vld [vmem:[%s19160_s26 + $0x1] ss:$0 sm:$0xff] }
0x1031   : > { %16641 = vmatprep.subr.bf16.mxu1 %v17251_v3 }
0x1033   : > { %15640 = vmatmul.mubr.msk.f32.vlgmr.msra.gmra.mrb[50].mxu1 %vm1425_vm1, %v18033_v57 }
0x1034   : > { %16643 = vmatpush3.bf16.msra.mxu1 %v16642_v36  ;;  %15661 = vmatprep.mubr.msk.f32.mxu1 %vm17252_vm0, %v17253_v11 }
0x1035   : > { %16644 = vmatprep.subr.bf16.mxu1 %v17251_v3 }
0x1036   : > { %v18122_v53 = vpop.f32.mrb[56].mxu0 }
0x1037   : > { %v15630_v56 = vpop.f32.mrb[57].mxu0  ;;  %v5904_v35 = vadd.f32 %v14268_v31, %v18122_v53 }
0x1038   : > { %16646 = vmatpush3.bf16.msra.mxu1 %v16645_v39  ;;  %v6960_v56 = vshrl.u32 %v6959_v55, 7 }
0x1039   : > { %16653 = vmatprep.subr.bf16.mxu1 %v17251_v3 }
0x103a   : > { %vm18199_vm4 = vcmp.gt.s32.totalorder %v6962_v58, %v6960_v56 }
0x103b   : > { %15662 = vmatmul.mubr.msk.f32.vlgmr.msra.gmra.mrb[52].mxu1 %vm1425_vm1, %v18033_v57 }
0x103c   : > { %16655 = vmatpush3.bf16.msra.mxu1 %v16654_v42  ;;  %15683 = vmatprep.mubr.msk.f32.mxu1 %vm17252_vm0, %v17253_v11  ;;  %v14283_v42 = vld [vmem:[%s19161_s6] ss:$0 sm:$0xff] }
0x103d   : > { %16656 = vmatprep.subr.bf16.mxu1 %v17251_v3 }
0x103e   : > { %v6043_v4 = vpop.f32.mrb[58].mxu0 }
0x103f   : > { %v15652_v8 = vpop.f32.mrb[59].mxu0  ;;  %v6044_v41 = vadd.f32 %v14270_v34, %v6043_v4 }
0x1040   : > { %16658 = vmatpush3.bf16.msra.mxu1 %v16657_v45 }
0x1041   : > { %16665 = vmatprep.subr.bf16.mxu1 %v17251_v3 }
0x1043   : > { %15684 = vmatmul.mubr.msk.f32.vlgmr.msra.gmra.mrb[54].mxu1 %vm1425_vm1, %v18033_v57 }
0x1044   : > { %16667 = vmatpush3.bf16.msra.mxu1 %v16666_v48  ;;  %15705 = vmatprep.mubr.msk.f32.mxu1 %vm17252_vm0, %v17253_v11 }
0x1045   : > { %16668 = vmatprep.subr.bf16.mxu1 %v17251_v3 }
0x1046   : > { %v6207_v14 = vpop.f32.mrb[60].mxu0 }
0x1047   : > { %v15674_v15 = vpop.f32.mrb[61].mxu0  ;;  %v6208_v27 = vadd.f32 %v14276_v24, %v6207_v14 }
0x1048   : > { %16670 = vmatpush3.bf16.msra.mxu1 %v16669_v52 }
0x1049   : > { %16677 = vmatprep.subr.bf16.mxu1 %v17251_v3 }
0x104b   : > { %15706 = vmatmul.mubr.msk.f32.vlgmr.msra.gmra.mrb[56].mxu1 %vm1425_vm1, %v18033_v57 }
0x104c   : > { %16679 = vmatpush3.bf16.msra.mxu1 %v16678_v61  ;;  %15727 = vmatprep.mubr.msk.f32.mxu1 %vm17252_vm0, %v17253_v11 }
0x104d   : > { %16680 = vmatprep.subr.bf16.mxu1 %v17251_v3 }
0x104e   : > { %v6347_v16 = vpop.f32.mrb[62].mxu0 }
0x104f   : > { %v15696_v17 = vpop.f32.mrb[63].mxu0  ;;  %v6348_v33 = vadd.f32 %v14278_v30, %v6347_v16 }
0x1050   : > { %16682 = vmatpush3.bf16.msra.mxu1 %v16681_v5 }
0x1051   : > { %15741 = vmatprep.subr.mxu1 %v17253_v11 }
0x1053   : > { %15728 = vmatmul.mubr.msk.f32.vlgmr.msra.gmra.mrb[58].mxu1 %vm1425_vm1, %v18033_v57 }
0x1054   : > { %15743 = vmatprep.mubr.msk.f32.mxu1 %vm17252_vm0, %v17253_v11 }
0x1056   : > { %v6511_v47 = vpop.f32.mrb[64].mxu0 }
0x1057   : > { %v6512_v48 = vadd.f32 %v14284_v46, %v6511_v47  ;;  %v15718_v49 = vpop.f32.mrb[65].mxu0  ;;  %v14286_v47 = vld [vmem:[%s19161_s6 + $0x3] ss:$0 sm:$0xff] }
0x105e   : > { %v18197_v53 = vpop.f32.mrb[66].mxu0 }
0x105f   : > { %v15740_v54 = vpop.f32.mrb[67].mxu0 }
0x1060   : > { %v6652_v54 = vadd.f32 %v14286_v47, %v18197_v53 }
0x10fe   : > { %v18159_v19 = vpop.f32.mrb[48].mxu1 }
0x10ff   : > { %v15608_v20 = vpop.f32.mrb[49].mxu1 }
0x1106   : > { %v5973_v21 = vpop.f32.mrb[50].mxu1 }
0x1107   : > { %v15641_v22 = vpop.f32.mrb[51].mxu1  ;;  %v5974_v40 = vadd.f32 %v14269_v37, %v5973_v21 }
0x110e   : > { %v6137_v23 = vpop.f32.mrb[52].mxu1 }
0x110f   : > { %v6138_v26 = vadd.f32 %v14275_v18, %v6137_v23  ;;  %v15663_v28 = vpop.f32.mrb[53].mxu1 }
0x1111   : > { %15742 = vmatpush3.xpose.msk.msra.mxu1 %vm2317_vm2, %v6138_v26 }
0x1112   : > { %15746 = vmatprep.subr.mxu1 %v17253_v11 }
0x1114   : > { %15744 = vmatmul.mubr.msk.f32.vlgmr.msra.gmra.mrb[60].mxu1 %vm2317_vm2, %v5834_v29  ;;  %v14261_v29 = vld [vmem:[%s19151_s16 + $0x1] ss:$0 sm:$0xff]  ;;  %s19166_s16 = sld [smem:[#allocation33_spill]] }
0x1115   : > { %15747 = vmatpush3.xpose.msk.msra.mxu1 %vm2317_vm2, %v6208_v27  ;;  %15748 = vmatprep.mubr.msk.f32.mxu1 %vm17252_vm0, %v17253_v11  ;;  %v5639_v31 = vadd.f32 %v14261_v29, %v18159_v19 }
0x1116   : > { %v6277_v36 = vpop.f32.mrb[54].mxu1  ;;  %15756 = vmatprep.subr.mxu1 %v17253_v11 }
0x1117   : > { %v6278_v38 = vadd.f32 %v14277_v32, %v6277_v36  ;;  %v15685_v39 = vpop.f32.mrb[55].mxu1  ;;  %v5642_v37 = vadd.f32 %v5639_v31, %v18019_v51 }
0x1118   : > { %15749 = vmatmul.mubr.msk.f32.vlgmr.msra.gmra.mrb[62].mxu1 %vm2317_vm2, %v5904_v35 }
0x1119   : > { %15752 = vmatpush3.xpose.msk.msra.mxu0 %vm2317_vm2, %v6278_v38  ;;  %15757 = vmatpush3.xpose.msk.msra.mxu1 %vm2317_vm2, %v6348_v33  ;;  %v5647_v38 = vsel %vm1425_vm1, %v5642_v37, 0.0 }
0x111a   : > { %15758 = vmatprep.mubr.msk.f32.mxu1 %vm17252_vm0, %v17253_v11  ;;  %15761 = vmatprep.subr.mxu0 %v17253_v11 }
0x111b   : > { %15766 = vmatprep.subr.mxu1 %v17253_v11 }
0x111c   : > { %15754 = vmatmul.mubr.msk.f32.vlgmr.msra.gmra.mrb[68].mxu0 %vm2317_vm2, %v5974_v40  ;;  %15759 = vmatmul.mubr.msk.f32.vlgmr.msra.gmra.mrb[64].mxu1 %vm2317_vm2, %v6044_v41 }
0x111d   : > { %15763 = vmatprep.mubr.msk.f32.mxu0 %vm17252_vm0, %v17253_v11  ;;  %15768 = vmatprep.mubr.msk.f32.mxu1 %vm17252_vm0, %v17253_v11 }
0x111e   : > { %v6441_v43 = vpop.f32.mrb[56].mxu1  ;;  %15767 = vmatpush3.msra.mxu1 %v6512_v48 }
0x111f   : > { %v6442_v44 = vadd.f32 %v14283_v42, %v6441_v43  ;;  %v15707_v45 = vpop.f32.mrb[57].mxu1  ;;  %15776 = vmatprep.subr.mxu1 %v17253_v11  ;;  %v14285_v42 = vld [vmem:[%s19161_s6 + $0x2] ss:$0 sm:$0xff] }
0x1121   : > { %15762 = vmatpush3.msra.mxu0 %v6442_v44 }
0x1122   : > { %15771 = vmatprep.subr.mxu0 %v17253_v11 }
0x1126   : > { %v18194_v50 = vpop.f32.mrb[58].mxu1 }
0x1127   : > { %v15729_v52 = vpop.f32.mrb[59].mxu1  ;;  %v6582_v45 = vadd.f32 %v14285_v42, %v18194_v50  ;;  %v7648_v42 = vld [vmem:[%s19166_s16 + $0x30] sm:$0xff] }
0x11e7   : > { %v6727_v60 = vpop.f32.mrb[60].mxu1 }
0x11e8   : > { %v6966_v61 = vsel %vm18199_vm4, -inf, %v6727_v60  ;;  %v15745_v62 = vpop.f32.mrb[61].mxu1 }
0x11e9   : > { %v6970_v63 = vsel %vm2317_vm2, %v6966_v61, -inf  ;;  %v5736_v62 = vld [vmem:[%s19164_s12 + $0x8] sm:$0xff] }
0x11ea   : > { %6971 = vmax.xlane.f32.xlu0 %v6970_v63  ;;  %v5737_v63 = vld [vmem:[%s19164_s12 + $0x10] sm:$0xff] }
0x11eb   : > { %v6803_v0 = vpop.f32.mrb[62].mxu1 }
0x11ec   : > { %v6967_v1 = vsel %vm18199_vm4, -inf, %v6803_v0  ;;  %v15750_v2 = vpop.f32.mrb[63].mxu1 }
0x11ed   : > { %v6973_v4 = vsel %vm2317_vm2, %v6967_v1, -inf  ;;  %v5738_v2 = vld [vmem:[%s19164_s12 + $0x18] sm:$0xff] }
0x11ee   : > { %6974 = vmax.xlane.f32.xlu1 %v6973_v4 }
0x11ef   : > { %v6879_v5 = vpop.f32.mrb[68].mxu0  ;;  %v6955_v6 = vpop.f32.mrb[64].mxu1 }
0x11f0   : > { %v6968_v7 = vsel %vm18199_vm4, -inf, %v6879_v5  ;;  %v6969_v8 = vsel %vm18199_vm4, -inf, %v6955_v6  ;;  %v15755_v9 = vpop.f32.mrb[69].mxu0  ;;  %v15760_v10 = vpop.f32.mrb[65].mxu1 }
0x11f1   : > { %v6979_v12 = vsel %vm2317_vm2, %v6969_v8, -inf  ;;  %v6976_v13 = vsel %vm2317_vm2, %v6968_v7, -inf }
0x11f2   : > { %6980 = vmax.xlane.f32.xlu1 %v6979_v12  ;;  %6977 = vmax.xlane.f32.xlu0 %v6976_v13 }
0x1277   : > { %v6972_v14 = vpop.xlane.xlu0 %6971 }
0x1278   : > { %v6982_v15 = vsub.f32 %v6966_v61, %v6972_v14  ;;  %v5735_v61 = vld [vmem:[%s19164_s12] sm:$0xff] }
0x127a   : > { %v6986_v16 = vmul.f32 1.442695, %v6982_v15 }
0x127b   : > { %v6975_v17 = vpop.xlane.xlu1 %6974 }
0x127c   : > { %17065 = vpow2.f32 %v6986_v16  ;;  %v6983_v20 = vsub.f32 %v6967_v1, %v6975_v17 }
0x127e   : > { %v6988_v21 = vmul.f32 1.442695, %v6983_v20 }
0x127f   : > { %v6981_v22 = vpop.xlane.xlu1 %6980  ;;  %v6978_v18 = vpop.xlane.xlu0 %6977 }
0x1280   : > { %17067 = vpow2.f32 %v6988_v21  ;;  %v6985_v23 = vsub.f32 %v6969_v8, %v6981_v22  ;;  %v6984_v24 = vsub.f32 %v6968_v7, %v6978_v18 }
0x1282   : > { %v6992_v25 = vmul.f32 1.442695, %v6985_v23  ;;  %v6990_v26 = vmul.f32 1.442695, %v6984_v24 }
0x1284   : > { %17069 = vpow2.f32 %v6992_v25  ;;  %v14307_v25 = vld [vmem:[%s19165_s14] ss:$0 sm:$0xff] }
0x1285   : > { %17071 = vpow2.f32 %v6990_v26 }
0x1286   : > { %v17066_v28 = vpop.eup %17065 }
0x1287   : > { %v6994_v27 = vsel %vm2317_vm2, %v17066_v28, 0.0 }
0x1288   : > { %6995 = vadd.xlane.f32.xlu0 %v6994_v27 }
0x128a   : > { %v17068_v30 = vpop.eup %17067 }
0x128b   : > { %v6997_v32 = vsel %vm2317_vm2, %v17068_v30, 0.0 }
0x128c   : > { %6998 = vadd.xlane.f32.xlu1 %v6997_v32 }
0x128e   : > { %v17070_v33 = vpop.eup %17069 }
0x128f   : > { %v17072_v35 = vpop.eup %17071  ;;  %v7003_v36 = vsel %vm2317_vm2, %v17070_v33, 0.0 }
0x1290   : > { %7004 = vadd.xlane.f32.xlu1 %v7003_v36  ;;  %v7000_v34 = vsel %vm2317_vm2, %v17072_v35, 0.0 }
0x1291   : > { %7001 = vadd.xlane.f32.xlu0 %v7000_v34  ;;  %v7643_v34 = vld [vmem:[%s19166_s16 + $0x8] sm:$0xff] }
0x1294   : > { %5648 = vadd.xlane.f32.xlu1 %v5647_v38  ;;  %v7646_v38 = vld [vmem:[%s19166_s16 + $0x20] sm:$0xff] }
0x1315   : > { %v6996_v39 = vpop.xlane.xlu0 %6995 }
0x1316   : > { %17073 = vrcp.f32 %v6996_v39 }
0x1319   : > { %v6999_v19 = vpop.xlane.xlu1 %6998 }
0x131a   : > { %17075 = vrcp.f32 %v6999_v19  ;;  %v7647_v19 = vld [vmem:[%s19166_s16 + $0x28] sm:$0xff] }
0x131d   : > { %v7005_v40 = vpop.xlane.xlu1 %7004 }
0x131e   : > { %17077 = vrcp.f32 %v7005_v40  ;;  %v7002_v41 = vpop.xlane.xlu0 %7001  ;;  %v7644_v40 = vld [vmem:[%s19166_s16 + $0x10] sm:$0xff] }
0x131f   : > { %17079 = vrcp.f32 %v7002_v41  ;;  %v7645_v41 = vld [vmem:[%s19166_s16 + $0x18] sm:$0xff] }
0x1320   : > { %v17074_v43 = vpop.eup %17073 }
0x1321   : > { %v7007_v44 = vmul.f32 %v17074_v43, %v17066_v28  ;;  %v5649_v51 = vpop.xlane.xlu1 %5648  ;;  %v16693_v43 = vpack.c.bf16 %v7645_v41, %v7644_v40 }
0x1322   : > { %v5650_v46 = vmul.f32 0.03125, %v5649_v51 }
0x1323   : > { %15764 = vmatmul.mubr.msk.f32.vlgmr.msra.gmra.mrb[70].mxu0 %vm2317_vm2, %v7007_v44  ;;  %v7649_v44 = vld [vmem:[%s19166_s16 + $0x38] sm:$0xff] }
0x1324   : > { %v17076_v48 = vpop.eup %17075  ;;  %v18227_v49 = vsub.f32 %v5642_v37, %v5650_v46  ;;  %15772 = vmatpush3.msra.mxu0 %v6582_v45  ;;  %15773 = vmatprep.mubr.msk.f32.mxu0 %vm17252_vm0, %v17253_v11  ;;  %v7642_v37 = vld [vmem:[%s19166_s16] sm:$0xff]  ;;  %v16699_v51 = vpack.c.bf16 %v7649_v44, %v7648_v42 }
0x1325   : > { %v7009_v52 = vmul.f32 %v17076_v48, %v17068_v30  ;;  %15781 = vmatprep.subr.mxu0 %v17253_v11  ;;  %v16690_v39 = vpack.c.bf16 %v7643_v34, %v7642_v37  ;;  %v7669_v37 = vld [vmem:[%s19169_s21 + $0x58] sm:$0xff]  ;;  %v7672_v34 = vld [vmem:[%s19169_s21 + $0x70] sm:$0xff] }
0x1326   : > { %v5652_v50 = vmul.f32 %v18227_v49, %v18227_v49 }
0x1327   : > { %15769 = vmatmul.mubr.msk.f32.vlgmr.msra.gmra.mrb[66].mxu1 %vm2317_vm2, %v7009_v52 }
0x1328   : > { %v17078_v55 = vpop.eup %17077  ;;  %15777 = vmatpush3.msra.mxu1 %v6652_v54  ;;  %v5653_v56 = vsel %vm1425_vm1, %v5652_v50, 0.0  ;;  %15778 = vmatprep.mubr.msk.f32.mxu1 %vm17252_vm0, %v17253_v11 }
0x1329   : > { %v17080_v58 = vpop.eup %17079  ;;  %v7013_v60 = vmul.f32 %v17078_v55, %v17070_v33  ;;  %5654 = vadd.xlane.f32.xlu1 %v5653_v56  ;;  %15786 = vmatprep.subr.mxu1 %v17253_v11  ;;  %v14308_v55 = vld [vmem:[%s19167_s17] ss:$0 sm:$0xff] }
0x132a   : > { %v7011_v53 = vmul.f32 %v17080_v58, %v17072_v35  ;;  %v7650_v56 = vld [vmem:[%s19166_s16 + $0x40] sm:$0xff] }
0x132b   : > { %15779 = vmatmul.mubr.msk.f32.vlgmr.msra.gmra.mrb[68].mxu1 %vm2317_vm2, %v7013_v60  ;;  %v7651_v60 = vld [vmem:[%s19166_s16 + $0x48] sm:$0xff] }
0x132c   : > { %15774 = vmatmul.mubr.msk.f32.vlgmr.msra.gmra.mrb[72].mxu0 %vm2317_vm2, %v7011_v53  ;;  %15788 = vmatprep.mubr.msk.f32.mxu1 %vm17252_vm0, %v17253_v11  ;;  %v7654_v53 = vld [vmem:[%s19166_s16 + $0x60] sm:$0xff] }
0x132d   : > { %15783 = vmatprep.mubr.msk.f32.mxu0 %vm17252_vm0, %v17253_v11  ;;  %15782 = vmatpush3.msra.mxu0 %v5735_v61  ;;  %v7655_v61 = vld [vmem:[%s19166_s16 + $0x68] sm:$0xff] }
0x132e   : > { %15791 = vmatprep.subr.mxu0 %v17253_v11  ;;  %15787 = vmatpush3.msra.mxu1 %v5736_v62  ;;  %v14309_v62 = vld [vmem:[%s19168_s19] ss:$0 sm:$0xff] }
0x132f   : > { %15796 = vmatprep.subr.mxu1 %v17253_v11 }
0x13b6   : > { %v5655_v48 = vpop.xlane.xlu1 %5654 }
0x13b7   : > { %v5656_v52 = vmul.f32 0.03125, %v5655_v48 }
0x13b9   : > { %v5657_v54 = vadd.f32 1e-05, %v5656_v52 }
0x13f6   : > { %v7083_v0 = vpop.f32.mrb[70].mxu0 }
0x13f7   : > { %v15765_v1 = vpop.f32.mrb[71].mxu0  ;;  %15784 = vmatmul.mubr.msk.f32.vlgmr.msra.gmra.mrb[74].mxu0 %vm2317_vm2, %v7083_v0  ;;  %v16702_v0 = vpack.c.bf16 %v7651_v60, %v7650_v56 }
0x13f8   : > { %15792 = vmatpush3.msra.mxu0 %v5737_v63  ;;  %15793 = vmatprep.mubr.msk.f32.mxu0 %vm17252_vm0, %v17253_v11  ;;  %v16708_v1 = vpack.c.bf16 %v7655_v61, %v7654_v53 }
0x13f9   : > { %16689 = vmatprep.subr.bf16.mxu0 %v17251_v3 }
0x13fa   : > { %v7156_v4 = vpop.f32.mrb[66].mxu1 }
0x13fb   : > { %v15770_v5 = vpop.f32.mrb[67].mxu1  ;;  %15789 = vmatmul.mubr.msk.f32.vlgmr.msra.gmra.mrb[70].mxu1 %vm2317_vm2, %v7156_v4 }
0x13fc   : > { %15797 = vmatpush3.msra.mxu1 %v5738_v2  ;;  %15798 = vmatprep.mubr.msk.f32.mxu1 %vm17252_vm0, %v17253_v11  ;;  %v7652_v2 = vld [vmem:[%s19166_s16 + $0x50] sm:$0xff]  ;;  %v7653_v5 = vld [vmem:[%s19166_s16 + $0x58] sm:$0xff] }
0x13fd   : > { %16695 = vmatprep.subr.bf16.mxu1 %v17251_v3 }
0x13fe   : > { %v7302_v6 = vpop.f32.mrb[68].mxu1 }
0x13ff   : > { %v7229_v7 = vpop.f32.mrb[72].mxu0  ;;  %v15780_v8 = vpop.f32.mrb[69].mxu1  ;;  %15799 = vmatmul.mubr.msk.f32.vlgmr.msra.gmra.mrb[72].mxu1 %vm2317_vm2, %v7302_v6  ;;  %v7656_v6 = vld [vmem:[%s19166_s16 + $0x70] sm:$0xff] }
0x1400   : > { %v15775_v9 = vpop.f32.mrb[73].mxu0  ;;  %15794 = vmatmul.mubr.msk.f32.vlgmr.msra.gmra.mrb[76].mxu0 %vm2317_vm2, %v7229_v7  ;;  %15820 = vmatprep.mubr.msk.f32.mxu1 %vm17252_vm0, %v17253_v11  ;;  %v7657_v7 = vld [vmem:[%s19166_s16 + $0x78] sm:$0xff]  ;;  %v16705_v8 = vpack.c.bf16 %v7653_v5, %v7652_v2 }
0x1401   : > { %15809 = vmatprep.mubr.msk.f32.mxu0 %vm17252_vm0, %v17253_v11  ;;  %16691 = vmatpush3.bf16.msra.mxu0 %v16690_v39  ;;  %v16711_v9 = vpack.c.bf16 %v7657_v7, %v7656_v6 }
0x1402   : > { %16692 = vmatprep.subr.bf16.mxu0 %v17251_v3 }
0x1405   : > { %16694 = vmatpush3.bf16.msra.mxu0 %v16693_v43 }
0x1406   : > { %16701 = vmatprep.subr.bf16.mxu0 %v17251_v3 }
0x14ca   : > { %v7375_v10 = vpop.f32.mrb[74].mxu0 }
0x14cb   : > { %v15785_v12 = vpop.f32.mrb[75].mxu0  ;;  %v7598_v14 = vsel %vm1425_vm1, %v7375_v10, 0.0  ;;  %v7658_v10 = vld [vmem:[%s19169_s21] sm:$0xff] }
0x14cc   : > { %v7659_v12 = vld [vmem:[%s19169_s21 + $0x8] sm:$0xff] }
0x14ce   : > { %v7448_v13 = vpop.f32.mrb[70].mxu1 }
0x14cf   : > { %v7599_v15 = vsel %vm1425_vm1, %v7448_v13, 0.0  ;;  %v15790_v16 = vpop.f32.mrb[71].mxu1  ;;  %v7662_v13 = vld [vmem:[%s19169_s21 + $0x20] sm:$0xff] }
0x14d0   : > { %v7600_v17 = vadd.f32 %v7599_v15, %v7598_v14  ;;  %v7663_v14 = vld [vmem:[%s19169_s21 + $0x28] sm:$0xff]  ;;  %v16714_v16 = vpack.c.bf16 %v7659_v12, %v7658_v10 }
0x14d2   : > { %v7594_v20 = vpop.f32.mrb[72].mxu1 }
0x14d3   : > { %v7521_v21 = vpop.f32.mrb[76].mxu0  ;;  %v15800_v22 = vpop.f32.mrb[73].mxu1  ;;  %v7603_v26 = vsel %vm1425_vm1, %v7594_v20, 0.0  ;;  %v7660_v20 = vld [vmem:[%s19169_s21 + $0x10] sm:$0xff] }
0x14d4   : > { %v7601_v18 = vsel %vm1425_vm1, %v7521_v21, 0.0  ;;  %v15795_v23 = vpop.f32.mrb[77].mxu0  ;;  %v7661_v22 = vld [vmem:[%s19169_s21 + $0x18] sm:$0xff] }
0x14d5   : > { %v7602_v24 = vadd.f32 %v7601_v18, %v7600_v17  ;;  %v16720_v17 = vpack.c.bf16 %v7663_v14, %v7662_v13  ;;  %v7664_v18 = vld [vmem:[%s19169_s21 + $0x30] sm:$0xff]  ;;  %v7665_v23 = vld [vmem:[%s19169_s21 + $0x38] sm:$0xff] }
0x14d7   : > { %v7604_v28 = vadd.f32 %v7603_v26, %v7602_v24  ;;  %v14265_v24 = vld [vmem:[%s19152_s15 + $0x1] ss:$0 sm:$0xff]  ;;  %s19170_s15 = sld [smem:[#allocation35_spill]] }
0x14d8   : > { %v7666_v26 = vld [vmem:[%s19169_s21 + $0x40] sm:$0xff] }
0x14d9   : > { %v7611_v27 = vadd.f32 %v14307_v25, %v7604_v28  ;;  %v16723_v25 = vpack.c.bf16 %v7665_v23, %v7664_v18 }
0x14db   : > { %v7612_v29 = vadd.f32 %v7611_v27, %v18033_v57  ;;  %v16696_v57 = vpack.c.bf16 %v7647_v19, %v7646_v38  ;;  %v7667_v27 = vld [vmem:[%s19169_s21 + $0x48] sm:$0xff]  ;;  %v7673_v38 = vld [vmem:[%s19169_s21 + $0x78] sm:$0xff] }
0x14dc   : > { %v16735_v19 = vpack.c.bf16 %v7673_v38, %v7672_v34  ;;  %v14326_v38 = vld [vmem:[%s19173_s25] ss:$0 sm:$0xff] }
0x14dd   : > { %v7615_v30 = vsel %vm1425_vm1, %v7612_v29, 0.0  ;;  %16697 = vmatpush3.bf16.msra.mxu1 %v16696_v57  ;;  %v7674_v57 = vld [vmem:[%s19170_s15] sm:$0xff]  ;;  %v7675_v40 = vld [vmem:[%s19170_s15 + $0x8] sm:$0xff]  ;;  %v7684_v53 = vld [vmem:[%s19170_s15 + $0x50] sm:$0xff] }
0x14de   : > { %7616 = vadd.xlane.f32.xlu0 %v7615_v30  ;;  %16698 = vmatprep.subr.bf16.mxu1 %v17251_v3  ;;  %v7671_v30 = vld [vmem:[%s19169_s21 + $0x68] sm:$0xff]  ;;  %v7678_v41 = vld [vmem:[%s19170_s15 + $0x20] sm:$0xff]  ;;  %v16738_v43 = vpack.c.bf16 %v7675_v40, %v7674_v57  ;;  %v7685_v61 = vld [vmem:[%s19170_s15 + $0x58] sm:$0xff] }
0x14df   : > { %v7679_v42 = vld [vmem:[%s19170_s15 + $0x28] sm:$0xff] }
0x14e0   : > { %v16744_v44 = vpack.c.bf16 %v7679_v42, %v7678_v41  ;;  %v7687_v56 = vld [vmem:[%s19170_s15 + $0x68] sm:$0xff] }
0x14e1   : > { %16700 = vmatpush3.bf16.msra.mxu1 %v16699_v51  ;;  %v7676_v51 = vld [vmem:[%s19170_s15 + $0x10] sm:$0xff] }
0x14e2   : > { %16707 = vmatprep.subr.bf16.mxu1 %v17251_v3 }
0x156b   : > { %v7617_v31 = vpop.xlane.xlu0 %7616 }
0x156c   : > { %v7618_v32 = vmul.f32 0.03125, %v7617_v31  ;;  %v14266_v31 = vld [vmem:[%s19153_s10 + $0x1] ss:$0 sm:$0xff]  ;;  %s19171_s10 = sld [smem:[#allocation37_spill]] }
0x156e   : > { %v7619_v33 = vsub.f32 %v7612_v29, %v7618_v32  ;;  %v7670_v29 = vld [vmem:[%s19169_s21 + $0x60] sm:$0xff]  ;;  %v16726_v32 = vpack.c.bf16 %v7667_v27, %v7666_v26 }
0x1570   : > { %v7620_v35 = vmul.f32 %v7619_v33, %v7619_v33 }
0x1572   : > { %v7621_v36 = vsel %vm1425_vm1, %v7620_v35, 0.0  ;;  %v7668_v35 = vld [vmem:[%s19169_s21 + $0x50] sm:$0xff]  ;;  %v14318_v13 = vld [vmem:[%s19171_s10] ss:$0 sm:$0xff]  ;;  %v14319_v14 = vld [vmem:[%s19171_s10 + $0x1] ss:$0 sm:$0xff] }
0x1573   : > { %7622 = vadd.xlane.f32.xlu0 %v7621_v36  ;;  %v16729_v39 = vpack.c.bf16 %v7669_v37, %v7668_v35  ;;  %v14321_v26 = vld [vmem:[%s19171_s10 + $0x3] ss:$0 sm:$0xff] }
0x1600   : > { %v7623_v45 = vpop.xlane.xlu0 %7622 }
0x1601   : > { %v7624_v46 = vmul.f32 0.03125, %v7623_v45  ;;  %v7677_v45 = vld [vmem:[%s19170_s15 + $0x18] sm:$0xff] }
0x1602   : > { %v16741_v48 = vpack.c.bf16 %v7677_v45, %v7676_v51 }
0x1603   : > { %v7625_v47 = vadd.f32 1e-05, %v7624_v46  ;;  %v7680_v46 = vld [vmem:[%s19170_s15 + $0x30] sm:$0xff] }
0x1605   : > { %17081 = vrsqrt.f32 %v7625_v47  ;;  %v7681_v47 = vld [vmem:[%s19170_s15 + $0x38] sm:$0xff] }
0x1606   : > { %17083 = vrsqrt.f32 %v5657_v54  ;;  %v16747_v52 = vpack.c.bf16 %v7681_v47, %v7680_v46  ;;  %v7682_v54 = vld [vmem:[%s19170_s15 + $0x40] sm:$0xff] }
0x160f   : > { %v17082_v50 = vpop.eup %17081 }
0x1610   : > { %v7627_v58 = vmul.f32 %v17082_v50, %v7619_v33  ;;  %v17084_v15 = vpop.eup %17083  ;;  %v16732_v33 = vpack.c.bf16 %v7671_v30, %v7670_v29  ;;  %v7683_v50 = vld [vmem:[%s19170_s15 + $0x48] sm:$0xff]  ;;  %v14312_v29 = vld [vmem:[%s19172_s24 + $0x2] ss:$0 sm:$0xff]  ;;  %v14313_v30 = vld [vmem:[%s19172_s24 + $0x3] ss:$0 sm:$0xff] }
0x1611   : > { %v5659_v21 = vmul.f32 %v17084_v15, %v18227_v49  ;;  %v16717_v49 = vpack.c.bf16 %v7661_v22, %v7660_v20  ;;  %v14311_v20 = vld [vmem:[%s19172_s24 + $0x1] ss:$0 sm:$0xff] }
0x1612   : > { %v7634_v63 = vmul.f32 %v14308_v55, %v7627_v58  ;;  %v7686_v55 = vld [vmem:[%s19170_s15 + $0x60] sm:$0xff]  ;;  %v16750_v58 = vpack.c.bf16 %v7683_v50, %v7682_v54 }
0x1613   : > { %v5666_v28 = vmul.f32 %v14265_v24, %v5659_v21  ;;  %v16756_v60 = vpack.c.bf16 %v7687_v56, %v7686_v55 }
0x1614   : > { %v18293_v4 = vadd.f32 %v14309_v62, %v7634_v63  ;;  %v7688_v62 = vld [vmem:[%s19170_s15 + $0x70] sm:$0xff]  ;;  %v7689_v63 = vld [vmem:[%s19170_s15 + $0x78] sm:$0xff] }
0x1615   : > { %v18336_v36 = vadd.f32 %v14266_v31, %v5666_v28 }
0x1616   : > { %15810 = vmatmul.mubr.msk.f32.vlgmr.msra.gmra.mrb[78].mxu0 %vm1425_vm1, %v18293_v4  ;;  %15821 = vmatmul.mubr.msk.f32.vlgmr.msra.gmra.mrb[74].mxu1 %vm1425_vm1, %v18293_v4 }
0x1617   : > { %16703 = vmatpush3.bf16.msra.mxu0 %v16702_v0  ;;  %16709 = vmatpush3.bf16.msra.mxu1 %v16708_v1  ;;  %v16753_v0 = vpack.c.bf16 %v7685_v61, %v7684_v53  ;;  %v16759_v1 = vpack.c.bf16 %v7689_v63, %v7688_v62 }
0x1618   : > { %16704 = vmatprep.subr.bf16.mxu0 %v17251_v3  ;;  %16710 = vmatprep.subr.bf16.mxu1 %v17251_v3 }
0x1619   : > { %15831 = vmatprep.mubr.msk.f32.mxu0 %vm17252_vm0, %v17253_v11  ;;  %15842 = vmatprep.mubr.msk.f32.mxu1 %vm17252_vm0, %v17253_v11 }
0x161b   : > { %16706 = vmatpush3.bf16.msra.mxu0 %v16705_v8  ;;  %16712 = vmatpush3.bf16.msra.mxu1 %v16711_v9 }
0x161c   : > { %16713 = vmatprep.subr.bf16.mxu0 %v17251_v3  ;;  %16719 = vmatprep.subr.bf16.mxu1 %v17251_v3 }
0x161e   : > { %15832 = vmatmul.mubr.msk.f32.vlgmr.msra.gmra.mrb[80].mxu0 %vm1425_vm1, %v18293_v4  ;;  %15843 = vmatmul.mubr.msk.f32.vlgmr.msra.gmra.mrb[76].mxu1 %vm1425_vm1, %v18293_v4 }
0x161f   : > { %16715 = vmatpush3.bf16.msra.mxu0 %v16714_v16  ;;  %16721 = vmatpush3.bf16.msra.mxu1 %v16720_v17  ;;  %v14310_v17 = vld [vmem:[%s19172_s24] ss:$0 sm:$0xff] }
0x1620   : > { %16716 = vmatprep.subr.bf16.mxu0 %v17251_v3  ;;  %16722 = vmatprep.subr.bf16.mxu1 %v17251_v3 }
0x1621   : > { %15853 = vmatprep.mubr.msk.f32.mxu0 %vm17252_vm0, %v17253_v11  ;;  %15864 = vmatprep.mubr.msk.f32.mxu1 %vm17252_vm0, %v17253_v11 }
0x1623   : > { %16718 = vmatpush3.bf16.msra.mxu0 %v16717_v49  ;;  %16724 = vmatpush3.bf16.msra.mxu1 %v16723_v25  ;;  %v14320_v25 = vld [vmem:[%s19171_s10 + $0x2] ss:$0 sm:$0xff] }
0x1624   : > { %16725 = vmatprep.subr.bf16.mxu0 %v17251_v3  ;;  %16731 = vmatprep.subr.bf16.mxu1 %v17251_v3 }
0x1626   : > { %15854 = vmatmul.mubr.msk.f32.vlgmr.msra.gmra.mrb[82].mxu0 %vm1425_vm1, %v18336_v36  ;;  %15865 = vmatmul.mubr.msk.f32.vlgmr.msra.gmra.mrb[78].mxu1 %vm1425_vm1, %v18336_v36 }
0x1627   : > { %16727 = vmatpush3.bf16.msra.mxu0 %v16726_v32  ;;  %16733 = vmatpush3.bf16.msra.mxu1 %v16732_v33 }
0x1628   : > { %16728 = vmatprep.subr.bf16.mxu0 %v17251_v3  ;;  %16734 = vmatprep.subr.bf16.mxu1 %v17251_v3 }
0x1629   : > { %15875 = vmatprep.mubr.msk.f32.mxu0 %vm17252_vm0, %v17253_v11  ;;  %15886 = vmatprep.mubr.msk.f32.mxu1 %vm17252_vm0, %v17253_v11 }
0x162b   : > { %16730 = vmatpush3.bf16.msra.mxu0 %v16729_v39  ;;  %16736 = vmatpush3.bf16.msra.mxu1 %v16735_v19  ;;  %v14327_v39 = vld [vmem:[%s19173_s25 + $0x1] ss:$0 sm:$0xff] }
0x162c   : > { %16737 = vmatprep.subr.bf16.mxu0 %v17251_v3  ;;  %16743 = vmatprep.subr.bf16.mxu1 %v17251_v3 }
0x162e   : > { %15876 = vmatmul.mubr.msk.f32.vlgmr.msra.gmra.mrb[84].mxu0 %vm1425_vm1, %v18336_v36  ;;  %15887 = vmatmul.mubr.msk.f32.vlgmr.msra.gmra.mrb[80].mxu1 %vm1425_vm1, %v18336_v36 }
0x162f   : > { %16739 = vmatpush3.bf16.msra.mxu0 %v16738_v43  ;;  %16745 = vmatpush3.bf16.msra.mxu1 %v16744_v44 }
0x1630   : > { %16740 = vmatprep.subr.bf16.mxu0 %v17251_v3  ;;  %16746 = vmatprep.subr.bf16.mxu1 %v17251_v3 }
0x1631   : > { %15897 = vmatprep.mubr.msk.f32.mxu0 %vm17252_vm0, %v17253_v11  ;;  %15908 = vmatprep.mubr.msk.f32.mxu1 %vm17252_vm0, %v17253_v11 }
0x1633   : > { %16742 = vmatpush3.bf16.msra.mxu0 %v16741_v48  ;;  %16748 = vmatpush3.bf16.msra.mxu1 %v16747_v52 }
0x1634   : > { %16749 = vmatprep.subr.bf16.mxu0 %v17251_v3  ;;  %16755 = vmatprep.subr.bf16.mxu1 %v17251_v3 }
0x1636   : > { %15898 = vmatmul.mubr.msk.f32.vlgmr.msra.gmra.mrb[86].mxu0 %vm1425_vm1, %v18336_v36  ;;  %15909 = vmatmul.mubr.msk.f32.vlgmr.msra.gmra.mrb[82].mxu1 %vm1425_vm1, %v18336_v36 }
0x1637   : > { %16751 = vmatpush3.bf16.msra.mxu0 %v16750_v58  ;;  %16757 = vmatpush3.bf16.msra.mxu1 %v16756_v60 }
0x1638   : > { %16752 = vmatprep.subr.bf16.mxu0 %v17251_v3  ;;  %16758 = vmatprep.subr.bf16.mxu1 %v17251_v3 }
0x1639   : > { %15919 = vmatprep.mubr.msk.f32.mxu0 %vm17252_vm0, %v17253_v11  ;;  %15930 = vmatprep.mubr.msk.f32.mxu1 %vm17252_vm0, %v17253_v11 }
0x163b   : > { %16754 = vmatpush3.bf16.msra.mxu0 %v16753_v0  ;;  %16760 = vmatpush3.bf16.msra.mxu1 %v16759_v1 }
0x163c   : > { %15933 = vmatprep.subr.mxu0 %v17253_v11  ;;  %15938 = vmatprep.subr.mxu1 %v17253_v11 }
0x163e   : > { %15920 = vmatmul.mubr.msk.f32.vlgmr.msra.gmra.mrb[88].mxu0 %vm1425_vm1, %v18336_v36  ;;  %15931 = vmatmul.mubr.msk.f32.vlgmr.msra.gmra.mrb[84].mxu1 %vm1425_vm1, %v18336_v36 }
0x163f   : > { %15935 = vmatprep.mubr.msk.f32.mxu0 %vm17252_vm0, %v17253_v11  ;;  %15940 = vmatprep.mubr.msk.f32.mxu1 %vm17252_vm0, %v17253_v11 }
0x16e9   : > { %v7800_v2 = vpop.f32.mrb[78].mxu0  ;;  %v7870_v5 = vpop.f32.mrb[74].mxu1 }
0x16ea   : > { %v15811_v6 = vpop.f32.mrb[79].mxu0  ;;  %v15822_v7 = vpop.f32.mrb[75].mxu1  ;;  %v7801_v24 = vadd.f32 %v14310_v17, %v7800_v2  ;;  %v7871_v49 = vadd.f32 %v14311_v20, %v7870_v5 }
0x16f1   : > { %v7940_v8 = vpop.f32.mrb[80].mxu0  ;;  %v8010_v9 = vpop.f32.mrb[76].mxu1 }
0x16f2   : > { %v15833_v10 = vpop.f32.mrb[81].mxu0  ;;  %v15844_v12 = vpop.f32.mrb[77].mxu1  ;;  %v7941_v37 = vadd.f32 %v14312_v29, %v7940_v8  ;;  %v8011_v34 = vadd.f32 %v14313_v30, %v8010_v9 }
0x16f9   : > { %v8107_v15 = vpop.f32.mrb[82].mxu0  ;;  %v8177_v16 = vpop.f32.mrb[78].mxu1 }
0x16fa   : > { %v8108_v21 = vadd.f32 %v14318_v13, %v8107_v15  ;;  %v8178_v22 = vadd.f32 %v14319_v14, %v8177_v16  ;;  %v15855_v18 = vpop.f32.mrb[83].mxu0  ;;  %v15866_v23 = vpop.f32.mrb[79].mxu1 }
0x16fc   : > { %15934 = vmatpush3.xpose.msk.msra.mxu0 %vm2317_vm2, %v8108_v21  ;;  %15939 = vmatpush3.xpose.msk.msra.mxu1 %vm2317_vm2, %v8178_v22 }
0x16fd   : > { %15943 = vmatprep.subr.mxu0 %v17253_v11  ;;  %15948 = vmatprep.subr.mxu1 %v17253_v11 }
0x16ff   : > { %15936 = vmatmul.mubr.msk.f32.vlgmr.msra.gmra.mrb[90].mxu0 %vm2317_vm2, %v7801_v24  ;;  %15941 = vmatmul.mubr.msk.f32.vlgmr.msra.gmra.mrb[86].mxu1 %vm2317_vm2, %v7871_v49 }
0x1700   : > { %15945 = vmatprep.mubr.msk.f32.mxu0 %vm17252_vm0, %v17253_v11  ;;  %15950 = vmatprep.mubr.msk.f32.mxu1 %vm17252_vm0, %v17253_v11 }
0x1701   : > { %v8247_v28 = vpop.f32.mrb[84].mxu0  ;;  %v8317_v27 = vpop.f32.mrb[80].mxu1 }
0x1702   : > { %v8248_v31 = vadd.f32 %v14320_v25, %v8247_v28  ;;  %v8318_v32 = vadd.f32 %v14321_v26, %v8317_v27  ;;  %v15877_v33 = vpop.f32.mrb[85].mxu0  ;;  %v15888_v35 = vpop.f32.mrb[81].mxu1  ;;  %v14329_v26 = vld [vmem:[%s19173_s25 + $0x3] ss:$0 sm:$0xff]  ;;  %v14328_v27 = vld [vmem:[%s19173_s25 + $0x2] ss:$0 sm:$0xff] }
0x1704   : > { %15944 = vmatpush3.xpose.msk.msra.mxu0 %vm2317_vm2, %v8248_v31  ;;  %15949 = vmatpush3.xpose.msk.msra.mxu1 %vm2317_vm2, %v8318_v32 }
0x1705   : > { %15953 = vmatprep.subr.mxu0 %v17253_v11  ;;  %15958 = vmatprep.subr.mxu1 %v17253_v11 }
0x1707   : > { %15946 = vmatmul.mubr.msk.f32.vlgmr.msra.gmra.mrb[92].mxu0 %vm2317_vm2, %v7941_v37  ;;  %15951 = vmatmul.mubr.msk.f32.vlgmr.msra.gmra.mrb[88].mxu1 %vm2317_vm2, %v8011_v34 }
0x1708   : > { %15955 = vmatprep.mubr.msk.f32.mxu0 %vm17252_vm0, %v17253_v11  ;;  %15960 = vmatprep.mubr.msk.f32.mxu1 %vm17252_vm0, %v17253_v11 }
0x1709   : > { %v8411_v19 = vpop.f32.mrb[86].mxu0  ;;  %v8481_v57 = vpop.f32.mrb[82].mxu1 }
0x170a   : > { %v8412_v40 = vadd.f32 %v14326_v38, %v8411_v19  ;;  %v8482_v41 = vadd.f32 %v14327_v39, %v8481_v57  ;;  %v15899_v42 = vpop.f32.mrb[87].mxu0  ;;  %v15910_v43 = vpop.f32.mrb[83].mxu1  ;;  %v7702_v39 = vld [vmem:[%s19174_s29] sm:$0xff]  ;;  %v7703_v19 = vld [vmem:[%s19174_s29 + $0x8] sm:$0xff]  ;;  %v7705_v57 = vld [vmem:[%s19174_s29 + $0x18] sm:$0xff] }
0x170c   : > { %15954 = vmatpush3.msra.mxu0 %v8412_v40  ;;  %15959 = vmatpush3.msra.mxu1 %v8482_v41  ;;  %v7704_v41 = vld [vmem:[%s19174_s29 + $0x10] sm:$0xff] }
0x170d   : > { %15963 = vmatprep.subr.mxu0 %v17253_v11  ;;  %15968 = vmatprep.subr.mxu1 %v17253_v11 }
0x1711   : > { %v18435_v44 = vpop.f32.mrb[88].mxu0  ;;  %v8621_v51 = vpop.f32.mrb[84].mxu1 }
0x1712   : > { %v15921_v45 = vpop.f32.mrb[89].mxu0  ;;  %v15932_v46 = vpop.f32.mrb[85].mxu1  ;;  %v8622_v31 = vadd.f32 %v14329_v26, %v8621_v51  ;;  %v8552_v33 = vadd.f32 %v14328_v27, %v18435_v44  ;;  %v9690_v26 = vld [vmem:[%s19178_s11 + $0x20] sm:$0xff] }
0x17d2   : > { %v8697_v47 = vpop.f32.mrb[90].mxu0  ;;  %v8773_v48 = vpop.f32.mrb[86].mxu1 }
0x17d3   : > { %v15937_v52 = vpop.f32.mrb[91].mxu0  ;;  %v15942_v54 = vpop.f32.mrb[87].mxu1  ;;  %v8932_v50 = vsel %vm2317_vm2, %v8773_v48, -inf  ;;  %v8929_v55 = vsel %vm2317_vm2, %v8697_v47, -inf }
0x17d4   : > { %8933 = vmax.xlane.f32.xlu1 %v8932_v50  ;;  %8930 = vmax.xlane.f32.xlu0 %v8929_v55 }
0x17da   : > { %v8849_v56 = vpop.f32.mrb[92].mxu0  ;;  %v8925_v58 = vpop.f32.mrb[88].mxu1 }
0x17db   : > { %v15947_v60 = vpop.f32.mrb[93].mxu0  ;;  %v15952_v53 = vpop.f32.mrb[89].mxu1  ;;  %v8938_v61 = vsel %vm2317_vm2, %v8925_v58, -inf  ;;  %v8935_v62 = vsel %vm2317_vm2, %v8849_v56, -inf }
0x17dc   : > { %8939 = vmax.xlane.f32.xlu1 %v8938_v61  ;;  %8936 = vmax.xlane.f32.xlu0 %v8935_v62 }
0x1861   : > { %v8934_v63 = vpop.xlane.xlu1 %8933  ;;  %v8931_v0 = vpop.xlane.xlu0 %8930 }
0x1862   : > { %v8942_v1 = vsub.f32 %v8773_v48, %v8934_v63  ;;  %v8941_v2 = vsub.f32 %v8697_v47, %v8931_v0 }
0x1864   : > { %v8947_v5 = vmul.f32 1.442695, %v8942_v1  ;;  %v8945_v6 = vmul.f32 1.442695, %v8941_v2  ;;  %v14350_v1 = vld [vmem:[%s19175_s30] ss:$0 sm:$0xff] }
0x1866   : > { %17085 = vpow2.f32 %v8947_v5 }
0x1867   : > { %17087 = vpow2.f32 %v8945_v6 }
0x1869   : > { %v8940_v7 = vpop.xlane.xlu1 %8939  ;;  %v8937_v8 = vpop.xlane.xlu0 %8936 }
0x186a   : > { %v8944_v9 = vsub.f32 %v8925_v58, %v8940_v7  ;;  %v8943_v10 = vsub.f32 %v8849_v56, %v8937_v8 }
0x186c   : > { %v8951_v12 = vmul.f32 1.442695, %v8944_v9  ;;  %v8949_v13 = vmul.f32 1.442695, %v8943_v10 }
0x186e   : > { %17089 = vpow2.f32 %v8951_v12 }
0x186f   : > { %17091 = vpow2.f32 %v8949_v13 }
0x1870   : > { %v17086_v14 = vpop.eup %17085 }
0x1871   : > { %v17088_v15 = vpop.eup %17087  ;;  %v8956_v16 = vsel %vm2317_vm2, %v17086_v14, 0.0 }
0x1872   : > { %8957 = vadd.xlane.f32.xlu1 %v8956_v16  ;;  %v8953_v17 = vsel %vm2317_vm2, %v17088_v15, 0.0  ;;  %v9602_v16 = vld [vmem:[%s19176_s18 + $0x8] sm:$0xff] }
0x1873   : > { %8954 = vadd.xlane.f32.xlu0 %v8953_v17 }
0x1878   : > { %v17090_v20 = vpop.eup %17089 }
0x1879   : > { %v17092_v21 = vpop.eup %17091  ;;  %v8962_v22 = vsel %vm2317_vm2, %v17090_v20, 0.0 }
0x187a   : > { %8963 = vadd.xlane.f32.xlu1 %v8962_v22  ;;  %v8959_v18 = vsel %vm2317_vm2, %v17092_v21, 0.0  ;;  %v9686_v22 = vld [vmem:[%s19177_s2] sm:$0xff]  ;;  %s19182_s2 = sld [smem:[#allocation44_spill]] }
0x187b   : > { %8960 = vadd.xlane.f32.xlu0 %v8959_v18  ;;  %v9687_v18 = vld [vmem:[%s19178_s11 + $0x8] sm:$0xff] }
0x1880   : > { %s19183_s27 = smov %s19182_s2 }
0x18ff   : > { %v8958_v23 = vpop.xlane.xlu1 %8957 }
0x1900   : > { %17093 = vrcp.f32 %v8958_v23  ;;  %v8955_v24 = vpop.xlane.xlu0 %8954  ;;  %v9688_v23 = vld [vmem:[%s19178_s11 + $0x10] sm:$0xff] }
0x1901   : > { %17095 = vrcp.f32 %v8955_v24  ;;  %v16768_v24 = vpack.c.bf16 %v9687_v18, %v9686_v22 }
0x1907   : > { %v8964_v49 = vpop.xlane.xlu1 %8963 }
0x1908   : > { %17097 = vrcp.f32 %v8964_v49  ;;  %v8961_v25 = vpop.xlane.xlu0 %8960  ;;  %v9689_v49 = vld [vmem:[%s19178_s11 + $0x18] sm:$0xff] }
0x1909   : > { %17099 = vrcp.f32 %v8961_v25  ;;  %v16771_v25 = vpack.c.bf16 %v9689_v49, %v9688_v23 }
0x190a   : > { %v17094_v28 = vpop.eup %17093 }
0x190b   : > { %v17096_v29 = vpop.eup %17095  ;;  %v8968_v30 = vmul.f32 %v17094_v28, %v17086_v14  ;;  %v9691_v28 = vld [vmem:[%s19178_s11 + $0x28] sm:$0xff] }
0x190c   : > { %v8966_v32 = vmul.f32 %v17096_v29, %v17088_v15  ;;  %v9601_v15 = vld [vmem:[%s19176_s18] sm:$0xff]  ;;  %v16774_v27 = vpack.c.bf16 %v9691_v28, %v9690_v26  ;;  %v14377_v26 = vld [vmem:[%s19157_s5 + $0x90] sm:$0xff]  ;;  %v14378_v28 = vld [vmem:[%s19157_s5 + $0x98] sm:$0xff] }
0x190d   : > { %15961 = vmatmul.mubr.msk.f32.vlgmr.msra.gmra.mrb[90].mxu1 %vm2317_vm2, %v8968_v30  ;;  %v16762_v17 = vpack.c.bf16 %v9602_v16, %v9601_v15  ;;  %v14363_v15 = vld [vmem:[%s19154_s3 + $0xa0] sm:$0xff] }
0x190e   : > { %15956 = vmatmul.mubr.msk.f32.vlgmr.msra.gmra.mrb[94].mxu0 %vm2317_vm2, %v8966_v32  ;;  %15969 = vmatpush3.msra.mxu1 %v8622_v31 }
0x190f   : > { %15964 = vmatpush3.msra.mxu0 %v8552_v33  ;;  %15965 = vmatprep.mubr.msk.f32.mxu0 %vm17252_vm0, %v17253_v11  ;;  %v14351_v33 = vld [vmem:[%s19179_s23] ss:$0 sm:$0xff] }
0x1910   : > { %15970 = vmatprep.mubr.msk.f32.mxu1 %vm17252_vm0, %v17253_v11  ;;  %15973 = vmatprep.subr.mxu0 %v17253_v11 }
0x1911   : > { %15978 = vmatprep.subr.mxu1 %v17253_v11 }
0x1912   : > { %v17098_v35 = vpop.eup %17097 }
0x1913   : > { %v17100_v37 = vpop.eup %17099  ;;  %v8972_v34 = vmul.f32 %v17098_v35, %v17090_v20  ;;  %v9604_v20 = vld [vmem:[%s19176_s18 + $0x18] sm:$0xff] }
0x1914   : > { %v8970_v38 = vmul.f32 %v17100_v37, %v17092_v21  ;;  %v14352_v37 = vld [vmem:[%s19180_s28] ss:$0 sm:$0xff]  ;;  %s19184_s28 = sld [smem:[#allocation48_spill]] }
0x1915   : > { %15971 = vmatmul.mubr.msk.f32.vlgmr.msra.gmra.mrb[92].mxu1 %vm2317_vm2, %v8972_v34 }
0x1916   : > { %15966 = vmatmul.mubr.msk.f32.vlgmr.msra.gmra.mrb[96].mxu0 %vm2317_vm2, %v8970_v38  ;;  %15980 = vmatprep.mubr.msk.f32.mxu1 %vm17252_vm0, %v17253_v11 }
0x1917   : > { %15975 = vmatprep.mubr.msk.f32.mxu0 %vm17252_vm0, %v17253_v11  ;;  %15974 = vmatpush3.msra.mxu0 %v7702_v39  ;;  %v9692_v39 = vld [vmem:[%s19178_s11 + $0x30] sm:$0xff] }
0x1918   : > { %15979 = vmatpush3.msra.mxu1 %v7703_v19  ;;  %15983 = vmatprep.subr.mxu0 %v17253_v11  ;;  %v9693_v19 = vld [vmem:[%s19178_s11 + $0x38] sm:$0xff] }
0x1919   : > { %15988 = vmatprep.subr.mxu1 %v17253_v11 }
0x19e0   : > { %v9115_v40 = vpop.f32.mrb[90].mxu1 }
0x19e1   : > { %v9042_v42 = vpop.f32.mrb[94].mxu0  ;;  %v15962_v43 = vpop.f32.mrb[91].mxu1  ;;  %15981 = vmatmul.mubr.msk.f32.vlgmr.msra.gmra.mrb[94].mxu1 %vm2317_vm2, %v9115_v40  ;;  %v14353_v40 = vld [vmem:[%s19182_s2] ss:$0 sm:$0xff]  ;;  %s1324_s2 = sand.u32 1, %s17197_s1  }
0x19e2   : > { %v15957_v44 = vpop.f32.mrb[95].mxu0  ;;  %15976 = vmatmul.mubr.msk.f32.vlgmr.msra.gmra.mrb[98].mxu0 %vm2317_vm2, %v9042_v42  ;;  %15989 = vmatpush3.msra.mxu1 %v7705_v57  ;;  %v16777_v57 = vpack.c.bf16 %v9693_v19, %v9692_v39  ;;  %v14385_v39 = vld [vmem:[%s19157_s5 + $0xd0] sm:$0xff]  ;;  %v14386_v19 = vld [vmem:[%s19157_s5 + $0xd8] sm:$0xff] }
0x19e3   : > { %15984 = vmatpush3.msra.mxu0 %v7704_v41  ;;  %15985 = vmatprep.mubr.msk.f32.mxu0 %vm17252_vm0, %v17253_v11 }
0x19e4   : > { %15990 = vmatprep.mubr.msk.f32.mxu1 %vm17252_vm0, %v17253_v11  ;;  %16761 = vmatprep.subr.bf16.mxu0 %v17251_v3 }
0x19e5   : > { %16767 = vmatprep.subr.bf16.mxu1 %v17251_v3 }
0x19e8   : > { %v9261_v51 = vpop.f32.mrb[92].mxu1 }
0x19e9   : > { %v9188_v45 = vpop.f32.mrb[96].mxu0  ;;  %v15972_v46 = vpop.f32.mrb[93].mxu1  ;;  %15991 = vmatmul.mubr.msk.f32.vlgmr.msra.gmra.mrb[96].mxu1 %vm2317_vm2, %v9261_v51  ;;  %v14355_v51 = vld [vmem:[%s19128_s4] ss:$0 sm:$0xff] }
0x19ea   : > { %v15967_v47 = vpop.f32.mrb[97].mxu0  ;;  %15986 = vmatmul.mubr.msk.f32.vlgmr.msra.gmra.mrb[100].mxu0 %vm2317_vm2, %v9188_v45  ;;  %16020 = vmatprep.mubr.msk.f32.mxu1 %vm17252_vm0, %v17253_v11 }
0x19eb   : > { %16001 = vmatprep.mubr.msk.f32.mxu0 %vm17252_vm0, %v17253_v11  ;;  %16763 = vmatpush3.bf16.msra.mxu0 %v16762_v17  ;;  %v14364_v17 = vld [vmem:[%s19154_s3 + $0xa8] sm:$0xff] }
0x19ec   : > { %16764 = vmatprep.subr.bf16.mxu0 %v17251_v3  ;;  %16769 = vmatpush3.bf16.msra.mxu1 %v16768_v24  ;;  %v16786_v18 = vpack.c.bf16 %v14364_v17, %v14363_v15  ;;  %v14365_v24 = vld [vmem:[%s19154_s3 + $0xb0] sm:$0xff]  ;;  %v14406_v17 = vld [vmem:[%s19158_s13 + $0xf8] sm:$0xff] }
0x19ed   : > { %16770 = vmatprep.subr.bf16.mxu1 %v17251_v3 }
0x19f0   : > { %16772 = vmatpush3.bf16.msra.mxu1 %v16771_v25  ;;  %v14366_v25 = vld [vmem:[%s19154_s3 + $0xb8] sm:$0xff] }
0x19f1   : > { %16773 = vmatprep.subr.bf16.mxu1 %v17251_v3 }
0x19f4   : > { %16775 = vmatpush3.bf16.msra.mxu1 %v16774_v27  ;;  %v16789_v27 = vpack.c.bf16 %v14366_v25, %v14365_v24 }
0x19f5   : > { %16776 = vmatprep.subr.bf16.mxu1 %v17251_v3 }
0x19f8   : > { %16778 = vmatpush3.bf16.msra.mxu1 %v16777_v57 }
0x19f9   : > { %16791 = vmatprep.subr.bf16.mxu1 %v17251_v3 }
0x1ab4   : > { %v9407_v48 = vpop.f32.mrb[94].mxu1 }
0x1ab5   : > { %v9334_v52 = vpop.f32.mrb[98].mxu0  ;;  %v9558_v54 = vsel %vm1425_vm1, %v9407_v48, 0.0  ;;  %v15982_v50 = vpop.f32.mrb[95].mxu1 }
0x1ab6   : > { %v9557_v55 = vsel %vm1425_vm1, %v9334_v52, 0.0  ;;  %v15977_v56 = vpop.f32.mrb[99].mxu0 }
0x1ab7   : > { %v9559_v58 = vadd.f32 %v9558_v54, %v9557_v55 }
0x1abc   : > { %v9553_v60 = vpop.f32.mrb[96].mxu1 }
0x1abd   : > { %v9480_v53 = vpop.f32.mrb[100].mxu0  ;;  %v15992_v61 = vpop.f32.mrb[97].mxu1  ;;  %v9562_v2 = vsel %vm1425_vm1, %v9553_v60, 0.0  ;;  %v14359_v60 = vld [vmem:[%s19154_s3 + $0x80] sm:$0xff] }
0x1abe   : > { %v9560_v62 = vsel %vm1425_vm1, %v9480_v53, 0.0  ;;  %v15987_v63 = vpop.f32.mrb[101].mxu0  ;;  %v14360_v53 = vld [vmem:[%s19154_s3 + $0x88] sm:$0xff]  ;;  %v14367_v61 = vld [vmem:[%s19154_s3 + $0xc0] sm:$0xff] }
0x1abf   : > { %v9561_v0 = vadd.f32 %v9560_v62, %v9559_v58  ;;  %v16780_v62 = vpack.c.bf16 %v14360_v53, %v14359_v60  ;;  %v14368_v63 = vld [vmem:[%s19154_s3 + $0xc8] sm:$0xff] }
0x1ac0   : > { %v14400_v60 = vld [vmem:[%s19158_s13 + $0xc8] sm:$0xff] }
0x1ac1   : > { %v9563_v5 = vadd.f32 %v9562_v2, %v9561_v0  ;;  %v16792_v0 = vpack.c.bf16 %v14368_v63, %v14367_v61  ;;  %v14362_v2 = vld [vmem:[%s19154_s3 + $0x98] sm:$0xff] }
0x1ac2   : > { %v14390_v63 = vld [vmem:[%s19157_s5 + $0xf8] sm:$0xff] }
0x1ac3   : > { %v9570_v6 = vadd.f32 %v14350_v1, %v9563_v5  ;;  %v14361_v1 = vld [vmem:[%s19154_s3 + $0x90] sm:$0xff] }
0x1ac4   : > { %v14369_v5 = vld [vmem:[%s19154_s3 + $0xd0] sm:$0xff] }
0x1ac5   : > { %v9571_v7 = vadd.f32 %v9570_v6, %v18293_v4  ;;  %v9603_v4 = vld [vmem:[%s19176_s18 + $0x10] sm:$0xff]  ;;  %v16783_v6 = vpack.c.bf16 %v14362_v2, %v14361_v1  ;;  %v14402_v1 = vld [vmem:[%s19158_s13 + $0xd8] sm:$0xff] }
0x1ac6   : > { %v16765_v21 = vpack.c.bf16 %v9604_v20, %v9603_v4  ;;  %v14375_v4 = vld [vmem:[%s19157_s5 + $0x80] sm:$0xff]  ;;  %v14376_v20 = vld [vmem:[%s19157_s5 + $0x88] sm:$0xff] }
0x1ac7   : > { %v9574_v8 = vsel %vm1425_vm1, %v9571_v7, 0.0  ;;  %v16804_v23 = vpack.c.bf16 %v14376_v20, %v14375_v4 }
0x1ac8   : > { %9575 = vadd.xlane.f32.xlu0 %v9574_v8  ;;  %16766 = vmatpush3.bf16.msra.mxu0 %v16765_v21  ;;  %v14358_v21 = vld [vmem:[%s17478_s20] ss:$0 sm:$0xff] }
0x1ac9   : > { %16779 = vmatprep.subr.bf16.mxu0 %v17251_v3 }
0x1b55   : > { %v9576_v9 = vpop.xlane.xlu0 %9575 }
0x1b56   : > { %v9577_v10 = vmul.f32 0.03125, %v9576_v9 }
0x1b58   : > { %v9578_v12 = vsub.f32 %v9571_v7, %v9577_v10  ;;  %v14370_v7 = vld [vmem:[%s19154_s3 + $0xd8] sm:$0xff] }
0x1b59   : > { %v16795_v8 = vpack.c.bf16 %v14370_v7, %v14369_v5  ;;  %v14396_v7 = vld [vmem:[%s19158_s13 + $0xa8] sm:$0xff] }
0x1b5a   : > { %v9579_v13 = vmul.f32 %v9578_v12, %v9578_v12 }
0x1b5c   : > { %v9580_v14 = vsel %vm1425_vm1, %v9579_v13, 0.0 }
0x1b5d   : > { %9581 = vadd.xlane.f32.xlu1 %v9580_v14  ;;  %v14357_v14 = vld [vmem:[%s19127_s9] ss:$0 sm:$0xff] }
0x1bea   : > { %v9582_v29 = vpop.xlane.xlu1 %9581 }
0x1beb   : > { %v9583_v30 = vmul.f32 0.03125, %v9582_v29  ;;  %v16807_v29 = vpack.c.bf16 %v14378_v28, %v14377_v26  ;;  %v14424_v26 = vld [vmem:[%s19160_s26 + $0x4] ss:$0 sm:$0xff] }
0x1bed   : > { %v9584_v31 = vadd.f32 1e-05, %v9583_v30  ;;  %v14371_v30 = vld [vmem:[%s19154_s3 + $0xe0] sm:$0xff] }
0x1bef   : > { %17101 = vrsqrt.f32 %v9584_v31  ;;  %v14372_v31 = vld [vmem:[%s19154_s3 + $0xe8] sm:$0xff] }
0x1bf9   : > { %v17102_v32 = vpop.eup %17101 }
0x1bfa   : > { %v9586_v35 = vmul.f32 %v17102_v32, %v9578_v12  ;;  %v14383_v32 = vld [vmem:[%s19157_s5 + $0xc0] sm:$0xff] }
0x1bfc   : > { %v9593_v34 = vmul.f32 %v14351_v33, %v9586_v35  ;;  %v14384_v33 = vld [vmem:[%s19157_s5 + $0xc8] sm:$0xff]  ;;  %v16798_v35 = vpack.c.bf16 %v14372_v31, %v14371_v30  ;;  %v14434_v31 = vld [vmem:[%s19159_s8 + $0x6] ss:$0 sm:$0xff] }
0x1bfe   : > { %v9600_v38 = vadd.f32 %v14352_v37, %v9593_v34  ;;  %v16816_v37 = vpack.c.bf16 %v14384_v33, %v14383_v32  ;;  %v14373_v34 = vld [vmem:[%s19154_s3 + $0xf0] sm:$0xff] }
0x1c00   : > { %16002 = vmatmul.mubr.msk.f32.vlgmr.msra.gmra.mrb[102].mxu0 %vm1425_vm1, %v9600_v38 }
0x1c01   : > { %16031 = vmatprep.mubr.msk.f32.mxu0 %vm17252_vm0, %v17253_v11  ;;  %16781 = vmatpush3.bf16.msra.mxu0 %v16780_v62  ;;  %v14389_v62 = vld [vmem:[%s19157_s5 + $0xf0] sm:$0xff] }
0x1c02   : > { %16782 = vmatprep.subr.bf16.mxu0 %v17251_v3  ;;  %v16825_v2 = vpack.c.bf16 %v14390_v63, %v14389_v62 }
0x1c05   : > { %16784 = vmatpush3.bf16.msra.mxu0 %v16783_v6  ;;  %v14395_v6 = vld [vmem:[%s19158_s13 + $0xa0] sm:$0xff] }
0x1c06   : > { %16785 = vmatprep.subr.bf16.mxu0 %v17251_v3 }
0x1cd3   : > { %v9681_v41 = vpop.f32.mrb[102].mxu0 }
0x1cd4   : > { %v9682_v42 = vadd.f32 %v14353_v40, %v9681_v41  ;;  %v16003_v43 = vpop.f32.mrb[103].mxu0  ;;  %v16819_v40 = vpack.c.bf16 %v14386_v19, %v14385_v39  ;;  %v14379_v41 = vld [vmem:[%s19157_s5 + $0xa0] sm:$0xff] }
0x1cd5   : > { %v14391_v43 = vld [vmem:[%s19158_s13 + $0x80] sm:$0xff] }
0x1cd6   : > { %v9685_v44 = vmax.f32 %v9682_v42, 0.0  ;;  %v14380_v42 = vld [vmem:[%s19157_s5 + $0xa8] sm:$0xff]  ;;  %v14433_v19 = vld [vmem:[%s19159_s8 + $0x5] ss:$0 sm:$0xff] }
0x1cd8   : > { %16021 = vmatmul.mubr.msk.f32.vlgmr.msra.gmra.mrb[98].mxu1 %vm3395_vm3, %v9685_v44  ;;  %v14392_v44 = vld [vmem:[%s19158_s13 + $0x88] sm:$0xff] }
0x1cd9   : > { %16053 = vmatprep.mubr.msk.f32.mxu1 %vm17252_vm0, %v17253_v11  ;;  %16793 = vmatpush3.bf16.msra.mxu1 %v16792_v0  ;;  %v14401_v0 = vld [vmem:[%s19158_s13 + $0xd0] sm:$0xff] }
0x1cda   : > { %16794 = vmatprep.subr.bf16.mxu1 %v17251_v3  ;;  %v16843_v5 = vpack.c.bf16 %v14402_v1, %v14401_v0 }
0x1cdd   : > { %16796 = vmatpush3.bf16.msra.mxu1 %v16795_v8  ;;  %v16834_v8 = vpack.c.bf16 %v14396_v7, %v14395_v6 }
0x1cde   : > { %16803 = vmatprep.subr.bf16.mxu1 %v17251_v3 }
0x1dab   : > { %v9770_v45 = vpop.f32.mrb[98].mxu1 }
0x1dac   : > { %v9771_v46 = vadd.f32 %v14355_v51, %v9770_v45  ;;  %v16022_v47 = vpop.f32.mrb[99].mxu1  ;;  %v16810_v51 = vpack.c.bf16 %v14380_v42, %v14379_v41  ;;  %v16828_v45 = vpack.c.bf16 %v14392_v44, %v14391_v43  ;;  %v14425_v42 = vld [vmem:[%s19160_s26 + $0x5] ss:$0 sm:$0xff] }
0x1dad   : > { %v14382_v47 = vld [vmem:[%s19157_s5 + $0xb8] sm:$0xff] }
0x1dae   : > { %v9774_v48 = vadd.f32 %v9771_v46, %v9600_v38  ;;  %v14374_v38 = vld [vmem:[%s19154_s3 + $0xf8] sm:$0xff]  ;;  %v14381_v46 = vld [vmem:[%s19157_s5 + $0xb0] sm:$0xff]  ;;  %s19185_s3 = smov %s19184_s28 }
0x1daf   : > { %v16801_v57 = vpack.c.bf16 %v14374_v38, %v14373_v34 }
0x1db0   : > { %v9777_v52 = vsel %vm1425_vm1, %v9774_v48, 0.0 }
0x1db1   : > { %9778 = vadd.xlane.f32.xlu0 %v9777_v52  ;;  %v14394_v52 = vld [vmem:[%s19158_s13 + $0x98] sm:$0xff] }
0x1e3e   : > { %v9779_v54 = vpop.xlane.xlu0 %9778 }
0x1e3f   : > { %v9780_v50 = vmul.f32 0.03125, %v9779_v54  ;;  %v16813_v54 = vpack.c.bf16 %v14382_v47, %v14381_v46  ;;  %v14435_v47 = vld [vmem:[%s19159_s8 + $0x7] ss:$0 sm:$0xff] }
0x1e41   : > { %v9781_v55 = vsub.f32 %v9774_v48, %v9780_v50  ;;  %v14393_v48 = vld [vmem:[%s19158_s13 + $0x90] sm:$0xff] }
0x1e42   : > { %v16831_v50 = vpack.c.bf16 %v14394_v52, %v14393_v48 }
0x1e43   : > { %v9782_v56 = vmul.f32 %v9781_v55, %v9781_v55 }
0x1e45   : > { %v9783_v58 = vsel %vm1425_vm1, %v9782_v56, 0.0  ;;  %v14388_v56 = vld [vmem:[%s19157_s5 + $0xe8] sm:$0xff] }
0x1e46   : > { %9784 = vadd.xlane.f32.xlu1 %v9783_v58  ;;  %v14399_v58 = vld [vmem:[%s19158_s13 + $0xc0] sm:$0xff] }
0x1e47   : > { %v16840_v61 = vpack.c.bf16 %v14400_v60, %v14399_v58  ;;  %v14441_v60 = vld [vmem:[%s19161_s6 + $0x5] ss:$0 sm:$0xff] }
0x1ed3   : > { %v9785_v9 = vpop.xlane.xlu1 %9784 }
0x1ed4   : > { %v9786_v10 = vmul.f32 0.03125, %v9785_v9  ;;  %v14397_v9 = vld [vmem:[%s19158_s13 + $0xb0] sm:$0xff] }
0x1ed6   : > { %v9787_v12 = vadd.f32 1e-05, %v9786_v10  ;;  %v14398_v10 = vld [vmem:[%s19158_s13 + $0xb8] sm:$0xff] }
0x1ed8   : > { %17103 = vrsqrt.f32 %v9787_v12  ;;  %v16837_v12 = vpack.c.bf16 %v14398_v10, %v14397_v9 }
0x1ee2   : > { %v17104_v13 = vpop.eup %17103 }
0x1ee3   : > { %v9789_v16 = vmul.f32 %v17104_v13, %v9781_v55  ;;  %v14387_v55 = vld [vmem:[%s19157_s5 + $0xe0] sm:$0xff] }
0x1ee4   : > { %v16822_v53 = vpack.c.bf16 %v14388_v56, %v14387_v55  ;;  %v14403_v13 = vld [vmem:[%s19158_s13 + $0xe0] sm:$0xff] }
0x1ee5   : > { %v9796_v22 = vmul.f32 %v14357_v14, %v9789_v16  ;;  %v14404_v14 = vld [vmem:[%s19158_s13 + $0xe8] sm:$0xff]  ;;  %v14405_v16 = vld [vmem:[%s19158_s13 + $0xf0] sm:$0xff] }
0x1ee6   : > { %v16846_v15 = vpack.c.bf16 %v14404_v14, %v14403_v13  ;;  %v16849_v4 = vpack.c.bf16 %v14406_v17, %v14405_v16 }
0x1ee7   : > { %v18539_v49 = vadd.f32 %v14358_v21, %v9796_v22 }
0x1ee9   : > { %16032 = vmatmul.mubr.msk.f32.vlgmr.msra.gmra.mrb[104].mxu0 %vm1425_vm1, %v18539_v49  ;;  %16054 = vmatmul.mubr.msk.f32.vlgmr.msra.gmra.mrb[100].mxu1 %vm1425_vm1, %v18539_v49 }
0x1eea   : > { %16787 = vmatpush3.bf16.msra.mxu0 %v16786_v18  ;;  %16805 = vmatpush3.bf16.msra.mxu1 %v16804_v23  ;;  %v14432_v23 = vld [vmem:[%s19159_s8 + $0x4] ss:$0 sm:$0xff] }
0x1eeb   : > { %16788 = vmatprep.subr.bf16.mxu0 %v17251_v3  ;;  %16806 = vmatprep.subr.bf16.mxu1 %v17251_v3 }
0x1eec   : > { %16042 = vmatprep.mubr.msk.f32.mxu0 %vm17252_vm0, %v17253_v11  ;;  %16075 = vmatprep.mubr.msk.f32.mxu1 %vm17252_vm0, %v17253_v11 }
0x1eee   : > { %16790 = vmatpush3.bf16.msra.mxu0 %v16789_v27  ;;  %16808 = vmatpush3.bf16.msra.mxu1 %v16807_v29 }
0x1eef   : > { %16797 = vmatprep.subr.bf16.mxu0 %v17251_v3  ;;  %16815 = vmatprep.subr.bf16.mxu1 %v17251_v3 }
0x1ef1   : > { %16043 = vmatmul.mubr.msk.f32.vlgmr.msra.gmra.mrb[106].mxu0 %vm1425_vm1, %v18539_v49  ;;  %16076 = vmatmul.mubr.msk.f32.vlgmr.msra.gmra.mrb[102].mxu1 %vm1425_vm1, %v18539_v49 }
0x1ef2   : > { %16799 = vmatpush3.bf16.msra.mxu0 %v16798_v35  ;;  %16817 = vmatpush3.bf16.msra.mxu1 %v16816_v37  ;;  %v14426_v35 = vld [vmem:[%s19160_s26 + $0x6] ss:$0 sm:$0xff] }
0x1ef3   : > { %16800 = vmatprep.subr.bf16.mxu0 %v17251_v3  ;;  %16818 = vmatprep.subr.bf16.mxu1 %v17251_v3 }
0x1ef4   : > { %16064 = vmatprep.mubr.msk.f32.mxu0 %vm17252_vm0, %v17253_v11  ;;  %16097 = vmatprep.mubr.msk.f32.mxu1 %vm17252_vm0, %v17253_v11 }
0x1ef6   : > { %16802 = vmatpush3.bf16.msra.mxu0 %v16801_v57  ;;  %16820 = vmatpush3.bf16.msra.mxu1 %v16819_v40  ;;  %v14440_v57 = vld [vmem:[%s19161_s6 + $0x4] ss:$0 sm:$0xff] }
0x1ef7   : > { %16809 = vmatprep.subr.bf16.mxu0 %v17251_v3  ;;  %16827 = vmatprep.subr.bf16.mxu1 %v17251_v3 }
0x1ef9   : > { %16065 = vmatmul.mubr.msk.f32.vlgmr.msra.gmra.mrb[108].mxu0 %vm1425_vm1, %v18539_v49  ;;  %16098 = vmatmul.mubr.msk.f32.vlgmr.msra.gmra.mrb[104].mxu1 %vm1425_vm1, %v18539_v49 }
0x1efa   : > { %16811 = vmatpush3.bf16.msra.mxu0 %v16810_v51  ;;  %16829 = vmatpush3.bf16.msra.mxu1 %v16828_v45 }
0x1efb   : > { %16812 = vmatprep.subr.bf16.mxu0 %v17251_v3  ;;  %16830 = vmatprep.subr.bf16.mxu1 %v17251_v3 }
0x1efc   : > { %16086 = vmatprep.mubr.msk.f32.mxu0 %vm17252_vm0, %v17253_v11  ;;  %16119 = vmatprep.mubr.msk.f32.mxu1 %vm17252_vm0, %v17253_v11 }
0x1efe   : > { %16814 = vmatpush3.bf16.msra.mxu0 %v16813_v54  ;;  %16832 = vmatpush3.bf16.msra.mxu1 %v16831_v50  ;;  %v14427_v54 = vld [vmem:[%s19160_s26 + $0x7] ss:$0 sm:$0xff] }
0x1eff   : > { %16821 = vmatprep.subr.bf16.mxu0 %v17251_v3  ;;  %16839 = vmatprep.subr.bf16.mxu1 %v17251_v3 }
0x1f01   : > { %16087 = vmatmul.mubr.msk.f32.vlgmr.msra.gmra.mrb[110].mxu0 %vm1425_vm1, %v18539_v49  ;;  %16120 = vmatmul.mubr.msk.f32.vlgmr.msra.gmra.mrb[106].mxu1 %vm1425_vm1, %v18539_v49 }
0x1f02   : > { %16823 = vmatpush3.bf16.msra.mxu0 %v16822_v53  ;;  %16841 = vmatpush3.bf16.msra.mxu1 %v16840_v61 }
0x1f03   : > { %16824 = vmatprep.subr.bf16.mxu0 %v17251_v3  ;;  %16842 = vmatprep.subr.bf16.mxu1 %v17251_v3 }
0x1f04   : > { %16108 = vmatprep.mubr.msk.f32.mxu0 %vm17252_vm0, %v17253_v11  ;;  %16141 = vmatprep.mubr.msk.f32.mxu1 %vm17252_vm0, %v17253_v11 }
0x1f06   : > { %16826 = vmatpush3.bf16.msra.mxu0 %v16825_v2  ;;  %16844 = vmatpush3.bf16.msra.mxu1 %v16843_v5 }
0x1f07   : > { %16833 = vmatprep.subr.bf16.mxu0 %v17251_v3  ;;  %16155 = vmatprep.subr.mxu1 %v17253_v11 }
0x1f09   : > { %16109 = vmatmul.mubr.msk.f32.vlgmr.msra.gmra.mrb[112].mxu0 %vm1425_vm1, %v18539_v49  ;;  %16142 = vmatmul.mubr.msk.f32.vlgmr.msra.gmra.mrb[108].mxu1 %vm1425_vm1, %v18539_v49 }
0x1f0a   : > { %16835 = vmatpush3.bf16.msra.mxu0 %v16834_v8  ;;  %16130 = vmatprep.mubr.msk.f32.mxu0 %vm17252_vm0, %v17253_v11 }
0x1f0b   : > { %16836 = vmatprep.subr.bf16.mxu0 %v17251_v3  ;;  %16157 = vmatprep.mubr.msk.f32.mxu1 %vm17252_vm0, %v17253_v11 }
0x1f0e   : > { %16838 = vmatpush3.bf16.msra.mxu0 %v16837_v12 }
0x1f0f   : > { %16845 = vmatprep.subr.bf16.mxu0 %v17251_v3 }
0x1f11   : > { %16131 = vmatmul.mubr.msk.f32.vlgmr.msra.gmra.mrb[114].mxu0 %vm1425_vm1, %v18539_v49 }
0x1f12   : > { %16847 = vmatpush3.bf16.msra.mxu0 %v16846_v15  ;;  %16152 = vmatprep.mubr.msk.f32.mxu0 %vm17252_vm0, %v17253_v11 }
0x1f13   : > { %16848 = vmatprep.subr.bf16.mxu0 %v17251_v3 }
0x1f16   : > { %16850 = vmatpush3.bf16.msra.mxu0 %v16849_v4 }
0x1f17   : > { %16165 = vmatprep.subr.mxu0 %v17253_v11 }
0x1f19   : > { %16153 = vmatmul.mubr.msk.f32.vlgmr.msra.gmra.mrb[116].mxu0 %vm1425_vm1, %v18539_v49 }
0x1f1a   : > { %16167 = vmatprep.mubr.msk.f32.mxu0 %vm17252_vm0, %v17253_v11 }
0x1fbc   : > { %v9970_v20 = vpop.f32.mrb[104].mxu0  ;;  %v10110_v21 = vpop.f32.mrb[100].mxu1 }
0x1fbd   : > { %v16033_v22 = vpop.f32.mrb[105].mxu0  ;;  %v16055_v18 = vpop.f32.mrb[101].mxu1  ;;  %v9971_v30 = vadd.f32 %v14424_v26, %v9970_v20  ;;  %v10111_v39 = vadd.f32 %v14426_v35, %v10110_v21 }
0x1fc4   : > { %v10040_v24 = vpop.f32.mrb[106].mxu0  ;;  %v10274_v25 = vpop.f32.mrb[102].mxu1 }
0x1fc5   : > { %v10275_v28 = vadd.f32 %v14432_v23, %v10274_v25  ;;  %v16044_v27 = vpop.f32.mrb[107].mxu0  ;;  %v16077_v29 = vpop.f32.mrb[103].mxu1  ;;  %v10041_v46 = vadd.f32 %v14425_v42, %v10040_v24 }
0x1fc7   : > { %16156 = vmatpush3.xpose.msk.msra.mxu1 %vm2317_vm2, %v10275_v28 }
0x1fc8   : > { %16160 = vmatprep.subr.mxu1 %v17253_v11 }
0x1fca   : > { %16158 = vmatmul.mubr.msk.f32.vlgmr.msra.gmra.mrb[110].mxu1 %vm2317_vm2, %v9971_v30 }
0x1fcb   : > { %16162 = vmatprep.mubr.msk.f32.mxu1 %vm17252_vm0, %v17253_v11 }
0x1fcc   : > { %v10180_v32 = vpop.f32.mrb[108].mxu0  ;;  %v10414_v33 = vpop.f32.mrb[104].mxu1 }
0x1fcd   : > { %v10415_v37 = vadd.f32 %v14434_v31, %v10414_v33  ;;  %v16066_v34 = vpop.f32.mrb[109].mxu0  ;;  %v16099_v38 = vpop.f32.mrb[105].mxu1  ;;  %v10181_v58 = vadd.f32 %v14427_v54, %v10180_v32 }
0x1fcf   : > { %16166 = vmatpush3.xpose.msk.msra.mxu0 %vm2317_vm2, %v10415_v37 }
0x1fd0   : > { %16175 = vmatprep.subr.mxu0 %v17253_v11 }
0x1fd2   : > { %16168 = vmatmul.mubr.msk.f32.vlgmr.msra.gmra.mrb[118].mxu0 %vm2317_vm2, %v10111_v39 }
0x1fd3   : > { %16177 = vmatprep.mubr.msk.f32.mxu0 %vm17252_vm0, %v17253_v11 }
0x1fd4   : > { %v10344_v40 = vpop.f32.mrb[110].mxu0  ;;  %v10578_v41 = vpop.f32.mrb[106].mxu1 }
0x1fd5   : > { %v10345_v43 = vadd.f32 %v14433_v19, %v10344_v40  ;;  %v10579_v44 = vadd.f32 %v14440_v57, %v10578_v41  ;;  %v16088_v51 = vpop.f32.mrb[111].mxu0  ;;  %v16121_v45 = vpop.f32.mrb[107].mxu1  ;;  %v14442_v40 = vld [vmem:[%s19161_s6 + $0x6] ss:$0 sm:$0xff] }
0x1fd7   : > { %16161 = vmatpush3.xpose.msk.msra.mxu1 %vm2317_vm2, %v10345_v43  ;;  %16176 = vmatpush3.msra.mxu0 %v10579_v44 }
0x1fd8   : > { %16170 = vmatprep.subr.mxu1 %v17253_v11  ;;  %16185 = vmatprep.subr.mxu0 %v17253_v11 }
0x1fda   : > { %16163 = vmatmul.mubr.msk.f32.vlgmr.msra.gmra.mrb[112].mxu1 %vm2317_vm2, %v10041_v46 }
0x1fdb   : > { %16172 = vmatprep.mubr.msk.f32.mxu1 %vm17252_vm0, %v17253_v11 }
0x1fdc   : > { %v10484_v48 = vpop.f32.mrb[112].mxu0  ;;  %v18668_v52 = vpop.f32.mrb[108].mxu1 }
0x1fdd   : > { %v10485_v50 = vadd.f32 %v14435_v47, %v10484_v48  ;;  %v16110_v55 = vpop.f32.mrb[113].mxu0  ;;  %v16143_v56 = vpop.f32.mrb[109].mxu1  ;;  %v10719_v43 = vadd.f32 %v14442_v40, %v18668_v52  ;;  %v14443_v47 = vld [vmem:[%s19161_s6 + $0x7] ss:$0 sm:$0xff]  ;;  %s14602_s6 = sshll.u32 %s17506_s0, 7  ;;  %s17254_s0 = smov [#allocation2]  }
0x1fde   : > { %v14419_v56 = vld [vmem:[%s19164_s12 + $0x20] sm:$0xff] }
0x1fdf   : > { %16171 = vmatpush3.xpose.msk.msra.mxu1 %vm2317_vm2, %v10485_v50 }
0x1fe0   : > { %16180 = vmatprep.subr.mxu1 %v17253_v11 }
0x1fe2   : > { %16173 = vmatmul.mubr.msk.f32.vlgmr.msra.gmra.mrb[114].mxu1 %vm2317_vm2, %v10181_v58  ;;  %v14420_v58 = vld [vmem:[%s19164_s12 + $0x28] sm:$0xff] }
0x1fe3   : > { %16182 = vmatprep.mubr.msk.f32.mxu1 %vm17252_vm0, %v17253_v11 }
0x1fe4   : > { %v10648_v53 = vpop.f32.mrb[114].mxu0 }
0x1fe5   : > { %v10649_v61 = vadd.f32 %v14441_v60, %v10648_v53  ;;  %v16132_v62 = vpop.f32.mrb[115].mxu0  ;;  %v14421_v60 = vld [vmem:[%s19164_s12 + $0x30] sm:$0xff] }
0x1fe7   : > { %16181 = vmatpush3.msra.mxu1 %v10649_v61 }
0x1fe8   : > { %16190 = vmatprep.subr.mxu1 %v17253_v11 }
0x1fec   : > { %v18678_v63 = vpop.f32.mrb[116].mxu0 }
0x1fed   : > { %v16154_v0 = vpop.f32.mrb[117].mxu0  ;;  %v10789_v54 = vadd.f32 %v14443_v47, %v18678_v63  ;;  %v14478_v47 = vld [vmem:[%s19166_s16 + $0xc8] sm:$0xff] }
0x1fee   : > { %v14422_v0 = vld [vmem:[%s19164_s12 + $0x38] sm:$0xff]  ;;  %s13951_s12 = scalar_lea.sflag [#allocation3], %s1324_s2 }
0x209d   : > { %v10864_v1 = vpop.f32.mrb[110].mxu1 }
0x209e   : > { %v11096_v2 = vsel %vm18199_vm4, -inf, %v10864_v1  ;;  %v16159_v5 = vpop.f32.mrb[111].mxu1 }
0x209f   : > { %v11100_v6 = vsel %vm2317_vm2, %v11096_v2, -inf }
0x20a0   : > { %11101 = vmax.xlane.f32.xlu0 %v11100_v6 }
0x20a5   : > { %v11016_v7 = vpop.f32.mrb[118].mxu0 }
0x20a6   : > { %v11098_v8 = vsel %vm18199_vm4, -inf, %v11016_v7  ;;  %v16169_v9 = vpop.f32.mrb[119].mxu0 }
0x20a7   : > { %v11106_v10 = vsel %vm2317_vm2, %v11098_v8, -inf }
0x20a8   : > { %11107 = vmax.xlane.f32.xlu0 %v11106_v10 }
0x20ad   : > { %v10940_v12 = vpop.f32.mrb[112].mxu1 }
0x20ae   : > { %v11097_v13 = vsel %vm18199_vm4, -inf, %v10940_v12  ;;  %v16164_v14 = vpop.f32.mrb[113].mxu1 }
0x20af   : > { %v11103_v15 = vsel %vm2317_vm2, %v11097_v13, -inf }
0x20b0   : > { %11104 = vmax.xlane.f32.xlu1 %v11103_v15 }
0x20b5   : > { %v11092_v16 = vpop.f32.mrb[114].mxu1 }
0x20b6   : > { %v11099_v17 = vsel %vm18199_vm4, -inf, %v11092_v16  ;;  %v16174_v4 = vpop.f32.mrb[115].mxu1 }
0x20b7   : > { %v11109_v20 = vsel %vm2317_vm2, %v11099_v17, -inf }
0x20b8   : > { %11110 = vmax.xlane.f32.xlu1 %v11109_v20 }
0x212d   : > { %v11102_v21 = vpop.xlane.xlu0 %11101 }
0x212e   : > { %v11112_v22 = vsub.f32 %v11096_v2, %v11102_v21  ;;  %v14464_v21 = vld [vmem:[%s19165_s14 + $0x1] ss:$0 sm:$0xff] }
0x2130   : > { %v11116_v18 = vmul.f32 1.442695, %v11112_v22 }
0x2132   : > { %17105 = vpow2.f32 %v11116_v18 }
0x2135   : > { %v11108_v23 = vpop.xlane.xlu0 %11107 }
0x2136   : > { %v11114_v24 = vsub.f32 %v11098_v8, %v11108_v23 }
0x2138   : > { %v11120_v25 = vmul.f32 1.442695, %v11114_v24 }
0x213a   : > { %17107 = vpow2.f32 %v11120_v25 }
0x213c   : > { %v17106_v26 = vpop.eup %17105 }
0x213d   : > { %v11105_v28 = vpop.xlane.xlu1 %11104  ;;  %v11124_v27 = vsel %vm2317_vm2, %v17106_v26, 0.0 }
0x213e   : > { %v11113_v29 = vsub.f32 %v11097_v13, %v11105_v28  ;;  %11125 = vadd.xlane.f32.xlu0 %v11124_v27 }
0x2140   : > { %v11118_v59 = vmul.f32 1.442695, %v11113_v29 }
0x2142   : > { %17109 = vpow2.f32 %v11118_v59 }
0x2144   : > { %v17108_v30 = vpop.eup %17107 }
0x2145   : > { %v11111_v31 = vpop.xlane.xlu1 %11110  ;;  %v11130_v32 = vsel %vm2317_vm2, %v17108_v30, 0.0 }
0x2146   : > { %v11115_v33 = vsub.f32 %v11099_v17, %v11111_v31  ;;  %11131 = vadd.xlane.f32.xlu0 %v11130_v32  ;;  %v14469_v31 = vld [vmem:[%s19166_s16 + $0x80] sm:$0xff]  ;;  %v14470_v32 = vld [vmem:[%s19166_s16 + $0x88] sm:$0xff] }
0x2148   : > { %v11122_v35 = vmul.f32 1.442695, %v11115_v33  ;;  %v14473_v33 = vld [vmem:[%s19166_s16 + $0xa0] sm:$0xff] }
0x214a   : > { %17111 = vpow2.f32 %v11122_v35  ;;  %v16852_v35 = vpack.c.bf16 %v14470_v32, %v14469_v31 }
0x214c   : > { %v17110_v37 = vpop.eup %17109 }
0x214d   : > { %v11127_v34 = vsel %vm2317_vm2, %v17110_v37, 0.0 }
0x214e   : > { %11128 = vadd.xlane.f32.xlu1 %v11127_v34  ;;  %v14471_v34 = vld [vmem:[%s19166_s16 + $0x90] sm:$0xff] }
0x2154   : > { %v17112_v38 = vpop.eup %17111 }
0x2155   : > { %v11133_v39 = vsel %vm2317_vm2, %v17112_v38, 0.0 }
0x2156   : > { %11134 = vadd.xlane.f32.xlu1 %v11133_v39  ;;  %v14475_v39 = vld [vmem:[%s19166_s16 + $0xb0] sm:$0xff] }
0x21cb   : > { %v11126_v19 = vpop.xlane.xlu0 %11125 }
0x21cc   : > { %17113 = vrcp.f32 %v11126_v19 }
0x21d3   : > { %v11132_v57 = vpop.xlane.xlu0 %11131 }
0x21d4   : > { %17115 = vrcp.f32 %v11132_v57  ;;  %v14476_v57 = vld [vmem:[%s19166_s16 + $0xb8] sm:$0xff] }
0x21d5   : > { %v16861_v40 = vpack.c.bf16 %v14476_v57, %v14475_v39  ;;  %v14509_v39 = vld [vmem:[%s19170_s15 + $0xc0] sm:$0xff] }
0x21d6   : > { %v17114_v41 = vpop.eup %17113  ;;  %v14513_v57 = vld [vmem:[%s19170_s15 + $0xe0] sm:$0xff] }
0x21d7   : > { %v11137_v42 = vmul.f32 %v17114_v41, %v17106_v26 }
0x21d9   : > { %16178 = vmatmul.mubr.msk.f32.vlgmr.msra.gmra.mrb[120].mxu0 %vm2317_vm2, %v11137_v42 }
0x21da   : > { %16186 = vmatpush3.msra.mxu0 %v10719_v43  ;;  %16187 = vmatprep.mubr.msk.f32.mxu0 %vm17252_vm0, %v17253_v11 }
0x21db   : > { %v11129_v44 = vpop.xlane.xlu1 %11128  ;;  %16195 = vmatprep.subr.mxu0 %v17253_v11 }
0x21dc   : > { %17117 = vrcp.f32 %v11129_v44 }
0x21de   : > { %v17116_v51 = vpop.eup %17115 }
0x21df   : > { %v11141_v45 = vmul.f32 %v17116_v51, %v17108_v30  ;;  %v14467_v51 = vld [vmem:[%s19167_s17 + $0x1] ss:$0 sm:$0xff] }
0x21e1   : > { %16188 = vmatmul.mubr.msk.f32.vlgmr.msra.gmra.mrb[122].mxu0 %vm2317_vm2, %v11141_v45  ;;  %v14477_v45 = vld [vmem:[%s19166_s16 + $0xc0] sm:$0xff] }
0x21e2   : > { %16197 = vmatprep.mubr.msk.f32.mxu0 %vm17252_vm0, %v17253_v11  ;;  %16196 = vmatpush3.msra.mxu0 %v14419_v56 }
0x21e3   : > { %v11135_v46 = vpop.xlane.xlu1 %11134  ;;  %16205 = vmatprep.subr.mxu0 %v17253_v11 }
0x21e4   : > { %17119 = vrcp.f32 %v11135_v46 }
0x21e6   : > { %v17118_v48 = vpop.eup %17117 }
0x21e7   : > { %v11139_v52 = vmul.f32 %v17118_v48, %v17110_v37  ;;  %v14474_v37 = vld [vmem:[%s19166_s16 + $0xa8] sm:$0xff]  ;;  %v14481_v48 = vld [vmem:[%s19166_s16 + $0xe0] sm:$0xff] }
0x21e9   : > { %16183 = vmatmul.mubr.msk.f32.vlgmr.msra.gmra.mrb[116].mxu1 %vm2317_vm2, %v11139_v52  ;;  %v14482_v52 = vld [vmem:[%s19166_s16 + $0xe8] sm:$0xff] }
0x21ea   : > { %16191 = vmatpush3.msra.mxu1 %v10789_v54  ;;  %16192 = vmatprep.mubr.msk.f32.mxu1 %vm17252_vm0, %v17253_v11  ;;  %v14468_v54 = vld [vmem:[%s19168_s19 + $0x1] ss:$0 sm:$0xff]  ;;  %v16870_v56 = vpack.c.bf16 %v14482_v52, %v14481_v48 }
0x21eb   : > { %16200 = vmatprep.subr.mxu1 %v17253_v11 }
0x21ee   : > { %v17120_v50 = vpop.eup %17119 }
0x21ef   : > { %v11143_v55 = vmul.f32 %v17120_v50, %v17112_v38  ;;  %v14472_v38 = vld [vmem:[%s19166_s16 + $0x98] sm:$0xff] }
0x21f0   : > { %v16855_v19 = vpack.c.bf16 %v14472_v38, %v14471_v34 }
0x21f1   : > { %16193 = vmatmul.mubr.msk.f32.vlgmr.msra.gmra.mrb[118].mxu1 %vm2317_vm2, %v11143_v55  ;;  %v16864_v55 = vpack.c.bf16 %v14478_v47, %v14477_v45  ;;  %v14516_v45 = vld [vmem:[%s19170_s15 + $0xf8] sm:$0xff] }
0x21f2   : > { %16202 = vmatprep.mubr.msk.f32.mxu1 %vm17252_vm0, %v17253_v11  ;;  %16201 = vmatpush3.msra.mxu1 %v14420_v58  ;;  %v14479_v58 = vld [vmem:[%s19166_s16 + $0xd0] sm:$0xff] }
0x21f3   : > { %16210 = vmatprep.subr.mxu1 %v17253_v11 }
0x22ac   : > { %v11213_v53 = vpop.f32.mrb[120].mxu0 }
0x22ad   : > { %v16179_v61 = vpop.f32.mrb[121].mxu0  ;;  %16198 = vmatmul.mubr.msk.f32.vlgmr.msra.gmra.mrb[124].mxu0 %vm2317_vm2, %v11213_v53  ;;  %v14480_v53 = vld [vmem:[%s19166_s16 + $0xd8] sm:$0xff] }
0x22ae   : > { %16206 = vmatpush3.msra.mxu0 %v14421_v60  ;;  %16207 = vmatprep.mubr.msk.f32.mxu0 %vm17252_vm0, %v17253_v11  ;;  %v14483_v61 = vld [vmem:[%s19166_s16 + $0xf0] sm:$0xff] }
0x22af   : > { %16851 = vmatprep.subr.bf16.mxu0 %v17251_v3 }
0x22b4   : > { %v11359_v62 = vpop.f32.mrb[122].mxu0 }
0x22b5   : > { %v16189_v63 = vpop.f32.mrb[123].mxu0  ;;  %16208 = vmatmul.mubr.msk.f32.vlgmr.msra.gmra.mrb[126].mxu0 %vm2317_vm2, %v11359_v62  ;;  %v14484_v62 = vld [vmem:[%s19166_s16 + $0xf8] sm:$0xff] }
0x22b6   : > { %16223 = vmatprep.mubr.msk.f32.mxu0 %vm17252_vm0, %v17253_v11  ;;  %16853 = vmatpush3.bf16.msra.mxu0 %v16852_v35  ;;  %v16867_v63 = vpack.c.bf16 %v14480_v53, %v14479_v58  ;;  %v14504_v35 = vld [vmem:[%s19170_s15 + $0x98] sm:$0xff] }
0x22b7   : > { %16854 = vmatprep.subr.bf16.mxu0 %v17251_v3 }
0x22ba   : > { %16856 = vmatpush3.bf16.msra.mxu0 %v16855_v19  ;;  %v14510_v19 = vld [vmem:[%s19170_s15 + $0xc8] sm:$0xff] }
0x22bb   : > { %16863 = vmatprep.subr.bf16.mxu0 %v17251_v3 }
0x22bc   : > { %v11286_v1 = vpop.f32.mrb[116].mxu1 }
0x22bd   : > { %v16184_v2 = vpop.f32.mrb[117].mxu1  ;;  %16203 = vmatmul.mubr.msk.f32.vlgmr.msra.gmra.mrb[120].mxu1 %vm2317_vm2, %v11286_v1  ;;  %v14485_v1 = vld [vmem:[%s19169_s21 + $0x80] sm:$0xff] }
0x22be   : > { %16211 = vmatpush3.msra.mxu1 %v14422_v0  ;;  %16212 = vmatprep.mubr.msk.f32.mxu1 %vm17252_vm0, %v17253_v11  ;;  %v16873_v0 = vpack.c.bf16 %v14484_v62, %v14483_v61  ;;  %v14486_v2 = vld [vmem:[%s19169_s21 + $0x88] sm:$0xff]  ;;  %v14542_v61 = vld [vmem:[%s19171_s10 + $0x4] ss:$0 sm:$0xff]  ;;  %v14543_v62 = vld [vmem:[%s19171_s10 + $0x5] ss:$0 sm:$0xff] }
0x22bf   : > { %16857 = vmatprep.subr.bf16.mxu1 %v17251_v3 }
0x22c4   : > { %v11432_v5 = vpop.f32.mrb[118].mxu1 }
0x22c5   : > { %v16194_v6 = vpop.f32.mrb[119].mxu1  ;;  %16213 = vmatmul.mubr.msk.f32.vlgmr.msra.gmra.mrb[122].mxu1 %vm2317_vm2, %v11432_v5  ;;  %v14489_v5 = vld [vmem:[%s19169_s21 + $0xa0] sm:$0xff] }
0x22c6   : > { %16234 = vmatprep.mubr.msk.f32.mxu1 %vm17252_vm0, %v17253_v11  ;;  %v14490_v6 = vld [vmem:[%s19169_s21 + $0xa8] sm:$0xff] }
0x2380   : > { %v11505_v7 = vpop.f32.mrb[124].mxu0 }
0x2381   : > { %v16199_v8 = vpop.f32.mrb[125].mxu0  ;;  %v11728_v13 = vsel %vm1425_vm1, %v11505_v7, 0.0  ;;  %v16876_v7 = vpack.c.bf16 %v14486_v2, %v14485_v1  ;;  %v14535_v1 = vld [vmem:[%s19172_s24 + $0x5] ss:$0 sm:$0xff] }
0x2382   : > { %v16882_v8 = vpack.c.bf16 %v14490_v6, %v14489_v5 }
0x2388   : > { %v11651_v9 = vpop.f32.mrb[126].mxu0 }
0x2389   : > { %v16209_v10 = vpop.f32.mrb[127].mxu0  ;;  %v11731_v17 = vsel %vm1425_vm1, %v11651_v9, 0.0  ;;  %v14487_v9 = vld [vmem:[%s19169_s21 + $0x90] sm:$0xff] }
0x238a   : > { %v14488_v10 = vld [vmem:[%s19169_s21 + $0x98] sm:$0xff] }
0x2390   : > { %v11578_v12 = vpop.f32.mrb[120].mxu1 }
0x2391   : > { %v11729_v14 = vsel %vm1425_vm1, %v11578_v12, 0.0  ;;  %v16204_v15 = vpop.f32.mrb[121].mxu1  ;;  %v14491_v12 = vld [vmem:[%s19169_s21 + $0xb0] sm:$0xff] }
0x2392   : > { %v11730_v16 = vadd.f32 %v11729_v14, %v11728_v13  ;;  %v14492_v13 = vld [vmem:[%s19169_s21 + $0xb8] sm:$0xff]  ;;  %v16879_v14 = vpack.c.bf16 %v14488_v10, %v14487_v9  ;;  %v14544_v10 = vld [vmem:[%s19171_s10 + $0x6] ss:$0 sm:$0xff] }
0x2393   : > { %v16885_v15 = vpack.c.bf16 %v14492_v13, %v14491_v12  ;;  %v14545_v12 = vld [vmem:[%s19171_s10 + $0x7] ss:$0 sm:$0xff] }
0x2394   : > { %v11732_v4 = vadd.f32 %v11731_v17, %v11730_v16  ;;  %v14493_v16 = vld [vmem:[%s19169_s21 + $0xc0] sm:$0xff]  ;;  %v14494_v17 = vld [vmem:[%s19169_s21 + $0xc8] sm:$0xff] }
0x2398   : > { %v11724_v20 = vpop.f32.mrb[122].mxu1 }
0x2399   : > { %v11733_v22 = vsel %vm1425_vm1, %v11724_v20, 0.0  ;;  %v16214_v18 = vpop.f32.mrb[123].mxu1  ;;  %v14498_v20 = vld [vmem:[%s19169_s21 + $0xe8] sm:$0xff] }
0x239a   : > { %v11734_v23 = vadd.f32 %v11733_v22, %v11732_v4  ;;  %v14497_v4 = vld [vmem:[%s19169_s21 + $0xe0] sm:$0xff]  ;;  %v14495_v18 = vld [vmem:[%s19169_s21 + $0xd0] sm:$0xff] }
0x239b   : > { %v16894_v22 = vpack.c.bf16 %v14498_v20, %v14497_v4 }
0x239c   : > { %v11741_v24 = vadd.f32 %v14464_v21, %v11734_v23  ;;  %v16888_v21 = vpack.c.bf16 %v14494_v17, %v14493_v16  ;;  %v14496_v23 = vld [vmem:[%s19169_s21 + $0xd8] sm:$0xff]  ;;  %v14537_v16 = vld [vmem:[%s19172_s24 + $0x7] ss:$0 sm:$0xff] }
0x239e   : > { %v11742_v25 = vadd.f32 %v11741_v24, %v18539_v49  ;;  %v16858_v49 = vpack.c.bf16 %v14474_v37, %v14473_v33  ;;  %v14499_v24 = vld [vmem:[%s19169_s21 + $0xf0] sm:$0xff] }
0x239f   : > { %v14503_v33 = vld [vmem:[%s19170_s15 + $0x90] sm:$0xff] }
0x23a0   : > { %v11747_v26 = vsel %vm1425_vm1, %v11742_v25, 0.0  ;;  %16859 = vmatpush3.bf16.msra.mxu1 %v16858_v49  ;;  %v14507_v37 = vld [vmem:[%s19170_s15 + $0xb0] sm:$0xff]  ;;  %v14508_v49 = vld [vmem:[%s19170_s15 + $0xb8] sm:$0xff]  ;;  %v16903_v34 = vpack.c.bf16 %v14504_v35, %v14503_v33 }
0x23a1   : > { %11748 = vadd.xlane.f32.xlu0 %v11747_v26  ;;  %16860 = vmatprep.subr.bf16.mxu1 %v17251_v3  ;;  %v16891_v26 = vpack.c.bf16 %v14496_v23, %v14495_v18  ;;  %v16909_v38 = vpack.c.bf16 %v14508_v49, %v14507_v37  ;;  %v14550_v23 = vld [vmem:[%s19173_s25 + $0x4] ss:$0 sm:$0xff] }
0x23a4   : > { %16862 = vmatpush3.bf16.msra.mxu1 %v16861_v40  ;;  %v14514_v40 = vld [vmem:[%s19170_s15 + $0xe8] sm:$0xff] }
0x23a5   : > { %16869 = vmatprep.subr.bf16.mxu1 %v17251_v3 }
0x242e   : > { %v11749_v28 = vpop.xlane.xlu0 %11748 }
0x242f   : > { %v11750_v27 = vmul.f32 0.03125, %v11749_v28 }
0x2431   : > { %v11751_v29 = vsub.f32 %v11742_v25, %v11750_v27  ;;  %v14500_v25 = vld [vmem:[%s19169_s21 + $0xf8] sm:$0xff]  ;;  %v14501_v27 = vld [vmem:[%s19170_s15 + $0x80] sm:$0xff] }
0x2432   : > { %v16897_v28 = vpack.c.bf16 %v14500_v25, %v14499_v24  ;;  %v14551_v24 = vld [vmem:[%s19173_s25 + $0x5] ss:$0 sm:$0xff] }
0x2433   : > { %v11752_v59 = vmul.f32 %v11751_v29, %v11751_v29 }
0x2435   : > { %v11753_v30 = vsel %vm1425_vm1, %v11752_v59, 0.0  ;;  %v14505_v59 = vld [vmem:[%s19170_s15 + $0xa0] sm:$0xff] }
0x2436   : > { %11754 = vadd.xlane.f32.xlu1 %v11753_v30  ;;  %v14506_v30 = vld [vmem:[%s19170_s15 + $0xa8] sm:$0xff] }
0x2437   : > { %v16906_v32 = vpack.c.bf16 %v14506_v30, %v14505_v59 }
0x24c3   : > { %v11755_v41 = vpop.xlane.xlu1 %11754 }
0x24c4   : > { %v11756_v42 = vmul.f32 0.03125, %v11755_v41  ;;  %v16912_v41 = vpack.c.bf16 %v14510_v19, %v14509_v39 }
0x24c6   : > { %v11757_v43 = vadd.f32 1e-05, %v11756_v42  ;;  %v16918_v42 = vpack.c.bf16 %v14514_v40, %v14513_v57 }
0x24c8   : > { %17121 = vrsqrt.f32 %v11757_v43  ;;  %v14511_v43 = vld [vmem:[%s19170_s15 + $0xd0] sm:$0xff] }
0x24d2   : > { %v17122_v44 = vpop.eup %17121 }
0x24d3   : > { %v11759_v46 = vmul.f32 %v17122_v44, %v11751_v29  ;;  %v14502_v29 = vld [vmem:[%s19170_s15 + $0x88] sm:$0xff]  ;;  %v14512_v44 = vld [vmem:[%s19170_s15 + $0xd8] sm:$0xff] }
0x24d4   : > { %v16900_v31 = vpack.c.bf16 %v14502_v29, %v14501_v27 }
0x24d5   : > { %v11766_v50 = vmul.f32 %v14467_v51, %v11759_v46  ;;  %v14515_v51 = vld [vmem:[%s19170_s15 + $0xf0] sm:$0xff]  ;;  %v16915_v46 = vpack.c.bf16 %v14512_v44, %v14511_v43 }
0x24d6   : > { %v16921_v47 = vpack.c.bf16 %v14516_v45, %v14515_v51 }
0x24d7   : > { %v18761_v60 = vadd.f32 %v14468_v54, %v11766_v50 }
0x24d9   : > { %16224 = vmatmul.mubr.msk.f32.vlgmr.msra.gmra.mrb[128].mxu0 %vm1425_vm1, %v18761_v60  ;;  %16235 = vmatmul.mubr.msk.f32.vlgmr.msra.gmra.mrb[124].mxu1 %vm1425_vm1, %v18761_v60 }
0x24da   : > { %16865 = vmatpush3.bf16.msra.mxu0 %v16864_v55  ;;  %16871 = vmatpush3.bf16.msra.mxu1 %v16870_v56 }
0x24db   : > { %16866 = vmatprep.subr.bf16.mxu0 %v17251_v3  ;;  %16872 = vmatprep.subr.bf16.mxu1 %v17251_v3 }
0x24dc   : > { %16245 = vmatprep.mubr.msk.f32.mxu0 %vm17252_vm0, %v17253_v11  ;;  %16256 = vmatprep.mubr.msk.f32.mxu1 %vm17252_vm0, %v17253_v11 }
0x24de   : > { %16868 = vmatpush3.bf16.msra.mxu0 %v16867_v63  ;;  %16874 = vmatpush3.bf16.msra.mxu1 %v16873_v0  ;;  %v14534_v0 = vld [vmem:[%s19172_s24 + $0x4] ss:$0 sm:$0xff] }
0x24df   : > { %16875 = vmatprep.subr.bf16.mxu0 %v17251_v3  ;;  %16881 = vmatprep.subr.bf16.mxu1 %v17251_v3 }
0x24e1   : > { %16246 = vmatmul.mubr.msk.f32.vlgmr.msra.gmra.mrb[130].mxu0 %vm1425_vm1, %v18761_v60  ;;  %16257 = vmatmul.mubr.msk.f32.vlgmr.msra.gmra.mrb[126].mxu1 %vm1425_vm1, %v18761_v60 }
0x24e2   : > { %16877 = vmatpush3.bf16.msra.mxu0 %v16876_v7  ;;  %16883 = vmatpush3.bf16.msra.mxu1 %v16882_v8 }
0x24e3   : > { %16878 = vmatprep.subr.bf16.mxu0 %v17251_v3  ;;  %16884 = vmatprep.subr.bf16.mxu1 %v17251_v3 }
0x24e4   : > { %16267 = vmatprep.mubr.msk.f32.mxu0 %vm17252_vm0, %v17253_v11  ;;  %16278 = vmatprep.mubr.msk.f32.mxu1 %vm17252_vm0, %v17253_v11 }
0x24e6   : > { %16880 = vmatpush3.bf16.msra.mxu0 %v16879_v14  ;;  %16886 = vmatpush3.bf16.msra.mxu1 %v16885_v15  ;;  %v14536_v15 = vld [vmem:[%s19172_s24 + $0x6] ss:$0 sm:$0xff] }
0x24e7   : > { %16887 = vmatprep.subr.bf16.mxu0 %v17251_v3  ;;  %16893 = vmatprep.subr.bf16.mxu1 %v17251_v3 }
0x24e9   : > { %16268 = vmatmul.mubr.msk.f32.vlgmr.msra.gmra.mrb[132].mxu0 %vm1425_vm1, %v18336_v36  ;;  %16279 = vmatmul.mubr.msk.f32.vlgmr.msra.gmra.mrb[128].mxu1 %vm1425_vm1, %v18336_v36 }
0x24ea   : > { %16889 = vmatpush3.bf16.msra.mxu0 %v16888_v21  ;;  %16895 = vmatpush3.bf16.msra.mxu1 %v16894_v22 }
0x24eb   : > { %16890 = vmatprep.subr.bf16.mxu0 %v17251_v3  ;;  %16896 = vmatprep.subr.bf16.mxu1 %v17251_v3 }
0x24ec   : > { %16289 = vmatprep.mubr.msk.f32.mxu0 %vm17252_vm0, %v17253_v11  ;;  %16300 = vmatprep.mubr.msk.f32.mxu1 %vm17252_vm0, %v17253_v11 }
0x24ee   : > { %16892 = vmatpush3.bf16.msra.mxu0 %v16891_v26  ;;  %16898 = vmatpush3.bf16.msra.mxu1 %v16897_v28 }
0x24ef   : > { %16899 = vmatprep.subr.bf16.mxu0 %v17251_v3  ;;  %16905 = vmatprep.subr.bf16.mxu1 %v17251_v3 }
0x24f1   : > { %16290 = vmatmul.mubr.msk.f32.vlgmr.msra.gmra.mrb[134].mxu0 %vm1425_vm1, %v18336_v36  ;;  %16301 = vmatmul.mubr.msk.f32.vlgmr.msra.gmra.mrb[130].mxu1 %vm1425_vm1, %v18336_v36 }
0x24f2   : > { %16901 = vmatpush3.bf16.msra.mxu0 %v16900_v31  ;;  %16907 = vmatpush3.bf16.msra.mxu1 %v16906_v32 }
0x24f3   : > { %16902 = vmatprep.subr.bf16.mxu0 %v17251_v3  ;;  %16908 = vmatprep.subr.bf16.mxu1 %v17251_v3 }
0x24f4   : > { %16311 = vmatprep.mubr.msk.f32.mxu0 %vm17252_vm0, %v17253_v11  ;;  %16322 = vmatprep.mubr.msk.f32.mxu1 %vm17252_vm0, %v17253_v11 }
0x24f6   : > { %16904 = vmatpush3.bf16.msra.mxu0 %v16903_v34  ;;  %16910 = vmatpush3.bf16.msra.mxu1 %v16909_v38 }
0x24f7   : > { %16911 = vmatprep.subr.bf16.mxu0 %v17251_v3  ;;  %16917 = vmatprep.subr.bf16.mxu1 %v17251_v3 }
0x24f9   : > { %16312 = vmatmul.mubr.msk.f32.vlgmr.msra.gmra.mrb[136].mxu0 %vm1425_vm1, %v18336_v36  ;;  %16323 = vmatmul.mubr.msk.f32.vlgmr.msra.gmra.mrb[132].mxu1 %vm1425_vm1, %v18336_v36 }
0x24fa   : > { %16913 = vmatpush3.bf16.msra.mxu0 %v16912_v41  ;;  %16919 = vmatpush3.bf16.msra.mxu1 %v16918_v42 }
0x24fb   : > { %16914 = vmatprep.subr.bf16.mxu0 %v17251_v3  ;;  %16920 = vmatprep.subr.bf16.mxu1 %v17251_v3 }
0x24fc   : > { %16333 = vmatprep.mubr.msk.f32.mxu0 %vm17252_vm0, %v17253_v11  ;;  %16344 = vmatprep.mubr.msk.f32.mxu1 %vm17252_vm0, %v17253_v11 }
0x24fe   : > { %16916 = vmatpush3.bf16.msra.mxu0 %v16915_v46  ;;  %16922 = vmatpush3.bf16.msra.mxu1 %v16921_v47 }
0x24ff   : > { %16347 = vmatprep.subr.mxu0 %v17253_v11  ;;  %16352 = vmatprep.subr.mxu1 %v17253_v11 }
0x2501   : > { %16334 = vmatmul.mubr.msk.f32.vlgmr.msra.gmra.mrb[138].mxu0 %vm1425_vm1, %v18336_v36  ;;  %16345 = vmatmul.mubr.msk.f32.vlgmr.msra.gmra.mrb[134].mxu1 %vm1425_vm1, %v18336_v36 }
0x2502   : > { %16349 = vmatprep.mubr.msk.f32.mxu0 %vm17252_vm0, %v17253_v11  ;;  %16354 = vmatprep.mubr.msk.f32.mxu1 %vm17252_vm0, %v17253_v11 }
0x25ac   : > { %v11940_v48 = vpop.f32.mrb[128].mxu0  ;;  %v12010_v52 = vpop.f32.mrb[124].mxu1 }
0x25ad   : > { %v16225_v54 = vpop.f32.mrb[129].mxu0  ;;  %v16236_v50 = vpop.f32.mrb[125].mxu1  ;;  %v11941_v8 = vadd.f32 %v14534_v0, %v11940_v48  ;;  %v12011_v9 = vadd.f32 %v14535_v1, %v12010_v52 }
0x25b4   : > { %v12080_v55 = vpop.f32.mrb[130].mxu0  ;;  %v12150_v56 = vpop.f32.mrb[126].mxu1 }
0x25b5   : > { %v16247_v58 = vpop.f32.mrb[131].mxu0  ;;  %v16258_v53 = vpop.f32.mrb[127].mxu1  ;;  %v12081_v22 = vadd.f32 %v14536_v15, %v12080_v55  ;;  %v12151_v18 = vadd.f32 %v14537_v16, %v12150_v56 }
0x25bc   : > { %v12244_v63 = vpop.f32.mrb[132].mxu0  ;;  %v12314_v36 = vpop.f32.mrb[128].mxu1 }
0x25bd   : > { %v12245_v2 = vadd.f32 %v14542_v61, %v12244_v63  ;;  %v12315_v5 = vadd.f32 %v14543_v62, %v12314_v36  ;;  %v16269_v6 = vpop.f32.mrb[133].mxu0  ;;  %v16280_v7 = vpop.f32.mrb[129].mxu1 }
0x25bf   : > { %16348 = vmatpush3.xpose.msk.msra.mxu0 %vm2317_vm2, %v12245_v2  ;;  %16353 = vmatpush3.xpose.msk.msra.mxu1 %vm2317_vm2, %v12315_v5 }
0x25c0   : > { %16357 = vmatprep.subr.mxu0 %v17253_v11  ;;  %16362 = vmatprep.subr.mxu1 %v17253_v11 }
0x25c2   : > { %16350 = vmatmul.mubr.msk.f32.vlgmr.msra.gmra.mrb[140].mxu0 %vm2317_vm2, %v11941_v8  ;;  %16355 = vmatmul.mubr.msk.f32.vlgmr.msra.gmra.mrb[136].mxu1 %vm2317_vm2, %v12011_v9  ;;  %v14553_v9 = vld [vmem:[%s19173_s25 + $0x7] ss:$0 sm:$0xff] }
0x25c3   : > { %16359 = vmatprep.mubr.msk.f32.mxu0 %vm17252_vm0, %v17253_v11  ;;  %16364 = vmatprep.mubr.msk.f32.mxu1 %vm17252_vm0, %v17253_v11 }
0x25c4   : > { %v12384_v13 = vpop.f32.mrb[134].mxu0  ;;  %v12454_v14 = vpop.f32.mrb[130].mxu1 }
0x25c5   : > { %v12385_v17 = vadd.f32 %v14544_v10, %v12384_v13  ;;  %v12455_v4 = vadd.f32 %v14545_v12, %v12454_v14  ;;  %v16291_v20 = vpop.f32.mrb[135].mxu0  ;;  %v16302_v21 = vpop.f32.mrb[131].mxu1  ;;  %v14552_v12 = vld [vmem:[%s19173_s25 + $0x6] ss:$0 sm:$0xff] }
0x25c7   : > { %16358 = vmatpush3.xpose.msk.msra.mxu0 %vm2317_vm2, %v12385_v17  ;;  %16363 = vmatpush3.xpose.msk.msra.mxu1 %vm2317_vm2, %v12455_v4 }
0x25c8   : > { %16367 = vmatprep.subr.mxu0 %v17253_v11  ;;  %16372 = vmatprep.subr.mxu1 %v17253_v11 }
0x25ca   : > { %16360 = vmatmul.mubr.msk.f32.vlgmr.msra.gmra.mrb[142].mxu0 %vm2317_vm2, %v12081_v22  ;;  %16365 = vmatmul.mubr.msk.f32.vlgmr.msra.gmra.mrb[138].mxu1 %vm2317_vm2, %v12151_v18  ;;  %v14529_v18 = vld [vmem:[%s19174_s29 + $0x20] sm:$0xff] }
0x25cb   : > { %16369 = vmatprep.mubr.msk.f32.mxu0 %vm17252_vm0, %v17253_v11  ;;  %16374 = vmatprep.mubr.msk.f32.mxu1 %vm17252_vm0, %v17253_v11 }
0x25cc   : > { %v12548_v25 = vpop.f32.mrb[136].mxu0  ;;  %v12618_v26 = vpop.f32.mrb[132].mxu1 }
0x25cd   : > { %v12549_v28 = vadd.f32 %v14550_v23, %v12548_v25  ;;  %v12619_v27 = vadd.f32 %v14551_v24, %v12618_v26  ;;  %v16313_v29 = vpop.f32.mrb[137].mxu0  ;;  %v16324_v59 = vpop.f32.mrb[133].mxu1  ;;  %v14530_v23 = vld [vmem:[%s19174_s29 + $0x28] sm:$0xff]  ;;  %v14532_v24 = vld [vmem:[%s19174_s29 + $0x38] sm:$0xff]  ;;  %v14531_v26 = vld [vmem:[%s19174_s29 + $0x30] sm:$0xff] }
0x25cf   : > { %16368 = vmatpush3.msra.mxu0 %v12549_v28  ;;  %16373 = vmatpush3.msra.mxu1 %v12619_v27 }
0x25d0   : > { %16377 = vmatprep.subr.mxu0 %v17253_v11  ;;  %16382 = vmatprep.subr.mxu1 %v17253_v11 }
0x25d4   : > { %v18898_v30 = vpop.f32.mrb[138].mxu0  ;;  %v12758_v31 = vpop.f32.mrb[134].mxu1 }
0x25d5   : > { %v16335_v32 = vpop.f32.mrb[139].mxu0  ;;  %v16346_v33 = vpop.f32.mrb[135].mxu1  ;;  %v12759_v15 = vadd.f32 %v14553_v9, %v12758_v31  ;;  %v12689_v17 = vadd.f32 %v14552_v12, %v18898_v30 }
0x2695   : > { %v12834_v35 = vpop.f32.mrb[140].mxu0  ;;  %v12910_v37 = vpop.f32.mrb[136].mxu1 }
0x2696   : > { %v16351_v49 = vpop.f32.mrb[141].mxu0  ;;  %v16356_v34 = vpop.f32.mrb[137].mxu1  ;;  %v13069_v38 = vsel %vm2317_vm2, %v12910_v37, -inf  ;;  %v13066_v39 = vsel %vm2317_vm2, %v12834_v35, -inf }
0x2697   : > { %13070 = vmax.xlane.f32.xlu1 %v13069_v38  ;;  %13067 = vmax.xlane.f32.xlu0 %v13066_v39 }
0x269d   : > { %v12986_v19 = vpop.f32.mrb[142].mxu0  ;;  %v13062_v57 = vpop.f32.mrb[138].mxu1 }
0x269e   : > { %v16361_v40 = vpop.f32.mrb[143].mxu0  ;;  %v16366_v41 = vpop.f32.mrb[139].mxu1  ;;  %v13075_v42 = vsel %vm2317_vm2, %v13062_v57, -inf  ;;  %v13072_v43 = vsel %vm2317_vm2, %v12986_v19, -inf }
0x269f   : > { %13076 = vmax.xlane.f32.xlu1 %v13075_v42  ;;  %13073 = vmax.xlane.f32.xlu0 %v13072_v43 }
0x2724   : > { %v13071_v44 = vpop.xlane.xlu1 %13070  ;;  %v13068_v51 = vpop.xlane.xlu0 %13067 }
0x2725   : > { %v13079_v45 = vsub.f32 %v12910_v37, %v13071_v44  ;;  %v13078_v46 = vsub.f32 %v12834_v35, %v13068_v51  ;;  %v14574_v44 = vld [vmem:[%s19175_s30 + $0x1] ss:$0 sm:$0xff] }
0x2727   : > { %v13084_v47 = vmul.f32 1.442695, %v13079_v45  ;;  %v13082_v48 = vmul.f32 1.442695, %v13078_v46 }
0x2729   : > { %17123 = vpow2.f32 %v13084_v47 }
0x272a   : > { %17125 = vpow2.f32 %v13082_v48 }
0x272c   : > { %v13077_v52 = vpop.xlane.xlu1 %13076  ;;  %v13074_v54 = vpop.xlane.xlu0 %13073 }
0x272d   : > { %v13081_v50 = vsub.f32 %v13062_v57, %v13077_v52  ;;  %v13080_v55 = vsub.f32 %v12986_v19, %v13074_v54 }
0x272f   : > { %v13088_v56 = vmul.f32 1.442695, %v13081_v50  ;;  %v13086_v58 = vmul.f32 1.442695, %v13080_v55 }
0x2731   : > { %17127 = vpow2.f32 %v13088_v56  ;;  %v14579_v56 = vld [vmem:[%s19176_s18 + $0x20] sm:$0xff] }
0x2732   : > { %17129 = vpow2.f32 %v13086_v58  ;;  %v14580_v58 = vld [vmem:[%s19176_s18 + $0x28] sm:$0xff] }
0x2733   : > { %v17124_v53 = vpop.eup %17123 }
0x2734   : > { %v17126_v61 = vpop.eup %17125  ;;  %v13093_v62 = vsel %vm2317_vm2, %v17124_v53, 0.0 }
0x2735   : > { %13094 = vadd.xlane.f32.xlu1 %v13093_v62  ;;  %v13090_v63 = vsel %vm2317_vm2, %v17126_v61, 0.0 }
0x2736   : > { %13091 = vadd.xlane.f32.xlu0 %v13090_v63  ;;  %v14586_v63 = vld [vmem:[%s19178_s11 + $0x40] sm:$0xff] }
0x273b   : > { %v17128_v36 = vpop.eup %17127 }
0x273c   : > { %v17130_v0 = vpop.eup %17129  ;;  %v13099_v1 = vsel %vm2317_vm2, %v17128_v36, 0.0 }
0x273d   : > { %13100 = vadd.xlane.f32.xlu1 %v13099_v1  ;;  %v13096_v2 = vsel %vm2317_vm2, %v17130_v0, 0.0 }
0x273e   : > { %13097 = vadd.xlane.f32.xlu0 %v13096_v2  ;;  %v14589_v2 = vld [vmem:[%s19178_s11 + $0x58] sm:$0xff] }
0x27c2   : > { %v13095_v5 = vpop.xlane.xlu1 %13094 }
0x27c3   : > { %17131 = vrcp.f32 %v13095_v5  ;;  %v13092_v6 = vpop.xlane.xlu0 %13091 }
0x27c4   : > { %17133 = vrcp.f32 %v13092_v6  ;;  %v14590_v6 = vld [vmem:[%s19178_s11 + $0x60] sm:$0xff] }
0x27ca   : > { %v13101_v7 = vpop.xlane.xlu1 %13100 }
0x27cb   : > { %17135 = vrcp.f32 %v13101_v7  ;;  %v13098_v8 = vpop.xlane.xlu0 %13097  ;;  %v14591_v7 = vld [vmem:[%s19178_s11 + $0x68] sm:$0xff] }
0x27cc   : > { %17137 = vrcp.f32 %v13098_v8  ;;  %v16936_v8 = vpack.c.bf16 %v14591_v7, %v14590_v6 }
0x27cd   : > { %v17132_v10 = vpop.eup %17131 }
0x27ce   : > { %v17134_v13 = vpop.eup %17133  ;;  %v13105_v14 = vmul.f32 %v17132_v10, %v17124_v53  ;;  %v16924_v53 = vpack.c.bf16 %v14580_v58, %v14579_v56 }
0x27cf   : > { %v13103_v16 = vmul.f32 %v17134_v13, %v17126_v61  ;;  %v14582_v61 = vld [vmem:[%s19176_s18 + $0x38] sm:$0xff] }
0x27d0   : > { %16375 = vmatmul.mubr.msk.f32.vlgmr.msra.gmra.mrb[140].mxu1 %vm2317_vm2, %v13105_v14  ;;  %v14577_v14 = vld [vmem:[%s19179_s23 + $0x1] ss:$0 sm:$0xff] }
0x27d1   : > { %16370 = vmatmul.mubr.msk.f32.vlgmr.msra.gmra.mrb[144].mxu0 %vm2317_vm2, %v13103_v16  ;;  %16383 = vmatpush3.msra.mxu1 %v12759_v15  ;;  %v14578_v16 = vld [vmem:[%s19181_s22 + $0x1] ss:$0 sm:$0xff] }
0x27d2   : > { %16378 = vmatpush3.msra.mxu0 %v12689_v17  ;;  %16379 = vmatprep.mubr.msk.f32.mxu0 %vm17252_vm0, %v17253_v11 }
0x27d3   : > { %16384 = vmatprep.mubr.msk.f32.mxu1 %vm17252_vm0, %v17253_v11  ;;  %16387 = vmatprep.subr.mxu0 %v17253_v11 }
0x27d4   : > { %16392 = vmatprep.subr.mxu1 %v17253_v11 }
0x27d5   : > { %v17136_v4 = vpop.eup %17135 }
0x27d6   : > { %v17138_v20 = vpop.eup %17137  ;;  %v13109_v21 = vmul.f32 %v17136_v4, %v17128_v36  ;;  %v14587_v36 = vld [vmem:[%s19178_s11 + $0x48] sm:$0xff] }
0x27d7   : > { %v13107_v22 = vmul.f32 %v17138_v20, %v17130_v0  ;;  %v14588_v0 = vld [vmem:[%s19178_s11 + $0x50] sm:$0xff]  ;;  %v16930_v1 = vpack.c.bf16 %v14587_v36, %v14586_v63 }
0x27d8   : > { %16385 = vmatmul.mubr.msk.f32.vlgmr.msra.gmra.mrb[142].mxu1 %vm2317_vm2, %v13109_v21  ;;  %v16933_v5 = vpack.c.bf16 %v14589_v2, %v14588_v0  ;;  %v14592_v20 = vld [vmem:[%s19178_s11 + $0x70] sm:$0xff]  ;;  %v14593_v21 = vld [vmem:[%s19178_s11 + $0x78] sm:$0xff]  ;;  %s18982_s11 = scalar_lea.hbm %s19184_s28, %s14602_s6 }
0x27d9   : > { %16380 = vmatmul.mubr.msk.f32.vlgmr.msra.gmra.mrb[146].mxu0 %vm2317_vm2, %v13107_v22  ;;  %16394 = vmatprep.mubr.msk.f32.mxu1 %vm17252_vm0, %v17253_v11  ;;  %v16939_v22 = vpack.c.bf16 %v14593_v21, %v14592_v20 }
0x27da   : > { %16389 = vmatprep.mubr.msk.f32.mxu0 %vm17252_vm0, %v17253_v11  ;;  %16388 = vmatpush3.msra.mxu0 %v14529_v18  ;;  %v14584_v18 = vld [vmem:[%s19183_s27 + $0x1] ss:$0 sm:$0xff] }
0x27db   : > { %16393 = vmatpush3.msra.mxu1 %v14530_v23  ;;  %16397 = vmatprep.subr.mxu0 %v17253_v11 }
0x27dc   : > { %16402 = vmatprep.subr.mxu1 %v17253_v11 }
0x28a3   : > { %v13252_v25 = vpop.f32.mrb[140].mxu1 }
0x28a4   : > { %v13179_v28 = vpop.f32.mrb[144].mxu0  ;;  %v16376_v27 = vpop.f32.mrb[141].mxu1  ;;  %16395 = vmatmul.mubr.msk.f32.vlgmr.msra.gmra.mrb[144].mxu1 %vm2317_vm2, %v13252_v25 }
0x28a5   : > { %v16371_v29 = vpop.f32.mrb[145].mxu0  ;;  %16390 = vmatmul.mubr.msk.f32.vlgmr.msra.gmra.mrb[148].mxu0 %vm2317_vm2, %v13179_v28  ;;  %16403 = vmatpush3.msra.mxu1 %v14532_v24 }
0x28a6   : > { %16398 = vmatpush3.msra.mxu0 %v14531_v26  ;;  %16399 = vmatprep.mubr.msk.f32.mxu0 %vm17252_vm0, %v17253_v11  ;;  %v14595_v26 = vld [vmem:[%s19128_s4 + $0x1] ss:$0 sm:$0xff]  ;;  %s14083_s4 = sshll.u32 %s1324_s2, 3 }
0x28a7   : > { %16404 = vmatprep.mubr.msk.f32.mxu1 %vm17252_vm0, %v17253_v11  ;;  %16923 = vmatprep.subr.bf16.mxu0 %v17251_v3  ;;  %s1326_s8 = scalar_lea.vmem [#allocation2], %s14083_s4  ;;  %s17147_s4 = sshll.u32 %s17254_s0, 4  ;;  %s17148_s4 = int_to_ptr.vmem [resolvable:$false] %s17147_s4 }
0x28a8   : > { %16929 = vmatprep.subr.bf16.mxu1 %v17251_v3  ;;  %s13964_s10 = sshll.u32 %s1326_s8, 4  ;;  %s18984_s10 = int_to_ptr.vmem [resolvable:$true] %s13964_s10 }
0x28a9   : > { %s17143_s13 = scalar_lea.vmem %s18984_s10, 128  ;;  %p17150_p0 = scmp.lt.s32.totalorder %s18984_s10, %s17148_s4 }
0x28aa   : > { %p17144_p11 = scmp.ne.s32.totalorder %s18984_s10, %s17143_s13 }
0x28ab   : > { %v13398_v59 = vpop.f32.mrb[142].mxu1 }
0x28ac   : > { %v13325_v30 = vpop.f32.mrb[146].mxu0  ;;  %v16386_v31 = vpop.f32.mrb[143].mxu1  ;;  %16405 = vmatmul.mubr.msk.f32.vlgmr.msra.gmra.mrb[146].mxu1 %vm2317_vm2, %v13398_v59  ;;  %p17145_p12 = pnand %p17144_p11, %p17523_p5 }
0x28ad   : > { %v16381_v32 = vpop.f32.mrb[147].mxu0  ;;  %16400 = vmatmul.mubr.msk.f32.vlgmr.msra.gmra.mrb[150].mxu0 %vm2317_vm2, %v13325_v30  ;;  %16434 = vmatprep.mubr.msk.f32.mxu1 %vm17252_vm0, %v17253_v11 }
0x28ae   : > { %16415 = vmatprep.mubr.msk.f32.mxu0 %vm17252_vm0, %v17253_v11  ;;  %16925 = vmatpush3.bf16.msra.mxu0 %v16924_v53  ;;  %p17146_p13 = pneg %p17145_p12 }
0x28af   : > { %16926 = vmatprep.subr.bf16.mxu0 %v17251_v3  ;;  %16931 = vmatpush3.bf16.msra.mxu1 %v16930_v1 }
0x28b0   : > { %16932 = vmatprep.subr.bf16.mxu1 %v17251_v3 }
0x28b3   : > { %16934 = vmatpush3.bf16.msra.mxu1 %v16933_v5 }
0x28b4   : > { %16935 = vmatprep.subr.bf16.mxu1 %v17251_v3 }
0x28b7   : > { %16937 = vmatpush3.bf16.msra.mxu1 %v16936_v8 }
0x28b8   : > { %16938 = vmatprep.subr.bf16.mxu1 %v17251_v3 }
0x28bb   : > { %16940 = vmatpush3.bf16.msra.mxu1 %v16939_v22 }
0x2977   : > { %v13544_v33 = vpop.f32.mrb[144].mxu1 }
0x2978   : > { %v13471_v35 = vpop.f32.mrb[148].mxu0  ;;  %v13695_v37 = vsel %vm1425_vm1, %v13544_v33, 0.0  ;;  %v16396_v49 = vpop.f32.mrb[145].mxu1 }
0x2979   : > { %v13694_v34 = vsel %vm1425_vm1, %v13471_v35, 0.0  ;;  %v16391_v38 = vpop.f32.mrb[149].mxu0 }
0x297a   : > { %v13696_v39 = vadd.f32 %v13695_v37, %v13694_v34 }
0x297f   : > { %v13690_v19 = vpop.f32.mrb[146].mxu1 }
0x2980   : > { %v13617_v57 = vpop.f32.mrb[150].mxu0  ;;  %v16406_v40 = vpop.f32.mrb[147].mxu1  ;;  %v13699_v11 = vsel %vm1425_vm1, %v13690_v19, 0.0  ;;  %v14599_v19 = vld [vmem:[%s19127_s9 + $0x1] ss:$0 sm:$0xff]  ;;  %s17149_s9 = scalar_lea.vmem %s17148_s4, 256 }
0x2981   : > { %v13697_v41 = vsel %vm1425_vm1, %v13617_v57, 0.0  ;;  %v16401_v42 = vpop.f32.mrb[151].mxu0  ;;  %v14600_v40 = vld [vmem:[%s17478_s20 + $0x1] ss:$0 sm:$0xff]  ;;  %p17151_p1 = scmp.lt.s32.totalorder %s17149_s9, %s17143_s13 }
0x2982   : > { %v13698_v43 = vadd.f32 %v13697_v41, %v13696_v39 }
0x2983   : > { %p17152_p2 = por %p17151_p1, %p17150_p0 }
0x2984   : > { %v13700_v51 = vadd.f32 %v13699_v11, %v13698_v43 }
0x2985   : > { %p17153_p3 = pnand %p17152_p2, %p17146_p13 }
0x2986   : > { %v13707_v45 = vadd.f32 %v14574_v44, %v13700_v51 }
0x2988   : > { %v13708_v46 = vadd.f32 %v13707_v45, %v18761_v60  ;;  %v14581_v60 = vld [vmem:[%s19176_s18 + $0x30] sm:$0xff] }
0x2989   : > { %v16927_v62 = vpack.c.bf16 %v14582_v61, %v14581_v60 }
0x298a   : > { %v13713_v47 = vsel %vm1425_vm1, %v13708_v46, 0.0 }
0x298b   : > { %13714 = vadd.xlane.f32.xlu0 %v13713_v47  ;;  %16928 = vmatpush3.bf16.msra.mxu0 %v16927_v62 }
0x2a18   : > { %v13715_v48 = vpop.xlane.xlu0 %13714 }
0x2a19   : > { %v13716_v52 = vmul.f32 0.03125, %v13715_v48 }
0x2a1b   : > { %v13717_v54 = vsub.f32 %v13708_v46, %v13716_v52 }
0x2a1d   : > { %v13718_v50 = vmul.f32 %v13717_v54, %v13717_v54 }
0x2a1f   : > { %v13719_v55 = vsel %vm1425_vm1, %v13718_v50, 0.0 }
0x2a20   : > { %13720 = vadd.xlane.f32.xlu1 %v13719_v55 }
0x2aad   : > { %v13721_v9 = vpop.xlane.xlu1 %13720 }
0x2aae   : > { %v13722_v10 = vmul.f32 0.03125, %v13721_v9 }
0x2ab0   : > { %v13723_v12 = vadd.f32 1e-05, %v13722_v10 }
0x2ab2   : > { %17139 = vrsqrt.f32 %v13723_v12 }
0x2abc   : > { %v17140_v13 = vpop.eup %17139 }
0x2abd   : > { %v13725_v15 = vmul.f32 %v17140_v13, %v13717_v54 }
0x2abf   : > { %v13732_v17 = vmul.f32 %v14577_v14, %v13725_v15 }
0x2ac1   : > { %v13739_v4 = vadd.f32 %v14578_v16, %v13732_v17 }
0x2ac3   : > { %16416 = vmatmul.mubr.msk.f32.vlgmr.msra.gmra.mrb[152].mxu0 %vm1425_vm1, %v13739_v4 }
0x2b96   : > { %v13822_v3 = vpop.f32.mrb[152].mxu0 }
0x2b97   : > { %v13823_v23 = vadd.f32 %v14584_v18, %v13822_v3  ;;  %v16417_v24 = vpop.f32.mrb[153].mxu0 }
0x2b99   : > { %v13826_v25 = vmax.f32 %v13823_v23, 0.0 }
0x2b9b   : > { %16435 = vmatmul.mubr.msk.f32.vlgmr.msra.gmra.mrb[148].mxu1 %vm3395_vm3, %v13826_v25 }
0x2c6e   : > { %v13913_v28 = vpop.f32.mrb[148].mxu1 }
0x2c6f   : > { %v13914_v27 = vadd.f32 %v14595_v26, %v13913_v28  ;;  %v16436_v29 = vpop.f32.mrb[149].mxu1 }
0x2c71   : > { %v13917_v59 = vadd.f32 %v13914_v27, %v13739_v4 }
0x2c73   : > { %v13922_v30 = vsel %vm1425_vm1, %v13917_v59, 0.0 }
0x2c74   : > { %13923 = vadd.xlane.f32.xlu0 %v13922_v30 }
0x2d01   : > { %v13924_v31 = vpop.xlane.xlu0 %13923 }
0x2d02   : > { %v13925_v32 = vmul.f32 0.03125, %v13924_v31 }
0x2d04   : > { %v13926_v33 = vsub.f32 %v13917_v59, %v13925_v32 }
0x2d06   : > { %v13927_v35 = vmul.f32 %v13926_v33, %v13926_v33 }
0x2d08   : > { %v13928_v37 = vsel %vm1425_vm1, %v13927_v35, 0.0 }
0x2d09   : > { %13929 = vadd.xlane.f32.xlu1 %v13928_v37 }
0x2d96   : > { %v13930_v49 = vpop.xlane.xlu1 %13929 }
0x2d97   : > { %v13931_v34 = vmul.f32 0.03125, %v13930_v49 }
0x2d99   : > { %v13932_v38 = vadd.f32 1e-05, %v13931_v34 }
0x2d9b   : > { %17141 = vrsqrt.f32 %v13932_v38 }
0x2da5   : > { %v17142_v39 = vpop.eup %17141 }
0x2da6   : > { %v13934_v57 = vmul.f32 %v17142_v39, %v13926_v33 }
0x2da8   : > { %v13941_v41 = vmul.f32 %v14599_v19, %v13934_v57 }
0x2daa   : > { %v13948_v42 = vadd.f32 %v14600_v40, %v13941_v41 }
0x2dac   : > { %13949 = vst.msk [vmem:[%s1326_s8] sm:$0xff] %vm1425_vm1, %v13948_v42 }
0x2dad   : > { %17156 = shalt.err (!%p17153_p3)
}
0x2dae   : > { %s17157_s6 = scalar_lea.hbm %s18982_s11, 128  ;;  %s17161_s8 = scalar_lea.hbm %s19185_s3, 256 }
0x2daf   : > { %p17158_p4 = scmp.ne.s32.totalorder %s18982_s11, %s17157_s6  ;;  %p17162_p9 = scmp.lt.u32.totalorder %s18982_s11, %s19185_s3 }
0x2db0   : > { %p17163_p10 = scmp.lt.u32.totalorder %s17161_s8, %s17157_s6  ;;  %p17165_p12 = scmp.lt.u32.totalorder %s17157_s6, %s18982_s11 }
0x2db1   : > { %p17159_p7 = pnand %p17158_p4, %p17523_p5 }
0x2db2   : > { %p17164_p11 = por %p17163_p10, %p17162_p9 }
0x2db3   : > { %p17160_p8 = pneg %p17159_p7 }
0x2db4   : > { %p17166_p0 = por %p17165_p12, %p17164_p11 }
0x2db6   : > { %p17167_p13 = pnand %p17166_p0, %p17160_p8 }
0x2db8   : > { %17170 = shalt.err (!%p17167_p13)
}
0x2db9   : > { %16941 = dma.vmem_to_hbm [thread:$0]  (%p17523_p5), %s18984_s10, 128, %s18982_s11, %s13951_s12  }
0x2dba PF: > { %s19187_s9 = sld [smem:[#allocation49_spill]]  ;;  %p16947_p1 = scmp.ge.s32.totalorder %s17205_s7, 2 }
0x2dbc   : > { %p16944_p2 = pnand %p16947_p1, %p17527_p6 }
0x2dc0   : > { %s13976_s28 = sand.u32 1, %s19187_s9  }
0x2dc1   : > { %s13977_s2 = scalar_lea.sflag [#allocation3], %s13976_s28 }
0x2dc2   : > { %17188 = dma.done.wait (!%p16944_p2), %s13977_s2, 128  }
0x2dc3   : > { %17190 = vsyncadd (!%p16944_p2), %s13977_s2, 4294967168  ;;  %s19189_s7 = sld [smem:[#allocation51_spill]]  ;;  %s19190_s0 = sld [smem:[#allocation50_spill]] }
0x2dc4   : > { %s19191_s2 = sld [smem:[#allocation52_spill]]  ;;  %s19192_s28 = smov %s17197_s1 }
0x2dc9   : > { %p99_p3 = scmp.ge.s32.totalorder %s19189_s7, 4   ;;  %s19193_s1 = smov %s19190_s0 }
0x2dcb   :  { %101 = sbr.rel (!%p99_p3) target bundleno = 109 (0x6d), region = 320 }
0x2dd2   :  { %13982 = vsyncpa [#allocation3], 1 }
0x2dd3   :  { %13984 = vsyncpa [#allocation3 + $0x1], 1 }

</bundles_post_ra>
